<compile_context>
chip_gen: v6e
topology: v6e:2x2x1
jax: 0.10.0
libtpu: 0.0.40
codegen_flags: <defaults>
</compile_context>

<pallas_src>
import numpy as np
import jax
import jax.numpy as jnp
from jax import lax
from jax.experimental import pallas as pl
from jax.experimental.pallas import tpu as pltpu

KH = KW = 7
PAD = 3


# ----------------------------------------------------------------------------
# Host-side constants: per-tap boundary masks + nearest-x2 duplication matrix
# ----------------------------------------------------------------------------
def _host_constants(C, H, W):
    HW = H * W
    ys, xs = np.divmod(np.arange(HW), W)

    taps = []
    for ky in range(KH):
        for kx in range(KW):
            oy, ox = ky - PAD, kx - PAD
            taps.append((ys + oy >= 0) & (ys + oy < H) &
                        (xs + ox >= 0) & (xs + ox < W))
    mask = np.stack(taps, 0).astype(np.float32)                    # (49, HW)
    mask = np.repeat(mask[:, None, :], C, axis=1).reshape(KH * KW * C, HW)
    mask = np.tile(mask, (1, 3))                                   # (784, 3*HW)

    # dup[y*W+x, (2y+r)*2W + 2x+c] = 1  -> out_flat = v10 @ dup is nearest x2
    dup = np.zeros((HW, 4 * HW), np.float32)
    cols = ((2 * ys[:, None] + np.array([0, 0, 1, 1])) * (2 * W)
            + (2 * xs[:, None] + np.array([0, 1, 0, 1])))          # (HW, 4)
    dup[np.arange(HW)[:, None], cols] = 1.0

    return (jnp.asarray(mask, dtype=jnp.bfloat16),
            jnp.asarray(dup, dtype=jnp.bfloat16))


# ----------------------------------------------------------------------------
# Fused Pallas kernel (whole forward chain for one sample per grid step)
# ----------------------------------------------------------------------------
def _build_fused_call(N, C, Co, H, W):
    HW = H * W
    HW3 = 3 * HW
    OHW = 4 * HW          # (2H)*(2W)
    K = KH * KW * C       # im2col depth (784)

    def kernel(xcat_ref, mask_ref, w1_ref, w2_ref, w3_ref,
               b1_ref, b2_ref, b3_ref, dup_ref, out_ref, lhs_ref):

        def build_im2col(act_bf, width):
            """Write masked shifted taps of act_bf (C, width) into lhs_ref[:, :width]."""
            for ky in range(KH):
                for kx in range(KW):
                    tap = ky * KW + kx
                    s = (ky - PAD) * W + (kx - PAD)
                    if s == 0:
                        shifted = act_bf
                    else:
                        # shifted[:, p] = act[:, p + s]  (wrap gets masked out)
                        shifted = jnp.roll(act_bf, -s, axis=1)
                    if ky == PAD and kx == PAD:
                        val = shifted                       # center tap: all valid
                    else:
                        val = shifted * mask_ref[tap * C:(tap + 1) * C, 0:width]
                    lhs_ref[tap * C:(tap + 1) * C, 0:width] = val

        # ---- stage 1: conv1 applied to [x1 | x2 | x3] in ONE GEMM ------------
        build_im2col(xcat_ref[0], HW3)
        raw = jnp.dot(w1_ref[...], lhs_ref[...],
                      preferred_element_type=jnp.float32)            # (Co, 3*HW)
        b1 = b1_ref[...]
        v1 = raw[:, 0:HW] + b1
        v2 = raw[:, HW:2 * HW] + b1
        v3 = raw[:, 2 * HW:3 * HW] + b1
        v4 = jnp.maximum(v1 + v2 + v3, 0.0)

        # ---- stage 2: v7 = relu(conv2(v4) + v1) -------------------------------
        build_im2col(v4.astype(jnp.bfloat16), HW)
        r2 = jnp.dot(w2_ref[...], lhs_ref[:, 0:HW],
                     preferred_element_type=jnp.float32)
        v7 = jnp.maximum(r2 + b2_ref[...] + v1, 0.0)

        # ---- stage 3: v10 = relu(conv3(v7) + v2) ------------------------------
        build_im2col(v7.astype(jnp.bfloat16), HW)
        r3 = jnp.dot(w3_ref[...], lhs_ref[:, 0:HW],
                     preferred_element_type=jnp.float32)
        v10 = jnp.maximum(r3 + b3_ref[...] + v2, 0.0)

        # ---- fused nearest x2 upsample: one lane-dense (Co, 4*HW) store -------
        # 0/1 selection GEMM; explicit bf16 hi/lo split keeps ~f32 accuracy.
        v10_hi = v10.astype(jnp.bfloat16)
        v10_lo = (v10 - v10_hi.astype(jnp.float32)).astype(jnp.bfloat16)
        up = (jnp.dot(v10_hi, dup_ref[...], preferred_element_type=jnp.float32)
              + jnp.dot(v10_lo, dup_ref[...], preferred_element_type=jnp.float32))
        out_ref[0, :, :] = up

    conv_flops = 2 * Co * K * HW
    flops = N * (5 * conv_flops + 2 * (2 * Co * HW * OHW))
    bytes_accessed = (N * (C * HW3 * 2 + Co * OHW * 4)
                      + K * HW3 * 2 + HW * OHW * 2
                      + 3 * (Co * K * 2 + Co * 4))

    const2 = lambda n: (0, 0)
    return pl.pallas_call(
        kernel,
        out_shape=jax.ShapeDtypeStruct((N, Co, OHW), jnp.float32),
        grid=(N,),
        in_specs=[
            pl.BlockSpec((1, C, HW3), lambda n: (n, 0, 0)),   # [x1 | x2 | x3] bf16
            pl.BlockSpec((K, HW3), const2),                   # boundary masks bf16
            pl.BlockSpec((Co, K), const2),                    # w1 (Co, 784) bf16
            pl.BlockSpec((Co, K), const2),                    # w2
            pl.BlockSpec((Co, K), const2),                    # w3
            pl.BlockSpec((Co, 1), const2),                    # b1 f32
            pl.BlockSpec((Co, 1), const2),                    # b2
            pl.BlockSpec((Co, 1), const2),                    # b3
            pl.BlockSpec((HW, OHW), const2),                  # upsample dup bf16
        ],
        out_specs=pl.BlockSpec((1, Co, OHW), lambda n: (n, 0, 0)),
        scratch_shapes=[pltpu.VMEM((K, HW3), jnp.bfloat16)],  # im2col LHS scratch
        compiler_params=pltpu.CompilerParams(
            dimension_semantics=("parallel",)),
        cost_estimate=pl.CostEstimate(flops=flops, transcendentals=0,
                                      bytes_accessed=bytes_accessed),
    )


# ----------------------------------------------------------------------------
# Model forward (NCHW in / NCHW out, matching the PyTorch module)
# ----------------------------------------------------------------------------
@jax.jit
def model_forward(x1, x2, x3, x4, params):
    del x4  # accepted but unused by the reference module's forward
    (w1, b1), (w2, b2), (w3, b3) = params          # OIHW weights, (Co,) biases
    N, C, H, W = x1.shape
    Co = w1.shape[0]
    HW = H * W

    def prep_w(w):   # (Co, Cin, KH, KW) -> (Co, KH*KW*Cin) bf16, tap-major rows
        return jnp.transpose(w, (0, 2, 3, 1)).reshape(Co, KH * KW * C).astype(
            jnp.bfloat16)

    def prep_b(b):
        return b.reshape(Co, 1).astype(jnp.float32)

    mask, dup = _host_constants(C, H, W)
    xcat = jnp.concatenate(
        [x1.reshape(N, C, HW), x2.reshape(N, C, HW), x3.reshape(N, C, HW)],
        axis=-1).astype(jnp.bfloat16)              # (N, C, 3*HW), half the DMA

    call = _build_fused_call(N, C, Co, H, W)
    out_flat = call(xcat, mask,
                    prep_w(w1), prep_w(w2), prep_w(w3),
                    prep_b(b1), prep_b(b2), prep_b(b3), dup)
    return out_flat.reshape(N, C, 2 * H, 2 * W)


# ----------------------------------------------------------------------------
# Pure-JAX reference (for correctness check)
# ----------------------------------------------------------------------------
def _ref_conv(x, w, b):
    y = lax.conv_general_dilated(
        x, w, (1, 1), ((PAD, PAD), (PAD, PAD)),
        dimension_numbers=("NCHW", "OIHW", "NCHW"),
        precision=lax.Precision.HIGHEST)
    return y + b[None, :, None, None]


def ref_forward(x1, x2, x3, x4, params):
    del x4
    (w1, b1), (w2, b2), (w3, b3) = params
    v1 = _ref_conv(x1, w1, b1)
    v2 = _ref_conv(x2, w1, b1)
    v3 = _ref_conv(x3, w1, b1)
    v4 = jax.nn.relu(v1 + v2 + v3)
    v7 = jax.nn.relu(_ref_conv(v4, w2, b2) + v1)
    v10 = jax.nn.relu(_ref_conv(v7, w3, b3) + v2)
    return jnp.repeat(jnp.repeat(v10, 2, axis=2), 2, axis=3)


# ----------------------------------------------------------------------------
# Parameter init (Conv2d-style uniform(-1/sqrt(fan_in), +1/sqrt(fan_in)))
# ----------------------------------------------------------------------------
def init_conv_params(key, cin, cout, k):
    kw, kb = jax.random.split(key)
    fan_in = cin * k * k
    bound = 1.0 / np.sqrt(fan_in)
    w = jax.random.uniform(kw, (cout, cin, k, k), jnp.float32, -bound, bound)
    b = jax.random.uniform(kb, (cout,), jnp.float32, -bound, bound)
    return (w, b)


if __name__ == "__main__":
    key = jax.random.PRNGKey(0)
    k1, k2, k3, kx1, kx2, kx3, kx4 = jax.random.split(key, 7)

    # Conv2d(16, 16, 7); x1/x2/x3 must share spatial dims for v1 + v2 + v3.
    N, C, H, W = 2, 16, 16, 16
    x1 = jax.random.normal(kx1, (N, C, H, W), jnp.float32)
    x2 = jax.random.normal(kx2, (N, C, H, W), jnp.float32)
    x3 = jax.random.normal(kx3, (N, C, H, W), jnp.float32)
    x4 = jax.random.normal(kx4, (N, C, H, W), jnp.float32)  # unused

    params = (init_conv_params(k1, C, C, 7),
              init_conv_params(k2, C, C, 7),
              init_conv_params(k3, C, C, 7))

    out = jax.block_until_ready(model_forward(x1, x2, x3, x4, params))
    assert out.shape == (N, C, 2 * H, 2 * W), out.shape

    ref = jax.block_until_ready(ref_forward(x1, x2, x3, x4, params))
    # bf16 GEMM operands (f32 accumulation) vs f32 reference
    np.testing.assert_allclose(np.asarray(out), np.asarray(ref),
                               rtol=5e-2, atol=5e-2)
    print("KERNEL_OK")
</pallas_src>

<mosaic_0001>
module attributes {stable_mosaic.version = 11 : i64} {
  func.func @kernel(%arg0: i32, %arg1: memref<1x16x768xbf16, #tpu.memory_space<vmem>>, %arg2: memref<784x768xbf16, #tpu.memory_space<vmem>>, %arg3: memref<16x784xbf16, #tpu.memory_space<vmem>>, %arg4: memref<16x784xbf16, #tpu.memory_space<vmem>>, %arg5: memref<16x784xbf16, #tpu.memory_space<vmem>>, %arg6: memref<16x1xf32, #tpu.memory_space<vmem>>, %arg7: memref<16x1xf32, #tpu.memory_space<vmem>>, %arg8: memref<16x1xf32, #tpu.memory_space<vmem>>, %arg9: memref<256x1024xbf16, #tpu.memory_space<vmem>>, %arg10: memref<1x16x1024xf32, #tpu.memory_space<vmem>>, %arg11: memref<784x768xbf16, #tpu.memory_space<vmem>>) attributes {dimension_semantics = [#tpu.dimension_semantics<parallel>], iteration_bounds = array<i64: 2>, scalar_prefetch = 0 : i64, scratch_operands = 1 : i64, tpu.core_type = #tpu.core_type<tc>, window_params = [{transform_indices = @transform_0, window_bounds = array<i64: 1, 16, 768>}, {pipeline_mode = #tpu.pipeline_mode<synchronous>, transform_indices = @transform_1, window_bounds = array<i64: 784, 768>}, {pipeline_mode = #tpu.pipeline_mode<synchronous>, transform_indices = @transform_2, window_bounds = array<i64: 16, 784>}, {pipeline_mode = #tpu.pipeline_mode<synchronous>, transform_indices = @transform_3, window_bounds = array<i64: 16, 784>}, {pipeline_mode = #tpu.pipeline_mode<synchronous>, transform_indices = @transform_4, window_bounds = array<i64: 16, 784>}, {pipeline_mode = #tpu.pipeline_mode<synchronous>, transform_indices = @transform_5, window_bounds = array<i64: 16, 1>}, {pipeline_mode = #tpu.pipeline_mode<synchronous>, transform_indices = @transform_6, window_bounds = array<i64: 16, 1>}, {pipeline_mode = #tpu.pipeline_mode<synchronous>, transform_indices = @transform_7, window_bounds = array<i64: 16, 1>}, {pipeline_mode = #tpu.pipeline_mode<synchronous>, transform_indices = @transform_8, window_bounds = array<i64: 256, 1024>}, {transform_indices = @transform_9, window_bounds = array<i64: 1, 16, 1024>}]} {
    %c0 = arith.constant 0 : index
    %c0_0 = arith.constant 0 : index
    %c0_1 = arith.constant 0 : index
    %0 = vector.load %arg1[%c0, %c0_0, %c0_1] : memref<1x16x768xbf16, #tpu.memory_space<vmem>>, vector<1x16x768xbf16>
    %1 = vector.shape_cast %0 : vector<1x16x768xbf16> to vector<16x768xbf16>
    %2 = vector.extract_strided_slice %1 {offsets = [0, 717], sizes = [16, 51], strides = [1, 1]} : vector<16x768xbf16> to vector<16x51xbf16>
    %3 = vector.extract_strided_slice %1 {offsets = [0, 0], sizes = [16, 717], strides = [1, 1]} : vector<16x768xbf16> to vector<16x717xbf16>
    %4 = tpu.concatenate %2, %3 in 1 : vector<16x51xbf16>, vector<16x717xbf16> -> vector<16x768xbf16>
    %c0_2 = arith.constant 0 : index
    %c0_3 = arith.constant 0 : index
    %5 = vector.load %arg2[%c0_2, %c0_3] : memref<784x768xbf16, #tpu.memory_space<vmem>>, vector<16x768xbf16>
    %6 = arith.mulf %4, %5 : vector<16x768xbf16>
    %c0_4 = arith.constant 0 : index
    %c0_5 = arith.constant 0 : index
    %7 = vector.load %arg11[%c0_4, %c0_5] : memref<784x768xbf16, #tpu.memory_space<vmem>>, vector<16x768xbf16>
    tpu.vector_store %arg11[%c0_4, %c0_5], %6 {strides = array<i32>} : memref<784x768xbf16, #tpu.memory_space<vmem>>, vector<16x768xbf16>,
    %8 = vector.extract_strided_slice %1 {offsets = [0, 718], sizes = [16, 50], strides = [1, 1]} : vector<16x768xbf16> to vector<16x50xbf16>
    %9 = vector.extract_strided_slice %1 {offsets = [0, 0], sizes = [16, 718], strides = [1, 1]} : vector<16x768xbf16> to vector<16x718xbf16>
    %10 = tpu.concatenate %8, %9 in 1 : vector<16x50xbf16>, vector<16x718xbf16> -> vector<16x768xbf16>
    %c16 = arith.constant 16 : index
    %c0_6 = arith.constant 0 : index
    %11 = vector.load %arg2[%c16, %c0_6] : memref<784x768xbf16, #tpu.memory_space<vmem>>, vector<16x768xbf16>
    %12 = arith.mulf %10, %11 : vector<16x768xbf16>
    %c16_7 = arith.constant 16 : index
    %c0_8 = arith.constant 0 : index
    %13 = vector.load %arg11[%c16_7, %c0_8] : memref<784x768xbf16, #tpu.memory_space<vmem>>, vector<16x768xbf16>
    tpu.vector_store %arg11[%c16_7, %c0_8], %12 {strides = array<i32>} : memref<784x768xbf16, #tpu.memory_space<vmem>>, vector<16x768xbf16>,
    %14 = vector.extract_strided_slice %1 {offsets = [0, 719], sizes = [16, 49], strides = [1, 1]} : vector<16x768xbf16> to vector<16x49xbf16>
    %15 = vector.extract_strided_slice %1 {offsets = [0, 0], sizes = [16, 719], strides = [1, 1]} : vector<16x768xbf16> to vector<16x719xbf16>
    %16 = tpu.concatenate %14, %15 in 1 : vector<16x49xbf16>, vector<16x719xbf16> -> vector<16x768xbf16>
    %c32 = arith.constant 32 : index
    %c0_9 = arith.constant 0 : index
    %17 = vector.load %arg2[%c32, %c0_9] : memref<784x768xbf16, #tpu.memory_space<vmem>>, vector<16x768xbf16>
    %18 = arith.mulf %16, %17 : vector<16x768xbf16>
    %c32_10 = arith.constant 32 : index
    %c0_11 = arith.constant 0 : index
    %19 = vector.load %arg11[%c32_10, %c0_11] : memref<784x768xbf16, #tpu.memory_space<vmem>>, vector<16x768xbf16>
    tpu.vector_store %arg11[%c32_10, %c0_11], %18 {strides = array<i32>} : memref<784x768xbf16, #tpu.memory_space<vmem>>, vector<16x768xbf16>,
    %20 = vector.extract_strided_slice %1 {offsets = [0, 720], sizes = [16, 48], strides = [1, 1]} : vector<16x768xbf16> to vector<16x48xbf16>
    %21 = vector.extract_strided_slice %1 {offsets = [0, 0], sizes = [16, 720], strides = [1, 1]} : vector<16x768xbf16> to vector<16x720xbf16>
    %22 = tpu.concatenate %20, %21 in 1 : vector<16x48xbf16>, vector<16x720xbf16> -> vector<16x768xbf16>
    %c48 = arith.constant 48 : index
    %c0_12 = arith.constant 0 : index
    %23 = vector.load %arg2[%c48, %c0_12] : memref<784x768xbf16, #tpu.memory_space<vmem>>, vector<16x768xbf16>
    %24 = arith.mulf %22, %23 : vector<16x768xbf16>
    %c48_13 = arith.constant 48 : index
    %c0_14 = arith.constant 0 : index
    %25 = vector.load %arg11[%c48_13, %c0_14] : memref<784x768xbf16, #tpu.memory_space<vmem>>, vector<16x768xbf16>
    tpu.vector_store %arg11[%c48_13, %c0_14], %24 {strides = array<i32>} : memref<784x768xbf16, #tpu.memory_space<vmem>>, vector<16x768xbf16>,
    %26 = vector.extract_strided_slice %1 {offsets = [0, 721], sizes = [16, 47], strides = [1, 1]} : vector<16x768xbf16> to vector<16x47xbf16>
    %27 = vector.extract_strided_slice %1 {offsets = [0, 0], sizes = [16, 721], strides = [1, 1]} : vector<16x768xbf16> to vector<16x721xbf16>
    %28 = tpu.concatenate %26, %27 in 1 : vector<16x47xbf16>, vector<16x721xbf16> -> vector<16x768xbf16>
    %c64 = arith.constant 64 : index
    %c0_15 = arith.constant 0 : index
    %29 = vector.load %arg2[%c64, %c0_15] : memref<784x768xbf16, #tpu.memory_space<vmem>>, vector<16x768xbf16>
    %30 = arith.mulf %28, %29 : vector<16x768xbf16>
    %c64_16 = arith.constant 64 : index
    %c0_17 = arith.constant 0 : index
    %31 = vector.load %arg11[%c64_16, %c0_17] : memref<784x768xbf16, #tpu.memory_space<vmem>>, vector<16x768xbf16>
    tpu.vector_store %arg11[%c64_16, %c0_17], %30 {strides = array<i32>} : memref<784x768xbf16, #tpu.memory_space<vmem>>, vector<16x768xbf16>,
    %32 = vector.extract_strided_slice %1 {offsets = [0, 722], sizes = [16, 46], strides = [1, 1]} : vector<16x768xbf16> to vector<16x46xbf16>
    %33 = vector.extract_strided_slice %1 {offsets = [0, 0], sizes = [16, 722], strides = [1, 1]} : vector<16x768xbf16> to vector<16x722xbf16>
    %34 = tpu.concatenate %32, %33 in 1 : vector<16x46xbf16>, vector<16x722xbf16> -> vector<16x768xbf16>
    %c80 = arith.constant 80 : index
    %c0_18 = arith.constant 0 : index
    %35 = vector.load %arg2[%c80, %c0_18] : memref<784x768xbf16, #tpu.memory_space<vmem>>, vector<16x768xbf16>
    %36 = arith.mulf %34, %35 : vector<16x768xbf16>
    %c80_19 = arith.constant 80 : index
    %c0_20 = arith.constant 0 : index
    %37 = vector.load %arg11[%c80_19, %c0_20] : memref<784x768xbf16, #tpu.memory_space<vmem>>, vector<16x768xbf16>
    tpu.vector_store %arg11[%c80_19, %c0_20], %36 {strides = array<i32>} : memref<784x768xbf16, #tpu.memory_space<vmem>>, vector<16x768xbf16>,
    %38 = vector.extract_strided_slice %1 {offsets = [0, 723], sizes = [16, 45], strides = [1, 1]} : vector<16x768xbf16> to vector<16x45xbf16>
    %39 = vector.extract_strided_slice %1 {offsets = [0, 0], sizes = [16, 723], strides = [1, 1]} : vector<16x768xbf16> to vector<16x723xbf16>
    %40 = tpu.concatenate %38, %39 in 1 : vector<16x45xbf16>, vector<16x723xbf16> -> vector<16x768xbf16>
    %c96 = arith.constant 96 : index
    %c0_21 = arith.constant 0 : index
    %41 = vector.load %arg2[%c96, %c0_21] : memref<784x768xbf16, #tpu.memory_space<vmem>>, vector<16x768xbf16>
    %42 = arith.mulf %40, %41 : vector<16x768xbf16>
    %c96_22 = arith.constant 96 : index
    %c0_23 = arith.constant 0 : index
    %43 = vector.load %arg11[%c96_22, %c0_23] : memref<784x768xbf16, #tpu.memory_space<vmem>>, vector<16x768xbf16>
    tpu.vector_store %arg11[%c96_22, %c0_23], %42 {strides = array<i32>} : memref<784x768xbf16, #tpu.memory_space<vmem>>, vector<16x768xbf16>,
    %44 = vector.extract_strided_slice %1 {offsets = [0, 733], sizes = [16, 35], strides = [1, 1]} : vector<16x768xbf16> to vector<16x35xbf16>
    %45 = vector.extract_strided_slice %1 {offsets = [0, 0], sizes = [16, 733], strides = [1, 1]} : vector<16x768xbf16> to vector<16x733xbf16>
    %46 = tpu.concatenate %44, %45 in 1 : vector<16x35xbf16>, vector<16x733xbf16> -> vector<16x768xbf16>
    %c112 = arith.constant 112 : index
    %c0_24 = arith.constant 0 : index
    %47 = vector.load %arg2[%c112, %c0_24] : memref<784x768xbf16, #tpu.memory_space<vmem>>, vector<16x768xbf16>
    %48 = arith.mulf %46, %47 : vector<16x768xbf16>
    %c112_25 = arith.constant 112 : index
    %c0_26 = arith.constant 0 : index
    %49 = vector.load %arg11[%c112_25, %c0_26] : memref<784x768xbf16, #tpu.memory_space<vmem>>, vector<16x768xbf16>
    tpu.vector_store %arg11[%c112_25, %c0_26], %48 {strides = array<i32>} : memref<784x768xbf16, #tpu.memory_space<vmem>>, vector<16x768xbf16>,
    %50 = vector.extract_strided_slice %1 {offsets = [0, 734], sizes = [16, 34], strides = [1, 1]} : vector<16x768xbf16> to vector<16x34xbf16>
    %51 = vector.extract_strided_slice %1 {offsets = [0, 0], sizes = [16, 734], strides = [1, 1]} : vector<16x768xbf16> to vector<16x734xbf16>
    %52 = tpu.concatenate %50, %51 in 1 : vector<16x34xbf16>, vector<16x734xbf16> -> vector<16x768xbf16>
    %c128 = arith.constant 128 : index
    %c0_27 = arith.constant 0 : index
    %53 = vector.load %arg2[%c128, %c0_27] : memref<784x768xbf16, #tpu.memory_space<vmem>>, vector<16x768xbf16>
    %54 = arith.mulf %52, %53 : vector<16x768xbf16>
    %c128_28 = arith.constant 128 : index
    %c0_29 = arith.constant 0 : index
    %55 = vector.load %arg11[%c128_28, %c0_29] : memref<784x768xbf16, #tpu.memory_space<vmem>>, vector<16x768xbf16>
    tpu.vector_store %arg11[%c128_28, %c0_29], %54 {strides = array<i32>} : memref<784x768xbf16, #tpu.memory_space<vmem>>, vector<16x768xbf16>,
    %56 = vector.extract_strided_slice %1 {offsets = [0, 735], sizes = [16, 33], strides = [1, 1]} : vector<16x768xbf16> to vector<16x33xbf16>
    %57 = vector.extract_strided_slice %1 {offsets = [0, 0], sizes = [16, 735], strides = [1, 1]} : vector<16x768xbf16> to vector<16x735xbf16>
    %58 = tpu.concatenate %56, %57 in 1 : vector<16x33xbf16>, vector<16x735xbf16> -> vector<16x768xbf16>
    %c144 = arith.constant 144 : index
    %c0_30 = arith.constant 0 : index
    %59 = vector.load %arg2[%c144, %c0_30] : memref<784x768xbf16, #tpu.memory_space<vmem>>, vector<16x768xbf16>
    %60 = arith.mulf %58, %59 : vector<16x768xbf16>
    %c144_31 = arith.constant 144 : index
    %c0_32 = arith.constant 0 : index
    %61 = vector.load %arg11[%c144_31, %c0_32] : memref<784x768xbf16, #tpu.memory_space<vmem>>, vector<16x768xbf16>
    tpu.vector_store %arg11[%c144_31, %c0_32], %60 {strides = array<i32>} : memref<784x768xbf16, #tpu.memory_space<vmem>>, vector<16x768xbf16>,
    %62 = vector.extract_strided_slice %1 {offsets = [0, 736], sizes = [16, 32], strides = [1, 1]} : vector<16x768xbf16> to vector<16x32xbf16>
    %63 = vector.extract_strided_slice %1 {offsets = [0, 0], sizes = [16, 736], strides = [1, 1]} : vector<16x768xbf16> to vector<16x736xbf16>
    %64 = tpu.concatenate %62, %63 in 1 : vector<16x32xbf16>, vector<16x736xbf16> -> vector<16x768xbf16>
    %c160 = arith.constant 160 : index
    %c0_33 = arith.constant 0 : index
    %65 = vector.load %arg2[%c160, %c0_33] : memref<784x768xbf16, #tpu.memory_space<vmem>>, vector<16x768xbf16>
    %66 = arith.mulf %64, %65 : vector<16x768xbf16>
    %c160_34 = arith.constant 160 : index
    %c0_35 = arith.constant 0 : index
    %67 = vector.load %arg11[%c160_34, %c0_35] : memref<784x768xbf16, #tpu.memory_space<vmem>>, vector<16x768xbf16>
    tpu.vector_store %arg11[%c160_34, %c0_35], %66 {strides = array<i32>} : memref<784x768xbf16, #tpu.memory_space<vmem>>, vector<16x768xbf16>,
    %68 = vector.extract_strided_slice %1 {offsets = [0, 737], sizes = [16, 31], strides = [1, 1]} : vector<16x768xbf16> to vector<16x31xbf16>
    %69 = vector.extract_strided_slice %1 {offsets = [0, 0], sizes = [16, 737], strides = [1, 1]} : vector<16x768xbf16> to vector<16x737xbf16>
    %70 = tpu.concatenate %68, %69 in 1 : vector<16x31xbf16>, vector<16x737xbf16> -> vector<16x768xbf16>
    %c176 = arith.constant 176 : index
    %c0_36 = arith.constant 0 : index
    %71 = vector.load %arg2[%c176, %c0_36] : memref<784x768xbf16, #tpu.memory_space<vmem>>, vector<16x768xbf16>
    %72 = arith.mulf %70, %71 : vector<16x768xbf16>
    %c176_37 = arith.constant 176 : index
    %c0_38 = arith.constant 0 : index
    %73 = vector.load %arg11[%c176_37, %c0_38] : memref<784x768xbf16, #tpu.memory_space<vmem>>, vector<16x768xbf16>
    tpu.vector_store %arg11[%c176_37, %c0_38], %72 {strides = array<i32>} : memref<784x768xbf16, #tpu.memory_space<vmem>>, vector<16x768xbf16>,
    %74 = vector.extract_strided_slice %1 {offsets = [0, 738], sizes = [16, 30], strides = [1, 1]} : vector<16x768xbf16> to vector<16x30xbf16>
    %75 = vector.extract_strided_slice %1 {offsets = [0, 0], sizes = [16, 738], strides = [1, 1]} : vector<16x768xbf16> to vector<16x738xbf16>
    %76 = tpu.concatenate %74, %75 in 1 : vector<16x30xbf16>, vector<16x738xbf16> -> vector<16x768xbf16>
    %c192 = arith.constant 192 : index
    %c0_39 = arith.constant 0 : index
    %77 = vector.load %arg2[%c192, %c0_39] : memref<784x768xbf16, #tpu.memory_space<vmem>>, vector<16x768xbf16>
    %78 = arith.mulf %76, %77 : vector<16x768xbf16>
    %c192_40 = arith.constant 192 : index
    %c0_41 = arith.constant 0 : index
    %79 = vector.load %arg11[%c192_40, %c0_41] : memref<784x768xbf16, #tpu.memory_space<vmem>>, vector<16x768xbf16>
    tpu.vector_store %arg11[%c192_40, %c0_41], %78 {strides = array<i32>} : memref<784x768xbf16, #tpu.memory_space<vmem>>, vector<16x768xbf16>,
    %80 = vector.extract_strided_slice %1 {offsets = [0, 739], sizes = [16, 29], strides = [1, 1]} : vector<16x768xbf16> to vector<16x29xbf16>
    %81 = vector.extract_strided_slice %1 {offsets = [0, 0], sizes = [16, 739], strides = [1, 1]} : vector<16x768xbf16> to vector<16x739xbf16>
    %82 = tpu.concatenate %80, %81 in 1 : vector<16x29xbf16>, vector<16x739xbf16> -> vector<16x768xbf16>
    %c208 = arith.constant 208 : index
    %c0_42 = arith.constant 0 : index
    %83 = vector.load %arg2[%c208, %c0_42] : memref<784x768xbf16, #tpu.memory_space<vmem>>, vector<16x768xbf16>
    %84 = arith.mulf %82, %83 : vector<16x768xbf16>
    %c208_43 = arith.constant 208 : index
    %c0_44 = arith.constant 0 : index
    %85 = vector.load %arg11[%c208_43, %c0_44] : memref<784x768xbf16, #tpu.memory_space<vmem>>, vector<16x768xbf16>
    tpu.vector_store %arg11[%c208_43, %c0_44], %84 {strides = array<i32>} : memref<784x768xbf16, #tpu.memory_space<vmem>>, vector<16x768xbf16>,
    %86 = vector.extract_strided_slice %1 {offsets = [0, 749], sizes = [16, 19], strides = [1, 1]} : vector<16x768xbf16> to vector<16x19xbf16>
    %87 = vector.extract_strided_slice %1 {offsets = [0, 0], sizes = [16, 749], strides = [1, 1]} : vector<16x768xbf16> to vector<16x749xbf16>
    %88 = tpu.concatenate %86, %87 in 1 : vector<16x19xbf16>, vector<16x749xbf16> -> vector<16x768xbf16>
    %c224 = arith.constant 224 : index
    %c0_45 = arith.constant 0 : index
    %89 = vector.load %arg2[%c224, %c0_45] : memref<784x768xbf16, #tpu.memory_space<vmem>>, vector<16x768xbf16>
    %90 = arith.mulf %88, %89 : vector<16x768xbf16>
    %c224_46 = arith.constant 224 : index
    %c0_47 = arith.constant 0 : index
    %91 = vector.load %arg11[%c224_46, %c0_47] : memref<784x768xbf16, #tpu.memory_space<vmem>>, vector<16x768xbf16>
    tpu.vector_store %arg11[%c224_46, %c0_47], %90 {strides = array<i32>} : memref<784x768xbf16, #tpu.memory_space<vmem>>, vector<16x768xbf16>,
    %92 = vector.extract_strided_slice %1 {offsets = [0, 750], sizes = [16, 18], strides = [1, 1]} : vector<16x768xbf16> to vector<16x18xbf16>
    %93 = vector.extract_strided_slice %1 {offsets = [0, 0], sizes = [16, 750], strides = [1, 1]} : vector<16x768xbf16> to vector<16x750xbf16>
    %94 = tpu.concatenate %92, %93 in 1 : vector<16x18xbf16>, vector<16x750xbf16> -> vector<16x768xbf16>
    %c240 = arith.constant 240 : index
    %c0_48 = arith.constant 0 : index
    %95 = vector.load %arg2[%c240, %c0_48] : memref<784x768xbf16, #tpu.memory_space<vmem>>, vector<16x768xbf16>
    %96 = arith.mulf %94, %95 : vector<16x768xbf16>
    %c240_49 = arith.constant 240 : index
    %c0_50 = arith.constant 0 : index
    %97 = vector.load %arg11[%c240_49, %c0_50] : memref<784x768xbf16, #tpu.memory_space<vmem>>, vector<16x768xbf16>
    tpu.vector_store %arg11[%c240_49, %c0_50], %96 {strides = array<i32>} : memref<784x768xbf16, #tpu.memory_space<vmem>>, vector<16x768xbf16>,
    %98 = vector.extract_strided_slice %1 {offsets = [0, 751], sizes = [16, 17], strides = [1, 1]} : vector<16x768xbf16> to vector<16x17xbf16>
    %99 = vector.extract_strided_slice %1 {offsets = [0, 0], sizes = [16, 751], strides = [1, 1]} : vector<16x768xbf16> to vector<16x751xbf16>
    %100 = tpu.concatenate %98, %99 in 1 : vector<16x17xbf16>, vector<16x751xbf16> -> vector<16x768xbf16>
    %c256 = arith.constant 256 : index
    %c0_51 = arith.constant 0 : index
    %101 = vector.load %arg2[%c256, %c0_51] : memref<784x768xbf16, #tpu.memory_space<vmem>>, vector<16x768xbf16>
    %102 = arith.mulf %100, %101 : vector<16x768xbf16>
    %c256_52 = arith.constant 256 : index
    %c0_53 = arith.constant 0 : index
    %103 = vector.load %arg11[%c256_52, %c0_53] : memref<784x768xbf16, #tpu.memory_space<vmem>>, vector<16x768xbf16>
    tpu.vector_store %arg11[%c256_52, %c0_53], %102 {strides = array<i32>} : memref<784x768xbf16, #tpu.memory_space<vmem>>, vector<16x768xbf16>,
    %104 = vector.extract_strided_slice %1 {offsets = [0, 752], sizes = [16, 16], strides = [1, 1]} : vector<16x768xbf16> to vector<16x16xbf16>
    %105 = vector.extract_strided_slice %1 {offsets = [0, 0], sizes = [16, 752], strides = [1, 1]} : vector<16x768xbf16> to vector<16x752xbf16>
    %106 = tpu.concatenate %104, %105 in 1 : vector<16x16xbf16>, vector<16x752xbf16> -> vector<16x768xbf16>
    %c272 = arith.constant 272 : index
    %c0_54 = arith.constant 0 : index
    %107 = vector.load %arg2[%c272, %c0_54] : memref<784x768xbf16, #tpu.memory_space<vmem>>, vector<16x768xbf16>
    %108 = arith.mulf %106, %107 : vector<16x768xbf16>
    %c272_55 = arith.constant 272 : index
    %c0_56 = arith.constant 0 : index
    %109 = vector.load %arg11[%c272_55, %c0_56] : memref<784x768xbf16, #tpu.memory_space<vmem>>, vector<16x768xbf16>
    tpu.vector_store %arg11[%c272_55, %c0_56], %108 {strides = array<i32>} : memref<784x768xbf16, #tpu.memory_space<vmem>>, vector<16x768xbf16>,
    %110 = vector.extract_strided_slice %1 {offsets = [0, 753], sizes = [16, 15], strides = [1, 1]} : vector<16x768xbf16> to vector<16x15xbf16>
    %111 = vector.extract_strided_slice %1 {offsets = [0, 0], sizes = [16, 753], strides = [1, 1]} : vector<16x768xbf16> to vector<16x753xbf16>
    %112 = tpu.concatenate %110, %111 in 1 : vector<16x15xbf16>, vector<16x753xbf16> -> vector<16x768xbf16>
    %c288 = arith.constant 288 : index
    %c0_57 = arith.constant 0 : index
    %113 = vector.load %arg2[%c288, %c0_57] : memref<784x768xbf16, #tpu.memory_space<vmem>>, vector<16x768xbf16>
    %114 = arith.mulf %112, %113 : vector<16x768xbf16>
    %c288_58 = arith.constant 288 : index
    %c0_59 = arith.constant 0 : index
    %115 = vector.load %arg11[%c288_58, %c0_59] : memref<784x768xbf16, #tpu.memory_space<vmem>>, vector<16x768xbf16>
    tpu.vector_store %arg11[%c288_58, %c0_59], %114 {strides = array<i32>} : memref<784x768xbf16, #tpu.memory_space<vmem>>, vector<16x768xbf16>,
    %116 = vector.extract_strided_slice %1 {offsets = [0, 754], sizes = [16, 14], strides = [1, 1]} : vector<16x768xbf16> to vector<16x14xbf16>
    %117 = vector.extract_strided_slice %1 {offsets = [0, 0], sizes = [16, 754], strides = [1, 1]} : vector<16x768xbf16> to vector<16x754xbf16>
    %118 = tpu.concatenate %116, %117 in 1 : vector<16x14xbf16>, vector<16x754xbf16> -> vector<16x768xbf16>
    %c304 = arith.constant 304 : index
    %c0_60 = arith.constant 0 : index
    %119 = vector.load %arg2[%c304, %c0_60] : memref<784x768xbf16, #tpu.memory_space<vmem>>, vector<16x768xbf16>
    %120 = arith.mulf %118, %119 : vector<16x768xbf16>
    %c304_61 = arith.constant 304 : index
    %c0_62 = arith.constant 0 : index
    %121 = vector.load %arg11[%c304_61, %c0_62] : memref<784x768xbf16, #tpu.memory_space<vmem>>, vector<16x768xbf16>
    tpu.vector_store %arg11[%c304_61, %c0_62], %120 {strides = array<i32>} : memref<784x768xbf16, #tpu.memory_space<vmem>>, vector<16x768xbf16>,
    %122 = vector.extract_strided_slice %1 {offsets = [0, 755], sizes = [16, 13], strides = [1, 1]} : vector<16x768xbf16> to vector<16x13xbf16>
    %123 = vector.extract_strided_slice %1 {offsets = [0, 0], sizes = [16, 755], strides = [1, 1]} : vector<16x768xbf16> to vector<16x755xbf16>
    %124 = tpu.concatenate %122, %123 in 1 : vector<16x13xbf16>, vector<16x755xbf16> -> vector<16x768xbf16>
    %c320 = arith.constant 320 : index
    %c0_63 = arith.constant 0 : index
    %125 = vector.load %arg2[%c320, %c0_63] : memref<784x768xbf16, #tpu.memory_space<vmem>>, vector<16x768xbf16>
    %126 = arith.mulf %124, %125 : vector<16x768xbf16>
    %c320_64 = arith.constant 320 : index
    %c0_65 = arith.constant 0 : index
    %127 = vector.load %arg11[%c320_64, %c0_65] : memref<784x768xbf16, #tpu.memory_space<vmem>>, vector<16x768xbf16>
    tpu.vector_store %arg11[%c320_64, %c0_65], %126 {strides = array<i32>} : memref<784x768xbf16, #tpu.memory_space<vmem>>, vector<16x768xbf16>,
    %128 = vector.extract_strided_slice %1 {offsets = [0, 765], sizes = [16, 3], strides = [1, 1]} : vector<16x768xbf16> to vector<16x3xbf16>
    %129 = vector.extract_strided_slice %1 {offsets = [0, 0], sizes = [16, 765], strides = [1, 1]} : vector<16x768xbf16> to vector<16x765xbf16>
    %130 = tpu.concatenate %128, %129 in 1 : vector<16x3xbf16>, vector<16x765xbf16> -> vector<16x768xbf16>
    %c336 = arith.constant 336 : index
    %c0_66 = arith.constant 0 : index
    %131 = vector.load %arg2[%c336, %c0_66] : memref<784x768xbf16, #tpu.memory_space<vmem>>, vector<16x768xbf16>
    %132 = arith.mulf %130, %131 : vector<16x768xbf16>
    %c336_67 = arith.constant 336 : index
    %c0_68 = arith.constant 0 : index
    %133 = vector.load %arg11[%c336_67, %c0_68] : memref<784x768xbf16, #tpu.memory_space<vmem>>, vector<16x768xbf16>
    tpu.vector_store %arg11[%c336_67, %c0_68], %132 {strides = array<i32>} : memref<784x768xbf16, #tpu.memory_space<vmem>>, vector<16x768xbf16>,
    %134 = vector.extract_strided_slice %1 {offsets = [0, 766], sizes = [16, 2], strides = [1, 1]} : vector<16x768xbf16> to vector<16x2xbf16>
    %135 = vector.extract_strided_slice %1 {offsets = [0, 0], sizes = [16, 766], strides = [1, 1]} : vector<16x768xbf16> to vector<16x766xbf16>
    %136 = tpu.concatenate %134, %135 in 1 : vector<16x2xbf16>, vector<16x766xbf16> -> vector<16x768xbf16>
    %c352 = arith.constant 352 : index
    %c0_69 = arith.constant 0 : index
    %137 = vector.load %arg2[%c352, %c0_69] : memref<784x768xbf16, #tpu.memory_space<vmem>>, vector<16x768xbf16>
    %138 = arith.mulf %136, %137 : vector<16x768xbf16>
    %c352_70 = arith.constant 352 : index
    %c0_71 = arith.constant 0 : index
    %139 = vector.load %arg11[%c352_70, %c0_71] : memref<784x768xbf16, #tpu.memory_space<vmem>>, vector<16x768xbf16>
    tpu.vector_store %arg11[%c352_70, %c0_71], %138 {strides = array<i32>} : memref<784x768xbf16, #tpu.memory_space<vmem>>, vector<16x768xbf16>,
    %140 = vector.extract_strided_slice %1 {offsets = [0, 767], sizes = [16, 1], strides = [1, 1]} : vector<16x768xbf16> to vector<16x1xbf16>
    %141 = vector.extract_strided_slice %1 {offsets = [0, 0], sizes = [16, 767], strides = [1, 1]} : vector<16x768xbf16> to vector<16x767xbf16>
    %142 = tpu.concatenate %140, %141 in 1 : vector<16x1xbf16>, vector<16x767xbf16> -> vector<16x768xbf16>
    %c368 = arith.constant 368 : index
    %c0_72 = arith.constant 0 : index
    %143 = vector.load %arg2[%c368, %c0_72] : memref<784x768xbf16, #tpu.memory_space<vmem>>, vector<16x768xbf16>
    %144 = arith.mulf %142, %143 : vector<16x768xbf16>
    %c368_73 = arith.constant 368 : index
    %c0_74 = arith.constant 0 : index
    %145 = vector.load %arg11[%c368_73, %c0_74] : memref<784x768xbf16, #tpu.memory_space<vmem>>, vector<16x768xbf16>
    tpu.vector_store %arg11[%c368_73, %c0_74], %144 {strides = array<i32>} : memref<784x768xbf16, #tpu.memory_space<vmem>>, vector<16x768xbf16>,
    %c384 = arith.constant 384 : index
    %c0_75 = arith.constant 0 : index
    %146 = vector.load %arg11[%c384, %c0_75] : memref<784x768xbf16, #tpu.memory_space<vmem>>, vector<16x768xbf16>
    tpu.vector_store %arg11[%c384, %c0_75], %1 {strides = array<i32>} : memref<784x768xbf16, #tpu.memory_space<vmem>>, vector<16x768xbf16>,
    %147 = vector.extract_strided_slice %1 {offsets = [0, 1], sizes = [16, 767], strides = [1, 1]} : vector<16x768xbf16> to vector<16x767xbf16>
    %148 = vector.extract_strided_slice %1 {offsets = [0, 0], sizes = [16, 1], strides = [1, 1]} : vector<16x768xbf16> to vector<16x1xbf16>
    %149 = tpu.concatenate %147, %148 in 1 : vector<16x767xbf16>, vector<16x1xbf16> -> vector<16x768xbf16>
    %c400 = arith.constant 400 : index
    %c0_76 = arith.constant 0 : index
    %150 = vector.load %arg2[%c400, %c0_76] : memref<784x768xbf16, #tpu.memory_space<vmem>>, vector<16x768xbf16>
    %151 = arith.mulf %149, %150 : vector<16x768xbf16>
    %c400_77 = arith.constant 400 : index
    %c0_78 = arith.constant 0 : index
    %152 = vector.load %arg11[%c400_77, %c0_78] : memref<784x768xbf16, #tpu.memory_space<vmem>>, vector<16x768xbf16>
    tpu.vector_store %arg11[%c400_77, %c0_78], %151 {strides = array<i32>} : memref<784x768xbf16, #tpu.memory_space<vmem>>, vector<16x768xbf16>,
    %153 = vector.extract_strided_slice %1 {offsets = [0, 2], sizes = [16, 766], strides = [1, 1]} : vector<16x768xbf16> to vector<16x766xbf16>
    %154 = vector.extract_strided_slice %1 {offsets = [0, 0], sizes = [16, 2], strides = [1, 1]} : vector<16x768xbf16> to vector<16x2xbf16>
    %155 = tpu.concatenate %153, %154 in 1 : vector<16x766xbf16>, vector<16x2xbf16> -> vector<16x768xbf16>
    %c416 = arith.constant 416 : index
    %c0_79 = arith.constant 0 : index
    %156 = vector.load %arg2[%c416, %c0_79] : memref<784x768xbf16, #tpu.memory_space<vmem>>, vector<16x768xbf16>
    %157 = arith.mulf %155, %156 : vector<16x768xbf16>
    %c416_80 = arith.constant 416 : index
    %c0_81 = arith.constant 0 : index
    %158 = vector.load %arg11[%c416_80, %c0_81] : memref<784x768xbf16, #tpu.memory_space<vmem>>, vector<16x768xbf16>
    tpu.vector_store %arg11[%c416_80, %c0_81], %157 {strides = array<i32>} : memref<784x768xbf16, #tpu.memory_space<vmem>>, vector<16x768xbf16>,
    %159 = vector.extract_strided_slice %1 {offsets = [0, 3], sizes = [16, 765], strides = [1, 1]} : vector<16x768xbf16> to vector<16x765xbf16>
    %160 = vector.extract_strided_slice %1 {offsets = [0, 0], sizes = [16, 3], strides = [1, 1]} : vector<16x768xbf16> to vector<16x3xbf16>
    %161 = tpu.concatenate %159, %160 in 1 : vector<16x765xbf16>, vector<16x3xbf16> -> vector<16x768xbf16>
    %c432 = arith.constant 432 : index
    %c0_82 = arith.constant 0 : index
    %162 = vector.load %arg2[%c432, %c0_82] : memref<784x768xbf16, #tpu.memory_space<vmem>>, vector<16x768xbf16>
    %163 = arith.mulf %161, %162 : vector<16x768xbf16>
    %c432_83 = arith.constant 432 : index
    %c0_84 = arith.constant 0 : index
    %164 = vector.load %arg11[%c432_83, %c0_84] : memref<784x768xbf16, #tpu.memory_space<vmem>>, vector<16x768xbf16>
    tpu.vector_store %arg11[%c432_83, %c0_84], %163 {strides = array<i32>} : memref<784x768xbf16, #tpu.memory_space<vmem>>, vector<16x768xbf16>,
    %165 = vector.extract_strided_slice %1 {offsets = [0, 13], sizes = [16, 755], strides = [1, 1]} : vector<16x768xbf16> to vector<16x755xbf16>
    %166 = vector.extract_strided_slice %1 {offsets = [0, 0], sizes = [16, 13], strides = [1, 1]} : vector<16x768xbf16> to vector<16x13xbf16>
    %167 = tpu.concatenate %165, %166 in 1 : vector<16x755xbf16>, vector<16x13xbf16> -> vector<16x768xbf16>
    %c448 = arith.constant 448 : index
    %c0_85 = arith.constant 0 : index
    %168 = vector.load %arg2[%c448, %c0_85] : memref<784x768xbf16, #tpu.memory_space<vmem>>, vector<16x768xbf16>
    %169 = arith.mulf %167, %168 : vector<16x768xbf16>
    %c448_86 = arith.constant 448 : index
    %c0_87 = arith.constant 0 : index
    %170 = vector.load %arg11[%c448_86, %c0_87] : memref<784x768xbf16, #tpu.memory_space<vmem>>, vector<16x768xbf16>
    tpu.vector_store %arg11[%c448_86, %c0_87], %169 {strides = array<i32>} : memref<784x768xbf16, #tpu.memory_space<vmem>>, vector<16x768xbf16>,
    %171 = vector.extract_strided_slice %1 {offsets = [0, 14], sizes = [16, 754], strides = [1, 1]} : vector<16x768xbf16> to vector<16x754xbf16>
    %172 = vector.extract_strided_slice %1 {offsets = [0, 0], sizes = [16, 14], strides = [1, 1]} : vector<16x768xbf16> to vector<16x14xbf16>
    %173 = tpu.concatenate %171, %172 in 1 : vector<16x754xbf16>, vector<16x14xbf16> -> vector<16x768xbf16>
    %c464 = arith.constant 464 : index
    %c0_88 = arith.constant 0 : index
    %174 = vector.load %arg2[%c464, %c0_88] : memref<784x768xbf16, #tpu.memory_space<vmem>>, vector<16x768xbf16>
    %175 = arith.mulf %173, %174 : vector<16x768xbf16>
    %c464_89 = arith.constant 464 : index
    %c0_90 = arith.constant 0 : index
    %176 = vector.load %arg11[%c464_89, %c0_90] : memref<784x768xbf16, #tpu.memory_space<vmem>>, vector<16x768xbf16>
    tpu.vector_store %arg11[%c464_89, %c0_90], %175 {strides = array<i32>} : memref<784x768xbf16, #tpu.memory_space<vmem>>, vector<16x768xbf16>,
    %177 = vector.extract_strided_slice %1 {offsets = [0, 15], sizes = [16, 753], strides = [1, 1]} : vector<16x768xbf16> to vector<16x753xbf16>
    %178 = vector.extract_strided_slice %1 {offsets = [0, 0], sizes = [16, 15], strides = [1, 1]} : vector<16x768xbf16> to vector<16x15xbf16>
    %179 = tpu.concatenate %177, %178 in 1 : vector<16x753xbf16>, vector<16x15xbf16> -> vector<16x768xbf16>
    %c480 = arith.constant 480 : index
    %c0_91 = arith.constant 0 : index
    %180 = vector.load %arg2[%c480, %c0_91] : memref<784x768xbf16, #tpu.memory_space<vmem>>, vector<16x768xbf16>
    %181 = arith.mulf %179, %180 : vector<16x768xbf16>
    %c480_92 = arith.constant 480 : index
    %c0_93 = arith.constant 0 : index
    %182 = vector.load %arg11[%c480_92, %c0_93] : memref<784x768xbf16, #tpu.memory_space<vmem>>, vector<16x768xbf16>
    tpu.vector_store %arg11[%c480_92, %c0_93], %181 {strides = array<i32>} : memref<784x768xbf16, #tpu.memory_space<vmem>>, vector<16x768xbf16>,
    %183 = vector.extract_strided_slice %1 {offsets = [0, 16], sizes = [16, 752], strides = [1, 1]} : vector<16x768xbf16> to vector<16x752xbf16>
    %184 = vector.extract_strided_slice %1 {offsets = [0, 0], sizes = [16, 16], strides = [1, 1]} : vector<16x768xbf16> to vector<16x16xbf16>
    %185 = tpu.concatenate %183, %184 in 1 : vector<16x752xbf16>, vector<16x16xbf16> -> vector<16x768xbf16>
    %c496 = arith.constant 496 : index
    %c0_94 = arith.constant 0 : index
    %186 = vector.load %arg2[%c496, %c0_94] : memref<784x768xbf16, #tpu.memory_space<vmem>>, vector<16x768xbf16>
    %187 = arith.mulf %185, %186 : vector<16x768xbf16>
    %c496_95 = arith.constant 496 : index
    %c0_96 = arith.constant 0 : index
    %188 = vector.load %arg11[%c496_95, %c0_96] : memref<784x768xbf16, #tpu.memory_space<vmem>>, vector<16x768xbf16>
    tpu.vector_store %arg11[%c496_95, %c0_96], %187 {strides = array<i32>} : memref<784x768xbf16, #tpu.memory_space<vmem>>, vector<16x768xbf16>,
    %189 = vector.extract_strided_slice %1 {offsets = [0, 17], sizes = [16, 751], strides = [1, 1]} : vector<16x768xbf16> to vector<16x751xbf16>
    %190 = vector.extract_strided_slice %1 {offsets = [0, 0], sizes = [16, 17], strides = [1, 1]} : vector<16x768xbf16> to vector<16x17xbf16>
    %191 = tpu.concatenate %189, %190 in 1 : vector<16x751xbf16>, vector<16x17xbf16> -> vector<16x768xbf16>
    %c512 = arith.constant 512 : index
    %c0_97 = arith.constant 0 : index
    %192 = vector.load %arg2[%c512, %c0_97] : memref<784x768xbf16, #tpu.memory_space<vmem>>, vector<16x768xbf16>
    %193 = arith.mulf %191, %192 : vector<16x768xbf16>
    %c512_98 = arith.constant 512 : index
    %c0_99 = arith.constant 0 : index
    %194 = vector.load %arg11[%c512_98, %c0_99] : memref<784x768xbf16, #tpu.memory_space<vmem>>, vector<16x768xbf16>
    tpu.vector_store %arg11[%c512_98, %c0_99], %193 {strides = array<i32>} : memref<784x768xbf16, #tpu.memory_space<vmem>>, vector<16x768xbf16>,
    %195 = vector.extract_strided_slice %1 {offsets = [0, 18], sizes = [16, 750], strides = [1, 1]} : vector<16x768xbf16> to vector<16x750xbf16>
    %196 = vector.extract_strided_slice %1 {offsets = [0, 0], sizes = [16, 18], strides = [1, 1]} : vector<16x768xbf16> to vector<16x18xbf16>
    %197 = tpu.concatenate %195, %196 in 1 : vector<16x750xbf16>, vector<16x18xbf16> -> vector<16x768xbf16>
    %c528 = arith.constant 528 : index
    %c0_100 = arith.constant 0 : index
    %198 = vector.load %arg2[%c528, %c0_100] : memref<784x768xbf16, #tpu.memory_space<vmem>>, vector<16x768xbf16>
    %199 = arith.mulf %197, %198 : vector<16x768xbf16>
    %c528_101 = arith.constant 528 : index
    %c0_102 = arith.constant 0 : index
    %200 = vector.load %arg11[%c528_101, %c0_102] : memref<784x768xbf16, #tpu.memory_space<vmem>>, vector<16x768xbf16>
    tpu.vector_store %arg11[%c528_101, %c0_102], %199 {strides = array<i32>} : memref<784x768xbf16, #tpu.memory_space<vmem>>, vector<16x768xbf16>,
    %201 = vector.extract_strided_slice %1 {offsets = [0, 19], sizes = [16, 749], strides = [1, 1]} : vector<16x768xbf16> to vector<16x749xbf16>
    %202 = vector.extract_strided_slice %1 {offsets = [0, 0], sizes = [16, 19], strides = [1, 1]} : vector<16x768xbf16> to vector<16x19xbf16>
    %203 = tpu.concatenate %201, %202 in 1 : vector<16x749xbf16>, vector<16x19xbf16> -> vector<16x768xbf16>
    %c544 = arith.constant 544 : index
    %c0_103 = arith.constant 0 : index
    %204 = vector.load %arg2[%c544, %c0_103] : memref<784x768xbf16, #tpu.memory_space<vmem>>, vector<16x768xbf16>
    %205 = arith.mulf %203, %204 : vector<16x768xbf16>
    %c544_104 = arith.constant 544 : index
    %c0_105 = arith.constant 0 : index
    %206 = vector.load %arg11[%c544_104, %c0_105] : memref<784x768xbf16, #tpu.memory_space<vmem>>, vector<16x768xbf16>
    tpu.vector_store %arg11[%c544_104, %c0_105], %205 {strides = array<i32>} : memref<784x768xbf16, #tpu.memory_space<vmem>>, vector<16x768xbf16>,
    %207 = vector.extract_strided_slice %1 {offsets = [0, 29], sizes = [16, 739], strides = [1, 1]} : vector<16x768xbf16> to vector<16x739xbf16>
    %208 = vector.extract_strided_slice %1 {offsets = [0, 0], sizes = [16, 29], strides = [1, 1]} : vector<16x768xbf16> to vector<16x29xbf16>
    %209 = tpu.concatenate %207, %208 in 1 : vector<16x739xbf16>, vector<16x29xbf16> -> vector<16x768xbf16>
    %c560 = arith.constant 560 : index
    %c0_106 = arith.constant 0 : index
    %210 = vector.load %arg2[%c560, %c0_106] : memref<784x768xbf16, #tpu.memory_space<vmem>>, vector<16x768xbf16>
    %211 = arith.mulf %209, %210 : vector<16x768xbf16>
    %c560_107 = arith.constant 560 : index
    %c0_108 = arith.constant 0 : index
    %212 = vector.load %arg11[%c560_107, %c0_108] : memref<784x768xbf16, #tpu.memory_space<vmem>>, vector<16x768xbf16>
    tpu.vector_store %arg11[%c560_107, %c0_108], %211 {strides = array<i32>} : memref<784x768xbf16, #tpu.memory_space<vmem>>, vector<16x768xbf16>,
    %213 = vector.extract_strided_slice %1 {offsets = [0, 30], sizes = [16, 738], strides = [1, 1]} : vector<16x768xbf16> to vector<16x738xbf16>
    %214 = vector.extract_strided_slice %1 {offsets = [0, 0], sizes = [16, 30], strides = [1, 1]} : vector<16x768xbf16> to vector<16x30xbf16>
    %215 = tpu.concatenate %213, %214 in 1 : vector<16x738xbf16>, vector<16x30xbf16> -> vector<16x768xbf16>
    %c576 = arith.constant 576 : index
    %c0_109 = arith.constant 0 : index
    %216 = vector.load %arg2[%c576, %c0_109] : memref<784x768xbf16, #tpu.memory_space<vmem>>, vector<16x768xbf16>
    %217 = arith.mulf %215, %216 : vector<16x768xbf16>
    %c576_110 = arith.constant 576 : index
    %c0_111 = arith.constant 0 : index
    %218 = vector.load %arg11[%c576_110, %c0_111] : memref<784x768xbf16, #tpu.memory_space<vmem>>, vector<16x768xbf16>
    tpu.vector_store %arg11[%c576_110, %c0_111], %217 {strides = array<i32>} : memref<784x768xbf16, #tpu.memory_space<vmem>>, vector<16x768xbf16>,
    %219 = vector.extract_strided_slice %1 {offsets = [0, 31], sizes = [16, 737], strides = [1, 1]} : vector<16x768xbf16> to vector<16x737xbf16>
    %220 = vector.extract_strided_slice %1 {offsets = [0, 0], sizes = [16, 31], strides = [1, 1]} : vector<16x768xbf16> to vector<16x31xbf16>
    %221 = tpu.concatenate %219, %220 in 1 : vector<16x737xbf16>, vector<16x31xbf16> -> vector<16x768xbf16>
    %c592 = arith.constant 592 : index
    %c0_112 = arith.constant 0 : index
    %222 = vector.load %arg2[%c592, %c0_112] : memref<784x768xbf16, #tpu.memory_space<vmem>>, vector<16x768xbf16>
    %223 = arith.mulf %221, %222 : vector<16x768xbf16>
    %c592_113 = arith.constant 592 : index
    %c0_114 = arith.constant 0 : index
    %224 = vector.load %arg11[%c592_113, %c0_114] : memref<784x768xbf16, #tpu.memory_space<vmem>>, vector<16x768xbf16>
    tpu.vector_store %arg11[%c592_113, %c0_114], %223 {strides = array<i32>} : memref<784x768xbf16, #tpu.memory_space<vmem>>, vector<16x768xbf16>,
    %225 = vector.extract_strided_slice %1 {offsets = [0, 32], sizes = [16, 736], strides = [1, 1]} : vector<16x768xbf16> to vector<16x736xbf16>
    %226 = vector.extract_strided_slice %1 {offsets = [0, 0], sizes = [16, 32], strides = [1, 1]} : vector<16x768xbf16> to vector<16x32xbf16>
    %227 = tpu.concatenate %225, %226 in 1 : vector<16x736xbf16>, vector<16x32xbf16> -> vector<16x768xbf16>
    %c608 = arith.constant 608 : index
    %c0_115 = arith.constant 0 : index
    %228 = vector.load %arg2[%c608, %c0_115] : memref<784x768xbf16, #tpu.memory_space<vmem>>, vector<16x768xbf16>
    %229 = arith.mulf %227, %228 : vector<16x768xbf16>
    %c608_116 = arith.constant 608 : index
    %c0_117 = arith.constant 0 : index
    %230 = vector.load %arg11[%c608_116, %c0_117] : memref<784x768xbf16, #tpu.memory_space<vmem>>, vector<16x768xbf16>
    tpu.vector_store %arg11[%c608_116, %c0_117], %229 {strides = array<i32>} : memref<784x768xbf16, #tpu.memory_space<vmem>>, vector<16x768xbf16>,
    %231 = vector.extract_strided_slice %1 {offsets = [0, 33], sizes = [16, 735], strides = [1, 1]} : vector<16x768xbf16> to vector<16x735xbf16>
    %232 = vector.extract_strided_slice %1 {offsets = [0, 0], sizes = [16, 33], strides = [1, 1]} : vector<16x768xbf16> to vector<16x33xbf16>
    %233 = tpu.concatenate %231, %232 in 1 : vector<16x735xbf16>, vector<16x33xbf16> -> vector<16x768xbf16>
    %c624 = arith.constant 624 : index
    %c0_118 = arith.constant 0 : index
    %234 = vector.load %arg2[%c624, %c0_118] : memref<784x768xbf16, #tpu.memory_space<vmem>>, vector<16x768xbf16>
    %235 = arith.mulf %233, %234 : vector<16x768xbf16>
    %c624_119 = arith.constant 624 : index
    %c0_120 = arith.constant 0 : index
    %236 = vector.load %arg11[%c624_119, %c0_120] : memref<784x768xbf16, #tpu.memory_space<vmem>>, vector<16x768xbf16>
    tpu.vector_store %arg11[%c624_119, %c0_120], %235 {strides = array<i32>} : memref<784x768xbf16, #tpu.memory_space<vmem>>, vector<16x768xbf16>,
    %237 = vector.extract_strided_slice %1 {offsets = [0, 34], sizes = [16, 734], strides = [1, 1]} : vector<16x768xbf16> to vector<16x734xbf16>
    %238 = vector.extract_strided_slice %1 {offsets = [0, 0], sizes = [16, 34], strides = [1, 1]} : vector<16x768xbf16> to vector<16x34xbf16>
    %239 = tpu.concatenate %237, %238 in 1 : vector<16x734xbf16>, vector<16x34xbf16> -> vector<16x768xbf16>
    %c640 = arith.constant 640 : index
    %c0_121 = arith.constant 0 : index
    %240 = vector.load %arg2[%c640, %c0_121] : memref<784x768xbf16, #tpu.memory_space<vmem>>, vector<16x768xbf16>
    %241 = arith.mulf %239, %240 : vector<16x768xbf16>
    %c640_122 = arith.constant 640 : index
    %c0_123 = arith.constant 0 : index
    %242 = vector.load %arg11[%c640_122, %c0_123] : memref<784x768xbf16, #tpu.memory_space<vmem>>, vector<16x768xbf16>
    tpu.vector_store %arg11[%c640_122, %c0_123], %241 {strides = array<i32>} : memref<784x768xbf16, #tpu.memory_space<vmem>>, vector<16x768xbf16>,
    %243 = vector.extract_strided_slice %1 {offsets = [0, 35], sizes = [16, 733], strides = [1, 1]} : vector<16x768xbf16> to vector<16x733xbf16>
    %244 = vector.extract_strided_slice %1 {offsets = [0, 0], sizes = [16, 35], strides = [1, 1]} : vector<16x768xbf16> to vector<16x35xbf16>
    %245 = tpu.concatenate %243, %244 in 1 : vector<16x733xbf16>, vector<16x35xbf16> -> vector<16x768xbf16>
    %c656 = arith.constant 656 : index
    %c0_124 = arith.constant 0 : index
    %246 = vector.load %arg2[%c656, %c0_124] : memref<784x768xbf16, #tpu.memory_space<vmem>>, vector<16x768xbf16>
    %247 = arith.mulf %245, %246 : vector<16x768xbf16>
    %c656_125 = arith.constant 656 : index
    %c0_126 = arith.constant 0 : index
    %248 = vector.load %arg11[%c656_125, %c0_126] : memref<784x768xbf16, #tpu.memory_space<vmem>>, vector<16x768xbf16>
    tpu.vector_store %arg11[%c656_125, %c0_126], %247 {strides = array<i32>} : memref<784x768xbf16, #tpu.memory_space<vmem>>, vector<16x768xbf16>,
    %249 = vector.extract_strided_slice %1 {offsets = [0, 45], sizes = [16, 723], strides = [1, 1]} : vector<16x768xbf16> to vector<16x723xbf16>
    %250 = vector.extract_strided_slice %1 {offsets = [0, 0], sizes = [16, 45], strides = [1, 1]} : vector<16x768xbf16> to vector<16x45xbf16>
    %251 = tpu.concatenate %249, %250 in 1 : vector<16x723xbf16>, vector<16x45xbf16> -> vector<16x768xbf16>
    %c672 = arith.constant 672 : index
    %c0_127 = arith.constant 0 : index
    %252 = vector.load %arg2[%c672, %c0_127] : memref<784x768xbf16, #tpu.memory_space<vmem>>, vector<16x768xbf16>
    %253 = arith.mulf %251, %252 : vector<16x768xbf16>
    %c672_128 = arith.constant 672 : index
    %c0_129 = arith.constant 0 : index
    %254 = vector.load %arg11[%c672_128, %c0_129] : memref<784x768xbf16, #tpu.memory_space<vmem>>, vector<16x768xbf16>
    tpu.vector_store %arg11[%c672_128, %c0_129], %253 {strides = array<i32>} : memref<784x768xbf16, #tpu.memory_space<vmem>>, vector<16x768xbf16>,
    %255 = vector.extract_strided_slice %1 {offsets = [0, 46], sizes = [16, 722], strides = [1, 1]} : vector<16x768xbf16> to vector<16x722xbf16>
    %256 = vector.extract_strided_slice %1 {offsets = [0, 0], sizes = [16, 46], strides = [1, 1]} : vector<16x768xbf16> to vector<16x46xbf16>
    %257 = tpu.concatenate %255, %256 in 1 : vector<16x722xbf16>, vector<16x46xbf16> -> vector<16x768xbf16>
    %c688 = arith.constant 688 : index
    %c0_130 = arith.constant 0 : index
    %258 = vector.load %arg2[%c688, %c0_130] : memref<784x768xbf16, #tpu.memory_space<vmem>>, vector<16x768xbf16>
    %259 = arith.mulf %257, %258 : vector<16x768xbf16>
    %c688_131 = arith.constant 688 : index
    %c0_132 = arith.constant 0 : index
    %260 = vector.load %arg11[%c688_131, %c0_132] : memref<784x768xbf16, #tpu.memory_space<vmem>>, vector<16x768xbf16>
    tpu.vector_store %arg11[%c688_131, %c0_132], %259 {strides = array<i32>} : memref<784x768xbf16, #tpu.memory_space<vmem>>, vector<16x768xbf16>,
    %261 = vector.extract_strided_slice %1 {offsets = [0, 47], sizes = [16, 721], strides = [1, 1]} : vector<16x768xbf16> to vector<16x721xbf16>
    %262 = vector.extract_strided_slice %1 {offsets = [0, 0], sizes = [16, 47], strides = [1, 1]} : vector<16x768xbf16> to vector<16x47xbf16>
    %263 = tpu.concatenate %261, %262 in 1 : vector<16x721xbf16>, vector<16x47xbf16> -> vector<16x768xbf16>
    %c704 = arith.constant 704 : index
    %c0_133 = arith.constant 0 : index
    %264 = vector.load %arg2[%c704, %c0_133] : memref<784x768xbf16, #tpu.memory_space<vmem>>, vector<16x768xbf16>
    %265 = arith.mulf %263, %264 : vector<16x768xbf16>
    %c704_134 = arith.constant 704 : index
    %c0_135 = arith.constant 0 : index
    %266 = vector.load %arg11[%c704_134, %c0_135] : memref<784x768xbf16, #tpu.memory_space<vmem>>, vector<16x768xbf16>
    tpu.vector_store %arg11[%c704_134, %c0_135], %265 {strides = array<i32>} : memref<784x768xbf16, #tpu.memory_space<vmem>>, vector<16x768xbf16>,
    %267 = vector.extract_strided_slice %1 {offsets = [0, 48], sizes = [16, 720], strides = [1, 1]} : vector<16x768xbf16> to vector<16x720xbf16>
    %268 = vector.extract_strided_slice %1 {offsets = [0, 0], sizes = [16, 48], strides = [1, 1]} : vector<16x768xbf16> to vector<16x48xbf16>
    %269 = tpu.concatenate %267, %268 in 1 : vector<16x720xbf16>, vector<16x48xbf16> -> vector<16x768xbf16>
    %c720 = arith.constant 720 : index
    %c0_136 = arith.constant 0 : index
    %270 = vector.load %arg2[%c720, %c0_136] : memref<784x768xbf16, #tpu.memory_space<vmem>>, vector<16x768xbf16>
    %271 = arith.mulf %269, %270 : vector<16x768xbf16>
    %c720_137 = arith.constant 720 : index
    %c0_138 = arith.constant 0 : index
    %272 = vector.load %arg11[%c720_137, %c0_138] : memref<784x768xbf16, #tpu.memory_space<vmem>>, vector<16x768xbf16>
    tpu.vector_store %arg11[%c720_137, %c0_138], %271 {strides = array<i32>} : memref<784x768xbf16, #tpu.memory_space<vmem>>, vector<16x768xbf16>,
    %273 = vector.extract_strided_slice %1 {offsets = [0, 49], sizes = [16, 719], strides = [1, 1]} : vector<16x768xbf16> to vector<16x719xbf16>
    %274 = vector.extract_strided_slice %1 {offsets = [0, 0], sizes = [16, 49], strides = [1, 1]} : vector<16x768xbf16> to vector<16x49xbf16>
    %275 = tpu.concatenate %273, %274 in 1 : vector<16x719xbf16>, vector<16x49xbf16> -> vector<16x768xbf16>
    %c736 = arith.constant 736 : index
    %c0_139 = arith.constant 0 : index
    %276 = vector.load %arg2[%c736, %c0_139] : memref<784x768xbf16, #tpu.memory_space<vmem>>, vector<16x768xbf16>
    %277 = arith.mulf %275, %276 : vector<16x768xbf16>
    %c736_140 = arith.constant 736 : index
    %c0_141 = arith.constant 0 : index
    %278 = vector.load %arg11[%c736_140, %c0_141] : memref<784x768xbf16, #tpu.memory_space<vmem>>, vector<16x768xbf16>
    tpu.vector_store %arg11[%c736_140, %c0_141], %277 {strides = array<i32>} : memref<784x768xbf16, #tpu.memory_space<vmem>>, vector<16x768xbf16>,
    %279 = vector.extract_strided_slice %1 {offsets = [0, 50], sizes = [16, 718], strides = [1, 1]} : vector<16x768xbf16> to vector<16x718xbf16>
    %280 = vector.extract_strided_slice %1 {offsets = [0, 0], sizes = [16, 50], strides = [1, 1]} : vector<16x768xbf16> to vector<16x50xbf16>
    %281 = tpu.concatenate %279, %280 in 1 : vector<16x718xbf16>, vector<16x50xbf16> -> vector<16x768xbf16>
    %c752 = arith.constant 752 : index
    %c0_142 = arith.constant 0 : index
    %282 = vector.load %arg2[%c752, %c0_142] : memref<784x768xbf16, #tpu.memory_space<vmem>>, vector<16x768xbf16>
    %283 = arith.mulf %281, %282 : vector<16x768xbf16>
    %c752_143 = arith.constant 752 : index
    %c0_144 = arith.constant 0 : index
    %284 = vector.load %arg11[%c752_143, %c0_144] : memref<784x768xbf16, #tpu.memory_space<vmem>>, vector<16x768xbf16>
    tpu.vector_store %arg11[%c752_143, %c0_144], %283 {strides = array<i32>} : memref<784x768xbf16, #tpu.memory_space<vmem>>, vector<16x768xbf16>,
    %285 = vector.extract_strided_slice %1 {offsets = [0, 51], sizes = [16, 717], strides = [1, 1]} : vector<16x768xbf16> to vector<16x717xbf16>
    %286 = vector.extract_strided_slice %1 {offsets = [0, 0], sizes = [16, 51], strides = [1, 1]} : vector<16x768xbf16> to vector<16x51xbf16>
    %287 = tpu.concatenate %285, %286 in 1 : vector<16x717xbf16>, vector<16x51xbf16> -> vector<16x768xbf16>
    %c768 = arith.constant 768 : index
    %c0_145 = arith.constant 0 : index
    %288 = vector.load %arg2[%c768, %c0_145] : memref<784x768xbf16, #tpu.memory_space<vmem>>, vector<16x768xbf16>
    %289 = arith.mulf %287, %288 : vector<16x768xbf16>
    %c768_146 = arith.constant 768 : index
    %c0_147 = arith.constant 0 : index
    %290 = vector.load %arg11[%c768_146, %c0_147] : memref<784x768xbf16, #tpu.memory_space<vmem>>, vector<16x768xbf16>
    tpu.vector_store %arg11[%c768_146, %c0_147], %289 {strides = array<i32>} : memref<784x768xbf16, #tpu.memory_space<vmem>>, vector<16x768xbf16>,
    %c0_148 = arith.constant 0 : index
    %c0_149 = arith.constant 0 : index
    %291 = vector.load %arg3[%c0_148, %c0_149] : memref<16x784xbf16, #tpu.memory_space<vmem>>, vector<16x784xbf16>
    %c0_150 = arith.constant 0 : index
    %c0_151 = arith.constant 0 : index
    %292 = vector.load %arg11[%c0_150, %c0_151] : memref<784x768xbf16, #tpu.memory_space<vmem>>, vector<784x768xbf16>
    %cst = arith.constant dense<0.000000e+00> : vector<16x768xf32>
    %293 = tpu.matmul %291, %292, %cst {dimension_numbers = #tpu.dot_dimension_numbers<[1], [0], [0], [1], [0, 0, 1, 1], [], []>} : vector<16x784xbf16>, vector<784x768xbf16>, vector<16x768xf32> -> vector<16x768xf32>
    %c0_152 = arith.constant 0 : index
    %c0_153 = arith.constant 0 : index
    %294 = vector.load %arg6[%c0_152, %c0_153] : memref<16x1xf32, #tpu.memory_space<vmem>>, vector<16x1xf32>
    %295 = vector.extract_strided_slice %293 {offsets = [0, 0], sizes = [16, 256], strides = [1, 1]} : vector<16x768xf32> to vector<16x256xf32>
    %296 = vector.broadcast %294 : vector<16x1xf32> to vector<16x256xf32>
    %297 = arith.addf %295, %296 : vector<16x256xf32>
    %298 = vector.extract_strided_slice %293 {offsets = [0, 256], sizes = [16, 256], strides = [1, 1]} : vector<16x768xf32> to vector<16x256xf32>
    %299 = vector.broadcast %294 : vector<16x1xf32> to vector<16x256xf32>
    %300 = arith.addf %298, %299 : vector<16x256xf32>
    %301 = vector.extract_strided_slice %293 {offsets = [0, 512], sizes = [16, 256], strides = [1, 1]} : vector<16x768xf32> to vector<16x256xf32>
    %302 = vector.broadcast %294 : vector<16x1xf32> to vector<16x256xf32>
    %303 = arith.addf %301, %302 : vector<16x256xf32>
    %304 = arith.addf %297, %300 : vector<16x256xf32>
    %305 = arith.addf %304, %303 : vector<16x256xf32>
    %cst_154 = arith.constant 0.000000e+00 : f32
    %306 = vector.broadcast %cst_154 : f32 to vector<16x256xf32>
    %307 = arith.maximumf %305, %306 : vector<16x256xf32>
    %308 = arith.truncf %307 : vector<16x256xf32> to vector<16x256xbf16>
    %309 = vector.extract_strided_slice %308 {offsets = [0, 205], sizes = [16, 51], strides = [1, 1]} : vector<16x256xbf16> to vector<16x51xbf16>
    %310 = vector.extract_strided_slice %308 {offsets = [0, 0], sizes = [16, 205], strides = [1, 1]} : vector<16x256xbf16> to vector<16x205xbf16>
    %311 = tpu.concatenate %309, %310 in 1 : vector<16x51xbf16>, vector<16x205xbf16> -> vector<16x256xbf16>
    %c0_155 = arith.constant 0 : index
    %c0_156 = arith.constant 0 : index
    %312 = vector.load %arg2[%c0_155, %c0_156] : memref<784x768xbf16, #tpu.memory_space<vmem>>, vector<16x256xbf16>
    %313 = arith.mulf %311, %312 : vector<16x256xbf16>
    %c0_157 = arith.constant 0 : index
    %c0_158 = arith.constant 0 : index
    %314 = vector.load %arg11[%c0_157, %c0_158] : memref<784x768xbf16, #tpu.memory_space<vmem>>, vector<16x256xbf16>
    tpu.vector_store %arg11[%c0_157, %c0_158], %313 {strides = array<i32>} : memref<784x768xbf16, #tpu.memory_space<vmem>>, vector<16x256xbf16>,
    %315 = vector.extract_strided_slice %308 {offsets = [0, 206], sizes = [16, 50], strides = [1, 1]} : vector<16x256xbf16> to vector<16x50xbf16>
    %316 = vector.extract_strided_slice %308 {offsets = [0, 0], sizes = [16, 206], strides = [1, 1]} : vector<16x256xbf16> to vector<16x206xbf16>
    %317 = tpu.concatenate %315, %316 in 1 : vector<16x50xbf16>, vector<16x206xbf16> -> vector<16x256xbf16>
    %c16_159 = arith.constant 16 : index
    %c0_160 = arith.constant 0 : index
    %318 = vector.load %arg2[%c16_159, %c0_160] : memref<784x768xbf16, #tpu.memory_space<vmem>>, vector<16x256xbf16>
    %319 = arith.mulf %317, %318 : vector<16x256xbf16>
    %c16_161 = arith.constant 16 : index
    %c0_162 = arith.constant 0 : index
    %320 = vector.load %arg11[%c16_161, %c0_162] : memref<784x768xbf16, #tpu.memory_space<vmem>>, vector<16x256xbf16>
    tpu.vector_store %arg11[%c16_161, %c0_162], %319 {strides = array<i32>} : memref<784x768xbf16, #tpu.memory_space<vmem>>, vector<16x256xbf16>,
    %321 = vector.extract_strided_slice %308 {offsets = [0, 207], sizes = [16, 49], strides = [1, 1]} : vector<16x256xbf16> to vector<16x49xbf16>
    %322 = vector.extract_strided_slice %308 {offsets = [0, 0], sizes = [16, 207], strides = [1, 1]} : vector<16x256xbf16> to vector<16x207xbf16>
    %323 = tpu.concatenate %321, %322 in 1 : vector<16x49xbf16>, vector<16x207xbf16> -> vector<16x256xbf16>
    %c32_163 = arith.constant 32 : index
    %c0_164 = arith.constant 0 : index
    %324 = vector.load %arg2[%c32_163, %c0_164] : memref<784x768xbf16, #tpu.memory_space<vmem>>, vector<16x256xbf16>
    %325 = arith.mulf %323, %324 : vector<16x256xbf16>
    %c32_165 = arith.constant 32 : index
    %c0_166 = arith.constant 0 : index
    %326 = vector.load %arg11[%c32_165, %c0_166] : memref<784x768xbf16, #tpu.memory_space<vmem>>, vector<16x256xbf16>
    tpu.vector_store %arg11[%c32_165, %c0_166], %325 {strides = array<i32>} : memref<784x768xbf16, #tpu.memory_space<vmem>>, vector<16x256xbf16>,
    %327 = vector.extract_strided_slice %308 {offsets = [0, 208], sizes = [16, 48], strides = [1, 1]} : vector<16x256xbf16> to vector<16x48xbf16>
    %328 = vector.extract_strided_slice %308 {offsets = [0, 0], sizes = [16, 208], strides = [1, 1]} : vector<16x256xbf16> to vector<16x208xbf16>
    %329 = tpu.concatenate %327, %328 in 1 : vector<16x48xbf16>, vector<16x208xbf16> -> vector<16x256xbf16>
    %c48_167 = arith.constant 48 : index
    %c0_168 = arith.constant 0 : index
    %330 = vector.load %arg2[%c48_167, %c0_168] : memref<784x768xbf16, #tpu.memory_space<vmem>>, vector<16x256xbf16>
    %331 = arith.mulf %329, %330 : vector<16x256xbf16>
    %c48_169 = arith.constant 48 : index
    %c0_170 = arith.constant 0 : index
    %332 = vector.load %arg11[%c48_169, %c0_170] : memref<784x768xbf16, #tpu.memory_space<vmem>>, vector<16x256xbf16>
    tpu.vector_store %arg11[%c48_169, %c0_170], %331 {strides = array<i32>} : memref<784x768xbf16, #tpu.memory_space<vmem>>, vector<16x256xbf16>,
    %333 = vector.extract_strided_slice %308 {offsets = [0, 209], sizes = [16, 47], strides = [1, 1]} : vector<16x256xbf16> to vector<16x47xbf16>
    %334 = vector.extract_strided_slice %308 {offsets = [0, 0], sizes = [16, 209], strides = [1, 1]} : vector<16x256xbf16> to vector<16x209xbf16>
    %335 = tpu.concatenate %333, %334 in 1 : vector<16x47xbf16>, vector<16x209xbf16> -> vector<16x256xbf16>
    %c64_171 = arith.constant 64 : index
    %c0_172 = arith.constant 0 : index
    %336 = vector.load %arg2[%c64_171, %c0_172] : memref<784x768xbf16, #tpu.memory_space<vmem>>, vector<16x256xbf16>
    %337 = arith.mulf %335, %336 : vector<16x256xbf16>
    %c64_173 = arith.constant 64 : index
    %c0_174 = arith.constant 0 : index
    %338 = vector.load %arg11[%c64_173, %c0_174] : memref<784x768xbf16, #tpu.memory_space<vmem>>, vector<16x256xbf16>
    tpu.vector_store %arg11[%c64_173, %c0_174], %337 {strides = array<i32>} : memref<784x768xbf16, #tpu.memory_space<vmem>>, vector<16x256xbf16>,
    %339 = vector.extract_strided_slice %308 {offsets = [0, 210], sizes = [16, 46], strides = [1, 1]} : vector<16x256xbf16> to vector<16x46xbf16>
    %340 = vector.extract_strided_slice %308 {offsets = [0, 0], sizes = [16, 210], strides = [1, 1]} : vector<16x256xbf16> to vector<16x210xbf16>
    %341 = tpu.concatenate %339, %340 in 1 : vector<16x46xbf16>, vector<16x210xbf16> -> vector<16x256xbf16>
    %c80_175 = arith.constant 80 : index
    %c0_176 = arith.constant 0 : index
    %342 = vector.load %arg2[%c80_175, %c0_176] : memref<784x768xbf16, #tpu.memory_space<vmem>>, vector<16x256xbf16>
    %343 = arith.mulf %341, %342 : vector<16x256xbf16>
    %c80_177 = arith.constant 80 : index
    %c0_178 = arith.constant 0 : index
    %344 = vector.load %arg11[%c80_177, %c0_178] : memref<784x768xbf16, #tpu.memory_space<vmem>>, vector<16x256xbf16>
    tpu.vector_store %arg11[%c80_177, %c0_178], %343 {strides = array<i32>} : memref<784x768xbf16, #tpu.memory_space<vmem>>, vector<16x256xbf16>,
    %345 = vector.extract_strided_slice %308 {offsets = [0, 211], sizes = [16, 45], strides = [1, 1]} : vector<16x256xbf16> to vector<16x45xbf16>
    %346 = vector.extract_strided_slice %308 {offsets = [0, 0], sizes = [16, 211], strides = [1, 1]} : vector<16x256xbf16> to vector<16x211xbf16>
    %347 = tpu.concatenate %345, %346 in 1 : vector<16x45xbf16>, vector<16x211xbf16> -> vector<16x256xbf16>
    %c96_179 = arith.constant 96 : index
    %c0_180 = arith.constant 0 : index
    %348 = vector.load %arg2[%c96_179, %c0_180] : memref<784x768xbf16, #tpu.memory_space<vmem>>, vector<16x256xbf16>
    %349 = arith.mulf %347, %348 : vector<16x256xbf16>
    %c96_181 = arith.constant 96 : index
    %c0_182 = arith.constant 0 : index
    %350 = vector.load %arg11[%c96_181, %c0_182] : memref<784x768xbf16, #tpu.memory_space<vmem>>, vector<16x256xbf16>
    tpu.vector_store %arg11[%c96_181, %c0_182], %349 {strides = array<i32>} : memref<784x768xbf16, #tpu.memory_space<vmem>>, vector<16x256xbf16>,
    %351 = vector.extract_strided_slice %308 {offsets = [0, 221], sizes = [16, 35], strides = [1, 1]} : vector<16x256xbf16> to vector<16x35xbf16>
    %352 = vector.extract_strided_slice %308 {offsets = [0, 0], sizes = [16, 221], strides = [1, 1]} : vector<16x256xbf16> to vector<16x221xbf16>
    %353 = tpu.concatenate %351, %352 in 1 : vector<16x35xbf16>, vector<16x221xbf16> -> vector<16x256xbf16>
    %c112_183 = arith.constant 112 : index
    %c0_184 = arith.constant 0 : index
    %354 = vector.load %arg2[%c112_183, %c0_184] : memref<784x768xbf16, #tpu.memory_space<vmem>>, vector<16x256xbf16>
    %355 = arith.mulf %353, %354 : vector<16x256xbf16>
    %c112_185 = arith.constant 112 : index
    %c0_186 = arith.constant 0 : index
    %356 = vector.load %arg11[%c112_185, %c0_186] : memref<784x768xbf16, #tpu.memory_space<vmem>>, vector<16x256xbf16>
    tpu.vector_store %arg11[%c112_185, %c0_186], %355 {strides = array<i32>} : memref<784x768xbf16, #tpu.memory_space<vmem>>, vector<16x256xbf16>,
    %357 = vector.extract_strided_slice %308 {offsets = [0, 222], sizes = [16, 34], strides = [1, 1]} : vector<16x256xbf16> to vector<16x34xbf16>
    %358 = vector.extract_strided_slice %308 {offsets = [0, 0], sizes = [16, 222], strides = [1, 1]} : vector<16x256xbf16> to vector<16x222xbf16>
    %359 = tpu.concatenate %357, %358 in 1 : vector<16x34xbf16>, vector<16x222xbf16> -> vector<16x256xbf16>
    %c128_187 = arith.constant 128 : index
    %c0_188 = arith.constant 0 : index
    %360 = vector.load %arg2[%c128_187, %c0_188] : memref<784x768xbf16, #tpu.memory_space<vmem>>, vector<16x256xbf16>
    %361 = arith.mulf %359, %360 : vector<16x256xbf16>
    %c128_189 = arith.constant 128 : index
    %c0_190 = arith.constant 0 : index
    %362 = vector.load %arg11[%c128_189, %c0_190] : memref<784x768xbf16, #tpu.memory_space<vmem>>, vector<16x256xbf16>
    tpu.vector_store %arg11[%c128_189, %c0_190], %361 {strides = array<i32>} : memref<784x768xbf16, #tpu.memory_space<vmem>>, vector<16x256xbf16>,
    %363 = vector.extract_strided_slice %308 {offsets = [0, 223], sizes = [16, 33], strides = [1, 1]} : vector<16x256xbf16> to vector<16x33xbf16>
    %364 = vector.extract_strided_slice %308 {offsets = [0, 0], sizes = [16, 223], strides = [1, 1]} : vector<16x256xbf16> to vector<16x223xbf16>
    %365 = tpu.concatenate %363, %364 in 1 : vector<16x33xbf16>, vector<16x223xbf16> -> vector<16x256xbf16>
    %c144_191 = arith.constant 144 : index
    %c0_192 = arith.constant 0 : index
    %366 = vector.load %arg2[%c144_191, %c0_192] : memref<784x768xbf16, #tpu.memory_space<vmem>>, vector<16x256xbf16>
    %367 = arith.mulf %365, %366 : vector<16x256xbf16>
    %c144_193 = arith.constant 144 : index
    %c0_194 = arith.constant 0 : index
    %368 = vector.load %arg11[%c144_193, %c0_194] : memref<784x768xbf16, #tpu.memory_space<vmem>>, vector<16x256xbf16>
    tpu.vector_store %arg11[%c144_193, %c0_194], %367 {strides = array<i32>} : memref<784x768xbf16, #tpu.memory_space<vmem>>, vector<16x256xbf16>,
    %369 = vector.extract_strided_slice %308 {offsets = [0, 224], sizes = [16, 32], strides = [1, 1]} : vector<16x256xbf16> to vector<16x32xbf16>
    %370 = vector.extract_strided_slice %308 {offsets = [0, 0], sizes = [16, 224], strides = [1, 1]} : vector<16x256xbf16> to vector<16x224xbf16>
    %371 = tpu.concatenate %369, %370 in 1 : vector<16x32xbf16>, vector<16x224xbf16> -> vector<16x256xbf16>
    %c160_195 = arith.constant 160 : index
    %c0_196 = arith.constant 0 : index
    %372 = vector.load %arg2[%c160_195, %c0_196] : memref<784x768xbf16, #tpu.memory_space<vmem>>, vector<16x256xbf16>
    %373 = arith.mulf %371, %372 : vector<16x256xbf16>
    %c160_197 = arith.constant 160 : index
    %c0_198 = arith.constant 0 : index
    %374 = vector.load %arg11[%c160_197, %c0_198] : memref<784x768xbf16, #tpu.memory_space<vmem>>, vector<16x256xbf16>
    tpu.vector_store %arg11[%c160_197, %c0_198], %373 {strides = array<i32>} : memref<784x768xbf16, #tpu.memory_space<vmem>>, vector<16x256xbf16>,
    %375 = vector.extract_strided_slice %308 {offsets = [0, 225], sizes = [16, 31], strides = [1, 1]} : vector<16x256xbf16> to vector<16x31xbf16>
    %376 = vector.extract_strided_slice %308 {offsets = [0, 0], sizes = [16, 225], strides = [1, 1]} : vector<16x256xbf16> to vector<16x225xbf16>
    %377 = tpu.concatenate %375, %376 in 1 : vector<16x31xbf16>, vector<16x225xbf16> -> vector<16x256xbf16>
    %c176_199 = arith.constant 176 : index
    %c0_200 = arith.constant 0 : index
    %378 = vector.load %arg2[%c176_199, %c0_200] : memref<784x768xbf16, #tpu.memory_space<vmem>>, vector<16x256xbf16>
    %379 = arith.mulf %377, %378 : vector<16x256xbf16>
    %c176_201 = arith.constant 176 : index
    %c0_202 = arith.constant 0 : index
    %380 = vector.load %arg11[%c176_201, %c0_202] : memref<784x768xbf16, #tpu.memory_space<vmem>>, vector<16x256xbf16>
    tpu.vector_store %arg11[%c176_201, %c0_202], %379 {strides = array<i32>} : memref<784x768xbf16, #tpu.memory_space<vmem>>, vector<16x256xbf16>,
    %381 = vector.extract_strided_slice %308 {offsets = [0, 226], sizes = [16, 30], strides = [1, 1]} : vector<16x256xbf16> to vector<16x30xbf16>
    %382 = vector.extract_strided_slice %308 {offsets = [0, 0], sizes = [16, 226], strides = [1, 1]} : vector<16x256xbf16> to vector<16x226xbf16>
    %383 = tpu.concatenate %381, %382 in 1 : vector<16x30xbf16>, vector<16x226xbf16> -> vector<16x256xbf16>
    %c192_203 = arith.constant 192 : index
    %c0_204 = arith.constant 0 : index
    %384 = vector.load %arg2[%c192_203, %c0_204] : memref<784x768xbf16, #tpu.memory_space<vmem>>, vector<16x256xbf16>
    %385 = arith.mulf %383, %384 : vector<16x256xbf16>
    %c192_205 = arith.constant 192 : index
    %c0_206 = arith.constant 0 : index
    %386 = vector.load %arg11[%c192_205, %c0_206] : memref<784x768xbf16, #tpu.memory_space<vmem>>, vector<16x256xbf16>
    tpu.vector_store %arg11[%c192_205, %c0_206], %385 {strides = array<i32>} : memref<784x768xbf16, #tpu.memory_space<vmem>>, vector<16x256xbf16>,
    %387 = vector.extract_strided_slice %308 {offsets = [0, 227], sizes = [16, 29], strides = [1, 1]} : vector<16x256xbf16> to vector<16x29xbf16>
    %388 = vector.extract_strided_slice %308 {offsets = [0, 0], sizes = [16, 227], strides = [1, 1]} : vector<16x256xbf16> to vector<16x227xbf16>
    %389 = tpu.concatenate %387, %388 in 1 : vector<16x29xbf16>, vector<16x227xbf16> -> vector<16x256xbf16>
    %c208_207 = arith.constant 208 : index
    %c0_208 = arith.constant 0 : index
    %390 = vector.load %arg2[%c208_207, %c0_208] : memref<784x768xbf16, #tpu.memory_space<vmem>>, vector<16x256xbf16>
    %391 = arith.mulf %389, %390 : vector<16x256xbf16>
    %c208_209 = arith.constant 208 : index
    %c0_210 = arith.constant 0 : index
    %392 = vector.load %arg11[%c208_209, %c0_210] : memref<784x768xbf16, #tpu.memory_space<vmem>>, vector<16x256xbf16>
    tpu.vector_store %arg11[%c208_209, %c0_210], %391 {strides = array<i32>} : memref<784x768xbf16, #tpu.memory_space<vmem>>, vector<16x256xbf16>,
    %393 = vector.extract_strided_slice %308 {offsets = [0, 237], sizes = [16, 19], strides = [1, 1]} : vector<16x256xbf16> to vector<16x19xbf16>
    %394 = vector.extract_strided_slice %308 {offsets = [0, 0], sizes = [16, 237], strides = [1, 1]} : vector<16x256xbf16> to vector<16x237xbf16>
    %395 = tpu.concatenate %393, %394 in 1 : vector<16x19xbf16>, vector<16x237xbf16> -> vector<16x256xbf16>
    %c224_211 = arith.constant 224 : index
    %c0_212 = arith.constant 0 : index
    %396 = vector.load %arg2[%c224_211, %c0_212] : memref<784x768xbf16, #tpu.memory_space<vmem>>, vector<16x256xbf16>
    %397 = arith.mulf %395, %396 : vector<16x256xbf16>
    %c224_213 = arith.constant 224 : index
    %c0_214 = arith.constant 0 : index
    %398 = vector.load %arg11[%c224_213, %c0_214] : memref<784x768xbf16, #tpu.memory_space<vmem>>, vector<16x256xbf16>
    tpu.vector_store %arg11[%c224_213, %c0_214], %397 {strides = array<i32>} : memref<784x768xbf16, #tpu.memory_space<vmem>>, vector<16x256xbf16>,
    %399 = vector.extract_strided_slice %308 {offsets = [0, 238], sizes = [16, 18], strides = [1, 1]} : vector<16x256xbf16> to vector<16x18xbf16>
    %400 = vector.extract_strided_slice %308 {offsets = [0, 0], sizes = [16, 238], strides = [1, 1]} : vector<16x256xbf16> to vector<16x238xbf16>
    %401 = tpu.concatenate %399, %400 in 1 : vector<16x18xbf16>, vector<16x238xbf16> -> vector<16x256xbf16>
    %c240_215 = arith.constant 240 : index
    %c0_216 = arith.constant 0 : index
    %402 = vector.load %arg2[%c240_215, %c0_216] : memref<784x768xbf16, #tpu.memory_space<vmem>>, vector<16x256xbf16>
    %403 = arith.mulf %401, %402 : vector<16x256xbf16>
    %c240_217 = arith.constant 240 : index
    %c0_218 = arith.constant 0 : index
    %404 = vector.load %arg11[%c240_217, %c0_218] : memref<784x768xbf16, #tpu.memory_space<vmem>>, vector<16x256xbf16>
    tpu.vector_store %arg11[%c240_217, %c0_218], %403 {strides = array<i32>} : memref<784x768xbf16, #tpu.memory_space<vmem>>, vector<16x256xbf16>,
    %405 = vector.extract_strided_slice %308 {offsets = [0, 239], sizes = [16, 17], strides = [1, 1]} : vector<16x256xbf16> to vector<16x17xbf16>
    %406 = vector.extract_strided_slice %308 {offsets = [0, 0], sizes = [16, 239], strides = [1, 1]} : vector<16x256xbf16> to vector<16x239xbf16>
    %407 = tpu.concatenate %405, %406 in 1 : vector<16x17xbf16>, vector<16x239xbf16> -> vector<16x256xbf16>
    %c256_219 = arith.constant 256 : index
    %c0_220 = arith.constant 0 : index
    %408 = vector.load %arg2[%c256_219, %c0_220] : memref<784x768xbf16, #tpu.memory_space<vmem>>, vector<16x256xbf16>
    %409 = arith.mulf %407, %408 : vector<16x256xbf16>
    %c256_221 = arith.constant 256 : index
    %c0_222 = arith.constant 0 : index
    %410 = vector.load %arg11[%c256_221, %c0_222] : memref<784x768xbf16, #tpu.memory_space<vmem>>, vector<16x256xbf16>
    tpu.vector_store %arg11[%c256_221, %c0_222], %409 {strides = array<i32>} : memref<784x768xbf16, #tpu.memory_space<vmem>>, vector<16x256xbf16>,
    %411 = vector.extract_strided_slice %308 {offsets = [0, 240], sizes = [16, 16], strides = [1, 1]} : vector<16x256xbf16> to vector<16x16xbf16>
    %412 = vector.extract_strided_slice %308 {offsets = [0, 0], sizes = [16, 240], strides = [1, 1]} : vector<16x256xbf16> to vector<16x240xbf16>
    %413 = tpu.concatenate %411, %412 in 1 : vector<16x16xbf16>, vector<16x240xbf16> -> vector<16x256xbf16>
    %c272_223 = arith.constant 272 : index
    %c0_224 = arith.constant 0 : index
    %414 = vector.load %arg2[%c272_223, %c0_224] : memref<784x768xbf16, #tpu.memory_space<vmem>>, vector<16x256xbf16>
    %415 = arith.mulf %413, %414 : vector<16x256xbf16>
    %c272_225 = arith.constant 272 : index
    %c0_226 = arith.constant 0 : index
    %416 = vector.load %arg11[%c272_225, %c0_226] : memref<784x768xbf16, #tpu.memory_space<vmem>>, vector<16x256xbf16>
    tpu.vector_store %arg11[%c272_225, %c0_226], %415 {strides = array<i32>} : memref<784x768xbf16, #tpu.memory_space<vmem>>, vector<16x256xbf16>,
    %417 = vector.extract_strided_slice %308 {offsets = [0, 241], sizes = [16, 15], strides = [1, 1]} : vector<16x256xbf16> to vector<16x15xbf16>
    %418 = vector.extract_strided_slice %308 {offsets = [0, 0], sizes = [16, 241], strides = [1, 1]} : vector<16x256xbf16> to vector<16x241xbf16>
    %419 = tpu.concatenate %417, %418 in 1 : vector<16x15xbf16>, vector<16x241xbf16> -> vector<16x256xbf16>
    %c288_227 = arith.constant 288 : index
    %c0_228 = arith.constant 0 : index
    %420 = vector.load %arg2[%c288_227, %c0_228] : memref<784x768xbf16, #tpu.memory_space<vmem>>, vector<16x256xbf16>
    %421 = arith.mulf %419, %420 : vector<16x256xbf16>
    %c288_229 = arith.constant 288 : index
    %c0_230 = arith.constant 0 : index
    %422 = vector.load %arg11[%c288_229, %c0_230] : memref<784x768xbf16, #tpu.memory_space<vmem>>, vector<16x256xbf16>
    tpu.vector_store %arg11[%c288_229, %c0_230], %421 {strides = array<i32>} : memref<784x768xbf16, #tpu.memory_space<vmem>>, vector<16x256xbf16>,
    %423 = vector.extract_strided_slice %308 {offsets = [0, 242], sizes = [16, 14], strides = [1, 1]} : vector<16x256xbf16> to vector<16x14xbf16>
    %424 = vector.extract_strided_slice %308 {offsets = [0, 0], sizes = [16, 242], strides = [1, 1]} : vector<16x256xbf16> to vector<16x242xbf16>
    %425 = tpu.concatenate %423, %424 in 1 : vector<16x14xbf16>, vector<16x242xbf16> -> vector<16x256xbf16>
    %c304_231 = arith.constant 304 : index
    %c0_232 = arith.constant 0 : index
    %426 = vector.load %arg2[%c304_231, %c0_232] : memref<784x768xbf16, #tpu.memory_space<vmem>>, vector<16x256xbf16>
    %427 = arith.mulf %425, %426 : vector<16x256xbf16>
    %c304_233 = arith.constant 304 : index
    %c0_234 = arith.constant 0 : index
    %428 = vector.load %arg11[%c304_233, %c0_234] : memref<784x768xbf16, #tpu.memory_space<vmem>>, vector<16x256xbf16>
    tpu.vector_store %arg11[%c304_233, %c0_234], %427 {strides = array<i32>} : memref<784x768xbf16, #tpu.memory_space<vmem>>, vector<16x256xbf16>,
    %429 = vector.extract_strided_slice %308 {offsets = [0, 243], sizes = [16, 13], strides = [1, 1]} : vector<16x256xbf16> to vector<16x13xbf16>
    %430 = vector.extract_strided_slice %308 {offsets = [0, 0], sizes = [16, 243], strides = [1, 1]} : vector<16x256xbf16> to vector<16x243xbf16>
    %431 = tpu.concatenate %429, %430 in 1 : vector<16x13xbf16>, vector<16x243xbf16> -> vector<16x256xbf16>
    %c320_235 = arith.constant 320 : index
    %c0_236 = arith.constant 0 : index
    %432 = vector.load %arg2[%c320_235, %c0_236] : memref<784x768xbf16, #tpu.memory_space<vmem>>, vector<16x256xbf16>
    %433 = arith.mulf %431, %432 : vector<16x256xbf16>
    %c320_237 = arith.constant 320 : index
    %c0_238 = arith.constant 0 : index
    %434 = vector.load %arg11[%c320_237, %c0_238] : memref<784x768xbf16, #tpu.memory_space<vmem>>, vector<16x256xbf16>
    tpu.vector_store %arg11[%c320_237, %c0_238], %433 {strides = array<i32>} : memref<784x768xbf16, #tpu.memory_space<vmem>>, vector<16x256xbf16>,
    %435 = vector.extract_strided_slice %308 {offsets = [0, 253], sizes = [16, 3], strides = [1, 1]} : vector<16x256xbf16> to vector<16x3xbf16>
    %436 = vector.extract_strided_slice %308 {offsets = [0, 0], sizes = [16, 253], strides = [1, 1]} : vector<16x256xbf16> to vector<16x253xbf16>
    %437 = tpu.concatenate %435, %436 in 1 : vector<16x3xbf16>, vector<16x253xbf16> -> vector<16x256xbf16>
    %c336_239 = arith.constant 336 : index
    %c0_240 = arith.constant 0 : index
    %438 = vector.load %arg2[%c336_239, %c0_240] : memref<784x768xbf16, #tpu.memory_space<vmem>>, vector<16x256xbf16>
    %439 = arith.mulf %437, %438 : vector<16x256xbf16>
    %c336_241 = arith.constant 336 : index
    %c0_242 = arith.constant 0 : index
    %440 = vector.load %arg11[%c336_241, %c0_242] : memref<784x768xbf16, #tpu.memory_space<vmem>>, vector<16x256xbf16>
    tpu.vector_store %arg11[%c336_241, %c0_242], %439 {strides = array<i32>} : memref<784x768xbf16, #tpu.memory_space<vmem>>, vector<16x256xbf16>,
    %441 = vector.extract_strided_slice %308 {offsets = [0, 254], sizes = [16, 2], strides = [1, 1]} : vector<16x256xbf16> to vector<16x2xbf16>
    %442 = vector.extract_strided_slice %308 {offsets = [0, 0], sizes = [16, 254], strides = [1, 1]} : vector<16x256xbf16> to vector<16x254xbf16>
    %443 = tpu.concatenate %441, %442 in 1 : vector<16x2xbf16>, vector<16x254xbf16> -> vector<16x256xbf16>
    %c352_243 = arith.constant 352 : index
    %c0_244 = arith.constant 0 : index
    %444 = vector.load %arg2[%c352_243, %c0_244] : memref<784x768xbf16, #tpu.memory_space<vmem>>, vector<16x256xbf16>
    %445 = arith.mulf %443, %444 : vector<16x256xbf16>
    %c352_245 = arith.constant 352 : index
    %c0_246 = arith.constant 0 : index
    %446 = vector.load %arg11[%c352_245, %c0_246] : memref<784x768xbf16, #tpu.memory_space<vmem>>, vector<16x256xbf16>
    tpu.vector_store %arg11[%c352_245, %c0_246], %445 {strides = array<i32>} : memref<784x768xbf16, #tpu.memory_space<vmem>>, vector<16x256xbf16>,
    %447 = vector.extract_strided_slice %308 {offsets = [0, 255], sizes = [16, 1], strides = [1, 1]} : vector<16x256xbf16> to vector<16x1xbf16>
    %448 = vector.extract_strided_slice %308 {offsets = [0, 0], sizes = [16, 255], strides = [1, 1]} : vector<16x256xbf16> to vector<16x255xbf16>
    %449 = tpu.concatenate %447, %448 in 1 : vector<16x1xbf16>, vector<16x255xbf16> -> vector<16x256xbf16>
    %c368_247 = arith.constant 368 : index
    %c0_248 = arith.constant 0 : index
    %450 = vector.load %arg2[%c368_247, %c0_248] : memref<784x768xbf16, #tpu.memory_space<vmem>>, vector<16x256xbf16>
    %451 = arith.mulf %449, %450 : vector<16x256xbf16>
    %c368_249 = arith.constant 368 : index
    %c0_250 = arith.constant 0 : index
    %452 = vector.load %arg11[%c368_249, %c0_250] : memref<784x768xbf16, #tpu.memory_space<vmem>>, vector<16x256xbf16>
    tpu.vector_store %arg11[%c368_249, %c0_250], %451 {strides = array<i32>} : memref<784x768xbf16, #tpu.memory_space<vmem>>, vector<16x256xbf16>,
    %c384_251 = arith.constant 384 : index
    %c0_252 = arith.constant 0 : index
    %453 = vector.load %arg11[%c384_251, %c0_252] : memref<784x768xbf16, #tpu.memory_space<vmem>>, vector<16x256xbf16>
    tpu.vector_store %arg11[%c384_251, %c0_252], %308 {strides = array<i32>} : memref<784x768xbf16, #tpu.memory_space<vmem>>, vector<16x256xbf16>,
    %454 = vector.extract_strided_slice %308 {offsets = [0, 1], sizes = [16, 255], strides = [1, 1]} : vector<16x256xbf16> to vector<16x255xbf16>
    %455 = vector.extract_strided_slice %308 {offsets = [0, 0], sizes = [16, 1], strides = [1, 1]} : vector<16x256xbf16> to vector<16x1xbf16>
    %456 = tpu.concatenate %454, %455 in 1 : vector<16x255xbf16>, vector<16x1xbf16> -> vector<16x256xbf16>
    %c400_253 = arith.constant 400 : index
    %c0_254 = arith.constant 0 : index
    %457 = vector.load %arg2[%c400_253, %c0_254] : memref<784x768xbf16, #tpu.memory_space<vmem>>, vector<16x256xbf16>
    %458 = arith.mulf %456, %457 : vector<16x256xbf16>
    %c400_255 = arith.constant 400 : index
    %c0_256 = arith.constant 0 : index
    %459 = vector.load %arg11[%c400_255, %c0_256] : memref<784x768xbf16, #tpu.memory_space<vmem>>, vector<16x256xbf16>
    tpu.vector_store %arg11[%c400_255, %c0_256], %458 {strides = array<i32>} : memref<784x768xbf16, #tpu.memory_space<vmem>>, vector<16x256xbf16>,
    %460 = vector.extract_strided_slice %308 {offsets = [0, 2], sizes = [16, 254], strides = [1, 1]} : vector<16x256xbf16> to vector<16x254xbf16>
    %461 = vector.extract_strided_slice %308 {offsets = [0, 0], sizes = [16, 2], strides = [1, 1]} : vector<16x256xbf16> to vector<16x2xbf16>
    %462 = tpu.concatenate %460, %461 in 1 : vector<16x254xbf16>, vector<16x2xbf16> -> vector<16x256xbf16>
    %c416_257 = arith.constant 416 : index
    %c0_258 = arith.constant 0 : index
    %463 = vector.load %arg2[%c416_257, %c0_258] : memref<784x768xbf16, #tpu.memory_space<vmem>>, vector<16x256xbf16>
    %464 = arith.mulf %462, %463 : vector<16x256xbf16>
    %c416_259 = arith.constant 416 : index
    %c0_260 = arith.constant 0 : index
    %465 = vector.load %arg11[%c416_259, %c0_260] : memref<784x768xbf16, #tpu.memory_space<vmem>>, vector<16x256xbf16>
    tpu.vector_store %arg11[%c416_259, %c0_260], %464 {strides = array<i32>} : memref<784x768xbf16, #tpu.memory_space<vmem>>, vector<16x256xbf16>,
    %466 = vector.extract_strided_slice %308 {offsets = [0, 3], sizes = [16, 253], strides = [1, 1]} : vector<16x256xbf16> to vector<16x253xbf16>
    %467 = vector.extract_strided_slice %308 {offsets = [0, 0], sizes = [16, 3], strides = [1, 1]} : vector<16x256xbf16> to vector<16x3xbf16>
    %468 = tpu.concatenate %466, %467 in 1 : vector<16x253xbf16>, vector<16x3xbf16> -> vector<16x256xbf16>
    %c432_261 = arith.constant 432 : index
    %c0_262 = arith.constant 0 : index
    %469 = vector.load %arg2[%c432_261, %c0_262] : memref<784x768xbf16, #tpu.memory_space<vmem>>, vector<16x256xbf16>
    %470 = arith.mulf %468, %469 : vector<16x256xbf16>
    %c432_263 = arith.constant 432 : index
    %c0_264 = arith.constant 0 : index
    %471 = vector.load %arg11[%c432_263, %c0_264] : memref<784x768xbf16, #tpu.memory_space<vmem>>, vector<16x256xbf16>
    tpu.vector_store %arg11[%c432_263, %c0_264], %470 {strides = array<i32>} : memref<784x768xbf16, #tpu.memory_space<vmem>>, vector<16x256xbf16>,
    %472 = vector.extract_strided_slice %308 {offsets = [0, 13], sizes = [16, 243], strides = [1, 1]} : vector<16x256xbf16> to vector<16x243xbf16>
    %473 = vector.extract_strided_slice %308 {offsets = [0, 0], sizes = [16, 13], strides = [1, 1]} : vector<16x256xbf16> to vector<16x13xbf16>
    %474 = tpu.concatenate %472, %473 in 1 : vector<16x243xbf16>, vector<16x13xbf16> -> vector<16x256xbf16>
    %c448_265 = arith.constant 448 : index
    %c0_266 = arith.constant 0 : index
    %475 = vector.load %arg2[%c448_265, %c0_266] : memref<784x768xbf16, #tpu.memory_space<vmem>>, vector<16x256xbf16>
    %476 = arith.mulf %474, %475 : vector<16x256xbf16>
    %c448_267 = arith.constant 448 : index
    %c0_268 = arith.constant 0 : index
    %477 = vector.load %arg11[%c448_267, %c0_268] : memref<784x768xbf16, #tpu.memory_space<vmem>>, vector<16x256xbf16>
    tpu.vector_store %arg11[%c448_267, %c0_268], %476 {strides = array<i32>} : memref<784x768xbf16, #tpu.memory_space<vmem>>, vector<16x256xbf16>,
    %478 = vector.extract_strided_slice %308 {offsets = [0, 14], sizes = [16, 242], strides = [1, 1]} : vector<16x256xbf16> to vector<16x242xbf16>
    %479 = vector.extract_strided_slice %308 {offsets = [0, 0], sizes = [16, 14], strides = [1, 1]} : vector<16x256xbf16> to vector<16x14xbf16>
    %480 = tpu.concatenate %478, %479 in 1 : vector<16x242xbf16>, vector<16x14xbf16> -> vector<16x256xbf16>
    %c464_269 = arith.constant 464 : index
    %c0_270 = arith.constant 0 : index
    %481 = vector.load %arg2[%c464_269, %c0_270] : memref<784x768xbf16, #tpu.memory_space<vmem>>, vector<16x256xbf16>
    %482 = arith.mulf %480, %481 : vector<16x256xbf16>
    %c464_271 = arith.constant 464 : index
    %c0_272 = arith.constant 0 : index
    %483 = vector.load %arg11[%c464_271, %c0_272] : memref<784x768xbf16, #tpu.memory_space<vmem>>, vector<16x256xbf16>
    tpu.vector_store %arg11[%c464_271, %c0_272], %482 {strides = array<i32>} : memref<784x768xbf16, #tpu.memory_space<vmem>>, vector<16x256xbf16>,
    %484 = vector.extract_strided_slice %308 {offsets = [0, 15], sizes = [16, 241], strides = [1, 1]} : vector<16x256xbf16> to vector<16x241xbf16>
    %485 = vector.extract_strided_slice %308 {offsets = [0, 0], sizes = [16, 15], strides = [1, 1]} : vector<16x256xbf16> to vector<16x15xbf16>
    %486 = tpu.concatenate %484, %485 in 1 : vector<16x241xbf16>, vector<16x15xbf16> -> vector<16x256xbf16>
    %c480_273 = arith.constant 480 : index
    %c0_274 = arith.constant 0 : index
    %487 = vector.load %arg2[%c480_273, %c0_274] : memref<784x768xbf16, #tpu.memory_space<vmem>>, vector<16x256xbf16>
    %488 = arith.mulf %486, %487 : vector<16x256xbf16>
    %c480_275 = arith.constant 480 : index
    %c0_276 = arith.constant 0 : index
    %489 = vector.load %arg11[%c480_275, %c0_276] : memref<784x768xbf16, #tpu.memory_space<vmem>>, vector<16x256xbf16>
    tpu.vector_store %arg11[%c480_275, %c0_276], %488 {strides = array<i32>} : memref<784x768xbf16, #tpu.memory_space<vmem>>, vector<16x256xbf16>,
    %490 = vector.extract_strided_slice %308 {offsets = [0, 16], sizes = [16, 240], strides = [1, 1]} : vector<16x256xbf16> to vector<16x240xbf16>
    %491 = vector.extract_strided_slice %308 {offsets = [0, 0], sizes = [16, 16], strides = [1, 1]} : vector<16x256xbf16> to vector<16x16xbf16>
    %492 = tpu.concatenate %490, %491 in 1 : vector<16x240xbf16>, vector<16x16xbf16> -> vector<16x256xbf16>
    %c496_277 = arith.constant 496 : index
    %c0_278 = arith.constant 0 : index
    %493 = vector.load %arg2[%c496_277, %c0_278] : memref<784x768xbf16, #tpu.memory_space<vmem>>, vector<16x256xbf16>
    %494 = arith.mulf %492, %493 : vector<16x256xbf16>
    %c496_279 = arith.constant 496 : index
    %c0_280 = arith.constant 0 : index
    %495 = vector.load %arg11[%c496_279, %c0_280] : memref<784x768xbf16, #tpu.memory_space<vmem>>, vector<16x256xbf16>
    tpu.vector_store %arg11[%c496_279, %c0_280], %494 {strides = array<i32>} : memref<784x768xbf16, #tpu.memory_space<vmem>>, vector<16x256xbf16>,
    %496 = vector.extract_strided_slice %308 {offsets = [0, 17], sizes = [16, 239], strides = [1, 1]} : vector<16x256xbf16> to vector<16x239xbf16>
    %497 = vector.extract_strided_slice %308 {offsets = [0, 0], sizes = [16, 17], strides = [1, 1]} : vector<16x256xbf16> to vector<16x17xbf16>
    %498 = tpu.concatenate %496, %497 in 1 : vector<16x239xbf16>, vector<16x17xbf16> -> vector<16x256xbf16>
    %c512_281 = arith.constant 512 : index
    %c0_282 = arith.constant 0 : index
    %499 = vector.load %arg2[%c512_281, %c0_282] : memref<784x768xbf16, #tpu.memory_space<vmem>>, vector<16x256xbf16>
    %500 = arith.mulf %498, %499 : vector<16x256xbf16>
    %c512_283 = arith.constant 512 : index
    %c0_284 = arith.constant 0 : index
    %501 = vector.load %arg11[%c512_283, %c0_284] : memref<784x768xbf16, #tpu.memory_space<vmem>>, vector<16x256xbf16>
    tpu.vector_store %arg11[%c512_283, %c0_284], %500 {strides = array<i32>} : memref<784x768xbf16, #tpu.memory_space<vmem>>, vector<16x256xbf16>,
    %502 = vector.extract_strided_slice %308 {offsets = [0, 18], sizes = [16, 238], strides = [1, 1]} : vector<16x256xbf16> to vector<16x238xbf16>
    %503 = vector.extract_strided_slice %308 {offsets = [0, 0], sizes = [16, 18], strides = [1, 1]} : vector<16x256xbf16> to vector<16x18xbf16>
    %504 = tpu.concatenate %502, %503 in 1 : vector<16x238xbf16>, vector<16x18xbf16> -> vector<16x256xbf16>
    %c528_285 = arith.constant 528 : index
    %c0_286 = arith.constant 0 : index
    %505 = vector.load %arg2[%c528_285, %c0_286] : memref<784x768xbf16, #tpu.memory_space<vmem>>, vector<16x256xbf16>
    %506 = arith.mulf %504, %505 : vector<16x256xbf16>
    %c528_287 = arith.constant 528 : index
    %c0_288 = arith.constant 0 : index
    %507 = vector.load %arg11[%c528_287, %c0_288] : memref<784x768xbf16, #tpu.memory_space<vmem>>, vector<16x256xbf16>
    tpu.vector_store %arg11[%c528_287, %c0_288], %506 {strides = array<i32>} : memref<784x768xbf16, #tpu.memory_space<vmem>>, vector<16x256xbf16>,
    %508 = vector.extract_strided_slice %308 {offsets = [0, 19], sizes = [16, 237], strides = [1, 1]} : vector<16x256xbf16> to vector<16x237xbf16>
    %509 = vector.extract_strided_slice %308 {offsets = [0, 0], sizes = [16, 19], strides = [1, 1]} : vector<16x256xbf16> to vector<16x19xbf16>
    %510 = tpu.concatenate %508, %509 in 1 : vector<16x237xbf16>, vector<16x19xbf16> -> vector<16x256xbf16>
    %c544_289 = arith.constant 544 : index
    %c0_290 = arith.constant 0 : index
    %511 = vector.load %arg2[%c544_289, %c0_290] : memref<784x768xbf16, #tpu.memory_space<vmem>>, vector<16x256xbf16>
    %512 = arith.mulf %510, %511 : vector<16x256xbf16>
    %c544_291 = arith.constant 544 : index
    %c0_292 = arith.constant 0 : index
    %513 = vector.load %arg11[%c544_291, %c0_292] : memref<784x768xbf16, #tpu.memory_space<vmem>>, vector<16x256xbf16>
    tpu.vector_store %arg11[%c544_291, %c0_292], %512 {strides = array<i32>} : memref<784x768xbf16, #tpu.memory_space<vmem>>, vector<16x256xbf16>,
    %514 = vector.extract_strided_slice %308 {offsets = [0, 29], sizes = [16, 227], strides = [1, 1]} : vector<16x256xbf16> to vector<16x227xbf16>
    %515 = vector.extract_strided_slice %308 {offsets = [0, 0], sizes = [16, 29], strides = [1, 1]} : vector<16x256xbf16> to vector<16x29xbf16>
    %516 = tpu.concatenate %514, %515 in 1 : vector<16x227xbf16>, vector<16x29xbf16> -> vector<16x256xbf16>
    %c560_293 = arith.constant 560 : index
    %c0_294 = arith.constant 0 : index
    %517 = vector.load %arg2[%c560_293, %c0_294] : memref<784x768xbf16, #tpu.memory_space<vmem>>, vector<16x256xbf16>
    %518 = arith.mulf %516, %517 : vector<16x256xbf16>
    %c560_295 = arith.constant 560 : index
    %c0_296 = arith.constant 0 : index
    %519 = vector.load %arg11[%c560_295, %c0_296] : memref<784x768xbf16, #tpu.memory_space<vmem>>, vector<16x256xbf16>
    tpu.vector_store %arg11[%c560_295, %c0_296], %518 {strides = array<i32>} : memref<784x768xbf16, #tpu.memory_space<vmem>>, vector<16x256xbf16>,
    %520 = vector.extract_strided_slice %308 {offsets = [0, 30], sizes = [16, 226], strides = [1, 1]} : vector<16x256xbf16> to vector<16x226xbf16>
    %521 = vector.extract_strided_slice %308 {offsets = [0, 0], sizes = [16, 30], strides = [1, 1]} : vector<16x256xbf16> to vector<16x30xbf16>
    %522 = tpu.concatenate %520, %521 in 1 : vector<16x226xbf16>, vector<16x30xbf16> -> vector<16x256xbf16>
    %c576_297 = arith.constant 576 : index
    %c0_298 = arith.constant 0 : index
    %523 = vector.load %arg2[%c576_297, %c0_298] : memref<784x768xbf16, #tpu.memory_space<vmem>>, vector<16x256xbf16>
    %524 = arith.mulf %522, %523 : vector<16x256xbf16>
    %c576_299 = arith.constant 576 : index
    %c0_300 = arith.constant 0 : index
    %525 = vector.load %arg11[%c576_299, %c0_300] : memref<784x768xbf16, #tpu.memory_space<vmem>>, vector<16x256xbf16>
    tpu.vector_store %arg11[%c576_299, %c0_300], %524 {strides = array<i32>} : memref<784x768xbf16, #tpu.memory_space<vmem>>, vector<16x256xbf16>,
    %526 = vector.extract_strided_slice %308 {offsets = [0, 31], sizes = [16, 225], strides = [1, 1]} : vector<16x256xbf16> to vector<16x225xbf16>
    %527 = vector.extract_strided_slice %308 {offsets = [0, 0], sizes = [16, 31], strides = [1, 1]} : vector<16x256xbf16> to vector<16x31xbf16>
    %528 = tpu.concatenate %526, %527 in 1 : vector<16x225xbf16>, vector<16x31xbf16> -> vector<16x256xbf16>
    %c592_301 = arith.constant 592 : index
    %c0_302 = arith.constant 0 : index
    %529 = vector.load %arg2[%c592_301, %c0_302] : memref<784x768xbf16, #tpu.memory_space<vmem>>, vector<16x256xbf16>
    %530 = arith.mulf %528, %529 : vector<16x256xbf16>
    %c592_303 = arith.constant 592 : index
    %c0_304 = arith.constant 0 : index
    %531 = vector.load %arg11[%c592_303, %c0_304] : memref<784x768xbf16, #tpu.memory_space<vmem>>, vector<16x256xbf16>
    tpu.vector_store %arg11[%c592_303, %c0_304], %530 {strides = array<i32>} : memref<784x768xbf16, #tpu.memory_space<vmem>>, vector<16x256xbf16>,
    %532 = vector.extract_strided_slice %308 {offsets = [0, 32], sizes = [16, 224], strides = [1, 1]} : vector<16x256xbf16> to vector<16x224xbf16>
    %533 = vector.extract_strided_slice %308 {offsets = [0, 0], sizes = [16, 32], strides = [1, 1]} : vector<16x256xbf16> to vector<16x32xbf16>
    %534 = tpu.concatenate %532, %533 in 1 : vector<16x224xbf16>, vector<16x32xbf16> -> vector<16x256xbf16>
    %c608_305 = arith.constant 608 : index
    %c0_306 = arith.constant 0 : index
    %535 = vector.load %arg2[%c608_305, %c0_306] : memref<784x768xbf16, #tpu.memory_space<vmem>>, vector<16x256xbf16>
    %536 = arith.mulf %534, %535 : vector<16x256xbf16>
    %c608_307 = arith.constant 608 : index
    %c0_308 = arith.constant 0 : index
    %537 = vector.load %arg11[%c608_307, %c0_308] : memref<784x768xbf16, #tpu.memory_space<vmem>>, vector<16x256xbf16>
    tpu.vector_store %arg11[%c608_307, %c0_308], %536 {strides = array<i32>} : memref<784x768xbf16, #tpu.memory_space<vmem>>, vector<16x256xbf16>,
    %538 = vector.extract_strided_slice %308 {offsets = [0, 33], sizes = [16, 223], strides = [1, 1]} : vector<16x256xbf16> to vector<16x223xbf16>
    %539 = vector.extract_strided_slice %308 {offsets = [0, 0], sizes = [16, 33], strides = [1, 1]} : vector<16x256xbf16> to vector<16x33xbf16>
    %540 = tpu.concatenate %538, %539 in 1 : vector<16x223xbf16>, vector<16x33xbf16> -> vector<16x256xbf16>
    %c624_309 = arith.constant 624 : index
    %c0_310 = arith.constant 0 : index
    %541 = vector.load %arg2[%c624_309, %c0_310] : memref<784x768xbf16, #tpu.memory_space<vmem>>, vector<16x256xbf16>
    %542 = arith.mulf %540, %541 : vector<16x256xbf16>
    %c624_311 = arith.constant 624 : index
    %c0_312 = arith.constant 0 : index
    %543 = vector.load %arg11[%c624_311, %c0_312] : memref<784x768xbf16, #tpu.memory_space<vmem>>, vector<16x256xbf16>
    tpu.vector_store %arg11[%c624_311, %c0_312], %542 {strides = array<i32>} : memref<784x768xbf16, #tpu.memory_space<vmem>>, vector<16x256xbf16>,
    %544 = vector.extract_strided_slice %308 {offsets = [0, 34], sizes = [16, 222], strides = [1, 1]} : vector<16x256xbf16> to vector<16x222xbf16>
    %545 = vector.extract_strided_slice %308 {offsets = [0, 0], sizes = [16, 34], strides = [1, 1]} : vector<16x256xbf16> to vector<16x34xbf16>
    %546 = tpu.concatenate %544, %545 in 1 : vector<16x222xbf16>, vector<16x34xbf16> -> vector<16x256xbf16>
    %c640_313 = arith.constant 640 : index
    %c0_314 = arith.constant 0 : index
    %547 = vector.load %arg2[%c640_313, %c0_314] : memref<784x768xbf16, #tpu.memory_space<vmem>>, vector<16x256xbf16>
    %548 = arith.mulf %546, %547 : vector<16x256xbf16>
    %c640_315 = arith.constant 640 : index
    %c0_316 = arith.constant 0 : index
    %549 = vector.load %arg11[%c640_315, %c0_316] : memref<784x768xbf16, #tpu.memory_space<vmem>>, vector<16x256xbf16>
    tpu.vector_store %arg11[%c640_315, %c0_316], %548 {strides = array<i32>} : memref<784x768xbf16, #tpu.memory_space<vmem>>, vector<16x256xbf16>,
    %550 = vector.extract_strided_slice %308 {offsets = [0, 35], sizes = [16, 221], strides = [1, 1]} : vector<16x256xbf16> to vector<16x221xbf16>
    %551 = vector.extract_strided_slice %308 {offsets = [0, 0], sizes = [16, 35], strides = [1, 1]} : vector<16x256xbf16> to vector<16x35xbf16>
    %552 = tpu.concatenate %550, %551 in 1 : vector<16x221xbf16>, vector<16x35xbf16> -> vector<16x256xbf16>
    %c656_317 = arith.constant 656 : index
    %c0_318 = arith.constant 0 : index
    %553 = vector.load %arg2[%c656_317, %c0_318] : memref<784x768xbf16, #tpu.memory_space<vmem>>, vector<16x256xbf16>
    %554 = arith.mulf %552, %553 : vector<16x256xbf16>
    %c656_319 = arith.constant 656 : index
    %c0_320 = arith.constant 0 : index
    %555 = vector.load %arg11[%c656_319, %c0_320] : memref<784x768xbf16, #tpu.memory_space<vmem>>, vector<16x256xbf16>
    tpu.vector_store %arg11[%c656_319, %c0_320], %554 {strides = array<i32>} : memref<784x768xbf16, #tpu.memory_space<vmem>>, vector<16x256xbf16>,
    %556 = vector.extract_strided_slice %308 {offsets = [0, 45], sizes = [16, 211], strides = [1, 1]} : vector<16x256xbf16> to vector<16x211xbf16>
    %557 = vector.extract_strided_slice %308 {offsets = [0, 0], sizes = [16, 45], strides = [1, 1]} : vector<16x256xbf16> to vector<16x45xbf16>
    %558 = tpu.concatenate %556, %557 in 1 : vector<16x211xbf16>, vector<16x45xbf16> -> vector<16x256xbf16>
    %c672_321 = arith.constant 672 : index
    %c0_322 = arith.constant 0 : index
    %559 = vector.load %arg2[%c672_321, %c0_322] : memref<784x768xbf16, #tpu.memory_space<vmem>>, vector<16x256xbf16>
    %560 = arith.mulf %558, %559 : vector<16x256xbf16>
    %c672_323 = arith.constant 672 : index
    %c0_324 = arith.constant 0 : index
    %561 = vector.load %arg11[%c672_323, %c0_324] : memref<784x768xbf16, #tpu.memory_space<vmem>>, vector<16x256xbf16>
    tpu.vector_store %arg11[%c672_323, %c0_324], %560 {strides = array<i32>} : memref<784x768xbf16, #tpu.memory_space<vmem>>, vector<16x256xbf16>,
    %562 = vector.extract_strided_slice %308 {offsets = [0, 46], sizes = [16, 210], strides = [1, 1]} : vector<16x256xbf16> to vector<16x210xbf16>
    %563 = vector.extract_strided_slice %308 {offsets = [0, 0], sizes = [16, 46], strides = [1, 1]} : vector<16x256xbf16> to vector<16x46xbf16>
    %564 = tpu.concatenate %562, %563 in 1 : vector<16x210xbf16>, vector<16x46xbf16> -> vector<16x256xbf16>
    %c688_325 = arith.constant 688 : index
    %c0_326 = arith.constant 0 : index
    %565 = vector.load %arg2[%c688_325, %c0_326] : memref<784x768xbf16, #tpu.memory_space<vmem>>, vector<16x256xbf16>
    %566 = arith.mulf %564, %565 : vector<16x256xbf16>
    %c688_327 = arith.constant 688 : index
    %c0_328 = arith.constant 0 : index
    %567 = vector.load %arg11[%c688_327, %c0_328] : memref<784x768xbf16, #tpu.memory_space<vmem>>, vector<16x256xbf16>
    tpu.vector_store %arg11[%c688_327, %c0_328], %566 {strides = array<i32>} : memref<784x768xbf16, #tpu.memory_space<vmem>>, vector<16x256xbf16>,
    %568 = vector.extract_strided_slice %308 {offsets = [0, 47], sizes = [16, 209], strides = [1, 1]} : vector<16x256xbf16> to vector<16x209xbf16>
    %569 = vector.extract_strided_slice %308 {offsets = [0, 0], sizes = [16, 47], strides = [1, 1]} : vector<16x256xbf16> to vector<16x47xbf16>
    %570 = tpu.concatenate %568, %569 in 1 : vector<16x209xbf16>, vector<16x47xbf16> -> vector<16x256xbf16>
    %c704_329 = arith.constant 704 : index
    %c0_330 = arith.constant 0 : index
    %571 = vector.load %arg2[%c704_329, %c0_330] : memref<784x768xbf16, #tpu.memory_space<vmem>>, vector<16x256xbf16>
    %572 = arith.mulf %570, %571 : vector<16x256xbf16>
    %c704_331 = arith.constant 704 : index
    %c0_332 = arith.constant 0 : index
    %573 = vector.load %arg11[%c704_331, %c0_332] : memref<784x768xbf16, #tpu.memory_space<vmem>>, vector<16x256xbf16>
    tpu.vector_store %arg11[%c704_331, %c0_332], %572 {strides = array<i32>} : memref<784x768xbf16, #tpu.memory_space<vmem>>, vector<16x256xbf16>,
    %574 = vector.extract_strided_slice %308 {offsets = [0, 48], sizes = [16, 208], strides = [1, 1]} : vector<16x256xbf16> to vector<16x208xbf16>
    %575 = vector.extract_strided_slice %308 {offsets = [0, 0], sizes = [16, 48], strides = [1, 1]} : vector<16x256xbf16> to vector<16x48xbf16>
    %576 = tpu.concatenate %574, %575 in 1 : vector<16x208xbf16>, vector<16x48xbf16> -> vector<16x256xbf16>
    %c720_333 = arith.constant 720 : index
    %c0_334 = arith.constant 0 : index
    %577 = vector.load %arg2[%c720_333, %c0_334] : memref<784x768xbf16, #tpu.memory_space<vmem>>, vector<16x256xbf16>
    %578 = arith.mulf %576, %577 : vector<16x256xbf16>
    %c720_335 = arith.constant 720 : index
    %c0_336 = arith.constant 0 : index
    %579 = vector.load %arg11[%c720_335, %c0_336] : memref<784x768xbf16, #tpu.memory_space<vmem>>, vector<16x256xbf16>
    tpu.vector_store %arg11[%c720_335, %c0_336], %578 {strides = array<i32>} : memref<784x768xbf16, #tpu.memory_space<vmem>>, vector<16x256xbf16>,
    %580 = vector.extract_strided_slice %308 {offsets = [0, 49], sizes = [16, 207], strides = [1, 1]} : vector<16x256xbf16> to vector<16x207xbf16>
    %581 = vector.extract_strided_slice %308 {offsets = [0, 0], sizes = [16, 49], strides = [1, 1]} : vector<16x256xbf16> to vector<16x49xbf16>
    %582 = tpu.concatenate %580, %581 in 1 : vector<16x207xbf16>, vector<16x49xbf16> -> vector<16x256xbf16>
    %c736_337 = arith.constant 736 : index
    %c0_338 = arith.constant 0 : index
    %583 = vector.load %arg2[%c736_337, %c0_338] : memref<784x768xbf16, #tpu.memory_space<vmem>>, vector<16x256xbf16>
    %584 = arith.mulf %582, %583 : vector<16x256xbf16>
    %c736_339 = arith.constant 736 : index
    %c0_340 = arith.constant 0 : index
    %585 = vector.load %arg11[%c736_339, %c0_340] : memref<784x768xbf16, #tpu.memory_space<vmem>>, vector<16x256xbf16>
    tpu.vector_store %arg11[%c736_339, %c0_340], %584 {strides = array<i32>} : memref<784x768xbf16, #tpu.memory_space<vmem>>, vector<16x256xbf16>,
    %586 = vector.extract_strided_slice %308 {offsets = [0, 50], sizes = [16, 206], strides = [1, 1]} : vector<16x256xbf16> to vector<16x206xbf16>
    %587 = vector.extract_strided_slice %308 {offsets = [0, 0], sizes = [16, 50], strides = [1, 1]} : vector<16x256xbf16> to vector<16x50xbf16>
    %588 = tpu.concatenate %586, %587 in 1 : vector<16x206xbf16>, vector<16x50xbf16> -> vector<16x256xbf16>
    %c752_341 = arith.constant 752 : index
    %c0_342 = arith.constant 0 : index
    %589 = vector.load %arg2[%c752_341, %c0_342] : memref<784x768xbf16, #tpu.memory_space<vmem>>, vector<16x256xbf16>
    %590 = arith.mulf %588, %589 : vector<16x256xbf16>
    %c752_343 = arith.constant 752 : index
    %c0_344 = arith.constant 0 : index
    %591 = vector.load %arg11[%c752_343, %c0_344] : memref<784x768xbf16, #tpu.memory_space<vmem>>, vector<16x256xbf16>
    tpu.vector_store %arg11[%c752_343, %c0_344], %590 {strides = array<i32>} : memref<784x768xbf16, #tpu.memory_space<vmem>>, vector<16x256xbf16>,
    %592 = vector.extract_strided_slice %308 {offsets = [0, 51], sizes = [16, 205], strides = [1, 1]} : vector<16x256xbf16> to vector<16x205xbf16>
    %593 = vector.extract_strided_slice %308 {offsets = [0, 0], sizes = [16, 51], strides = [1, 1]} : vector<16x256xbf16> to vector<16x51xbf16>
    %594 = tpu.concatenate %592, %593 in 1 : vector<16x205xbf16>, vector<16x51xbf16> -> vector<16x256xbf16>
    %c768_345 = arith.constant 768 : index
    %c0_346 = arith.constant 0 : index
    %595 = vector.load %arg2[%c768_345, %c0_346] : memref<784x768xbf16, #tpu.memory_space<vmem>>, vector<16x256xbf16>
    %596 = arith.mulf %594, %595 : vector<16x256xbf16>
    %c768_347 = arith.constant 768 : index
    %c0_348 = arith.constant 0 : index
    %597 = vector.load %arg11[%c768_347, %c0_348] : memref<784x768xbf16, #tpu.memory_space<vmem>>, vector<16x256xbf16>
    tpu.vector_store %arg11[%c768_347, %c0_348], %596 {strides = array<i32>} : memref<784x768xbf16, #tpu.memory_space<vmem>>, vector<16x256xbf16>,
    %c0_349 = arith.constant 0 : index
    %c0_350 = arith.constant 0 : index
    %598 = vector.load %arg4[%c0_349, %c0_350] : memref<16x784xbf16, #tpu.memory_space<vmem>>, vector<16x784xbf16>
    %c0_351 = arith.constant 0 : index
    %c0_352 = arith.constant 0 : index
    %599 = vector.load %arg11[%c0_351, %c0_352] : memref<784x768xbf16, #tpu.memory_space<vmem>>, vector<784x256xbf16>
    %cst_353 = arith.constant dense<0.000000e+00> : vector<16x256xf32>
    %600 = tpu.matmul %598, %599, %cst_353 {dimension_numbers = #tpu.dot_dimension_numbers<[1], [0], [0], [1], [0, 0, 1, 1], [], []>} : vector<16x784xbf16>, vector<784x256xbf16>, vector<16x256xf32> -> vector<16x256xf32>
    %c0_354 = arith.constant 0 : index
    %c0_355 = arith.constant 0 : index
    %601 = vector.load %arg7[%c0_354, %c0_355] : memref<16x1xf32, #tpu.memory_space<vmem>>, vector<16x1xf32>
    %602 = vector.broadcast %601 : vector<16x1xf32> to vector<16x256xf32>
    %603 = arith.addf %600, %602 : vector<16x256xf32>
    %604 = arith.addf %603, %297 : vector<16x256xf32>
    %cst_356 = arith.constant 0.000000e+00 : f32
    %605 = vector.broadcast %cst_356 : f32 to vector<16x256xf32>
    %606 = arith.maximumf %604, %605 : vector<16x256xf32>
    %607 = arith.truncf %606 : vector<16x256xf32> to vector<16x256xbf16>
    %608 = vector.extract_strided_slice %607 {offsets = [0, 205], sizes = [16, 51], strides = [1, 1]} : vector<16x256xbf16> to vector<16x51xbf16>
    %609 = vector.extract_strided_slice %607 {offsets = [0, 0], sizes = [16, 205], strides = [1, 1]} : vector<16x256xbf16> to vector<16x205xbf16>
    %610 = tpu.concatenate %608, %609 in 1 : vector<16x51xbf16>, vector<16x205xbf16> -> vector<16x256xbf16>
    %c0_357 = arith.constant 0 : index
    %c0_358 = arith.constant 0 : index
    %611 = vector.load %arg2[%c0_357, %c0_358] : memref<784x768xbf16, #tpu.memory_space<vmem>>, vector<16x256xbf16>
    %612 = arith.mulf %610, %611 : vector<16x256xbf16>
    %c0_359 = arith.constant 0 : index
    %c0_360 = arith.constant 0 : index
    %613 = vector.load %arg11[%c0_359, %c0_360] : memref<784x768xbf16, #tpu.memory_space<vmem>>, vector<16x256xbf16>
    tpu.vector_store %arg11[%c0_359, %c0_360], %612 {strides = array<i32>} : memref<784x768xbf16, #tpu.memory_space<vmem>>, vector<16x256xbf16>,
    %614 = vector.extract_strided_slice %607 {offsets = [0, 206], sizes = [16, 50], strides = [1, 1]} : vector<16x256xbf16> to vector<16x50xbf16>
    %615 = vector.extract_strided_slice %607 {offsets = [0, 0], sizes = [16, 206], strides = [1, 1]} : vector<16x256xbf16> to vector<16x206xbf16>
    %616 = tpu.concatenate %614, %615 in 1 : vector<16x50xbf16>, vector<16x206xbf16> -> vector<16x256xbf16>
    %c16_361 = arith.constant 16 : index
    %c0_362 = arith.constant 0 : index
    %617 = vector.load %arg2[%c16_361, %c0_362] : memref<784x768xbf16, #tpu.memory_space<vmem>>, vector<16x256xbf16>
    %618 = arith.mulf %616, %617 : vector<16x256xbf16>
    %c16_363 = arith.constant 16 : index
    %c0_364 = arith.constant 0 : index
    %619 = vector.load %arg11[%c16_363, %c0_364] : memref<784x768xbf16, #tpu.memory_space<vmem>>, vector<16x256xbf16>
    tpu.vector_store %arg11[%c16_363, %c0_364], %618 {strides = array<i32>} : memref<784x768xbf16, #tpu.memory_space<vmem>>, vector<16x256xbf16>,
    %620 = vector.extract_strided_slice %607 {offsets = [0, 207], sizes = [16, 49], strides = [1, 1]} : vector<16x256xbf16> to vector<16x49xbf16>
    %621 = vector.extract_strided_slice %607 {offsets = [0, 0], sizes = [16, 207], strides = [1, 1]} : vector<16x256xbf16> to vector<16x207xbf16>
    %622 = tpu.concatenate %620, %621 in 1 : vector<16x49xbf16>, vector<16x207xbf16> -> vector<16x256xbf16>
    %c32_365 = arith.constant 32 : index
    %c0_366 = arith.constant 0 : index
    %623 = vector.load %arg2[%c32_365, %c0_366] : memref<784x768xbf16, #tpu.memory_space<vmem>>, vector<16x256xbf16>
    %624 = arith.mulf %622, %623 : vector<16x256xbf16>
    %c32_367 = arith.constant 32 : index
    %c0_368 = arith.constant 0 : index
    %625 = vector.load %arg11[%c32_367, %c0_368] : memref<784x768xbf16, #tpu.memory_space<vmem>>, vector<16x256xbf16>
    tpu.vector_store %arg11[%c32_367, %c0_368], %624 {strides = array<i32>} : memref<784x768xbf16, #tpu.memory_space<vmem>>, vector<16x256xbf16>,
    %626 = vector.extract_strided_slice %607 {offsets = [0, 208], sizes = [16, 48], strides = [1, 1]} : vector<16x256xbf16> to vector<16x48xbf16>
    %627 = vector.extract_strided_slice %607 {offsets = [0, 0], sizes = [16, 208], strides = [1, 1]} : vector<16x256xbf16> to vector<16x208xbf16>
    %628 = tpu.concatenate %626, %627 in 1 : vector<16x48xbf16>, vector<16x208xbf16> -> vector<16x256xbf16>
    %c48_369 = arith.constant 48 : index
    %c0_370 = arith.constant 0 : index
    %629 = vector.load %arg2[%c48_369, %c0_370] : memref<784x768xbf16, #tpu.memory_space<vmem>>, vector<16x256xbf16>
    %630 = arith.mulf %628, %629 : vector<16x256xbf16>
    %c48_371 = arith.constant 48 : index
    %c0_372 = arith.constant 0 : index
    %631 = vector.load %arg11[%c48_371, %c0_372] : memref<784x768xbf16, #tpu.memory_space<vmem>>, vector<16x256xbf16>
    tpu.vector_store %arg11[%c48_371, %c0_372], %630 {strides = array<i32>} : memref<784x768xbf16, #tpu.memory_space<vmem>>, vector<16x256xbf16>,
    %632 = vector.extract_strided_slice %607 {offsets = [0, 209], sizes = [16, 47], strides = [1, 1]} : vector<16x256xbf16> to vector<16x47xbf16>
    %633 = vector.extract_strided_slice %607 {offsets = [0, 0], sizes = [16, 209], strides = [1, 1]} : vector<16x256xbf16> to vector<16x209xbf16>
    %634 = tpu.concatenate %632, %633 in 1 : vector<16x47xbf16>, vector<16x209xbf16> -> vector<16x256xbf16>
    %c64_373 = arith.constant 64 : index
    %c0_374 = arith.constant 0 : index
    %635 = vector.load %arg2[%c64_373, %c0_374] : memref<784x768xbf16, #tpu.memory_space<vmem>>, vector<16x256xbf16>
    %636 = arith.mulf %634, %635 : vector<16x256xbf16>
    %c64_375 = arith.constant 64 : index
    %c0_376 = arith.constant 0 : index
    %637 = vector.load %arg11[%c64_375, %c0_376] : memref<784x768xbf16, #tpu.memory_space<vmem>>, vector<16x256xbf16>
    tpu.vector_store %arg11[%c64_375, %c0_376], %636 {strides = array<i32>} : memref<784x768xbf16, #tpu.memory_space<vmem>>, vector<16x256xbf16>,
    %638 = vector.extract_strided_slice %607 {offsets = [0, 210], sizes = [16, 46], strides = [1, 1]} : vector<16x256xbf16> to vector<16x46xbf16>
    %639 = vector.extract_strided_slice %607 {offsets = [0, 0], sizes = [16, 210], strides = [1, 1]} : vector<16x256xbf16> to vector<16x210xbf16>
    %640 = tpu.concatenate %638, %639 in 1 : vector<16x46xbf16>, vector<16x210xbf16> -> vector<16x256xbf16>
    %c80_377 = arith.constant 80 : index
    %c0_378 = arith.constant 0 : index
    %641 = vector.load %arg2[%c80_377, %c0_378] : memref<784x768xbf16, #tpu.memory_space<vmem>>, vector<16x256xbf16>
    %642 = arith.mulf %640, %641 : vector<16x256xbf16>
    %c80_379 = arith.constant 80 : index
    %c0_380 = arith.constant 0 : index
    %643 = vector.load %arg11[%c80_379, %c0_380] : memref<784x768xbf16, #tpu.memory_space<vmem>>, vector<16x256xbf16>
    tpu.vector_store %arg11[%c80_379, %c0_380], %642 {strides = array<i32>} : memref<784x768xbf16, #tpu.memory_space<vmem>>, vector<16x256xbf16>,
    %644 = vector.extract_strided_slice %607 {offsets = [0, 211], sizes = [16, 45], strides = [1, 1]} : vector<16x256xbf16> to vector<16x45xbf16>
    %645 = vector.extract_strided_slice %607 {offsets = [0, 0], sizes = [16, 211], strides = [1, 1]} : vector<16x256xbf16> to vector<16x211xbf16>
    %646 = tpu.concatenate %644, %645 in 1 : vector<16x45xbf16>, vector<16x211xbf16> -> vector<16x256xbf16>
    %c96_381 = arith.constant 96 : index
    %c0_382 = arith.constant 0 : index
    %647 = vector.load %arg2[%c96_381, %c0_382] : memref<784x768xbf16, #tpu.memory_space<vmem>>, vector<16x256xbf16>
    %648 = arith.mulf %646, %647 : vector<16x256xbf16>
    %c96_383 = arith.constant 96 : index
    %c0_384 = arith.constant 0 : index
    %649 = vector.load %arg11[%c96_383, %c0_384] : memref<784x768xbf16, #tpu.memory_space<vmem>>, vector<16x256xbf16>
    tpu.vector_store %arg11[%c96_383, %c0_384], %648 {strides = array<i32>} : memref<784x768xbf16, #tpu.memory_space<vmem>>, vector<16x256xbf16>,
    %650 = vector.extract_strided_slice %607 {offsets = [0, 221], sizes = [16, 35], strides = [1, 1]} : vector<16x256xbf16> to vector<16x35xbf16>
    %651 = vector.extract_strided_slice %607 {offsets = [0, 0], sizes = [16, 221], strides = [1, 1]} : vector<16x256xbf16> to vector<16x221xbf16>
    %652 = tpu.concatenate %650, %651 in 1 : vector<16x35xbf16>, vector<16x221xbf16> -> vector<16x256xbf16>
    %c112_385 = arith.constant 112 : index
    %c0_386 = arith.constant 0 : index
    %653 = vector.load %arg2[%c112_385, %c0_386] : memref<784x768xbf16, #tpu.memory_space<vmem>>, vector<16x256xbf16>
    %654 = arith.mulf %652, %653 : vector<16x256xbf16>
    %c112_387 = arith.constant 112 : index
    %c0_388 = arith.constant 0 : index
    %655 = vector.load %arg11[%c112_387, %c0_388] : memref<784x768xbf16, #tpu.memory_space<vmem>>, vector<16x256xbf16>
    tpu.vector_store %arg11[%c112_387, %c0_388], %654 {strides = array<i32>} : memref<784x768xbf16, #tpu.memory_space<vmem>>, vector<16x256xbf16>,
    %656 = vector.extract_strided_slice %607 {offsets = [0, 222], sizes = [16, 34], strides = [1, 1]} : vector<16x256xbf16> to vector<16x34xbf16>
    %657 = vector.extract_strided_slice %607 {offsets = [0, 0], sizes = [16, 222], strides = [1, 1]} : vector<16x256xbf16> to vector<16x222xbf16>
    %658 = tpu.concatenate %656, %657 in 1 : vector<16x34xbf16>, vector<16x222xbf16> -> vector<16x256xbf16>
    %c128_389 = arith.constant 128 : index
    %c0_390 = arith.constant 0 : index
    %659 = vector.load %arg2[%c128_389, %c0_390] : memref<784x768xbf16, #tpu.memory_space<vmem>>, vector<16x256xbf16>
    %660 = arith.mulf %658, %659 : vector<16x256xbf16>
    %c128_391 = arith.constant 128 : index
    %c0_392 = arith.constant 0 : index
    %661 = vector.load %arg11[%c128_391, %c0_392] : memref<784x768xbf16, #tpu.memory_space<vmem>>, vector<16x256xbf16>
    tpu.vector_store %arg11[%c128_391, %c0_392], %660 {strides = array<i32>} : memref<784x768xbf16, #tpu.memory_space<vmem>>, vector<16x256xbf16>,
    %662 = vector.extract_strided_slice %607 {offsets = [0, 223], sizes = [16, 33], strides = [1, 1]} : vector<16x256xbf16> to vector<16x33xbf16>
    %663 = vector.extract_strided_slice %607 {offsets = [0, 0], sizes = [16, 223], strides = [1, 1]} : vector<16x256xbf16> to vector<16x223xbf16>
    %664 = tpu.concatenate %662, %663 in 1 : vector<16x33xbf16>, vector<16x223xbf16> -> vector<16x256xbf16>
    %c144_393 = arith.constant 144 : index
    %c0_394 = arith.constant 0 : index
    %665 = vector.load %arg2[%c144_393, %c0_394] : memref<784x768xbf16, #tpu.memory_space<vmem>>, vector<16x256xbf16>
    %666 = arith.mulf %664, %665 : vector<16x256xbf16>
    %c144_395 = arith.constant 144 : index
    %c0_396 = arith.constant 0 : index
    %667 = vector.load %arg11[%c144_395, %c0_396] : memref<784x768xbf16, #tpu.memory_space<vmem>>, vector<16x256xbf16>
    tpu.vector_store %arg11[%c144_395, %c0_396], %666 {strides = array<i32>} : memref<784x768xbf16, #tpu.memory_space<vmem>>, vector<16x256xbf16>,
    %668 = vector.extract_strided_slice %607 {offsets = [0, 224], sizes = [16, 32], strides = [1, 1]} : vector<16x256xbf16> to vector<16x32xbf16>
    %669 = vector.extract_strided_slice %607 {offsets = [0, 0], sizes = [16, 224], strides = [1, 1]} : vector<16x256xbf16> to vector<16x224xbf16>
    %670 = tpu.concatenate %668, %669 in 1 : vector<16x32xbf16>, vector<16x224xbf16> -> vector<16x256xbf16>
    %c160_397 = arith.constant 160 : index
    %c0_398 = arith.constant 0 : index
    %671 = vector.load %arg2[%c160_397, %c0_398] : memref<784x768xbf16, #tpu.memory_space<vmem>>, vector<16x256xbf16>
    %672 = arith.mulf %670, %671 : vector<16x256xbf16>
    %c160_399 = arith.constant 160 : index
    %c0_400 = arith.constant 0 : index
    %673 = vector.load %arg11[%c160_399, %c0_400] : memref<784x768xbf16, #tpu.memory_space<vmem>>, vector<16x256xbf16>
    tpu.vector_store %arg11[%c160_399, %c0_400], %672 {strides = array<i32>} : memref<784x768xbf16, #tpu.memory_space<vmem>>, vector<16x256xbf16>,
    %674 = vector.extract_strided_slice %607 {offsets = [0, 225], sizes = [16, 31], strides = [1, 1]} : vector<16x256xbf16> to vector<16x31xbf16>
    %675 = vector.extract_strided_slice %607 {offsets = [0, 0], sizes = [16, 225], strides = [1, 1]} : vector<16x256xbf16> to vector<16x225xbf16>
    %676 = tpu.concatenate %674, %675 in 1 : vector<16x31xbf16>, vector<16x225xbf16> -> vector<16x256xbf16>
    %c176_401 = arith.constant 176 : index
    %c0_402 = arith.constant 0 : index
    %677 = vector.load %arg2[%c176_401, %c0_402] : memref<784x768xbf16, #tpu.memory_space<vmem>>, vector<16x256xbf16>
    %678 = arith.mulf %676, %677 : vector<16x256xbf16>
    %c176_403 = arith.constant 176 : index
    %c0_404 = arith.constant 0 : index
    %679 = vector.load %arg11[%c176_403, %c0_404] : memref<784x768xbf16, #tpu.memory_space<vmem>>, vector<16x256xbf16>
    tpu.vector_store %arg11[%c176_403, %c0_404], %678 {strides = array<i32>} : memref<784x768xbf16, #tpu.memory_space<vmem>>, vector<16x256xbf16>,
    %680 = vector.extract_strided_slice %607 {offsets = [0, 226], sizes = [16, 30], strides = [1, 1]} : vector<16x256xbf16> to vector<16x30xbf16>
    %681 = vector.extract_strided_slice %607 {offsets = [0, 0], sizes = [16, 226], strides = [1, 1]} : vector<16x256xbf16> to vector<16x226xbf16>
    %682 = tpu.concatenate %680, %681 in 1 : vector<16x30xbf16>, vector<16x226xbf16> -> vector<16x256xbf16>
    %c192_405 = arith.constant 192 : index
    %c0_406 = arith.constant 0 : index
    %683 = vector.load %arg2[%c192_405, %c0_406] : memref<784x768xbf16, #tpu.memory_space<vmem>>, vector<16x256xbf16>
    %684 = arith.mulf %682, %683 : vector<16x256xbf16>
    %c192_407 = arith.constant 192 : index
    %c0_408 = arith.constant 0 : index
    %685 = vector.load %arg11[%c192_407, %c0_408] : memref<784x768xbf16, #tpu.memory_space<vmem>>, vector<16x256xbf16>
    tpu.vector_store %arg11[%c192_407, %c0_408], %684 {strides = array<i32>} : memref<784x768xbf16, #tpu.memory_space<vmem>>, vector<16x256xbf16>,
    %686 = vector.extract_strided_slice %607 {offsets = [0, 227], sizes = [16, 29], strides = [1, 1]} : vector<16x256xbf16> to vector<16x29xbf16>
    %687 = vector.extract_strided_slice %607 {offsets = [0, 0], sizes = [16, 227], strides = [1, 1]} : vector<16x256xbf16> to vector<16x227xbf16>
    %688 = tpu.concatenate %686, %687 in 1 : vector<16x29xbf16>, vector<16x227xbf16> -> vector<16x256xbf16>
    %c208_409 = arith.constant 208 : index
    %c0_410 = arith.constant 0 : index
    %689 = vector.load %arg2[%c208_409, %c0_410] : memref<784x768xbf16, #tpu.memory_space<vmem>>, vector<16x256xbf16>
    %690 = arith.mulf %688, %689 : vector<16x256xbf16>
    %c208_411 = arith.constant 208 : index
    %c0_412 = arith.constant 0 : index
    %691 = vector.load %arg11[%c208_411, %c0_412] : memref<784x768xbf16, #tpu.memory_space<vmem>>, vector<16x256xbf16>
    tpu.vector_store %arg11[%c208_411, %c0_412], %690 {strides = array<i32>} : memref<784x768xbf16, #tpu.memory_space<vmem>>, vector<16x256xbf16>,
    %692 = vector.extract_strided_slice %607 {offsets = [0, 237], sizes = [16, 19], strides = [1, 1]} : vector<16x256xbf16> to vector<16x19xbf16>
    %693 = vector.extract_strided_slice %607 {offsets = [0, 0], sizes = [16, 237], strides = [1, 1]} : vector<16x256xbf16> to vector<16x237xbf16>
    %694 = tpu.concatenate %692, %693 in 1 : vector<16x19xbf16>, vector<16x237xbf16> -> vector<16x256xbf16>
    %c224_413 = arith.constant 224 : index
    %c0_414 = arith.constant 0 : index
    %695 = vector.load %arg2[%c224_413, %c0_414] : memref<784x768xbf16, #tpu.memory_space<vmem>>, vector<16x256xbf16>
    %696 = arith.mulf %694, %695 : vector<16x256xbf16>
    %c224_415 = arith.constant 224 : index
    %c0_416 = arith.constant 0 : index
    %697 = vector.load %arg11[%c224_415, %c0_416] : memref<784x768xbf16, #tpu.memory_space<vmem>>, vector<16x256xbf16>
    tpu.vector_store %arg11[%c224_415, %c0_416], %696 {strides = array<i32>} : memref<784x768xbf16, #tpu.memory_space<vmem>>, vector<16x256xbf16>,
    %698 = vector.extract_strided_slice %607 {offsets = [0, 238], sizes = [16, 18], strides = [1, 1]} : vector<16x256xbf16> to vector<16x18xbf16>
    %699 = vector.extract_strided_slice %607 {offsets = [0, 0], sizes = [16, 238], strides = [1, 1]} : vector<16x256xbf16> to vector<16x238xbf16>
    %700 = tpu.concatenate %698, %699 in 1 : vector<16x18xbf16>, vector<16x238xbf16> -> vector<16x256xbf16>
    %c240_417 = arith.constant 240 : index
    %c0_418 = arith.constant 0 : index
    %701 = vector.load %arg2[%c240_417, %c0_418] : memref<784x768xbf16, #tpu.memory_space<vmem>>, vector<16x256xbf16>
    %702 = arith.mulf %700, %701 : vector<16x256xbf16>
    %c240_419 = arith.constant 240 : index
    %c0_420 = arith.constant 0 : index
    %703 = vector.load %arg11[%c240_419, %c0_420] : memref<784x768xbf16, #tpu.memory_space<vmem>>, vector<16x256xbf16>
    tpu.vector_store %arg11[%c240_419, %c0_420], %702 {strides = array<i32>} : memref<784x768xbf16, #tpu.memory_space<vmem>>, vector<16x256xbf16>,
    %704 = vector.extract_strided_slice %607 {offsets = [0, 239], sizes = [16, 17], strides = [1, 1]} : vector<16x256xbf16> to vector<16x17xbf16>
    %705 = vector.extract_strided_slice %607 {offsets = [0, 0], sizes = [16, 239], strides = [1, 1]} : vector<16x256xbf16> to vector<16x239xbf16>
    %706 = tpu.concatenate %704, %705 in 1 : vector<16x17xbf16>, vector<16x239xbf16> -> vector<16x256xbf16>
    %c256_421 = arith.constant 256 : index
    %c0_422 = arith.constant 0 : index
    %707 = vector.load %arg2[%c256_421, %c0_422] : memref<784x768xbf16, #tpu.memory_space<vmem>>, vector<16x256xbf16>
    %708 = arith.mulf %706, %707 : vector<16x256xbf16>
    %c256_423 = arith.constant 256 : index
    %c0_424 = arith.constant 0 : index
    %709 = vector.load %arg11[%c256_423, %c0_424] : memref<784x768xbf16, #tpu.memory_space<vmem>>, vector<16x256xbf16>
    tpu.vector_store %arg11[%c256_423, %c0_424], %708 {strides = array<i32>} : memref<784x768xbf16, #tpu.memory_space<vmem>>, vector<16x256xbf16>,
    %710 = vector.extract_strided_slice %607 {offsets = [0, 240], sizes = [16, 16], strides = [1, 1]} : vector<16x256xbf16> to vector<16x16xbf16>
    %711 = vector.extract_strided_slice %607 {offsets = [0, 0], sizes = [16, 240], strides = [1, 1]} : vector<16x256xbf16> to vector<16x240xbf16>
    %712 = tpu.concatenate %710, %711 in 1 : vector<16x16xbf16>, vector<16x240xbf16> -> vector<16x256xbf16>
    %c272_425 = arith.constant 272 : index
    %c0_426 = arith.constant 0 : index
    %713 = vector.load %arg2[%c272_425, %c0_426] : memref<784x768xbf16, #tpu.memory_space<vmem>>, vector<16x256xbf16>
    %714 = arith.mulf %712, %713 : vector<16x256xbf16>
    %c272_427 = arith.constant 272 : index
    %c0_428 = arith.constant 0 : index
    %715 = vector.load %arg11[%c272_427, %c0_428] : memref<784x768xbf16, #tpu.memory_space<vmem>>, vector<16x256xbf16>
    tpu.vector_store %arg11[%c272_427, %c0_428], %714 {strides = array<i32>} : memref<784x768xbf16, #tpu.memory_space<vmem>>, vector<16x256xbf16>,
    %716 = vector.extract_strided_slice %607 {offsets = [0, 241], sizes = [16, 15], strides = [1, 1]} : vector<16x256xbf16> to vector<16x15xbf16>
    %717 = vector.extract_strided_slice %607 {offsets = [0, 0], sizes = [16, 241], strides = [1, 1]} : vector<16x256xbf16> to vector<16x241xbf16>
    %718 = tpu.concatenate %716, %717 in 1 : vector<16x15xbf16>, vector<16x241xbf16> -> vector<16x256xbf16>
    %c288_429 = arith.constant 288 : index
    %c0_430 = arith.constant 0 : index
    %719 = vector.load %arg2[%c288_429, %c0_430] : memref<784x768xbf16, #tpu.memory_space<vmem>>, vector<16x256xbf16>
    %720 = arith.mulf %718, %719 : vector<16x256xbf16>
    %c288_431 = arith.constant 288 : index
    %c0_432 = arith.constant 0 : index
    %721 = vector.load %arg11[%c288_431, %c0_432] : memref<784x768xbf16, #tpu.memory_space<vmem>>, vector<16x256xbf16>
    tpu.vector_store %arg11[%c288_431, %c0_432], %720 {strides = array<i32>} : memref<784x768xbf16, #tpu.memory_space<vmem>>, vector<16x256xbf16>,
    %722 = vector.extract_strided_slice %607 {offsets = [0, 242], sizes = [16, 14], strides = [1, 1]} : vector<16x256xbf16> to vector<16x14xbf16>
    %723 = vector.extract_strided_slice %607 {offsets = [0, 0], sizes = [16, 242], strides = [1, 1]} : vector<16x256xbf16> to vector<16x242xbf16>
    %724 = tpu.concatenate %722, %723 in 1 : vector<16x14xbf16>, vector<16x242xbf16> -> vector<16x256xbf16>
    %c304_433 = arith.constant 304 : index
    %c0_434 = arith.constant 0 : index
    %725 = vector.load %arg2[%c304_433, %c0_434] : memref<784x768xbf16, #tpu.memory_space<vmem>>, vector<16x256xbf16>
    %726 = arith.mulf %724, %725 : vector<16x256xbf16>
    %c304_435 = arith.constant 304 : index
    %c0_436 = arith.constant 0 : index
    %727 = vector.load %arg11[%c304_435, %c0_436] : memref<784x768xbf16, #tpu.memory_space<vmem>>, vector<16x256xbf16>
    tpu.vector_store %arg11[%c304_435, %c0_436], %726 {strides = array<i32>} : memref<784x768xbf16, #tpu.memory_space<vmem>>, vector<16x256xbf16>,
    %728 = vector.extract_strided_slice %607 {offsets = [0, 243], sizes = [16, 13], strides = [1, 1]} : vector<16x256xbf16> to vector<16x13xbf16>
    %729 = vector.extract_strided_slice %607 {offsets = [0, 0], sizes = [16, 243], strides = [1, 1]} : vector<16x256xbf16> to vector<16x243xbf16>
    %730 = tpu.concatenate %728, %729 in 1 : vector<16x13xbf16>, vector<16x243xbf16> -> vector<16x256xbf16>
    %c320_437 = arith.constant 320 : index
    %c0_438 = arith.constant 0 : index
    %731 = vector.load %arg2[%c320_437, %c0_438] : memref<784x768xbf16, #tpu.memory_space<vmem>>, vector<16x256xbf16>
    %732 = arith.mulf %730, %731 : vector<16x256xbf16>
    %c320_439 = arith.constant 320 : index
    %c0_440 = arith.constant 0 : index
    %733 = vector.load %arg11[%c320_439, %c0_440] : memref<784x768xbf16, #tpu.memory_space<vmem>>, vector<16x256xbf16>
    tpu.vector_store %arg11[%c320_439, %c0_440], %732 {strides = array<i32>} : memref<784x768xbf16, #tpu.memory_space<vmem>>, vector<16x256xbf16>,
    %734 = vector.extract_strided_slice %607 {offsets = [0, 253], sizes = [16, 3], strides = [1, 1]} : vector<16x256xbf16> to vector<16x3xbf16>
    %735 = vector.extract_strided_slice %607 {offsets = [0, 0], sizes = [16, 253], strides = [1, 1]} : vector<16x256xbf16> to vector<16x253xbf16>
    %736 = tpu.concatenate %734, %735 in 1 : vector<16x3xbf16>, vector<16x253xbf16> -> vector<16x256xbf16>
    %c336_441 = arith.constant 336 : index
    %c0_442 = arith.constant 0 : index
    %737 = vector.load %arg2[%c336_441, %c0_442] : memref<784x768xbf16, #tpu.memory_space<vmem>>, vector<16x256xbf16>
    %738 = arith.mulf %736, %737 : vector<16x256xbf16>
    %c336_443 = arith.constant 336 : index
    %c0_444 = arith.constant 0 : index
    %739 = vector.load %arg11[%c336_443, %c0_444] : memref<784x768xbf16, #tpu.memory_space<vmem>>, vector<16x256xbf16>
    tpu.vector_store %arg11[%c336_443, %c0_444], %738 {strides = array<i32>} : memref<784x768xbf16, #tpu.memory_space<vmem>>, vector<16x256xbf16>,
    %740 = vector.extract_strided_slice %607 {offsets = [0, 254], sizes = [16, 2], strides = [1, 1]} : vector<16x256xbf16> to vector<16x2xbf16>
    %741 = vector.extract_strided_slice %607 {offsets = [0, 0], sizes = [16, 254], strides = [1, 1]} : vector<16x256xbf16> to vector<16x254xbf16>
    %742 = tpu.concatenate %740, %741 in 1 : vector<16x2xbf16>, vector<16x254xbf16> -> vector<16x256xbf16>
    %c352_445 = arith.constant 352 : index
    %c0_446 = arith.constant 0 : index
    %743 = vector.load %arg2[%c352_445, %c0_446] : memref<784x768xbf16, #tpu.memory_space<vmem>>, vector<16x256xbf16>
    %744 = arith.mulf %742, %743 : vector<16x256xbf16>
    %c352_447 = arith.constant 352 : index
    %c0_448 = arith.constant 0 : index
    %745 = vector.load %arg11[%c352_447, %c0_448] : memref<784x768xbf16, #tpu.memory_space<vmem>>, vector<16x256xbf16>
    tpu.vector_store %arg11[%c352_447, %c0_448], %744 {strides = array<i32>} : memref<784x768xbf16, #tpu.memory_space<vmem>>, vector<16x256xbf16>,
    %746 = vector.extract_strided_slice %607 {offsets = [0, 255], sizes = [16, 1], strides = [1, 1]} : vector<16x256xbf16> to vector<16x1xbf16>
    %747 = vector.extract_strided_slice %607 {offsets = [0, 0], sizes = [16, 255], strides = [1, 1]} : vector<16x256xbf16> to vector<16x255xbf16>
    %748 = tpu.concatenate %746, %747 in 1 : vector<16x1xbf16>, vector<16x255xbf16> -> vector<16x256xbf16>
    %c368_449 = arith.constant 368 : index
    %c0_450 = arith.constant 0 : index
    %749 = vector.load %arg2[%c368_449, %c0_450] : memref<784x768xbf16, #tpu.memory_space<vmem>>, vector<16x256xbf16>
    %750 = arith.mulf %748, %749 : vector<16x256xbf16>
    %c368_451 = arith.constant 368 : index
    %c0_452 = arith.constant 0 : index
    %751 = vector.load %arg11[%c368_451, %c0_452] : memref<784x768xbf16, #tpu.memory_space<vmem>>, vector<16x256xbf16>
    tpu.vector_store %arg11[%c368_451, %c0_452], %750 {strides = array<i32>} : memref<784x768xbf16, #tpu.memory_space<vmem>>, vector<16x256xbf16>,
    %c384_453 = arith.constant 384 : index
    %c0_454 = arith.constant 0 : index
    %752 = vector.load %arg11[%c384_453, %c0_454] : memref<784x768xbf16, #tpu.memory_space<vmem>>, vector<16x256xbf16>
    tpu.vector_store %arg11[%c384_453, %c0_454], %607 {strides = array<i32>} : memref<784x768xbf16, #tpu.memory_space<vmem>>, vector<16x256xbf16>,
    %753 = vector.extract_strided_slice %607 {offsets = [0, 1], sizes = [16, 255], strides = [1, 1]} : vector<16x256xbf16> to vector<16x255xbf16>
    %754 = vector.extract_strided_slice %607 {offsets = [0, 0], sizes = [16, 1], strides = [1, 1]} : vector<16x256xbf16> to vector<16x1xbf16>
    %755 = tpu.concatenate %753, %754 in 1 : vector<16x255xbf16>, vector<16x1xbf16> -> vector<16x256xbf16>
    %c400_455 = arith.constant 400 : index
    %c0_456 = arith.constant 0 : index
    %756 = vector.load %arg2[%c400_455, %c0_456] : memref<784x768xbf16, #tpu.memory_space<vmem>>, vector<16x256xbf16>
    %757 = arith.mulf %755, %756 : vector<16x256xbf16>
    %c400_457 = arith.constant 400 : index
    %c0_458 = arith.constant 0 : index
    %758 = vector.load %arg11[%c400_457, %c0_458] : memref<784x768xbf16, #tpu.memory_space<vmem>>, vector<16x256xbf16>
    tpu.vector_store %arg11[%c400_457, %c0_458], %757 {strides = array<i32>} : memref<784x768xbf16, #tpu.memory_space<vmem>>, vector<16x256xbf16>,
    %759 = vector.extract_strided_slice %607 {offsets = [0, 2], sizes = [16, 254], strides = [1, 1]} : vector<16x256xbf16> to vector<16x254xbf16>
    %760 = vector.extract_strided_slice %607 {offsets = [0, 0], sizes = [16, 2], strides = [1, 1]} : vector<16x256xbf16> to vector<16x2xbf16>
    %761 = tpu.concatenate %759, %760 in 1 : vector<16x254xbf16>, vector<16x2xbf16> -> vector<16x256xbf16>
    %c416_459 = arith.constant 416 : index
    %c0_460 = arith.constant 0 : index
    %762 = vector.load %arg2[%c416_459, %c0_460] : memref<784x768xbf16, #tpu.memory_space<vmem>>, vector<16x256xbf16>
    %763 = arith.mulf %761, %762 : vector<16x256xbf16>
    %c416_461 = arith.constant 416 : index
    %c0_462 = arith.constant 0 : index
    %764 = vector.load %arg11[%c416_461, %c0_462] : memref<784x768xbf16, #tpu.memory_space<vmem>>, vector<16x256xbf16>
    tpu.vector_store %arg11[%c416_461, %c0_462], %763 {strides = array<i32>} : memref<784x768xbf16, #tpu.memory_space<vmem>>, vector<16x256xbf16>,
    %765 = vector.extract_strided_slice %607 {offsets = [0, 3], sizes = [16, 253], strides = [1, 1]} : vector<16x256xbf16> to vector<16x253xbf16>
    %766 = vector.extract_strided_slice %607 {offsets = [0, 0], sizes = [16, 3], strides = [1, 1]} : vector<16x256xbf16> to vector<16x3xbf16>
    %767 = tpu.concatenate %765, %766 in 1 : vector<16x253xbf16>, vector<16x3xbf16> -> vector<16x256xbf16>
    %c432_463 = arith.constant 432 : index
    %c0_464 = arith.constant 0 : index
    %768 = vector.load %arg2[%c432_463, %c0_464] : memref<784x768xbf16, #tpu.memory_space<vmem>>, vector<16x256xbf16>
    %769 = arith.mulf %767, %768 : vector<16x256xbf16>
    %c432_465 = arith.constant 432 : index
    %c0_466 = arith.constant 0 : index
    %770 = vector.load %arg11[%c432_465, %c0_466] : memref<784x768xbf16, #tpu.memory_space<vmem>>, vector<16x256xbf16>
    tpu.vector_store %arg11[%c432_465, %c0_466], %769 {strides = array<i32>} : memref<784x768xbf16, #tpu.memory_space<vmem>>, vector<16x256xbf16>,
    %771 = vector.extract_strided_slice %607 {offsets = [0, 13], sizes = [16, 243], strides = [1, 1]} : vector<16x256xbf16> to vector<16x243xbf16>
    %772 = vector.extract_strided_slice %607 {offsets = [0, 0], sizes = [16, 13], strides = [1, 1]} : vector<16x256xbf16> to vector<16x13xbf16>
    %773 = tpu.concatenate %771, %772 in 1 : vector<16x243xbf16>, vector<16x13xbf16> -> vector<16x256xbf16>
    %c448_467 = arith.constant 448 : index
    %c0_468 = arith.constant 0 : index
    %774 = vector.load %arg2[%c448_467, %c0_468] : memref<784x768xbf16, #tpu.memory_space<vmem>>, vector<16x256xbf16>
    %775 = arith.mulf %773, %774 : vector<16x256xbf16>
    %c448_469 = arith.constant 448 : index
    %c0_470 = arith.constant 0 : index
    %776 = vector.load %arg11[%c448_469, %c0_470] : memref<784x768xbf16, #tpu.memory_space<vmem>>, vector<16x256xbf16>
    tpu.vector_store %arg11[%c448_469, %c0_470], %775 {strides = array<i32>} : memref<784x768xbf16, #tpu.memory_space<vmem>>, vector<16x256xbf16>,
    %777 = vector.extract_strided_slice %607 {offsets = [0, 14], sizes = [16, 242], strides = [1, 1]} : vector<16x256xbf16> to vector<16x242xbf16>
    %778 = vector.extract_strided_slice %607 {offsets = [0, 0], sizes = [16, 14], strides = [1, 1]} : vector<16x256xbf16> to vector<16x14xbf16>
    %779 = tpu.concatenate %777, %778 in 1 : vector<16x242xbf16>, vector<16x14xbf16> -> vector<16x256xbf16>
    %c464_471 = arith.constant 464 : index
    %c0_472 = arith.constant 0 : index
    %780 = vector.load %arg2[%c464_471, %c0_472] : memref<784x768xbf16, #tpu.memory_space<vmem>>, vector<16x256xbf16>
    %781 = arith.mulf %779, %780 : vector<16x256xbf16>
    %c464_473 = arith.constant 464 : index
    %c0_474 = arith.constant 0 : index
    %782 = vector.load %arg11[%c464_473, %c0_474] : memref<784x768xbf16, #tpu.memory_space<vmem>>, vector<16x256xbf16>
    tpu.vector_store %arg11[%c464_473, %c0_474], %781 {strides = array<i32>} : memref<784x768xbf16, #tpu.memory_space<vmem>>, vector<16x256xbf16>,
    %783 = vector.extract_strided_slice %607 {offsets = [0, 15], sizes = [16, 241], strides = [1, 1]} : vector<16x256xbf16> to vector<16x241xbf16>
    %784 = vector.extract_strided_slice %607 {offsets = [0, 0], sizes = [16, 15], strides = [1, 1]} : vector<16x256xbf16> to vector<16x15xbf16>
    %785 = tpu.concatenate %783, %784 in 1 : vector<16x241xbf16>, vector<16x15xbf16> -> vector<16x256xbf16>
    %c480_475 = arith.constant 480 : index
    %c0_476 = arith.constant 0 : index
    %786 = vector.load %arg2[%c480_475, %c0_476] : memref<784x768xbf16, #tpu.memory_space<vmem>>, vector<16x256xbf16>
    %787 = arith.mulf %785, %786 : vector<16x256xbf16>
    %c480_477 = arith.constant 480 : index
    %c0_478 = arith.constant 0 : index
    %788 = vector.load %arg11[%c480_477, %c0_478] : memref<784x768xbf16, #tpu.memory_space<vmem>>, vector<16x256xbf16>
    tpu.vector_store %arg11[%c480_477, %c0_478], %787 {strides = array<i32>} : memref<784x768xbf16, #tpu.memory_space<vmem>>, vector<16x256xbf16>,
    %789 = vector.extract_strided_slice %607 {offsets = [0, 16], sizes = [16, 240], strides = [1, 1]} : vector<16x256xbf16> to vector<16x240xbf16>
    %790 = vector.extract_strided_slice %607 {offsets = [0, 0], sizes = [16, 16], strides = [1, 1]} : vector<16x256xbf16> to vector<16x16xbf16>
    %791 = tpu.concatenate %789, %790 in 1 : vector<16x240xbf16>, vector<16x16xbf16> -> vector<16x256xbf16>
    %c496_479 = arith.constant 496 : index
    %c0_480 = arith.constant 0 : index
    %792 = vector.load %arg2[%c496_479, %c0_480] : memref<784x768xbf16, #tpu.memory_space<vmem>>, vector<16x256xbf16>
    %793 = arith.mulf %791, %792 : vector<16x256xbf16>
    %c496_481 = arith.constant 496 : index
    %c0_482 = arith.constant 0 : index
    %794 = vector.load %arg11[%c496_481, %c0_482] : memref<784x768xbf16, #tpu.memory_space<vmem>>, vector<16x256xbf16>
    tpu.vector_store %arg11[%c496_481, %c0_482], %793 {strides = array<i32>} : memref<784x768xbf16, #tpu.memory_space<vmem>>, vector<16x256xbf16>,
    %795 = vector.extract_strided_slice %607 {offsets = [0, 17], sizes = [16, 239], strides = [1, 1]} : vector<16x256xbf16> to vector<16x239xbf16>
    %796 = vector.extract_strided_slice %607 {offsets = [0, 0], sizes = [16, 17], strides = [1, 1]} : vector<16x256xbf16> to vector<16x17xbf16>
    %797 = tpu.concatenate %795, %796 in 1 : vector<16x239xbf16>, vector<16x17xbf16> -> vector<16x256xbf16>
    %c512_483 = arith.constant 512 : index
    %c0_484 = arith.constant 0 : index
    %798 = vector.load %arg2[%c512_483, %c0_484] : memref<784x768xbf16, #tpu.memory_space<vmem>>, vector<16x256xbf16>
    %799 = arith.mulf %797, %798 : vector<16x256xbf16>
    %c512_485 = arith.constant 512 : index
    %c0_486 = arith.constant 0 : index
    %800 = vector.load %arg11[%c512_485, %c0_486] : memref<784x768xbf16, #tpu.memory_space<vmem>>, vector<16x256xbf16>
    tpu.vector_store %arg11[%c512_485, %c0_486], %799 {strides = array<i32>} : memref<784x768xbf16, #tpu.memory_space<vmem>>, vector<16x256xbf16>,
    %801 = vector.extract_strided_slice %607 {offsets = [0, 18], sizes = [16, 238], strides = [1, 1]} : vector<16x256xbf16> to vector<16x238xbf16>
    %802 = vector.extract_strided_slice %607 {offsets = [0, 0], sizes = [16, 18], strides = [1, 1]} : vector<16x256xbf16> to vector<16x18xbf16>
    %803 = tpu.concatenate %801, %802 in 1 : vector<16x238xbf16>, vector<16x18xbf16> -> vector<16x256xbf16>
    %c528_487 = arith.constant 528 : index
    %c0_488 = arith.constant 0 : index
    %804 = vector.load %arg2[%c528_487, %c0_488] : memref<784x768xbf16, #tpu.memory_space<vmem>>, vector<16x256xbf16>
    %805 = arith.mulf %803, %804 : vector<16x256xbf16>
    %c528_489 = arith.constant 528 : index
    %c0_490 = arith.constant 0 : index
    %806 = vector.load %arg11[%c528_489, %c0_490] : memref<784x768xbf16, #tpu.memory_space<vmem>>, vector<16x256xbf16>
    tpu.vector_store %arg11[%c528_489, %c0_490], %805 {strides = array<i32>} : memref<784x768xbf16, #tpu.memory_space<vmem>>, vector<16x256xbf16>,
    %807 = vector.extract_strided_slice %607 {offsets = [0, 19], sizes = [16, 237], strides = [1, 1]} : vector<16x256xbf16> to vector<16x237xbf16>
    %808 = vector.extract_strided_slice %607 {offsets = [0, 0], sizes = [16, 19], strides = [1, 1]} : vector<16x256xbf16> to vector<16x19xbf16>
    %809 = tpu.concatenate %807, %808 in 1 : vector<16x237xbf16>, vector<16x19xbf16> -> vector<16x256xbf16>
    %c544_491 = arith.constant 544 : index
    %c0_492 = arith.constant 0 : index
    %810 = vector.load %arg2[%c544_491, %c0_492] : memref<784x768xbf16, #tpu.memory_space<vmem>>, vector<16x256xbf16>
    %811 = arith.mulf %809, %810 : vector<16x256xbf16>
    %c544_493 = arith.constant 544 : index
    %c0_494 = arith.constant 0 : index
    %812 = vector.load %arg11[%c544_493, %c0_494] : memref<784x768xbf16, #tpu.memory_space<vmem>>, vector<16x256xbf16>
    tpu.vector_store %arg11[%c544_493, %c0_494], %811 {strides = array<i32>} : memref<784x768xbf16, #tpu.memory_space<vmem>>, vector<16x256xbf16>,
    %813 = vector.extract_strided_slice %607 {offsets = [0, 29], sizes = [16, 227], strides = [1, 1]} : vector<16x256xbf16> to vector<16x227xbf16>
    %814 = vector.extract_strided_slice %607 {offsets = [0, 0], sizes = [16, 29], strides = [1, 1]} : vector<16x256xbf16> to vector<16x29xbf16>
    %815 = tpu.concatenate %813, %814 in 1 : vector<16x227xbf16>, vector<16x29xbf16> -> vector<16x256xbf16>
    %c560_495 = arith.constant 560 : index
    %c0_496 = arith.constant 0 : index
    %816 = vector.load %arg2[%c560_495, %c0_496] : memref<784x768xbf16, #tpu.memory_space<vmem>>, vector<16x256xbf16>
    %817 = arith.mulf %815, %816 : vector<16x256xbf16>
    %c560_497 = arith.constant 560 : index
    %c0_498 = arith.constant 0 : index
    %818 = vector.load %arg11[%c560_497, %c0_498] : memref<784x768xbf16, #tpu.memory_space<vmem>>, vector<16x256xbf16>
    tpu.vector_store %arg11[%c560_497, %c0_498], %817 {strides = array<i32>} : memref<784x768xbf16, #tpu.memory_space<vmem>>, vector<16x256xbf16>,
    %819 = vector.extract_strided_slice %607 {offsets = [0, 30], sizes = [16, 226], strides = [1, 1]} : vector<16x256xbf16> to vector<16x226xbf16>
    %820 = vector.extract_strided_slice %607 {offsets = [0, 0], sizes = [16, 30], strides = [1, 1]} : vector<16x256xbf16> to vector<16x30xbf16>
    %821 = tpu.concatenate %819, %820 in 1 : vector<16x226xbf16>, vector<16x30xbf16> -> vector<16x256xbf16>
    %c576_499 = arith.constant 576 : index
    %c0_500 = arith.constant 0 : index
    %822 = vector.load %arg2[%c576_499, %c0_500] : memref<784x768xbf16, #tpu.memory_space<vmem>>, vector<16x256xbf16>
    %823 = arith.mulf %821, %822 : vector<16x256xbf16>
    %c576_501 = arith.constant 576 : index
    %c0_502 = arith.constant 0 : index
    %824 = vector.load %arg11[%c576_501, %c0_502] : memref<784x768xbf16, #tpu.memory_space<vmem>>, vector<16x256xbf16>
    tpu.vector_store %arg11[%c576_501, %c0_502], %823 {strides = array<i32>} : memref<784x768xbf16, #tpu.memory_space<vmem>>, vector<16x256xbf16>,
    %825 = vector.extract_strided_slice %607 {offsets = [0, 31], sizes = [16, 225], strides = [1, 1]} : vector<16x256xbf16> to vector<16x225xbf16>
    %826 = vector.extract_strided_slice %607 {offsets = [0, 0], sizes = [16, 31], strides = [1, 1]} : vector<16x256xbf16> to vector<16x31xbf16>
    %827 = tpu.concatenate %825, %826 in 1 : vector<16x225xbf16>, vector<16x31xbf16> -> vector<16x256xbf16>
    %c592_503 = arith.constant 592 : index
    %c0_504 = arith.constant 0 : index
    %828 = vector.load %arg2[%c592_503, %c0_504] : memref<784x768xbf16, #tpu.memory_space<vmem>>, vector<16x256xbf16>
    %829 = arith.mulf %827, %828 : vector<16x256xbf16>
    %c592_505 = arith.constant 592 : index
    %c0_506 = arith.constant 0 : index
    %830 = vector.load %arg11[%c592_505, %c0_506] : memref<784x768xbf16, #tpu.memory_space<vmem>>, vector<16x256xbf16>
    tpu.vector_store %arg11[%c592_505, %c0_506], %829 {strides = array<i32>} : memref<784x768xbf16, #tpu.memory_space<vmem>>, vector<16x256xbf16>,
    %831 = vector.extract_strided_slice %607 {offsets = [0, 32], sizes = [16, 224], strides = [1, 1]} : vector<16x256xbf16> to vector<16x224xbf16>
    %832 = vector.extract_strided_slice %607 {offsets = [0, 0], sizes = [16, 32], strides = [1, 1]} : vector<16x256xbf16> to vector<16x32xbf16>
    %833 = tpu.concatenate %831, %832 in 1 : vector<16x224xbf16>, vector<16x32xbf16> -> vector<16x256xbf16>
    %c608_507 = arith.constant 608 : index
    %c0_508 = arith.constant 0 : index
    %834 = vector.load %arg2[%c608_507, %c0_508] : memref<784x768xbf16, #tpu.memory_space<vmem>>, vector<16x256xbf16>
    %835 = arith.mulf %833, %834 : vector<16x256xbf16>
    %c608_509 = arith.constant 608 : index
    %c0_510 = arith.constant 0 : index
    %836 = vector.load %arg11[%c608_509, %c0_510] : memref<784x768xbf16, #tpu.memory_space<vmem>>, vector<16x256xbf16>
    tpu.vector_store %arg11[%c608_509, %c0_510], %835 {strides = array<i32>} : memref<784x768xbf16, #tpu.memory_space<vmem>>, vector<16x256xbf16>,
    %837 = vector.extract_strided_slice %607 {offsets = [0, 33], sizes = [16, 223], strides = [1, 1]} : vector<16x256xbf16> to vector<16x223xbf16>
    %838 = vector.extract_strided_slice %607 {offsets = [0, 0], sizes = [16, 33], strides = [1, 1]} : vector<16x256xbf16> to vector<16x33xbf16>
    %839 = tpu.concatenate %837, %838 in 1 : vector<16x223xbf16>, vector<16x33xbf16> -> vector<16x256xbf16>
    %c624_511 = arith.constant 624 : index
    %c0_512 = arith.constant 0 : index
    %840 = vector.load %arg2[%c624_511, %c0_512] : memref<784x768xbf16, #tpu.memory_space<vmem>>, vector<16x256xbf16>
    %841 = arith.mulf %839, %840 : vector<16x256xbf16>
    %c624_513 = arith.constant 624 : index
    %c0_514 = arith.constant 0 : index
    %842 = vector.load %arg11[%c624_513, %c0_514] : memref<784x768xbf16, #tpu.memory_space<vmem>>, vector<16x256xbf16>
    tpu.vector_store %arg11[%c624_513, %c0_514], %841 {strides = array<i32>} : memref<784x768xbf16, #tpu.memory_space<vmem>>, vector<16x256xbf16>,
    %843 = vector.extract_strided_slice %607 {offsets = [0, 34], sizes = [16, 222], strides = [1, 1]} : vector<16x256xbf16> to vector<16x222xbf16>
    %844 = vector.extract_strided_slice %607 {offsets = [0, 0], sizes = [16, 34], strides = [1, 1]} : vector<16x256xbf16> to vector<16x34xbf16>
    %845 = tpu.concatenate %843, %844 in 1 : vector<16x222xbf16>, vector<16x34xbf16> -> vector<16x256xbf16>
    %c640_515 = arith.constant 640 : index
    %c0_516 = arith.constant 0 : index
    %846 = vector.load %arg2[%c640_515, %c0_516] : memref<784x768xbf16, #tpu.memory_space<vmem>>, vector<16x256xbf16>
    %847 = arith.mulf %845, %846 : vector<16x256xbf16>
    %c640_517 = arith.constant 640 : index
    %c0_518 = arith.constant 0 : index
    %848 = vector.load %arg11[%c640_517, %c0_518] : memref<784x768xbf16, #tpu.memory_space<vmem>>, vector<16x256xbf16>
    tpu.vector_store %arg11[%c640_517, %c0_518], %847 {strides = array<i32>} : memref<784x768xbf16, #tpu.memory_space<vmem>>, vector<16x256xbf16>,
    %849 = vector.extract_strided_slice %607 {offsets = [0, 35], sizes = [16, 221], strides = [1, 1]} : vector<16x256xbf16> to vector<16x221xbf16>
    %850 = vector.extract_strided_slice %607 {offsets = [0, 0], sizes = [16, 35], strides = [1, 1]} : vector<16x256xbf16> to vector<16x35xbf16>
    %851 = tpu.concatenate %849, %850 in 1 : vector<16x221xbf16>, vector<16x35xbf16> -> vector<16x256xbf16>
    %c656_519 = arith.constant 656 : index
    %c0_520 = arith.constant 0 : index
    %852 = vector.load %arg2[%c656_519, %c0_520] : memref<784x768xbf16, #tpu.memory_space<vmem>>, vector<16x256xbf16>
    %853 = arith.mulf %851, %852 : vector<16x256xbf16>
    %c656_521 = arith.constant 656 : index
    %c0_522 = arith.constant 0 : index
    %854 = vector.load %arg11[%c656_521, %c0_522] : memref<784x768xbf16, #tpu.memory_space<vmem>>, vector<16x256xbf16>
    tpu.vector_store %arg11[%c656_521, %c0_522], %853 {strides = array<i32>} : memref<784x768xbf16, #tpu.memory_space<vmem>>, vector<16x256xbf16>,
    %855 = vector.extract_strided_slice %607 {offsets = [0, 45], sizes = [16, 211], strides = [1, 1]} : vector<16x256xbf16> to vector<16x211xbf16>
    %856 = vector.extract_strided_slice %607 {offsets = [0, 0], sizes = [16, 45], strides = [1, 1]} : vector<16x256xbf16> to vector<16x45xbf16>
    %857 = tpu.concatenate %855, %856 in 1 : vector<16x211xbf16>, vector<16x45xbf16> -> vector<16x256xbf16>
    %c672_523 = arith.constant 672 : index
    %c0_524 = arith.constant 0 : index
    %858 = vector.load %arg2[%c672_523, %c0_524] : memref<784x768xbf16, #tpu.memory_space<vmem>>, vector<16x256xbf16>
    %859 = arith.mulf %857, %858 : vector<16x256xbf16>
    %c672_525 = arith.constant 672 : index
    %c0_526 = arith.constant 0 : index
    %860 = vector.load %arg11[%c672_525, %c0_526] : memref<784x768xbf16, #tpu.memory_space<vmem>>, vector<16x256xbf16>
    tpu.vector_store %arg11[%c672_525, %c0_526], %859 {strides = array<i32>} : memref<784x768xbf16, #tpu.memory_space<vmem>>, vector<16x256xbf16>,
    %861 = vector.extract_strided_slice %607 {offsets = [0, 46], sizes = [16, 210], strides = [1, 1]} : vector<16x256xbf16> to vector<16x210xbf16>
    %862 = vector.extract_strided_slice %607 {offsets = [0, 0], sizes = [16, 46], strides = [1, 1]} : vector<16x256xbf16> to vector<16x46xbf16>
    %863 = tpu.concatenate %861, %862 in 1 : vector<16x210xbf16>, vector<16x46xbf16> -> vector<16x256xbf16>
    %c688_527 = arith.constant 688 : index
    %c0_528 = arith.constant 0 : index
    %864 = vector.load %arg2[%c688_527, %c0_528] : memref<784x768xbf16, #tpu.memory_space<vmem>>, vector<16x256xbf16>
    %865 = arith.mulf %863, %864 : vector<16x256xbf16>
    %c688_529 = arith.constant 688 : index
    %c0_530 = arith.constant 0 : index
    %866 = vector.load %arg11[%c688_529, %c0_530] : memref<784x768xbf16, #tpu.memory_space<vmem>>, vector<16x256xbf16>
    tpu.vector_store %arg11[%c688_529, %c0_530], %865 {strides = array<i32>} : memref<784x768xbf16, #tpu.memory_space<vmem>>, vector<16x256xbf16>,
    %867 = vector.extract_strided_slice %607 {offsets = [0, 47], sizes = [16, 209], strides = [1, 1]} : vector<16x256xbf16> to vector<16x209xbf16>
    %868 = vector.extract_strided_slice %607 {offsets = [0, 0], sizes = [16, 47], strides = [1, 1]} : vector<16x256xbf16> to vector<16x47xbf16>
    %869 = tpu.concatenate %867, %868 in 1 : vector<16x209xbf16>, vector<16x47xbf16> -> vector<16x256xbf16>
    %c704_531 = arith.constant 704 : index
    %c0_532 = arith.constant 0 : index
    %870 = vector.load %arg2[%c704_531, %c0_532] : memref<784x768xbf16, #tpu.memory_space<vmem>>, vector<16x256xbf16>
    %871 = arith.mulf %869, %870 : vector<16x256xbf16>
    %c704_533 = arith.constant 704 : index
    %c0_534 = arith.constant 0 : index
    %872 = vector.load %arg11[%c704_533, %c0_534] : memref<784x768xbf16, #tpu.memory_space<vmem>>, vector<16x256xbf16>
    tpu.vector_store %arg11[%c704_533, %c0_534], %871 {strides = array<i32>} : memref<784x768xbf16, #tpu.memory_space<vmem>>, vector<16x256xbf16>,
    %873 = vector.extract_strided_slice %607 {offsets = [0, 48], sizes = [16, 208], strides = [1, 1]} : vector<16x256xbf16> to vector<16x208xbf16>
    %874 = vector.extract_strided_slice %607 {offsets = [0, 0], sizes = [16, 48], strides = [1, 1]} : vector<16x256xbf16> to vector<16x48xbf16>
    %875 = tpu.concatenate %873, %874 in 1 : vector<16x208xbf16>, vector<16x48xbf16> -> vector<16x256xbf16>
    %c720_535 = arith.constant 720 : index
    %c0_536 = arith.constant 0 : index
    %876 = vector.load %arg2[%c720_535, %c0_536] : memref<784x768xbf16, #tpu.memory_space<vmem>>, vector<16x256xbf16>
    %877 = arith.mulf %875, %876 : vector<16x256xbf16>
    %c720_537 = arith.constant 720 : index
    %c0_538 = arith.constant 0 : index
    %878 = vector.load %arg11[%c720_537, %c0_538] : memref<784x768xbf16, #tpu.memory_space<vmem>>, vector<16x256xbf16>
    tpu.vector_store %arg11[%c720_537, %c0_538], %877 {strides = array<i32>} : memref<784x768xbf16, #tpu.memory_space<vmem>>, vector<16x256xbf16>,
    %879 = vector.extract_strided_slice %607 {offsets = [0, 49], sizes = [16, 207], strides = [1, 1]} : vector<16x256xbf16> to vector<16x207xbf16>
    %880 = vector.extract_strided_slice %607 {offsets = [0, 0], sizes = [16, 49], strides = [1, 1]} : vector<16x256xbf16> to vector<16x49xbf16>
    %881 = tpu.concatenate %879, %880 in 1 : vector<16x207xbf16>, vector<16x49xbf16> -> vector<16x256xbf16>
    %c736_539 = arith.constant 736 : index
    %c0_540 = arith.constant 0 : index
    %882 = vector.load %arg2[%c736_539, %c0_540] : memref<784x768xbf16, #tpu.memory_space<vmem>>, vector<16x256xbf16>
    %883 = arith.mulf %881, %882 : vector<16x256xbf16>
    %c736_541 = arith.constant 736 : index
    %c0_542 = arith.constant 0 : index
    %884 = vector.load %arg11[%c736_541, %c0_542] : memref<784x768xbf16, #tpu.memory_space<vmem>>, vector<16x256xbf16>
    tpu.vector_store %arg11[%c736_541, %c0_542], %883 {strides = array<i32>} : memref<784x768xbf16, #tpu.memory_space<vmem>>, vector<16x256xbf16>,
    %885 = vector.extract_strided_slice %607 {offsets = [0, 50], sizes = [16, 206], strides = [1, 1]} : vector<16x256xbf16> to vector<16x206xbf16>
    %886 = vector.extract_strided_slice %607 {offsets = [0, 0], sizes = [16, 50], strides = [1, 1]} : vector<16x256xbf16> to vector<16x50xbf16>
    %887 = tpu.concatenate %885, %886 in 1 : vector<16x206xbf16>, vector<16x50xbf16> -> vector<16x256xbf16>
    %c752_543 = arith.constant 752 : index
    %c0_544 = arith.constant 0 : index
    %888 = vector.load %arg2[%c752_543, %c0_544] : memref<784x768xbf16, #tpu.memory_space<vmem>>, vector<16x256xbf16>
    %889 = arith.mulf %887, %888 : vector<16x256xbf16>
    %c752_545 = arith.constant 752 : index
    %c0_546 = arith.constant 0 : index
    %890 = vector.load %arg11[%c752_545, %c0_546] : memref<784x768xbf16, #tpu.memory_space<vmem>>, vector<16x256xbf16>
    tpu.vector_store %arg11[%c752_545, %c0_546], %889 {strides = array<i32>} : memref<784x768xbf16, #tpu.memory_space<vmem>>, vector<16x256xbf16>,
    %891 = vector.extract_strided_slice %607 {offsets = [0, 51], sizes = [16, 205], strides = [1, 1]} : vector<16x256xbf16> to vector<16x205xbf16>
    %892 = vector.extract_strided_slice %607 {offsets = [0, 0], sizes = [16, 51], strides = [1, 1]} : vector<16x256xbf16> to vector<16x51xbf16>
    %893 = tpu.concatenate %891, %892 in 1 : vector<16x205xbf16>, vector<16x51xbf16> -> vector<16x256xbf16>
    %c768_547 = arith.constant 768 : index
    %c0_548 = arith.constant 0 : index
    %894 = vector.load %arg2[%c768_547, %c0_548] : memref<784x768xbf16, #tpu.memory_space<vmem>>, vector<16x256xbf16>
    %895 = arith.mulf %893, %894 : vector<16x256xbf16>
    %c768_549 = arith.constant 768 : index
    %c0_550 = arith.constant 0 : index
    %896 = vector.load %arg11[%c768_549, %c0_550] : memref<784x768xbf16, #tpu.memory_space<vmem>>, vector<16x256xbf16>
    tpu.vector_store %arg11[%c768_549, %c0_550], %895 {strides = array<i32>} : memref<784x768xbf16, #tpu.memory_space<vmem>>, vector<16x256xbf16>,
    %c0_551 = arith.constant 0 : index
    %c0_552 = arith.constant 0 : index
    %897 = vector.load %arg5[%c0_551, %c0_552] : memref<16x784xbf16, #tpu.memory_space<vmem>>, vector<16x784xbf16>
    %c0_553 = arith.constant 0 : index
    %c0_554 = arith.constant 0 : index
    %898 = vector.load %arg11[%c0_553, %c0_554] : memref<784x768xbf16, #tpu.memory_space<vmem>>, vector<784x256xbf16>
    %cst_555 = arith.constant dense<0.000000e+00> : vector<16x256xf32>
    %899 = tpu.matmul %897, %898, %cst_555 {dimension_numbers = #tpu.dot_dimension_numbers<[1], [0], [0], [1], [0, 0, 1, 1], [], []>} : vector<16x784xbf16>, vector<784x256xbf16>, vector<16x256xf32> -> vector<16x256xf32>
    %c0_556 = arith.constant 0 : index
    %c0_557 = arith.constant 0 : index
    %900 = vector.load %arg8[%c0_556, %c0_557] : memref<16x1xf32, #tpu.memory_space<vmem>>, vector<16x1xf32>
    %901 = vector.broadcast %900 : vector<16x1xf32> to vector<16x256xf32>
    %902 = arith.addf %899, %901 : vector<16x256xf32>
    %903 = arith.addf %902, %300 : vector<16x256xf32>
    %cst_558 = arith.constant 0.000000e+00 : f32
    %904 = vector.broadcast %cst_558 : f32 to vector<16x256xf32>
    %905 = arith.maximumf %903, %904 : vector<16x256xf32>
    %906 = arith.truncf %905 : vector<16x256xf32> to vector<16x256xbf16>
    %907 = arith.extf %906 : vector<16x256xbf16> to vector<16x256xf32>
    %908 = arith.subf %905, %907 : vector<16x256xf32>
    %909 = arith.truncf %908 : vector<16x256xf32> to vector<16x256xbf16>
    %c0_559 = arith.constant 0 : index
    %c0_560 = arith.constant 0 : index
    %910 = vector.load %arg9[%c0_559, %c0_560] : memref<256x1024xbf16, #tpu.memory_space<vmem>>, vector<256x1024xbf16>
    %cst_561 = arith.constant dense<0.000000e+00> : vector<16x1024xf32>
    %911 = tpu.matmul %906, %910, %cst_561 {dimension_numbers = #tpu.dot_dimension_numbers<[1], [0], [0], [1], [0, 0, 1, 1], [], []>} : vector<16x256xbf16>, vector<256x1024xbf16>, vector<16x1024xf32> -> vector<16x1024xf32>
    %c0_562 = arith.constant 0 : index
    %c0_563 = arith.constant 0 : index
    %912 = vector.load %arg9[%c0_562, %c0_563] : memref<256x1024xbf16, #tpu.memory_space<vmem>>, vector<256x1024xbf16>
    %cst_564 = arith.constant dense<0.000000e+00> : vector<16x1024xf32>
    %913 = tpu.matmul %909, %912, %cst_564 {dimension_numbers = #tpu.dot_dimension_numbers<[1], [0], [0], [1], [0, 0, 1, 1], [], []>} : vector<16x256xbf16>, vector<256x1024xbf16>, vector<16x1024xf32> -> vector<16x1024xf32>
    %914 = arith.addf %911, %913 : vector<16x1024xf32>
    %c0_565 = arith.constant 0 : index
    %c0_566 = arith.constant 0 : index
    %c0_567 = arith.constant 0 : index
    %915 = vector.load %arg10[%c0_565, %c0_566, %c0_567] : memref<1x16x1024xf32, #tpu.memory_space<vmem>>, vector<1x16x1024xf32>
    %916 = vector.shape_cast %915 : vector<1x16x1024xf32> to vector<16x1024xf32>
    %917 = vector.shape_cast %914 : vector<16x1024xf32> to vector<1x16x1024xf32>
    tpu.vector_store %arg10[%c0_565, %c0_566, %c0_567], %917 {strides = array<i32>} : memref<1x16x1024xf32, #tpu.memory_space<vmem>>, vector<1x16x1024xf32>,
    return
  }
  func.func @transform_0(%arg0: i32) -> (i32, i32, i32) {
    %c0_i32 = arith.constant 0 : i32
    %c0_i32_0 = arith.constant 0 : i32
    %c0_i32_1 = arith.constant 0 : i32
    return %arg0, %c0_i32, %c0_i32_0 : i32, i32, i32
  }
  func.func @transform_1(%arg0: i32) -> (i32, i32) {
    %c0_i32 = arith.constant 0 : i32
    %c0_i32_0 = arith.constant 0 : i32
    %c0_i32_1 = arith.constant 0 : i32
    return %c0_i32, %c0_i32_0 : i32, i32
  }
  func.func @transform_2(%arg0: i32) -> (i32, i32) {
    %c0_i32 = arith.constant 0 : i32
    %c0_i32_0 = arith.constant 0 : i32
    %c0_i32_1 = arith.constant 0 : i32
    return %c0_i32, %c0_i32_0 : i32, i32
  }
  func.func @transform_3(%arg0: i32) -> (i32, i32) {
    %c0_i32 = arith.constant 0 : i32
    %c0_i32_0 = arith.constant 0 : i32
    %c0_i32_1 = arith.constant 0 : i32
    return %c0_i32, %c0_i32_0 : i32, i32
  }
  func.func @transform_4(%arg0: i32) -> (i32, i32) {
    %c0_i32 = arith.constant 0 : i32
    %c0_i32_0 = arith.constant 0 : i32
    %c0_i32_1 = arith.constant 0 : i32
    return %c0_i32, %c0_i32_0 : i32, i32
  }
  func.func @transform_5(%arg0: i32) -> (i32, i32) {
    %c0_i32 = arith.constant 0 : i32
    %c0_i32_0 = arith.constant 0 : i32
    %c0_i32_1 = arith.constant 0 : i32
    return %c0_i32, %c0_i32_0 : i32, i32
  }
  func.func @transform_6(%arg0: i32) -> (i32, i32) {
    %c0_i32 = arith.constant 0 : i32
    %c0_i32_0 = arith.constant 0 : i32
    %c0_i32_1 = arith.constant 0 : i32
    return %c0_i32, %c0_i32_0 : i32, i32
  }
  func.func @transform_7(%arg0: i32) -> (i32, i32) {
    %c0_i32 = arith.constant 0 : i32
    %c0_i32_0 = arith.constant 0 : i32
    %c0_i32_1 = arith.constant 0 : i32
    return %c0_i32, %c0_i32_0 : i32, i32
  }
  func.func @transform_8(%arg0: i32) -> (i32, i32) {
    %c0_i32 = arith.constant 0 : i32
    %c0_i32_0 = arith.constant 0 : i32
    %c0_i32_1 = arith.constant 0 : i32
    return %c0_i32, %c0_i32_0 : i32, i32
  }
  func.func @transform_9(%arg0: i32) -> (i32, i32, i32) {
    %c0_i32 = arith.constant 0 : i32
    %c0_i32_0 = arith.constant 0 : i32
    %c0_i32_1 = arith.constant 0 : i32
    return %arg0, %c0_i32, %c0_i32_0 : i32, i32, i32
  }
}

</mosaic_0001>

<bundles_post_ra>
// kernel: model_forward.1
= control target key start
LH: loop header
LB: loop body
LE: loop exit
PB: predicated region body
PF: predicated region fallthrough
CT: control target
= control target key end

     0   :  { %s16729_s30 = smov 0   ;;  %s21591_s0 = inlined_call_operand.vmem [shape: bf16[2,16,768], index: 0, kind: input, shape index: {}]   ;;  %s21592_s1 = inlined_call_operand.vmem [shape: bf16[784,768], index: 1, kind: input, shape index: {}]   ;;  %s21593_s2 = inlined_call_operand.vmem [shape: bf16[16,784], index: 2, kind: input, shape index: {}]   ;;  %s21594_s3 = inlined_call_operand.vmem [shape: bf16[16,784], index: 3, kind: input, shape index: {}]   ;;  %s21595_s4 = inlined_call_operand.vmem [shape: bf16[16,784], index: 4, kind: input, shape index: {}]   ;;  %s21596_s5 = inlined_call_operand.vmem [shape: f32[16,1], index: 5, kind: input, shape index: {}]   ;;  %s21597_s6 = inlined_call_operand.vmem [shape: f32[16,1], index: 6, kind: input, shape index: {}]   ;;  %s21598_s7 = inlined_call_operand.vmem [shape: f32[16,1], index: 7, kind: input, shape index: {}]   ;;  %s21599_s8 = inlined_call_operand.vmem [shape: bf16[256,1024], index: 8, kind: input, shape index: {}]   ;;  %s21600_s9 = inlined_call_operand.vmem [shape: f32[2,16,1024], index: 9, kind: output, shape index: {}]  }
   0x1   :  { %21922 = sst [smem:[#allocation80_spill]] %s21591_s0 }
   0x2   :  { %21923 = sst [smem:[#allocation81_spill]] %s21592_s1 }
   0x3   :  { %21924 = sst [smem:[#allocation82_spill]] %s21593_s2 }
   0x4   :  { %21925 = sst [smem:[#allocation83_spill]] %s21594_s3 }
   0x5   :  { %21926 = sst [smem:[#allocation84_spill]] %s21595_s4 }
   0x6   :  { %21927 = sst [smem:[#allocation85_spill]] %s21596_s5 }
   0x7   :  { %21928 = sst [smem:[#allocation86_spill]] %s21597_s6 }
   0x8   :  { %21929 = sst [smem:[#allocation87_spill]] %s21598_s7 }
   0x9   :  { %21930 = sst [smem:[#allocation88_spill]] %s21599_s8 }
   0xa   :  { %21931 = sst [smem:[#allocation89_spill]] %s21600_s9 }
   0xb LB: > { %21932 = sst [smem:[#allocation3_spill]] %s16628_s30  ;;  %s14151_s10 = sadd.s32 4294967295, %s16628_s30   ;;  %s16628_s30 = sphi %s16729_s30, %s19_s30  }
   0xc   : > { %p14155_p0 = scmp.ge.s32.totalorder %s16628_s30, 1  ;;  %p287_p1 = scmp.lt.s32.totalorder %s16628_s30, 3 }
   0xe   : > { %p288_p2 = pnand %p14155_p0, %p287_p1 }
  0x10   : > { %291 = sbr.rel (%p288_p2) target bundleno = 2375 (0x947), region = 56 }
  0x15   : > { %p323_p3 = scmp.lt.s32.totalorder %s14151_s10, 1  ;;  %s21934_s0 = sld [smem:[#allocation80_spill]]  ;;  %vm1118_vm0 = vcmask 285696   ;;  %vm1012_vm1 = vcmask 367616   ;;  %vm906_vm2 = vcmask 375808   ;;  %vm800_vm3 = vcmask 384000  }
  0x16   : > { %s21765_s15 = smov 35   ;;  %s21697_s16 = smov 45   ;;  %vm694_vm4 = vcmask 392192   ;;  %vm588_vm5 = vcmask 400384   ;;  %vm21811_vm6 = vcmask 408576   ;;  %vm21810_vm7 = vcmask 416768  }
  0x17   : > { %s22590_s10 = smov (!%p323_p3, %s14151_s10), 1  ;;  %s21763_s17 = smov 46   ;;  %vm21670_vm8 = vcmask 146432   ;;  %vm21663_vm9 = vcmask 154624   ;;  %vm21657_vm10 = vcmask 236544   ;;  %vm21651_vm11 = vcmask 244736  }
  0x18   : > { %21933 = sst [smem:[#allocation4_spill]] %s22590_s10  ;;  %s15784_s11 = smul.u32 48, %s22590_s10  ;;  %vm2814_vm12 = vcmask 7168   ;;  %vm21645_vm13 = vcmask 252928   ;;  %vm2708_vm14 = vcmask 15360   ;;  %vm21646_vm15 = vcmask 261120  }
  0x19   : > { %s21761_s18 = smov 47   ;;  %s21754_s19 = smov 48  }
  0x1a   : > { %s21752_s20 = smov 49   ;;  %s21745_s21 = smov 50  }
  0x1b   : > { %s16743_s14 = scalar_lea.vmem %s21934_s0, %s15784_s11  ;;  %s21615_s22 = smov 51  }
  0x1c   : > { %v16746_v0 = vld [vmem:[%s16743_s14 + $0x14] ss:$24 sps:$4 sm:$0xff]   ;;  %v16749_v1 = vld [vmem:[%s16743_s14] ss:$24 sps:$4 sm:$0xff]   ;;  %v16756_v2 = vld [vmem:[%s16743_s14 + $0x4] ss:$24 sps:$4 sm:$0xff]  }
  0x1d   : > { %1106 = vrot.lane.b32.xlu1 %v16746_v0, %s21765_s15  ;;  %1108 = vrot.lane.b32.xlu0 %v16749_v1, %s21765_s15  ;;  %s21613_s23 = smov 18   ;;  %s21609_s24 = smov 19   ;;  %v16919_v25 = vld [vmem:[%s16743_s14 + $0x8] ss:$24 sps:$4 sm:$0xff]   ;;  %v16967_v46 = vld [vmem:[%s16743_s14 + $0x4] ss:$24 sps:$4 sm:$0xff]  }
  0x1e   : > { %s21607_s25 = smov 29   ;;  %s21605_s26 = smov 30   ;;  %v16604_v52 = vld [vmem:[%s16743_s14 + $0x14] ss:$24 sps:$4 sm:$0xff]   ;;  %v16999_v60 = vld [vmem:[%s16743_s14] ss:$24 sps:$4 sm:$0xff]  }
  0x1f   : > { %s21741_s27 = smov 1   ;;  %s21601_s28 = smov 31  }
  0x20   : > { %s21739_s29 = smov 2   ;;  %s21603_s11 = smov 32  }
  0x21   : > { %1002 = vrot.lane.b32.xlu1 %v16749_v1, %s21697_s16  ;;  %1110 = vrot.lane.b32.xlu0 %v16756_v2, %s21765_s15  ;;  %s21721_s12 = smov 3   ;;  %s21611_s13 = smov 33  }
  0x22   : > { %s21935_s1 = sld [smem:[#allocation81_spill]]  ;;  %s21999_s30 = smov 34  }
  0x23   : > { %s21936_s2 = sld [smem:[#allocation82_spill]]  ;;  %s22001_s0 = smov 125  }
  0x24   : > { %s22004_s8 = smov 126   ;;  %s22006_s10 = smov 96  }
  0x25   : > { %1000 = vrot.lane.b32.xlu1 %v16746_v0, %s21697_s16  ;;  %1004 = vrot.lane.b32.xlu0 %v16756_v2, %s21697_s16  ;;  %s22009_s3 = smov 98   ;;  %s22010_s5 = smov 99  }
  0x26   : > { %s22011_s7 = smov 35   ;;  %s22070_s6 = smov 15  }
  0x27   : > { %s22085_s9 = smov 125   ;;  %s22230_s4 = smov 49  }
  0x28   : > { %v15849_v5 = vld [vmem:[%s21935_s1 + $0x154] ss:$24 sps:$4 sm:$0xff]   ;;  %v15851_v6 = vld [vmem:[%s21935_s1 + $0x150] ss:$24 sps:$4 sm:$0xff]   ;;  %v15852_v10 = vld [vmem:[%s21935_s1 + $0x124] ss:$24 sps:$4 sm:$0xff]  }
  0x29   : > { %898 = vrot.lane.b32.xlu1 %v16756_v2, %s21763_s17  ;;  %896 = vrot.lane.b32.xlu0 %v16749_v1, %s21763_s17  ;;  %v15854_v11 = vld [vmem:[%s21935_s1 + $0x120] ss:$24 sps:$4 sm:$0xff]   ;;  %v15855_v22 = vld [vmem:[%s21935_s1 + $0xf4] ss:$24 sps:$4 sm:$0xff]  }
  0x2a   : > { %v15920_v20 = vld [vmem:[%s21936_s2 + $0x4] ss:$28 sps:$4 sm:$0xff]   ;;  %v15859_v26 = vld [vmem:[%s21935_s1 + $0xf0] ss:$24 sps:$4 sm:$0xff]   ;;  %v15863_v38 = vld [vmem:[%s21935_s1 + $0x94] ss:$24 sps:$4 sm:$0xff]  }
  0x2b   : > { %7300 = vmatprep.mubr.bf16.mxu0 %v15920_v20  ;;  %v15860_v31 = vld [vmem:[%s21935_s1 + $0xc4] ss:$24 sps:$4 sm:$0xff]   ;;  %v15862_v32 = vld [vmem:[%s21935_s1 + $0xc0] ss:$24 sps:$4 sm:$0xff]   ;;  %v15865_v44 = vld [vmem:[%s21935_s1 + $0x90] ss:$24 sps:$4 sm:$0xff]  }
  0x2c   : > { %v15866_v50 = vld [vmem:[%s21935_s1 + $0x64] ss:$24 sps:$4 sm:$0xff]   ;;  %v15868_v53 = vld [vmem:[%s21935_s1 + $0x60] ss:$24 sps:$4 sm:$0xff]   ;;  %v15869_v58 = vld [vmem:[%s21935_s1 + $0x34] ss:$24 sps:$4 sm:$0xff]  }
  0x2d   : > { %790 = vrot.lane.b32.xlu1 %v16749_v1, %s21761_s18  ;;  %894 = vrot.lane.b32.xlu0 %v16746_v0, %s21763_s17 }
  0x31   : > { %788 = vrot.lane.b32.xlu1 %v16746_v0, %s21761_s18  ;;  %792 = vrot.lane.b32.xlu0 %v16756_v2, %s21761_s18 }
  0x35   : > { %686 = vrot.lane.b32.xlu1 %v16756_v2, %s21754_s19  ;;  %684 = vrot.lane.b32.xlu0 %v16749_v1, %s21754_s19 }
  0x39   : > { %578 = vrot.lane.b32.xlu1 %v16749_v1, %s21752_s20  ;;  %682 = vrot.lane.b32.xlu0 %v16746_v0, %s21754_s19 }
  0x3d   : > { %576 = vrot.lane.b32.xlu1 %v16746_v0, %s21752_s20  ;;  %580 = vrot.lane.b32.xlu0 %v16756_v2, %s21752_s20 }
  0x41   : > { %474 = vrot.lane.b32.xlu1 %v16756_v2, %s21745_s21  ;;  %472 = vrot.lane.b32.xlu0 %v16749_v1, %s21745_s21 }
  0x45   : > { %366 = vrot.lane.b32.xlu1 %v16749_v1, %s21615_s22  ;;  %470 = vrot.lane.b32.xlu0 %v16746_v0, %s21745_s21 }
  0x49   : > { %345 = vrot.lane.b32.xlu1 %v16746_v0, %s21615_s22  ;;  %368 = vrot.lane.b32.xlu0 %v16756_v2, %s21615_s22  ;;  %s21729_s22 = smov 15  }
  0x4d   : > { %1958 = vrot.lane.b32.xlu1 %v16756_v2, %s21613_s23  ;;  %1956 = vrot.lane.b32.xlu0 %v16749_v1, %s21613_s23 }
  0x51   : > { %1850 = vrot.lane.b32.xlu1 %v16749_v1, %s21609_s24  ;;  %1954 = vrot.lane.b32.xlu0 %v16746_v0, %s21613_s23  ;;  %s21621_s23 = smov 95  }
  0x55   : > { %1848 = vrot.lane.b32.xlu1 %v16746_v0, %s21609_s24  ;;  %1852 = vrot.lane.b32.xlu0 %v16756_v2, %s21609_s24  ;;  %s21731_s24 = smov 14  }
  0x59   : > { %1746 = vrot.lane.b32.xlu1 %v16756_v2, %s21607_s25  ;;  %1744 = vrot.lane.b32.xlu0 %v16749_v1, %s21607_s25 }
  0x5d   : > { %1638 = vrot.lane.b32.xlu1 %v16749_v1, %s21605_s26  ;;  %1742 = vrot.lane.b32.xlu0 %v16746_v0, %s21607_s25  ;;  %s21633_s25 = smov 112  }
  0x61   : > { %2804 = vrot.lane.b32.xlu1 %v16749_v1, %s21741_s27  ;;  %1640 = vrot.lane.b32.xlu0 %v16756_v2, %s21605_s26 }
  0x65   : > { %1636 = vrot.lane.b32.xlu1 %v16746_v0, %s21605_s26  ;;  %2806 = vrot.lane.b32.xlu0 %v16756_v2, %s21741_s27  ;;  %s21623_s26 = smov 96  }
  0x69   : > { %1532 = vrot.lane.b32.xlu1 %v16749_v1, %s21601_s28  ;;  %2802 = vrot.lane.b32.xlu0 %v16746_v0, %s21741_s27 }
  0x6d   : > { %2698 = vrot.lane.b32.xlu1 %v16749_v1, %s21739_s29  ;;  %1534 = vrot.lane.b32.xlu0 %v16756_v2, %s21601_s28 }
  0x71   : > { %1530 = vrot.lane.b32.xlu1 %v16746_v0, %s21601_s28  ;;  %2700 = vrot.lane.b32.xlu0 %v16756_v2, %s21739_s29  ;;  %s21617_s28 = smov 13  }
  0x75   : > { %1426 = vrot.lane.b32.xlu1 %v16749_v1, %s21603_s11  ;;  %2696 = vrot.lane.b32.xlu0 %v16746_v0, %s21739_s29 }
  0x79   : > { %2592 = vrot.lane.b32.xlu1 %v16749_v1, %s21721_s12  ;;  %1428 = vrot.lane.b32.xlu0 %v16756_v2, %s21603_s11 }
  0x7d   : > { %1424 = vrot.lane.b32.xlu1 %v16746_v0, %s21603_s11  ;;  %2594 = vrot.lane.b32.xlu0 %v16756_v2, %s21721_s12  ;;  %s21619_s11 = smov 34  }
  0x81   : > { %1320 = vrot.lane.b32.xlu1 %v16749_v1, %s21611_s13  ;;  %2590 = vrot.lane.b32.xlu0 %v16746_v0, %s21721_s12 }
  0x85   : > { %2486 = vrot.lane.b32.xlu1 %v16749_v1, %s21617_s28  ;;  %1322 = vrot.lane.b32.xlu0 %v16756_v2, %s21611_s13 }
  0x89   : > { %1318 = vrot.lane.b32.xlu1 %v16746_v0, %s21611_s13  ;;  %2488 = vrot.lane.b32.xlu0 %v16756_v2, %s21617_s28  ;;  %s21625_s13 = smov 16  }
  0x8d   : > { %1214 = vrot.lane.b32.xlu1 %v16749_v1, %s21619_s11  ;;  %2484 = vrot.lane.b32.xlu0 %v16746_v0, %s21617_s28  ;;  %s21635_s28 = smov 113  }
  0x8f   : > { %v16870_v3 = vpop.permute.xlu1 %1106  ;;  %v1109_v4 = vpop.permute.xlu0 %1108 }
  0x90   : > { %v1132_v9 = vsel %vm1118_vm0, %v16870_v3, %v1109_v4 }
  0x91   : > { %2380 = vrot.lane.b32.xlu1 %v16749_v1, %s21731_s24  ;;  %1216 = vrot.lane.b32.xlu0 %v16756_v2, %s21619_s11  ;;  %v1170_v15 = vmul.bf16 %v15851_v6, %v1132_v9  ;;  %v15874_v9 = vld [vmem:[%s21935_s1] ss:$24 sps:$4 sm:$0xff]  }
  0x93   : > { %v1003_v7 = vpop.permute.xlu1 %1002  ;;  %v16882_v8 = vpop.permute.xlu0 %1110 }
  0x94   : > { %v1119_v12 = vsel %vm1118_vm0, %v1109_v4, %v16882_v8 }
  0x95   : > { %1212 = vrot.lane.b32.xlu1 %v16746_v0, %s21619_s11  ;;  %2382 = vrot.lane.b32.xlu0 %v16756_v2, %s21731_s24  ;;  %v1171_v13 = vmul.bf16 %v15849_v5, %v1119_v12  ;;  %s21627_s11 = smov 97  }
  0x97   : > { %v16898_v14 = vpop.permute.xlu1 %1000  ;;  %7268 = vmatprep.subr.bf16.mxu0 %v1171_v13  ;;  %v16902_v17 = vpop.permute.xlu0 %1004 }
  0x98   : > { %v1026_v16 = vsel %vm1012_vm1, %v16898_v14, %v1003_v7  ;;  %v1013_v18 = vsel %vm1012_vm1, %v1003_v7, %v16902_v17  ;;  %7269 = vmatpush1.bf16.msra.mxu0 %v1170_v15  ;;  %v15872_v7 = vld [vmem:[%s21935_s1 + $0x4] ss:$24 sps:$4 sm:$0xff]  }
  0x99   : > { %2274 = vrot.lane.b32.xlu1 %v16749_v1, %s21729_s22  ;;  %v1064_v19 = vmul.bf16 %v15854_v11, %v1026_v16  ;;  %2378 = vrot.lane.b32.xlu0 %v16746_v0, %s21731_s24  ;;  %v1065_v21 = vmul.bf16 %v15852_v10, %v1013_v18  ;;  %v15875_v16 = vld [vmem:[%s21935_s1 + $0x2d4] ss:$24 sps:$4 sm:$0xff]  }
  0x9b   : > { %v16916_v23 = vpop.permute.xlu1 %898  ;;  %7270 = vmatprep.subr.bf16.mxu0 %v1065_v21  ;;  %v897_v24 = vpop.permute.xlu0 %896 }
  0x9c   : > { %v907_v27 = vsel %vm906_vm2, %v897_v24, %v16916_v23  ;;  %7271 = vmatpush1.bf16.msra.mxu0 %v1064_v19 }
  0x9d   : > { %4400 = vrot.lane.b32.xlu1 %v16756_v2, %s21621_s23  ;;  %2276 = vrot.lane.b32.xlu0 %v16756_v2, %s21729_s22  ;;  %v959_v28 = vmul.bf16 %v15855_v22, %v907_v27 }
  0x9f   : > { %v791_v29 = vpop.permute.xlu1 %790  ;;  %7272 = vmatprep.subr.bf16.mxu0 %v959_v28  ;;  %v16930_v30 = vpop.permute.xlu0 %894 }
  0xa0   : > { %v920_v33 = vsel %vm906_vm2, %v16930_v30, %v897_v24  ;;  %v15877_v24 = vld [vmem:[%s21935_s1 + $0x2d0] ss:$24 sps:$4 sm:$0xff]  }
  0xa1   : > { %2272 = vrot.lane.b32.xlu1 %v16746_v0, %s21729_s22  ;;  %4402 = vrot.lane.b32.xlu0 %v16919_v25, %s21621_s23  ;;  %v958_v34 = vmul.bf16 %v15859_v26, %v920_v33 }
  0xa3   : > { %v16944_v35 = vpop.permute.xlu1 %788  ;;  %7273 = vmatpush1.bf16.msra.mxu0 %v958_v34  ;;  %v16948_v37 = vpop.permute.xlu0 %792 }
  0xa4   : > { %v814_v36 = vsel %vm800_vm3, %v16944_v35, %v791_v29  ;;  %v801_v39 = vsel %vm800_vm3, %v791_v29, %v16948_v37 }
  0xa5   : > { %2168 = vrot.lane.b32.xlu1 %v16749_v1, %s21625_s13  ;;  %v852_v40 = vmul.bf16 %v15862_v32, %v814_v36  ;;  %4398 = vrot.lane.b32.xlu0 %v16749_v1, %s21621_s23  ;;  %v853_v41 = vmul.bf16 %v15860_v31, %v801_v39  ;;  %s21629_s23 = smov 17   ;;  %v15871_v1 = vld [vmem:[%s21935_s1 + $0x30] ss:$24 sps:$4 sm:$0xff]   ;;  %v15878_v31 = vld [vmem:[%s21935_s1 + $0x2a4] ss:$24 sps:$4 sm:$0xff]  }
  0xa6   : > { %v15880_v32 = vld [vmem:[%s21935_s1 + $0x2a0] ss:$24 sps:$4 sm:$0xff]  }
  0xa7   : > { %v16959_v42 = vpop.permute.xlu1 %686  ;;  %7274 = vmatprep.subr.bf16.mxu0 %v853_v41  ;;  %v685_v43 = vpop.permute.xlu0 %684 }
  0xa8   : > { %v695_v45 = vsel %vm694_vm4, %v685_v43, %v16959_v42  ;;  %7275 = vmatpush1.bf16.msra.mxu0 %v852_v40  ;;  %v15881_v40 = vld [vmem:[%s21935_s1 + $0x274] ss:$24 sps:$4 sm:$0xff]  }
  0xa9   : > { %4294 = vrot.lane.b32.xlu1 %v16967_v46, %s21623_s26  ;;  %2170 = vrot.lane.b32.xlu0 %v16967_v46, %s21625_s13  ;;  %v747_v47 = vmul.bf16 %v15863_v38, %v695_v45 }
  0xab   : > { %v579_v48 = vpop.permute.xlu1 %578  ;;  %7276 = vmatprep.subr.bf16.mxu0 %v747_v47  ;;  %v16973_v49 = vpop.permute.xlu0 %682 }
  0xac   : > { %v708_v51 = vsel %vm694_vm4, %v16973_v49, %v685_v43 }
  0xad   : > { %2166 = vrot.lane.b32.xlu1 %v16604_v52, %s21625_s13  ;;  %4296 = vrot.lane.b32.xlu0 %v16919_v25, %s21623_s26  ;;  %v746_v54 = vmul.bf16 %v15865_v44, %v708_v51  ;;  %s21641_s13 = smov 109  }
  0xaf   : > { %v16987_v55 = vpop.permute.xlu1 %576  ;;  %7277 = vmatpush1.bf16.msra.mxu0 %v746_v54  ;;  %v16991_v57 = vpop.permute.xlu0 %580  ;;  %v15884_v54 = vld [vmem:[%s21935_s1 + $0x244] ss:$24 sps:$4 sm:$0xff]  }
  0xb0   : > { %21937 = vst [vmem:[#allocation5_spill] sm:$0xff] %v16987_v55  ;;  %v602_v56 = vsel %vm588_vm5, %v16987_v55, %v579_v48  ;;  %v589_v59 = vsel %vm588_vm5, %v579_v48, %v16991_v57  ;;  %v15883_v48 = vld [vmem:[%s21935_s1 + $0x270] ss:$24 sps:$4 sm:$0xff]  }
  0xb1   : > { %2062 = vrot.lane.b32.xlu1 %v16999_v60, %s21629_s23  ;;  %v640_v61 = vmul.bf16 %v15868_v53, %v602_v56  ;;  %4292 = vrot.lane.b32.xlu0 %v16999_v60, %s21623_s26  ;;  %v641_v62 = vmul.bf16 %v15866_v50, %v589_v59  ;;  %s21631_s26 = smov 98  }
  0xb3   : > { %v17005_v63 = vpop.permute.xlu1 %474  ;;  %7278 = vmatprep.subr.bf16.mxu0 %v641_v62  ;;  %v473_v0 = vpop.permute.xlu0 %472 }
  0xb4   : > { %v483_v2 = vsel %vm21811_vm6, %v473_v0, %v17005_v63  ;;  %7279 = vmatpush1.bf16.msra.mxu0 %v640_v61  ;;  %v15886_v61 = vld [vmem:[%s21935_s1 + $0x240] ss:$24 sps:$4 sm:$0xff]  }
  0xb5   : > { %4188 = vrot.lane.b32.xlu1 %v16967_v46, %s21627_s11  ;;  %2064 = vrot.lane.b32.xlu0 %v16967_v46, %s21629_s23  ;;  %v535_v4 = vmul.bf16 %v15869_v58, %v483_v2 }
  0xb7   : > { %v367_v5 = vpop.permute.xlu1 %366  ;;  %7280 = vmatprep.subr.bf16.mxu0 %v535_v4  ;;  %v17016_v6 = vpop.permute.xlu0 %470 }
  0xb8   : > { %21938 = vst [vmem:[#allocation6_spill] sm:$0xff] %v17016_v6  ;;  %v496_v10 = vsel %vm21811_vm6, %v17016_v6, %v473_v0  ;;  %v15887_v0 = vld [vmem:[%s21935_s1 + $0x454] ss:$24 sps:$4 sm:$0xff]  }
  0xb9   : > { %2060 = vrot.lane.b32.xlu1 %v16604_v52, %s21629_s23  ;;  %4190 = vrot.lane.b32.xlu0 %v16919_v25, %s21627_s11  ;;  %v534_v11 = vmul.bf16 %v15871_v1, %v496_v10  ;;  %s21643_s23 = smov 115  }
  0xbb   : > { %v17029_v12 = vpop.permute.xlu1 %345  ;;  %7281 = vmatpush1.bf16.msra.mxu0 %v534_v11  ;;  %v17033_v15 = vpop.permute.xlu0 %368 }
  0xbc   : > { %21939 = vst [vmem:[#allocation7_spill] sm:$0xff] %v17029_v12  ;;  %v390_v13 = vsel %vm21810_vm7, %v17029_v12, %v367_v5  ;;  %v377_v18 = vsel %vm21810_vm7, %v367_v5, %v17033_v15 }
  0xbd   : > { %3552 = vrot.lane.b32.xlu1 %v16967_v46, %s21633_s25  ;;  %v428_v19 = vmul.bf16 %v15874_v9, %v390_v13  ;;  %4186 = vrot.lane.b32.xlu0 %v16999_v60, %s21627_s11  ;;  %v429_v20 = vmul.bf16 %v15872_v7, %v377_v18  ;;  %s21637_s11 = smov 99   ;;  %v15889_v13 = vld [vmem:[%s21935_s1 + $0x450] ss:$24 sps:$4 sm:$0xff]  }
  0xbf   : > { %v17044_v21 = vpop.permute.xlu1 %1958  ;;  %7282 = vmatprep.subr.bf16.mxu0 %v429_v20  ;;  %v1957_v22 = vpop.permute.xlu0 %1956 }
  0xc0   : > { %v1967_v26 = vsel %vm21670_vm8, %v1957_v22, %v17044_v21  ;;  %7283 = vmatpush1.bf16.msra.mxu0 %v428_v19 }
  0xc1   : > { %4082 = vrot.lane.b32.xlu1 %v16967_v46, %s21631_s26  ;;  %3554 = vrot.lane.b32.xlu0 %v16919_v25, %s21633_s25  ;;  %v2019_v27 = vmul.bf16 %v15875_v16, %v1967_v26 }
  0xc3   : > { %v1851_v28 = vpop.permute.xlu1 %1850  ;;  %7284 = vmatprep.subr.bf16.mxu0 %v2019_v27  ;;  %v17055_v29 = vpop.permute.xlu0 %1954 }
  0xc4   : > { %21940 = vst [vmem:[#allocation8_spill] sm:$0xff] %v17055_v29  ;;  %v1980_v33 = vsel %vm21670_vm8, %v17055_v29, %v1957_v22  ;;  %v15890_v22 = vld [vmem:[%s21935_s1 + $0x214] ss:$24 sps:$4 sm:$0xff]   ;;  %vm21681_vm8 = vcmask 138240   ;;  %v15977_v29 = vld [vmem:[%s21935_s1 + $0x8a0] ss:$24 sps:$4 sm:$0xff]  }
  0xc5   : > { %3550 = vrot.lane.b32.xlu1 %v16999_v60, %s21633_s25  ;;  %4084 = vrot.lane.b32.xlu0 %v16919_v25, %s21631_s26  ;;  %v2018_v34 = vmul.bf16 %v15877_v24, %v1980_v33  ;;  %s21649_s25 = smov 125  }
  0xc7   : > { %v17069_v36 = vpop.permute.xlu1 %1848  ;;  %7285 = vmatpush2.bf16.msra.mxu0 %v2018_v34  ;;  %v17073_v39 = vpop.permute.xlu0 %1852 }
  0xc8   : > { %21941 = vst [vmem:[#allocation9_spill] sm:$0xff] %v17069_v36  ;;  %v1874_v38 = vsel %vm21663_vm9, %v17069_v36, %v1851_v28  ;;  %v1861_v41 = vsel %vm21663_vm9, %v1851_v28, %v17073_v39  ;;  %v15892_v28 = vld [vmem:[%s21935_s1 + $0x210] ss:$24 sps:$4 sm:$0xff]   ;;  %vm21669_vm9 = vcmask 777216  }
  0xc9   : > { %3446 = vrot.lane.b32.xlu1 %v16967_v46, %s21635_s28  ;;  %v1912_v43 = vmul.bf16 %v15880_v32, %v1874_v38  ;;  %4080 = vrot.lane.b32.xlu0 %v16999_v60, %s21631_s26  ;;  %v1913_v44 = vmul.bf16 %v15878_v31, %v1861_v41  ;;  %v15893_v32 = vld [vmem:[%s21935_s1 + $0x424] ss:$24 sps:$4 sm:$0xff]   ;;  %s21743_s26 = smov 94  }
  0xcb   : > { %v17084_v45 = vpop.permute.xlu1 %1746  ;;  %7286 = vmatprep.subr.bf16.mxu0 %v1913_v44  ;;  %v1745_v47 = vpop.permute.xlu0 %1744  ;;  %v15895_v44 = vld [vmem:[%s21935_s1 + $0x420] ss:$24 sps:$4 sm:$0xff]  }
  0xcc   : > { %v1755_v50 = vsel %vm21657_vm10, %v1745_v47, %v17084_v45  ;;  %7287 = vmatpush2.bf16.msra.mxu0 %v1912_v43 }
  0xcd   : > { %3976 = vrot.lane.b32.xlu1 %v16967_v46, %s21637_s11  ;;  %3448 = vrot.lane.b32.xlu0 %v16919_v25, %s21635_s28  ;;  %v1807_v51 = vmul.bf16 %v15881_v40, %v1755_v50 }
  0xcf   : > { %v1639_v52 = vpop.permute.xlu1 %1638  ;;  %7288 = vmatprep.subr.bf16.mxu0 %v1807_v51  ;;  %v17095_v53 = vpop.permute.xlu0 %1742 }
  0xd0   : > { %21942 = vst [vmem:[#allocation10_spill] sm:$0xff] %v17095_v53  ;;  %v1768_v56 = vsel %vm21657_vm10, %v17095_v53, %v1745_v47  ;;  %vm21792_vm10 = vcmask 113664   ;;  %v15971_v53 = vld [vmem:[%s21935_s1 + $0x8d0] ss:$24 sps:$4 sm:$0xff]  }
  0xd1   : > { %3444 = vrot.lane.b32.xlu1 %v16999_v60, %s21635_s28  ;;  %3978 = vrot.lane.b32.xlu0 %v16919_v25, %s21637_s11  ;;  %v1806_v58 = vmul.bf16 %v15883_v48, %v1768_v56  ;;  %s21639_s28 = smov 114  }
  0xd3   : > { %v2805_v59 = vpop.permute.xlu1 %2804  ;;  %7289 = vmatpush2.bf16.msra.mxu0 %v1806_v58  ;;  %v17109_v62 = vpop.permute.xlu0 %1640 }
  0xd4   : > { %v1649_v1 = vsel %vm21651_vm11, %v1639_v52, %v17109_v62 }
  0xd5   : > { %3340 = vrot.lane.b32.xlu1 %v16967_v46, %s21639_s28  ;;  %3974 = vrot.lane.b32.xlu0 %v16999_v60, %s21637_s11  ;;  %v1701_v2 = vmul.bf16 %v15884_v54, %v1649_v1  ;;  %s21655_s11 = smov 126  }
  0xd7   : > { %v17120_v4 = vpop.permute.xlu1 %1636  ;;  %7290 = vmatprep.subr.bf16.mxu0 %v1701_v2  ;;  %v17124_v7 = vpop.permute.xlu0 %2806 }
  0xd8   : > { %21943 = vst [vmem:[#allocation11_spill] sm:$0xff] %v17120_v4  ;;  %v1662_v5 = vsel %vm21651_vm11, %v17120_v4, %v1639_v52  ;;  %v2815_v10 = vsel %vm2814_vm12, %v2805_v59, %v17124_v7  ;;  %v15896_v52 = vld [vmem:[%s21935_s1 + $0x1e4] ss:$24 sps:$4 sm:$0xff]   ;;  %vm21793_vm11 = vcmask 105472  }
  0xd9   : > { %3870 = vrot.lane.b32.xlu1 %v16967_v46, %s21641_s13  ;;  %v1700_v9 = vmul.bf16 %v15886_v61, %v1662_v5  ;;  %3342 = vrot.lane.b32.xlu0 %v16919_v25, %s21639_s28  ;;  %v2867_v11 = vmul.bf16 %v15887_v0, %v2815_v10  ;;  %v15899_v0 = vld [vmem:[%s21935_s1 + $0x3f4] ss:$24 sps:$4 sm:$0xff]  }
  0xdb   : > { %v1533_v16 = vpop.permute.xlu1 %1532  ;;  %7291 = vmatpush2.bf16.msra.mxu0 %v1700_v9  ;;  %7311 = vmatprep.subr.bf16.mxu1 %v2867_v11  ;;  %v17135_v18 = vpop.permute.xlu0 %2802 }
  0xdc   : > { %21944 = vst [vmem:[#allocation12_spill] sm:$0xff] %v17135_v18  ;;  %v2828_v19 = vsel %vm2814_vm12, %v17135_v18, %v2805_v59  ;;  %v15898_v59 = vld [vmem:[%s21935_s1 + $0x1e0] ss:$24 sps:$4 sm:$0xff]   ;;  %v15959_v18 = vld [vmem:[%s21935_s1 + $0x630] ss:$24 sps:$4 sm:$0xff]  }
  0xdd   : > { %3338 = vrot.lane.b32.xlu1 %v16999_v60, %s21639_s28  ;;  %3872 = vrot.lane.b32.xlu0 %v16919_v25, %s21641_s13  ;;  %v2866_v20 = vmul.bf16 %v15889_v13, %v2828_v19  ;;  %s21647_s28 = smov 110   ;;  %v15901_v13 = vld [vmem:[%s21935_s1 + $0x3f0] ss:$24 sps:$4 sm:$0xff]  }
  0xdf   : > { %v2699_v24 = vpop.permute.xlu1 %2698  ;;  %7312 = vmatpush1.bf16.msra.mxu1 %v2866_v20  ;;  %v17146_v26 = vpop.permute.xlu0 %1534 }
  0xe0   : > { %v1543_v27 = vsel %vm21645_vm13, %v1533_v16, %v17146_v26 }
  0xe1   : > { %3234 = vrot.lane.b32.xlu1 %v16967_v46, %s21643_s23  ;;  %3868 = vrot.lane.b32.xlu0 %v16999_v60, %s21641_s13  ;;  %v1595_v31 = vmul.bf16 %v15890_v22, %v1543_v27  ;;  %s21661_s13 = smov 127  }
  0xe3   : > { %v17160_v33 = vpop.permute.xlu1 %1530  ;;  %7292 = vmatprep.subr.bf16.mxu0 %v1595_v31  ;;  %v17164_v38 = vpop.permute.xlu0 %2700 }
  0xe4   : > { %21945 = vst [vmem:[#allocation13_spill] sm:$0xff] %v17160_v33  ;;  %v1556_v34 = vsel %vm21645_vm13, %v17160_v33, %v1533_v16  ;;  %v2709_v40 = vsel %vm2708_vm14, %v2699_v24, %v17164_v38  ;;  %vm2602_vm13 = vcmask 23552  }
  0xe5   : > { %3764 = vrot.lane.b32.xlu1 %v16967_v46, %s21647_s28  ;;  %v1594_v41 = vmul.bf16 %v15892_v28, %v1556_v34  ;;  %3236 = vrot.lane.b32.xlu0 %v16919_v25, %s21643_s23  ;;  %v2761_v43 = vmul.bf16 %v15893_v32, %v2709_v40  ;;  %v15904_v32 = vld [vmem:[%s21935_s1 + $0x1b0] ss:$24 sps:$4 sm:$0xff]   ;;  %v15905_v40 = vld [vmem:[%s21935_s1 + $0x3c4] ss:$24 sps:$4 sm:$0xff]  }
  0xe7   : > { %v1427_v47 = vpop.permute.xlu1 %1426  ;;  %7293 = vmatpush2.bf16.msra.mxu0 %v1594_v41  ;;  %7313 = vmatprep.subr.bf16.mxu1 %v2761_v43  ;;  %v17175_v48 = vpop.permute.xlu0 %2696 }
  0xe8   : > { %21946 = vst [vmem:[#allocation14_spill] sm:$0xff] %v17175_v48  ;;  %v2722_v50 = vsel %vm2708_vm14, %v17175_v48, %v2699_v24  ;;  %v15902_v24 = vld [vmem:[%s21935_s1 + $0x1b4] ss:$24 sps:$4 sm:$0xff]   ;;  %v15947_v48 = vld [vmem:[%s21935_s1 + $0x690] ss:$24 sps:$4 sm:$0xff]  }
  0xe9   : > { %3232 = vrot.lane.b32.xlu1 %v16999_v60, %s21643_s23  ;;  %3766 = vrot.lane.b32.xlu0 %v16919_v25, %s21647_s28  ;;  %v2760_v51 = vmul.bf16 %v15895_v44, %v2722_v50  ;;  %s21653_s23 = smov 111  }
  0xeb   : > { %v2593_v54 = vpop.permute.xlu1 %2592  ;;  %7314 = vmatpush1.bf16.msra.mxu1 %v2760_v51  ;;  %v17186_v56 = vpop.permute.xlu0 %1428 }
  0xec   : > { %v1437_v58 = vsel %vm21646_vm15, %v1427_v47, %v17186_v56 }
  0xed   : > { %3128 = vrot.lane.b32.xlu1 %v16967_v46, %s21649_s25  ;;  %3762 = vrot.lane.b32.xlu0 %v16999_v60, %s21647_s28  ;;  %v1489_v61 = vmul.bf16 %v15896_v52, %v1437_v58  ;;  %v15907_v52 = vld [vmem:[%s21935_s1 + $0x3c0] ss:$24 sps:$4 sm:$0xff]   ;;  %s21692_s28 = smov 81  }
  0xef   : > { %v17200_v1 = vpop.permute.xlu1 %1424  ;;  %7294 = vmatprep.subr.bf16.mxu0 %v1489_v61  ;;  %v17204_v5 = vpop.permute.xlu0 %2594 }
  0xf0   : > { %21947 = vst [vmem:[#allocation15_spill] sm:$0xff] %v17200_v1  ;;  %v1450_v2 = vsel %vm21646_vm15, %v17200_v1, %v1427_v47  ;;  %v2603_v9 = vsel %vm2602_vm13, %v2593_v54, %v17204_v5  ;;  %vm21652_vm15 = vcmask 269312   ;;  %v15965_v1 = vld [vmem:[%s21935_s1 + $0x600] ss:$24 sps:$4 sm:$0xff]  }
  0xf1   : > { %3658 = vrot.lane.b32.xlu1 %v16967_v46, %s21653_s23  ;;  %v1488_v10 = vmul.bf16 %v15898_v59, %v1450_v2  ;;  %3130 = vrot.lane.b32.xlu0 %v16919_v25, %s21649_s25  ;;  %v2655_v11 = vmul.bf16 %v15899_v0, %v2603_v9  ;;  %v15908_v0 = vld [vmem:[%s21935_s1 + $0x184] ss:$24 sps:$4 sm:$0xff]  }
  0xf3   : > { %v1321_v16 = vpop.permute.xlu1 %1320  ;;  %7295 = vmatpush2.bf16.msra.mxu0 %v1488_v10  ;;  %7315 = vmatprep.subr.bf16.mxu1 %v2655_v11  ;;  %v17215_v19 = vpop.permute.xlu0 %2590  ;;  %v15910_v11 = vld [vmem:[%s21935_s1 + $0x180] ss:$24 sps:$4 sm:$0xff]  }
  0xf4   : > { %21948 = vst [vmem:[#allocation16_spill] sm:$0xff] %v17215_v19  ;;  %v2616_v20 = vsel %vm2602_vm13, %v17215_v19, %v2593_v54 }
  0xf5   : > { %3126 = vrot.lane.b32.xlu1 %v16999_v60, %s21649_s25  ;;  %3660 = vrot.lane.b32.xlu0 %v16919_v25, %s21653_s23  ;;  %v2654_v22 = vmul.bf16 %v15901_v13, %v2616_v20  ;;  %s21658_s25 = smov 78  }
  0xf7   : > { %v2487_v27 = vpop.permute.xlu1 %2486  ;;  %7316 = vmatpush1.bf16.msra.mxu1 %v2654_v22  ;;  %v17226_v28 = vpop.permute.xlu0 %1322 }
  0xf8   : > { %v1331_v31 = vsel %vm21652_vm15, %v1321_v16, %v17226_v28 }
  0xf9   : > { %3022 = vrot.lane.b32.xlu1 %v16967_v46, %s21655_s11  ;;  %3656 = vrot.lane.b32.xlu0 %v16999_v60, %s21653_s23  ;;  %v1383_v34 = vmul.bf16 %v15902_v24, %v1331_v31  ;;  %s21974_s23 = smov 19  }
  0xfb   : > { %v17240_v41 = vpop.permute.xlu1 %1318  ;;  %7296 = vmatprep.subr.bf16.mxu0 %v1383_v34  ;;  %v17244_v44 = vpop.permute.xlu0 %2488  ;;  %v15913_v34 = vld [vmem:[%s21935_s1 + $0x390] ss:$24 sps:$4 sm:$0xff]  }
  0xfc   : > { %21949 = vst [vmem:[#allocation17_spill] sm:$0xff] %v17240_v41  ;;  %v1344_v43 = vsel %vm21652_vm15, %v17240_v41, %v1321_v16  ;;  %v2497_v47 = vsel %vm21793_vm11, %v2487_v27, %v17244_v44  ;;  %vm21660_vm15 = vcmask 277504   ;;  %v15911_v16 = vld [vmem:[%s21935_s1 + $0x394] ss:$24 sps:$4 sm:$0xff]  }
  0xfd   : > { %5248 = vrot.lane.b32.xlu1 %v16967_v46, %s21658_s25  ;;  %v1382_v50 = vmul.bf16 %v15904_v32, %v1344_v43  ;;  %3024 = vrot.lane.b32.xlu0 %v16919_v25, %s21655_s11  ;;  %v2549_v51 = vmul.bf16 %v15905_v40, %v2497_v47  ;;  %v15922_v40 = vld [vmem:[%s21936_s2] ss:$28 sps:$4 sm:$0xff]  }
  0xff   : > { %v1215_v54 = vpop.permute.xlu1 %1214  ;;  %7297 = vmatpush2.bf16.msra.mxu0 %v1382_v50  ;;  %7317 = vmatprep.subr.bf16.mxu1 %v2549_v51  ;;  %v17255_v58 = vpop.permute.xlu0 %2484 }
 0x100   : > { %21950 = vst [vmem:[#allocation18_spill] sm:$0xff] %v17255_v58  ;;  %v2510_v59 = vsel %vm21793_vm11, %v17255_v58, %v2487_v27 }
 0x101   : > { %3020 = vrot.lane.b32.xlu1 %v16999_v60, %s21655_s11  ;;  %5250 = vrot.lane.b32.xlu0 %v16919_v25, %s21658_s25  ;;  %v2548_v61 = vmul.bf16 %v15907_v52, %v2510_v59  ;;  %s21664_s11 = smov 79   ;;  %v15914_v52 = vld [vmem:[%s21935_s1 + $0x364] ss:$24 sps:$4 sm:$0xff]  }
 0x103   : > { %v2381_v2 = vpop.permute.xlu1 %2380  ;;  %7318 = vmatpush1.bf16.msra.mxu1 %v2548_v61  ;;  %v17266_v9 = vpop.permute.xlu0 %1216 }
 0x104   : > { %v1225_v10 = vsel %vm21660_vm15, %v1215_v54, %v17266_v9 }
 0x105   : > { %2916 = vrot.lane.b32.xlu1 %v16967_v46, %s21661_s13  ;;  %5246 = vrot.lane.b32.xlu0 %v16999_v60, %s21658_s25  ;;  %v1277_v13 = vmul.bf16 %v15908_v0, %v1225_v10  ;;  %s21667_s25 = smov 80   ;;  %v15916_v0 = vld [vmem:[%s21935_s1 + $0x360] ss:$24 sps:$4 sm:$0xff]   ;;  %v15917_v10 = vld [vmem:[%s21935_s1 + $0x754] ss:$24 sps:$4 sm:$0xff]  }
 0x107   : > { %v17280_v20 = vpop.permute.xlu1 %1212  ;;  %7298 = vmatprep.subr.bf16.mxu0 %v1277_v13  ;;  %v17284_v24 = vpop.permute.xlu0 %2382 }
 0x108   : > { %21951 = vst [vmem:[#allocation19_spill] sm:$0xff] %v17280_v20  ;;  %v1238_v22 = vsel %vm21660_vm15, %v17280_v20, %v1215_v54  ;;  %v2391_v27 = vsel %vm21792_vm10, %v2381_v2, %v17284_v24  ;;  %vm21666_vm15 = vcmask 121856  }
 0x109   : > { %5142 = vrot.lane.b32.xlu1 %v16967_v46, %s21664_s11  ;;  %v1276_v31 = vmul.bf16 %v15910_v11, %v1238_v22  ;;  %2918 = vrot.lane.b32.xlu0 %v16919_v25, %s21661_s13  ;;  %v2443_v32 = vmul.bf16 %v15911_v16, %v2391_v27 }
 0x10b   : > { %v2275_v43 = vpop.permute.xlu1 %2274  ;;  %7299 = vmatpush2.bf16.msra.mxu0 %v1276_v31  ;;  %7319 = vmatprep.subr.bf16.mxu1 %v2443_v32  ;;  %v17298_v47 = vpop.permute.xlu0 %2378  ;;  %v15919_v32 = vld [vmem:[%s21935_s1 + $0x750] ss:$24 sps:$4 sm:$0xff]  }
 0x10c   : > { %21952 = vst [vmem:[#allocation20_spill] sm:$0xff] %v17298_v47  ;;  %v2404_v50 = vsel %vm21792_vm10, %v17298_v47, %v2381_v2 }
 0x10d   : > { %2914 = vrot.lane.b32.xlu1 %v16999_v60, %s21661_s13  ;;  %5144 = vrot.lane.b32.xlu0 %v16919_v25, %s21664_s11  ;;  %v2442_v51 = vmul.bf16 %v15913_v34, %v2404_v50  ;;  %v17347_v50 = vld [vmem:[%s21936_s2 + $0xc] ss:$28 sps:$4 sm:$0xff]   ;;  %s21695_s13 = smov 93  }
 0x10e   : > { %7301 = vmatmul.mubr.bf16.vlgmr.msra.gmra.mxu0 %v15922_v40  ;;  %7343 = vmatprep.mubr.bf16.mxu1 %v17347_v50 }
 0x10f   : > { %v4401_v54 = vpop.permute.xlu1 %4400  ;;  %7320 = vmatpush1.bf16.msra.mxu1 %v2442_v51  ;;  %v17309_v59 = vpop.permute.xlu0 %2276 }
 0x110   : > { %v2285_v61 = vsel %vm21666_vm15, %v2275_v43, %v17309_v59 }
 0x111   : > { %5036 = vrot.lane.b32.xlu1 %v16967_v46, %s21667_s25  ;;  %5140 = vrot.lane.b32.xlu0 %v16999_v60, %s21664_s11  ;;  %v2337_v2 = vmul.bf16 %v15914_v52, %v2285_v61  ;;  %v15923_v52 = vld [vmem:[%s21935_s1 + $0x334] ss:$24 sps:$4 sm:$0xff]   ;;  %s21671_s11 = smov 77  }
 0x113   : > { %v17323_v11 = vpop.permute.xlu1 %2272  ;;  %7321 = vmatprep.subr.bf16.mxu1 %v2337_v2  ;;  %v17327_v16 = vpop.permute.xlu0 %4402 }
 0x114   : > { %21953 = vst [vmem:[#allocation21_spill] sm:$0xff] %v17323_v11  ;;  %v2298_v13 = vsel %vm21666_vm15, %v17323_v11, %v2275_v43  ;;  %v4412_v22 = vsel %vm21669_vm9, %v4401_v54, %v17327_v16  ;;  %vm2178_vm15 = vcmask 130048  }
 0x115   : > { %5034 = vrot.lane.b32.xlu1 %v16999_v60, %s21667_s25  ;;  %v2336_v27 = vmul.bf16 %v15916_v0, %v2298_v13  ;;  %5038 = vrot.lane.b32.xlu0 %v16919_v25, %s21667_s25  ;;  %v4463_v31 = vmul.bf16 %v15917_v10, %v4412_v22  ;;  %v15925_v0 = vld [vmem:[%s21935_s1 + $0x330] ss:$24 sps:$4 sm:$0xff]   ;;  %v15926_v10 = vld [vmem:[%s21935_s1 + $0x724] ss:$24 sps:$4 sm:$0xff]   ;;  %s21682_s25 = smov 82  }
 0x117   : > { %v2169_v34 = vpop.permute.xlu1 %2168  ;;  %7322 = vmatpush1.bf16.msra.mxu1 %v2336_v27  ;;  %7354 = vmatprep.subr.bf16.mxu0 %v4463_v31  ;;  %v17338_v40 = vpop.permute.xlu0 %4398 }
 0x118   : > { %21954 = vst [vmem:[#allocation22_spill] sm:$0xff] %v17338_v40  ;;  %v4411_v43 = vsel %vm21669_vm9, %v17338_v40, %v4401_v54  ;;  %vm21673_vm9 = vcmask 785408  }
 0x119   : > { %4932 = vrot.lane.b32.xlu1 %v16919_v25, %s21692_s28  ;;  %v4462_v51 = vmul.bf16 %v15919_v32, %v4411_v43  ;;  %4930 = vrot.lane.b32.xlu0 %v16967_v46, %s21692_s28  ;;  %v17380_v43 = vld [vmem:[%s16743_s14 + $0x8] ss:$24 sps:$4 sm:$0xff]  }
 0x11b   : > { %v4295_v61 = vpop.permute.xlu1 %4294  ;;  %7355 = vmatpush1.bf16.msra.mxu0 %v4462_v51  ;;  %v17355_v54 = vpop.permute.xlu0 %2170 }
 0x11c   : > { %v2179_v25 = vsel %vm2178_vm15, %v2169_v34, %v17355_v54 }
 0x11d   : > { %5354 = vrot.lane.b32.xlu1 %v16967_v46, %s21671_s11  ;;  %4928 = vrot.lane.b32.xlu0 %v16999_v60, %s21692_s28  ;;  %v2231_v2 = vmul.bf16 %v15923_v52, %v2179_v25  ;;  %s21969_s28 = smov 51  }
 0x11f   : > { %v17369_v13 = vpop.permute.xlu1 %2166  ;;  %7323 = vmatprep.subr.bf16.mxu1 %v2231_v2  ;;  %v17373_v27 = vpop.permute.xlu0 %4296  ;;  %v21674_v2 = vmov 0  }
 0x120   : > { %21955 = vst [vmem:[#allocation23_spill] sm:$0xff] %v17369_v13  ;;  %v2192_v22 = vsel %vm2178_vm15, %v17369_v13, %v2169_v34  ;;  %v4306_v31 = vsel %vm21673_vm9, %v4295_v61, %v17373_v27  ;;  %v15928_v34 = vld [vmem:[%s21935_s1 + $0x720] ss:$24 sps:$4 sm:$0xff]   ;;  %15843 = vset.pattern.permute.xlu1 %v21674_v2  ;;  %15842 = vset.pattern.permute.xlu0 %v21674_v2 }
 0x121   : > { %4824 = vrot.lane.b32.xlu1 %v16967_v46, %s21682_s25  ;;  %v2230_v32 = vmul.bf16 %v15925_v0, %v2192_v22  ;;  %5356 = vrot.lane.b32.xlu0 %v17380_v43, %s21671_s11  ;;  %v4357_v51 = vmul.bf16 %v15926_v10, %v4306_v31  ;;  %v15929_v22 = vld [vmem:[%s21935_s1 + $0x304] ss:$24 sps:$4 sm:$0xff]  }
 0x123   : > { %v2063_v52 = vpop.permute.xlu1 %2062  ;;  %7324 = vmatpush1.bf16.msra.mxu1 %v2230_v32  ;;  %7356 = vmatprep.subr.bf16.mxu0 %v4357_v51  ;;  %v17387_v25 = vpop.permute.xlu0 %4292  ;;  %v15932_v51 = vld [vmem:[%s21935_s1 + $0x300] ss:$24 sps:$4 sm:$0xff]  }
 0x124   : > { %21956 = vst [vmem:[#allocation24_spill] sm:$0xff] %v17387_v25  ;;  %v4305_v0 = vsel %vm21673_vm9, %v17387_v25, %v4295_v61  ;;  %vm21684_vm9 = vcmask 793600   ;;  %v15935_v25 = vld [vmem:[%s21935_s1 + $0x6f0] ss:$24 sps:$4 sm:$0xff]  }
 0x125   : > { %5352 = vrot.lane.b32.xlu1 %v16999_v60, %s21671_s11  ;;  %v4356_v10 = vmul.bf16 %v15928_v34, %v4305_v0  ;;  %4826 = vrot.lane.b32.xlu0 %v17380_v43, %s21682_s25  ;;  %v17412_v0 = vld [vmem:[%s16743_s14 + $0xc] ss:$24 sps:$4 sm:$0xff]   ;;  %s21690_s11 = smov 83  }
 0x127   : > { %v4189_v31 = vpop.permute.xlu1 %4188  ;;  %7357 = vmatpush1.bf16.msra.mxu0 %v4356_v10  ;;  %v17400_v32 = vpop.permute.xlu0 %2064  ;;  %v15933_v10 = vld [vmem:[%s21935_s1 + $0x6f4] ss:$24 sps:$4 sm:$0xff]  }
 0x128   : > { %v2073_v61 = vsel %vm21681_vm8, %v2063_v52, %v17400_v32 }
 0x129   : > { %1112 = vrot.lane.b32.xlu1 %v17380_v43, %s21765_s15  ;;  %4822 = vrot.lane.b32.xlu0 %v16999_v60, %s21682_s25  ;;  %v2125_v34 = vmul.bf16 %v15929_v22, %v2073_v61  ;;  %s21971_s25 = smov 18  }
 0x12b   : > { %v17417_v2 = vpop.permute.xlu1 %2060  ;;  %7325 = vmatprep.subr.bf16.mxu1 %v2125_v34  ;;  %v17421_v11 = vpop.permute.xlu0 %4190 }
 0x12c   : > { %21957 = vst [vmem:[#allocation25_spill] sm:$0xff] %v17417_v2  ;;  %v2086_v13 = vsel %vm21681_vm8, %v17417_v2, %v2063_v52  ;;  %v4200_v47 = vsel %vm21684_vm9, %v4189_v31, %v17421_v11  ;;  %vm21689_vm8 = vcmask 916480  }
 0x12d   : > { %4718 = vrot.lane.b32.xlu1 %v16967_v46, %s21690_s11  ;;  %v2124_v22 = vmul.bf16 %v15932_v51, %v2086_v13  ;;  %1114 = vrot.lane.b32.xlu0 %v17412_v0, %s21765_s15  ;;  %v4251_v61 = vmul.bf16 %v15933_v10, %v4200_v47  ;;  %v15936_v47 = vld [vmem:[%s21935_s1 + $0x5d4] ss:$24 sps:$4 sm:$0xff]   ;;  %v15939_v10 = vld [vmem:[%s21935_s1 + $0x6c4] ss:$24 sps:$4 sm:$0xff]   ;;  %s22008_s15 = smov 97  }
 0x12f   : > { %v3553_v52 = vpop.permute.xlu1 %3552  ;;  %7326 = vmatpush1.bf16.msra.mxu1 %v2124_v22  ;;  %7358 = vmatprep.subr.bf16.mxu0 %v4251_v61  ;;  %v17432_v34 = vpop.permute.xlu0 %4186 }
 0x130   : > { %21958 = vst [vmem:[#allocation26_spill] sm:$0xff] %v17432_v34  ;;  %v4199_v2 = vsel %vm21684_vm9, %v17432_v34, %v4189_v31  ;;  %vm21694_vm9 = vcmask 801792  }
 0x131   : > { %4716 = vrot.lane.b32.xlu1 %v16999_v60, %s21690_s11  ;;  %v4250_v46 = vmul.bf16 %v15935_v25, %v4199_v2  ;;  %4720 = vrot.lane.b32.xlu0 %v17380_v43, %s21690_s11  ;;  %v15938_v25 = vld [vmem:[%s21935_s1 + $0x5d0] ss:$24 sps:$4 sm:$0xff]   ;;  %s21990_s11 = smov 113  }
 0x133   : > { %v4083_v13 = vpop.permute.xlu1 %4082  ;;  %7359 = vmatpush1.bf16.msra.mxu0 %v4250_v46  ;;  %v17443_v51 = vpop.permute.xlu0 %3554 }
 0x134   : > { %v3564_v31 = vsel %vm21689_vm8, %v3553_v52, %v17443_v51 }
 0x135   : > { %1008 = vrot.lane.b32.xlu1 %v17412_v0, %s21697_s16  ;;  %1006 = vrot.lane.b32.xlu0 %v17380_v43, %s21697_s16  ;;  %v3615_v2 = vmul.bf16 %v15936_v47, %v3564_v31  ;;  %v17468_v31 = vld [vmem:[%s16743_s14 + $0x4] ss:$24 sps:$4 sm:$0xff]   ;;  %s21980_s16 = smov 17  }
 0x137   : > { %v17457_v22 = vpop.permute.xlu1 %3550  ;;  %7327 = vmatprep.subr.bf16.mxu1 %v3615_v2  ;;  %v17461_v46 = vpop.permute.xlu0 %4084 }
 0x138   : > { %21959 = vst [vmem:[#allocation27_spill] sm:$0xff] %v17457_v22  ;;  %v3563_v61 = vsel %vm21689_vm8, %v17457_v22, %v3553_v52  ;;  %v4094_v34 = vsel %vm21694_vm9, %v4083_v13, %v17461_v46  ;;  %v15941_v52 = vld [vmem:[%s21935_s1 + $0x6c0] ss:$24 sps:$4 sm:$0xff]   ;;  %vm21703_vm8 = vcmask 924672  }
 0x139   : > { %4614 = vrot.lane.b32.xlu1 %v17380_v43, %s21695_s13  ;;  %v3614_v47 = vmul.bf16 %v15938_v25, %v3563_v61  ;;  %4612 = vrot.lane.b32.xlu0 %v17468_v31, %s21695_s13  ;;  %v4145_v58 = vmul.bf16 %v15939_v10, %v4094_v34  ;;  %v15942_v34 = vld [vmem:[%s21935_s1 + $0x5a4] ss:$24 sps:$4 sm:$0xff]  }
 0x13b   : > { %v3447_v2 = vpop.permute.xlu1 %3446  ;;  %7328 = vmatpush2.bf16.msra.mxu1 %v3614_v47  ;;  %7360 = vmatprep.subr.bf16.mxu0 %v4145_v58  ;;  %v17475_v22 = vpop.permute.xlu0 %4080  ;;  %v15945_v47 = vld [vmem:[%s21935_s1 + $0x694] ss:$24 sps:$4 sm:$0xff]  }
 0x13c   : > { %21960 = vst [vmem:[#allocation28_spill] sm:$0xff] %v17475_v22  ;;  %v4093_v40 = vsel %vm21694_vm9, %v17475_v22, %v4083_v13  ;;  %vm21704_vm9 = vcmask 809984  }
 0x13d   : > { %900 = vrot.lane.b32.xlu1 %v17380_v43, %s21763_s17  ;;  %v4144_v25 = vmul.bf16 %v15941_v52, %v4093_v40  ;;  %4610 = vrot.lane.b32.xlu0 %v16999_v60, %s21695_s13  ;;  %v15944_v40 = vld [vmem:[%s21935_s1 + $0x5a0] ss:$24 sps:$4 sm:$0xff]   ;;  %v16020_v52 = vld [vmem:[%s21936_s2 + $0x14] ss:$28 sps:$4 sm:$0xff]   ;;  %s21967_s13 = smov 13  }
 0x13e   : > { %7386 = vmatprep.mubr.bf16.mxu0 %v16020_v52 }
 0x13f   : > { %v3977_v10 = vpop.permute.xlu1 %3976  ;;  %7361 = vmatpush1.bf16.msra.mxu0 %v4144_v25  ;;  %v17486_v58 = vpop.permute.xlu0 %3448 }
 0x140   : > { %v3458_v61 = vsel %vm21703_vm8, %v3447_v2, %v17486_v58 }
 0x141   : > { %4506 = vrot.lane.b32.xlu1 %v17468_v31, %s21743_s26  ;;  %902 = vrot.lane.b32.xlu0 %v17412_v0, %s21763_s17  ;;  %v3509_v13 = vmul.bf16 %v15942_v34, %v3458_v61  ;;  %s21995_s17 = smov 114  }
 0x143   : > { %v17503_v25 = vpop.permute.xlu1 %3444  ;;  %7329 = vmatprep.subr.bf16.mxu1 %v3509_v13  ;;  %v17507_v19 = vpop.permute.xlu0 %3978 }
 0x144   : > { %21961 = vst [vmem:[#allocation29_spill] sm:$0xff] %v17503_v25  ;;  %v3457_v22 = vsel %vm21703_vm8, %v17503_v25, %v3447_v2  ;;  %v3988_v34 = vsel %vm21704_vm9, %v3977_v10, %v17507_v19  ;;  %vm21708_vm8 = vcmask 932864  }
 0x145   : > { %4504 = vrot.lane.b32.xlu1 %v16999_v60, %s21743_s26  ;;  %v3508_v61 = vmul.bf16 %v15944_v40, %v3457_v22  ;;  %4508 = vrot.lane.b32.xlu0 %v17380_v43, %s21743_s26  ;;  %v4039_v20 = vmul.bf16 %v15945_v47, %v3988_v34  ;;  %v15948_v22 = vld [vmem:[%s21935_s1 + $0x574] ss:$24 sps:$4 sm:$0xff]   ;;  %v15951_v34 = vld [vmem:[%s21935_s1 + $0x664] ss:$24 sps:$4 sm:$0xff]   ;;  %s21986_s26 = smov 112  }
 0x147   : > { %v3341_v2 = vpop.permute.xlu1 %3340  ;;  %7330 = vmatpush2.bf16.msra.mxu1 %v3508_v61  ;;  %7362 = vmatprep.subr.bf16.mxu0 %v4039_v20  ;;  %v17518_v13 = vpop.permute.xlu0 %3974 }
 0x148   : > { %21962 = vst [vmem:[#allocation30_spill] sm:$0xff] %v17518_v13  ;;  %v3987_v52 = vsel %vm21704_vm9, %v17518_v13, %v3977_v10  ;;  %vm21709_vm9 = vcmask 891904   ;;  %v15953_v13 = vld [vmem:[%s21935_s1 + $0x660] ss:$24 sps:$4 sm:$0xff]  }
 0x149   : > { %796 = vrot.lane.b32.xlu1 %v17412_v0, %s21761_s18  ;;  %v4038_v60 = vmul.bf16 %v15947_v48, %v3987_v52  ;;  %794 = vrot.lane.b32.xlu0 %v17380_v43, %s21761_s18  ;;  %v15950_v48 = vld [vmem:[%s21935_s1 + $0x570] ss:$24 sps:$4 sm:$0xff]   ;;  %s22007_s18 = smov 127  }
 0x14b   : > { %v3871_v40 = vpop.permute.xlu1 %3870  ;;  %7363 = vmatpush1.bf16.msra.mxu0 %v4038_v60  ;;  %v17529_v20 = vpop.permute.xlu0 %3342 }
 0x14c   : > { %v3352_v47 = vsel %vm21708_vm8, %v3341_v2, %v17529_v20 }
 0x14d   : > { %2810 = vrot.lane.b32.xlu1 %v17412_v0, %s21741_s27  ;;  %2808 = vrot.lane.b32.xlu0 %v17380_v43, %s21741_s27  ;;  %v3403_v10 = vmul.bf16 %v15948_v22, %v3352_v47  ;;  %s21983_s27 = smov 30  }
 0x14f   : > { %v17543_v61 = vpop.permute.xlu1 %3338  ;;  %7331 = vmatprep.subr.bf16.mxu1 %v3403_v10  ;;  %v17547_v60 = vpop.permute.xlu0 %3872 }
 0x150   : > { %21963 = vst [vmem:[#allocation31_spill] sm:$0xff] %v17543_v61  ;;  %v3351_v52 = vsel %vm21708_vm8, %v17543_v61, %v3341_v2  ;;  %v3882_v25 = vsel %vm21709_vm9, %v3871_v40, %v17547_v60  ;;  %vm21714_vm8 = vcmask 941056  }
 0x151   : > { %690 = vrot.lane.b32.xlu1 %v17412_v0, %s21754_s19  ;;  %v3402_v22 = vmul.bf16 %v15950_v48, %v3351_v52  ;;  %688 = vrot.lane.b32.xlu0 %v17380_v43, %s21754_s19  ;;  %v3933_v47 = vmul.bf16 %v15951_v34, %v3882_v25  ;;  %v15954_v25 = vld [vmem:[%s21935_s1 + $0x544] ss:$24 sps:$4 sm:$0xff]   ;;  %s21993_s19 = smov 32  }
 0x153   : > { %v3235_v41 = vpop.permute.xlu1 %3234  ;;  %7332 = vmatpush2.bf16.msra.mxu1 %v3402_v22  ;;  %7364 = vmatprep.subr.bf16.mxu0 %v3933_v47  ;;  %v17558_v2 = vpop.permute.xlu0 %3868  ;;  %v15957_v47 = vld [vmem:[%s21935_s1 + $0x634] ss:$24 sps:$4 sm:$0xff]  }
 0x154   : > { %21964 = vst [vmem:[#allocation32_spill] sm:$0xff] %v17558_v2  ;;  %v3881_v10 = vsel %vm21709_vm9, %v17558_v2, %v3871_v40  ;;  %vm21715_vm9 = vcmask 900096  }
 0x155   : > { %2704 = vrot.lane.b32.xlu1 %v17412_v0, %s21739_s29  ;;  %v3932_v48 = vmul.bf16 %v15953_v13, %v3881_v10  ;;  %2702 = vrot.lane.b32.xlu0 %v17380_v43, %s21739_s29  ;;  %v15956_v13 = vld [vmem:[%s21935_s1 + $0x540] ss:$24 sps:$4 sm:$0xff]   ;;  %s21998_s29 = smov 115  }
 0x157   : > { %v3765_v34 = vpop.permute.xlu1 %3764  ;;  %7365 = vmatpush1.bf16.msra.mxu0 %v3932_v48  ;;  %v17569_v52 = vpop.permute.xlu0 %3236 }
 0x158   : > { %v3246_v22 = vsel %vm21714_vm8, %v3235_v41, %v17569_v52 }
 0x159   : > { %584 = vrot.lane.b32.xlu1 %v17412_v0, %s21752_s20  ;;  %582 = vrot.lane.b32.xlu0 %v17380_v43, %s21752_s20  ;;  %v3297_v40 = vmul.bf16 %v15954_v25, %v3246_v22  ;;  %s22003_s20 = smov 95  }
 0x15b   : > { %v17583_v10 = vpop.permute.xlu1 %3232  ;;  %7333 = vmatprep.subr.bf16.mxu1 %v3297_v40  ;;  %v17587_v61 = vpop.permute.xlu0 %3766 }
 0x15c   : > { %21965 = vst [vmem:[#allocation33_spill] sm:$0xff] %v17583_v10  ;;  %v3245_v48 = vsel %vm21714_vm8, %v17583_v10, %v3235_v41  ;;  %v3776_v2 = vsel %vm21715_vm9, %v3765_v34, %v17587_v61  ;;  %vm21720_vm8 = vcmask 1022976  }
 0x15d   : > { %2598 = vrot.lane.b32.xlu1 %v17412_v0, %s21721_s12  ;;  %v3296_v25 = vmul.bf16 %v15956_v13, %v3245_v48  ;;  %2596 = vrot.lane.b32.xlu0 %v17380_v43, %s21721_s12  ;;  %v3827_v22 = vmul.bf16 %v15957_v47, %v3776_v2  ;;  %v15960_v2 = vld [vmem:[%s21935_s1 + $0x514] ss:$24 sps:$4 sm:$0xff]   ;;  %s21975_s12 = smov 16  }
 0x15f   : > { %v3129_v33 = vpop.permute.xlu1 %3128  ;;  %7334 = vmatpush2.bf16.msra.mxu1 %v3296_v25  ;;  %7366 = vmatprep.subr.bf16.mxu0 %v3827_v22  ;;  %v17598_v41 = vpop.permute.xlu0 %3762  ;;  %v15963_v22 = vld [vmem:[%s21935_s1 + $0x604] ss:$24 sps:$4 sm:$0xff]  }
 0x160   : > { %21966 = vst [vmem:[#allocation34_spill] sm:$0xff] %v17598_v41  ;;  %v3775_v40 = vsel %vm21715_vm9, %v17598_v41, %v3765_v34  ;;  %vm21723_vm9 = vcmask 908288  }
 0x161   : > { %478 = vrot.lane.b32.xlu1 %v17412_v0, %s21745_s21  ;;  %v3826_v13 = vmul.bf16 %v15959_v18, %v3775_v40  ;;  %476 = vrot.lane.b32.xlu0 %v17380_v43, %s21745_s21  ;;  %v15962_v18 = vld [vmem:[%s21935_s1 + $0x510] ss:$24 sps:$4 sm:$0xff]   ;;  %s21988_s21 = smov 31  }
 0x163   : > { %v3659_v47 = vpop.permute.xlu1 %3658  ;;  %7367 = vmatpush1.bf16.msra.mxu0 %v3826_v13  ;;  %v17609_v48 = vpop.permute.xlu0 %3130 }
 0x164   : > { %v3140_v25 = vsel %vm21720_vm8, %v3129_v33, %v17609_v48 }
 0x165   : > { %2492 = vrot.lane.b32.xlu1 %v17412_v0, %s21967_s13  ;;  %2490 = vrot.lane.b32.xlu0 %v17380_v43, %s21967_s13  ;;  %v3191_v34 = vmul.bf16 %v15960_v2, %v3140_v25 }
 0x167   : > { %v17623_v40 = vpop.permute.xlu1 %3126  ;;  %7335 = vmatprep.subr.bf16.mxu1 %v3191_v34  ;;  %v17627_v10 = vpop.permute.xlu0 %3660 }
 0x168   : > { %21968 = vst [vmem:[#allocation35_spill] sm:$0xff] %v17623_v40  ;;  %v3139_v13 = vsel %vm21720_vm8, %v17623_v40, %v3129_v33  ;;  %v3670_v41 = vsel %vm21723_vm9, %v3659_v47, %v17627_v10  ;;  %vm21728_vm8 = vcmask 1031168  }
 0x169   : > { %372 = vrot.lane.b32.xlu1 %v17412_v0, %s21969_s28  ;;  %v3190_v2 = vmul.bf16 %v15962_v18, %v3139_v13  ;;  %370 = vrot.lane.b32.xlu0 %v17380_v43, %s21969_s28  ;;  %v3721_v25 = vmul.bf16 %v15963_v22, %v3670_v41  ;;  %v15966_v41 = vld [vmem:[%s21935_s1 + $0x4e4] ss:$24 sps:$4 sm:$0xff]  }
 0x16b   : > { %v3023_v4 = vpop.permute.xlu1 %3022  ;;  %7336 = vmatpush2.bf16.msra.mxu1 %v3190_v2  ;;  %7368 = vmatprep.subr.bf16.mxu0 %v3721_v25  ;;  %v17638_v33 = vpop.permute.xlu0 %3656  ;;  %v15969_v25 = vld [vmem:[%s21935_s1 + $0x8d4] ss:$24 sps:$4 sm:$0xff]  }
 0x16c   : > { %21970 = vst [vmem:[#allocation36_spill] sm:$0xff] %v17638_v33  ;;  %v3669_v34 = vsel %vm21723_vm9, %v17638_v33, %v3659_v47  ;;  %vm21733_vm9 = vcmask 637952  }
 0x16d   : > { %2386 = vrot.lane.b32.xlu1 %v17412_v0, %s21731_s24  ;;  %v3720_v18 = vmul.bf16 %v15965_v1, %v3669_v34  ;;  %2384 = vrot.lane.b32.xlu0 %v17380_v43, %s21731_s24  ;;  %v15968_v1 = vld [vmem:[%s21935_s1 + $0x4e0] ss:$24 sps:$4 sm:$0xff]   ;;  %s21978_s24 = smov 29  }
 0x16f   : > { %v5249_v22 = vpop.permute.xlu1 %5248  ;;  %7369 = vmatpush1.bf16.msra.mxu0 %v3720_v18  ;;  %v17649_v13 = vpop.permute.xlu0 %3024 }
 0x170   : > { %v3034_v2 = vsel %vm21728_vm8, %v3023_v4, %v17649_v13 }
 0x171   : > { %1962 = vrot.lane.b32.xlu1 %v17412_v0, %s21971_s25  ;;  %1960 = vrot.lane.b32.xlu0 %v17380_v43, %s21971_s25  ;;  %v3085_v47 = vmul.bf16 %v15966_v41, %v3034_v2 }
 0x173   : > { %v17663_v34 = vpop.permute.xlu1 %3020  ;;  %7337 = vmatprep.subr.bf16.mxu1 %v3085_v47  ;;  %v17667_v40 = vpop.permute.xlu0 %5250 }
 0x174   : > { %21972 = vst [vmem:[#allocation37_spill] sm:$0xff] %v17663_v34  ;;  %v3033_v18 = vsel %vm21728_vm8, %v17663_v34, %v3023_v4  ;;  %v5260_v33 = vsel %vm21733_vm9, %v5249_v22, %v17667_v40  ;;  %vm21738_vm8 = vcmask 1039360  }
 0x175   : > { %2280 = vrot.lane.b32.xlu1 %v17412_v0, %s21729_s22  ;;  %v3084_v41 = vmul.bf16 %v15968_v1, %v3033_v18  ;;  %2278 = vrot.lane.b32.xlu0 %v17380_v43, %s21729_s22  ;;  %v5311_v2 = vmul.bf16 %v15969_v25, %v5260_v33  ;;  %v15972_v33 = vld [vmem:[%s21935_s1 + $0x4b4] ss:$24 sps:$4 sm:$0xff]   ;;  %s21996_s22 = smov 33  }
 0x177   : > { %v2917_v36 = vpop.permute.xlu1 %2916  ;;  %7338 = vmatpush2.bf16.msra.mxu1 %v3084_v41  ;;  %7370 = vmatprep.subr.bf16.mxu0 %v5311_v2  ;;  %v17678_v4 = vpop.permute.xlu0 %5246  ;;  %v15975_v2 = vld [vmem:[%s21935_s1 + $0x8a4] ss:$24 sps:$4 sm:$0xff]  }
 0x178   : > { %21973 = vst [vmem:[#allocation38_spill] sm:$0xff] %v17678_v4  ;;  %v5259_v47 = vsel %vm21733_vm9, %v17678_v4, %v5249_v22  ;;  %vm21749_vm9 = vcmask 646144  }
 0x179   : > { %1856 = vrot.lane.b32.xlu1 %v17412_v0, %s21974_s23  ;;  %v5310_v1 = vmul.bf16 %v15971_v53, %v5259_v47  ;;  %1854 = vrot.lane.b32.xlu0 %v17380_v43, %s21974_s23  ;;  %v15974_v53 = vld [vmem:[%s21935_s1 + $0x4b0] ss:$24 sps:$4 sm:$0xff]  }
 0x17b   : > { %v5143_v25 = vpop.permute.xlu1 %5142  ;;  %7371 = vmatpush2.bf16.msra.mxu0 %v5310_v1  ;;  %v17689_v18 = vpop.permute.xlu0 %2918 }
 0x17c   : > { %v2928_v41 = vsel %vm21738_vm8, %v2917_v36, %v17689_v18 }
 0x17d   : > { %2174 = vrot.lane.b32.xlu1 %v17412_v0, %s21975_s12  ;;  %2172 = vrot.lane.b32.xlu0 %v17380_v43, %s21975_s12  ;;  %v2979_v22 = vmul.bf16 %v15972_v33, %v2928_v41 }
 0x17f   : > { %v17703_v47 = vpop.permute.xlu1 %2914  ;;  %7339 = vmatprep.subr.bf16.mxu1 %v2979_v22  ;;  %v17707_v34 = vpop.permute.xlu0 %5144 }
 0x180   : > { %21976 = vst [vmem:[#allocation39_spill] sm:$0xff] %v17703_v47  ;;  %v2927_v1 = vsel %vm21738_vm8, %v17703_v47, %v2917_v36  ;;  %21977 = vst [vmem:[#allocation40_spill] sm:$0xff] %v17707_v34  ;;  %v5154_v4 = vsel %vm21749_vm9, %v5143_v25, %v17707_v34  ;;  %vm21751_vm8 = vcmask 654336  }
 0x181   : > { %1750 = vrot.lane.b32.xlu1 %v17412_v0, %s21978_s24  ;;  %v2978_v33 = vmul.bf16 %v15974_v53, %v2927_v1  ;;  %1748 = vrot.lane.b32.xlu0 %v17380_v43, %s21978_s24  ;;  %v5205_v41 = vmul.bf16 %v15975_v2, %v5154_v4  ;;  %v15978_v4 = vld [vmem:[%s21935_s1 + $0x870] ss:$24 sps:$4 sm:$0xff]   ;;  %v16608_v1 = vld [vmem:[%s16743_s14] ss:$24 sps:$4 sm:$0xff]  }
 0x183   : > { %v5037_v36 = vpop.permute.xlu1 %5036  ;;  %7340 = vmatpush2.bf16.msra.mxu1 %v2978_v33  ;;  %7372 = vmatprep.subr.bf16.mxu0 %v5205_v41  ;;  %v17718_v22 = vpop.permute.xlu0 %5140 }
 0x184   : > { %21979 = vst [vmem:[#allocation41_spill] sm:$0xff] %v17718_v22  ;;  %7341 = vmatprep.subr.bf16.mxu1 %v17468_v31  ;;  %v5153_v47 = vsel %vm21749_vm9, %v17718_v22, %v5143_v25  ;;  %v15980_v31 = vld [vmem:[%s21935_s1 + $0x874] ss:$24 sps:$4 sm:$0xff]   ;;  %v15992_v25 = vld [vmem:[%s21936_s2 + $0x8] ss:$28 sps:$4 sm:$0xff]   ;;  %vm21756_vm9 = vcmask 662528  }
 0x185   : > { %2068 = vrot.lane.b32.xlu1 %v17412_v0, %s21980_s16  ;;  %v5204_v53 = vmul.bf16 %v15977_v29, %v5153_v47  ;;  %2066 = vrot.lane.b32.xlu0 %v17380_v43, %s21980_s16  ;;  %v17748_v22 = vld [vmem:[%s16743_s14 + $0x10] ss:$24 sps:$4 sm:$0xff]  }
 0x187   : > { %v17736_v2 = vpop.permute.xlu1 %5034  ;;  %7342 = vmatpush2.bf16.msra.mxu1 %v16608_v1  ;;  %7373 = vmatpush2.bf16.msra.mxu0 %v5204_v53  ;;  %v17741_v29 = vpop.permute.xlu0 %5038  ;;  %v15982_v53 = vld [vmem:[%s21935_s1 + $0x844] ss:$24 sps:$4 sm:$0xff]  }
 0x188   : > { %21981 = vst [vmem:[#allocation42_spill] sm:$0xff] %v17736_v2  ;;  %v5047_v33 = vsel %vm21751_vm8, %v17736_v2, %v5037_v36  ;;  %21982 = vst [vmem:[#allocation43_spill] sm:$0xff] %v17741_v29  ;;  %v5048_v41 = vsel %vm21751_vm8, %v5037_v36, %v17741_v29  ;;  %vm21767_vm8 = vcmask 629760  }
 0x189   : > { %v5098_v47 = vmul.bf16 %v15978_v4, %v5047_v33  ;;  %1644 = vrot.lane.b32.xlu1 %v17412_v0, %s21983_s27  ;;  %1642 = vrot.lane.b32.xlu0 %v17380_v43, %s21983_s27  ;;  %v5099_v12 = vmul.bf16 %v15980_v31, %v5048_v41  ;;  %v21985_v4 = vmov 0  }
 0x18a   : > { %7344 = vmatmul.mubr.bf16.vlgmr.msra.gmra.mxu1 %v15992_v25  ;;  %v15984_v25 = vld [vmem:[%s21935_s1 + $0x840] ss:$24 sps:$4 sm:$0xff]  }
 0x18b   : > { %v17755_v1 = vpop.permute.xlu1 %4932  ;;  %7429 = vmatprep.mubr.bf16.mxu1 %v21985_v4  ;;  %7374 = vmatprep.subr.bf16.mxu0 %v5099_v12  ;;  %v4931_v36 = vpop.permute.xlu0 %4930 }
 0x18c   : > { %21984 = vst [vmem:[#allocation44_spill] sm:$0xff] %v17755_v1  ;;  %v4942_v33 = vsel %vm21756_vm9, %v4931_v36, %v17755_v1  ;;  %7375 = vmatpush2.bf16.msra.mxu0 %v5098_v47 }
 0x18d   : > { %3558 = vrot.lane.b32.xlu1 %v17748_v22, %s21986_s26  ;;  %3556 = vrot.lane.b32.xlu0 %v17412_v0, %s21986_s26  ;;  %v4993_v31 = vmul.bf16 %v15982_v53, %v4942_v33  ;;  %v15987_v53 = vld [vmem:[%s21935_s1 + $0x904] ss:$24 sps:$4 sm:$0xff]  }
 0x18f   : > { %v5355_v41 = vpop.permute.xlu1 %5354  ;;  %7376 = vmatprep.subr.bf16.mxu0 %v4993_v31  ;;  %v17767_v2 = vpop.permute.xlu0 %4928 }
 0x190   : > { %21987 = vst [vmem:[#allocation45_spill] sm:$0xff] %v17767_v2  ;;  %v4941_v12 = vsel %vm21756_vm9, %v17767_v2, %v4931_v36  ;;  %v15985_v36 = vld [vmem:[%s21935_s1 + $0x900] ss:$24 sps:$4 sm:$0xff]   ;;  %vm4834_vm9 = vcmask 670720  }
 0x191   : > { %1538 = vrot.lane.b32.xlu1 %v17412_v0, %s21988_s21  ;;  %v4992_v47 = vmul.bf16 %v15984_v25, %v4941_v12  ;;  %1536 = vrot.lane.b32.xlu0 %v17380_v43, %s21988_s21  ;;  %v15993_v12 = vld [vmem:[%s21935_s1 + $0x814] ss:$24 sps:$4 sm:$0xff]  }
 0x193   : > { %v4825_v33 = vpop.permute.xlu1 %4824  ;;  %7377 = vmatpush2.bf16.msra.mxu0 %v4992_v47  ;;  %v17778_v31 = vpop.permute.xlu0 %5356 }
 0x194   : > { %21989 = vst [vmem:[#allocation46_spill] sm:$0xff] %v17778_v31  ;;  %v5366_v4 = vsel %vm21767_vm8, %v5355_v41, %v17778_v31 }
 0x195   : > { %3452 = vrot.lane.b32.xlu1 %v17748_v22, %s21990_s11  ;;  %3450 = vrot.lane.b32.xlu0 %v17412_v0, %s21990_s11  ;;  %v5417_v25 = vmul.bf16 %v15987_v53, %v5366_v4  ;;  %v15995_v53 = vld [vmem:[%s21935_s1 + $0x810] ss:$24 sps:$4 sm:$0xff]  }
 0x197   : > { %v17792_v47 = vpop.permute.xlu1 %5352  ;;  %7411 = vmatprep.subr.bf16.mxu1 %v5417_v25  ;;  %v17796_v31 = vpop.permute.xlu0 %4826 }
 0x198   : > { %21991 = vst [vmem:[#allocation47_spill] sm:$0xff] %v17792_v47  ;;  %v5365_v2 = vsel %vm21767_vm8, %v17792_v47, %v5355_v41  ;;  %21992 = vst [vmem:[#allocation48_spill] sm:$0xff] %v17796_v31  ;;  %v4836_v29 = vsel %vm4834_vm9, %v4825_v33, %v17796_v31  ;;  %v15999_v41 = vld [vmem:[%s21936_s2 + $0x18] ss:$28 sps:$4 sm:$0xff]   ;;  %vm21775_vm8 = vcmask 678912  }
 0x199   : > { %v5416_v1 = vmul.bf16 %v15985_v36, %v5365_v2  ;;  %1432 = vrot.lane.b32.xlu1 %v17412_v0, %s21993_s19  ;;  %1430 = vrot.lane.b32.xlu0 %v17380_v43, %s21993_s19  ;;  %v4887_v4 = vmul.bf16 %v15993_v12, %v4836_v29  ;;  %v15998_v12 = vld [vmem:[%s21935_s1 + $0x15c] ss:$24 sps:$4 sm:$0xff]   ;;  %v15996_v47 = vld [vmem:[%s21935_s1 + $0x7e0] ss:$24 sps:$4 sm:$0xff]  }
 0x19b   : > { %v1113_v25 = vpop.permute.xlu1 %1112  ;;  %7412 = vmatpush1.bf16.msra.mxu1 %v5416_v1  ;;  %7378 = vmatprep.subr.bf16.mxu0 %v4887_v4  ;;  %v17810_v2 = vpop.permute.xlu0 %4822  ;;  %v15990_v1 = vld [vmem:[%s21935_s1 + $0x158] ss:$24 sps:$4 sm:$0xff]  }
 0x19c   : > { %21994 = vst [vmem:[#allocation49_spill] sm:$0xff] %v17810_v2  ;;  %v4835_v36 = vsel %vm4834_vm9, %v17810_v2, %v4825_v33  ;;  %v17828_v33 = vld [vmem:[%s21936_s2 + $0x4] ss:$28 sps:$4 sm:$0xff]  }
 0x19d   : > { %3346 = vrot.lane.b32.xlu1 %v17748_v22, %s21995_s17  ;;  %v4886_v29 = vmul.bf16 %v15995_v53, %v4835_v36  ;;  %3344 = vrot.lane.b32.xlu0 %v17412_v0, %s21995_s17  ;;  %v1120_v53 = vsel %vm1118_vm0, %v16882_v8, %v1113_v25  ;;  %v16000_v8 = vld [vmem:[%s21935_s1 + $0x7e4] ss:$24 sps:$4 sm:$0xff]   ;;  %s22029_s17 = smov 50  }
 0x19e   : > { %15042 = vmatmul.mubr.msk.bf16.vlgmr.msra.gmra.mxu1 %vm2178_vm15, %v15999_v41 }
 0x19f   : > { %v4719_v4 = vpop.permute.xlu1 %4718  ;;  %7472 = vmatprep.mubr.bf16.mxu1 %v17828_v33  ;;  %7379 = vmatpush2.bf16.msra.mxu0 %v4886_v29  ;;  %v17833_v36 = vpop.permute.xlu0 %1114  ;;  %v1172_v29 = vmul.bf16 %v15990_v1, %v1120_v53  ;;  %v16001_v1 = vld [vmem:[%s21935_s1 + $0x128] ss:$24 sps:$4 sm:$0xff]  }
 0x1a0   : > { %v1121_v41 = vsel %vm1118_vm0, %v1113_v25, %v17833_v36 }
 0x1a1   : > { %1326 = vrot.lane.b32.xlu1 %v17412_v0, %s21996_s22  ;;  %1324 = vrot.lane.b32.xlu0 %v17380_v43, %s21996_s22  ;;  %v1173_v2 = vmul.bf16 %v15998_v12, %v1121_v41 }
 0x1a3   : > { %v17847_v31 = vpop.permute.xlu1 %4716  ;;  %7440 = vmatprep.subr.bf16.mxu1 %v1173_v2  ;;  %v17851_v6 = vpop.permute.xlu0 %4720  ;;  %v16003_v2 = vld [vmem:[%s21935_s1 + $0x12c] ss:$24 sps:$4 sm:$0xff]  }
 0x1a4   : > { %21997 = vst [vmem:[#allocation50_spill] sm:$0xff] %v17847_v31  ;;  %v4729_v25 = vsel %vm21775_vm8, %v17847_v31, %v4719_v4  ;;  %v4730_v55 = vsel %vm21775_vm8, %v4719_v4, %v17851_v6  ;;  %7441 = vmatpush1.bf16.msra.mxu1 %v1172_v29  ;;  %vm21778_vm8 = vcmask 760832   ;;  %v16006_v29 = vld [vmem:[%s21935_s1 + $0x7b4] ss:$24 sps:$4 sm:$0xff]  }
 0x1a5   : > { %v4780_v34 = vmul.bf16 %v15996_v47, %v4729_v25  ;;  %3240 = vrot.lane.b32.xlu1 %v17748_v22, %s21998_s29  ;;  %3238 = vrot.lane.b32.xlu0 %v17412_v0, %s21998_s29  ;;  %v4781_v12 = vmul.bf16 %v16000_v8, %v4730_v55  ;;  %s22018_s29 = smov 78  }
 0x1a7   : > { %v17865_v47 = vpop.permute.xlu1 %1008  ;;  %7380 = vmatprep.subr.bf16.mxu0 %v4781_v12  ;;  %v1007_v4 = vpop.permute.xlu0 %1006  ;;  %v16008_v12 = vld [vmem:[%s21935_s1 + $0x7b0] ss:$24 sps:$4 sm:$0xff]  }
 0x1a8   : > { %v1014_v53 = vsel %vm1012_vm1, %v16902_v17, %v1007_v4  ;;  %v1015_v41 = vsel %vm1012_vm1, %v1007_v4, %v17865_v47  ;;  %7381 = vmatpush2.bf16.msra.mxu0 %v4780_v34 }
 0x1a9   : > { %1220 = vrot.lane.b32.xlu1 %v17412_v0, %s21999_s30  ;;  %v1066_v55 = vmul.bf16 %v16001_v1, %v1014_v53  ;;  %1218 = vrot.lane.b32.xlu0 %v17380_v43, %s21999_s30  ;;  %v1067_v8 = vmul.bf16 %v16003_v2, %v1015_v41  ;;  %v16011_v41 = vld [vmem:[%s21935_s1 + $0xfc] ss:$24 sps:$4 sm:$0xff]  }
 0x1ab   : > { %v17878_v25 = vpop.permute.xlu1 %4614  ;;  %7442 = vmatprep.subr.bf16.mxu1 %v1067_v8  ;;  %v4613_v17 = vpop.permute.xlu0 %4612 }
 0x1ac   : > { %22000 = vst [vmem:[#allocation51_spill] sm:$0xff] %v17878_v25  ;;  %v4624_v34 = vsel %vm21778_vm8, %v4613_v17, %v17878_v25  ;;  %7443 = vmatpush1.bf16.msra.mxu1 %v1066_v55  ;;  %v16004_v55 = vld [vmem:[%s21935_s1 + $0xf8] ss:$24 sps:$4 sm:$0xff]  }
 0x1ad   : > { %3134 = vrot.lane.b32.xlu1 %v17748_v22, %s22001_s0  ;;  %3132 = vrot.lane.b32.xlu0 %v17412_v0, %s22001_s0  ;;  %v4675_v43 = vmul.bf16 %v16006_v29, %v4624_v34  ;;  %s22019_s0 = smov 48  }
 0x1af   : > { %v901_v1 = vpop.permute.xlu1 %900  ;;  %7382 = vmatprep.subr.bf16.mxu0 %v4675_v43  ;;  %v17889_v2 = vpop.permute.xlu0 %4610  ;;  %v16009_v43 = vld [vmem:[%s21935_s1 + $0x780] ss:$24 sps:$4 sm:$0xff]  }
 0x1b0   : > { %22002 = vst [vmem:[#allocation52_spill] sm:$0xff] %v17889_v2  ;;  %v4623_v4 = vsel %vm21778_vm8, %v17889_v2, %v4613_v17  ;;  %v908_v29 = vsel %vm906_vm2, %v16916_v23, %v901_v1  ;;  %vm4516_vm8 = vcmask 769024   ;;  %v16012_v23 = vld [vmem:[%s21935_s1 + $0x784] ss:$24 sps:$4 sm:$0xff]  }
 0x1b1   : > { %4406 = vrot.lane.b32.xlu1 %v17748_v22, %s22003_s20  ;;  %v4674_v53 = vmul.bf16 %v16008_v12, %v4623_v4  ;;  %4404 = vrot.lane.b32.xlu0 %v17412_v0, %s22003_s20  ;;  %v960_v4 = vmul.bf16 %v16004_v55, %v908_v29  ;;  %v16013_v55 = vld [vmem:[%s21935_s1 + $0xc8] ss:$24 sps:$4 sm:$0xff]   ;;  %v16015_v29 = vld [vmem:[%s21935_s1 + $0xcc] ss:$24 sps:$4 sm:$0xff]  }
 0x1b3   : > { %v4507_v8 = vpop.permute.xlu1 %4506  ;;  %7383 = vmatpush2.bf16.msra.mxu0 %v4674_v53  ;;  %v17905_v17 = vpop.permute.xlu0 %902 }
 0x1b4   : > { %v909_v34 = vsel %vm906_vm2, %v901_v1, %v17905_v17 }
 0x1b5   : > { %3028 = vrot.lane.b32.xlu1 %v17748_v22, %s22004_s8  ;;  %3026 = vrot.lane.b32.xlu0 %v17412_v0, %s22004_s8  ;;  %v961_v12 = vmul.bf16 %v16011_v41, %v909_v34  ;;  %s22014_s8 = smov 110  }
 0x1b7   : > { %v17919_v53 = vpop.permute.xlu1 %4504  ;;  %7444 = vmatprep.subr.bf16.mxu1 %v961_v12  ;;  %v17923_v31 = vpop.permute.xlu0 %4508 }
 0x1b8   : > { %22005 = vst [vmem:[#allocation53_spill] sm:$0xff] %v17919_v53  ;;  %v4517_v1 = vsel %vm4516_vm8, %v17919_v53, %v4507_v8  ;;  %v4518_v25 = vsel %vm4516_vm8, %v4507_v8, %v17923_v31  ;;  %7445 = vmatpush1.bf16.msra.mxu1 %v960_v4 }
 0x1b9   : > { %v4568_v2 = vmul.bf16 %v16009_v43, %v4517_v1  ;;  %4300 = vrot.lane.b32.xlu1 %v17748_v22, %s22006_s10  ;;  %4298 = vrot.lane.b32.xlu0 %v17412_v0, %s22006_s10  ;;  %v4569_v41 = vmul.bf16 %v16012_v23, %v4518_v25  ;;  %v16018_v43 = vld [vmem:[%s21936_s2 + $0x10] ss:$28 sps:$4 sm:$0xff]  }
 0x1ba   : > { %v16016_v1 = vld [vmem:[%s21935_s1 + $0x458] ss:$24 sps:$4 sm:$0xff]  }
 0x1bb   : > { %v17937_v34 = vpop.permute.xlu1 %796  ;;  %7384 = vmatprep.subr.bf16.mxu0 %v4569_v41  ;;  %v795_v8 = vpop.permute.xlu0 %794 }
 0x1bc   : > { %v802_v12 = vsel %vm800_vm3, %v16948_v37, %v795_v8  ;;  %v803_v25 = vsel %vm800_vm3, %v795_v8, %v17937_v34  ;;  %7385 = vmatpush2.bf16.msra.mxu0 %v4568_v2  ;;  %v16021_v37 = vld [vmem:[%s21935_s1 + $0x45c] ss:$24 sps:$4 sm:$0xff]  }
 0x1bd   : > { %2922 = vrot.lane.b32.xlu1 %v17748_v22, %s22007_s18  ;;  %v854_v23 = vmul.bf16 %v16013_v55, %v802_v12  ;;  %2920 = vrot.lane.b32.xlu0 %v17412_v0, %s22007_s18  ;;  %v855_v4 = vmul.bf16 %v16015_v29, %v803_v25  ;;  %v16022_v25 = vld [vmem:[%s21935_s1 + $0x98] ss:$24 sps:$4 sm:$0xff]   ;;  %s22015_s18 = smov 46  }
 0x1bf   : > { %v17956_v41 = vpop.permute.xlu1 %2810  ;;  %7446 = vmatprep.subr.bf16.mxu1 %v855_v4  ;;  %v2809_v2 = vpop.permute.xlu0 %2808  ;;  %7387 = vmatmul.mubr.bf16.vlgmr.msra.gmra.mxu0 %v16018_v43 }
 0x1c0   : > { %v2816_v55 = vsel %vm2814_vm12, %v17124_v7, %v2809_v2  ;;  %v2817_v8 = vsel %vm2814_vm12, %v2809_v2, %v17956_v41  ;;  %7447 = vmatpush1.bf16.msra.mxu1 %v854_v23  ;;  %v16024_v7 = vld [vmem:[%s21935_s1 + $0x9c] ss:$24 sps:$4 sm:$0xff]   ;;  %7515 = vmatprep.mubr.bf16.mxu0 %v17347_v50  ;;  %v16025_v50 = vld [vmem:[%s21935_s1 + $0x428] ss:$24 sps:$4 sm:$0xff]  }
 0x1c1   : > { %4194 = vrot.lane.b32.xlu1 %v17748_v22, %s22008_s15  ;;  %v2868_v29 = vmul.bf16 %v16016_v1, %v2816_v55  ;;  %4192 = vrot.lane.b32.xlu0 %v17412_v0, %s22008_s15  ;;  %v2869_v12 = vmul.bf16 %v16021_v37, %v2817_v8 }
 0x1c3   : > { %v17973_v43 = vpop.permute.xlu1 %690  ;;  %7483 = vmatprep.subr.bf16.mxu0 %v2869_v12  ;;  %v689_v23 = vpop.permute.xlu0 %688 }
 0x1c4   : > { %v696_v4 = vsel %vm694_vm4, %v16959_v42, %v689_v23  ;;  %v697_v1 = vsel %vm694_vm4, %v689_v23, %v17973_v43  ;;  %7484 = vmatpush1.bf16.msra.mxu0 %v2868_v29  ;;  %v16027_v42 = vld [vmem:[%s21935_s1 + $0x42c] ss:$24 sps:$4 sm:$0xff]   ;;  %v16028_v23 = vld [vmem:[%s21935_s1 + $0x68] ss:$24 sps:$4 sm:$0xff]  }
 0x1c5   : > { %4088 = vrot.lane.b32.xlu1 %v17748_v22, %s22009_s3  ;;  %v748_v37 = vmul.bf16 %v16022_v25, %v696_v4  ;;  %4086 = vrot.lane.b32.xlu0 %v17412_v0, %s22009_s3  ;;  %v749_v2 = vmul.bf16 %v16024_v7, %v697_v1 }
 0x1c7   : > { %v17989_v55 = vpop.permute.xlu1 %2704  ;;  %7448 = vmatprep.subr.bf16.mxu1 %v749_v2  ;;  %v2703_v8 = vpop.permute.xlu0 %2702 }
 0x1c8   : > { %v2710_v29 = vsel %vm2708_vm14, %v17164_v38, %v2703_v8  ;;  %v2711_v12 = vsel %vm2708_vm14, %v2703_v8, %v17989_v55  ;;  %7449 = vmatpush1.bf16.msra.mxu1 %v748_v37  ;;  %v16030_v38 = vld [vmem:[%s21935_s1 + $0x6c] ss:$24 sps:$4 sm:$0xff]   ;;  %v16031_v8 = vld [vmem:[%s21935_s1 + $0x3f8] ss:$24 sps:$4 sm:$0xff]  }
 0x1c9   : > { %3980 = vrot.lane.b32.xlu1 %v17412_v0, %s22010_s5  ;;  %v2762_v25 = vmul.bf16 %v16025_v50, %v2710_v29  ;;  %1116 = vrot.lane.b32.xlu0 %v17748_v22, %s22011_s7  ;;  %v2763_v7 = vmul.bf16 %v16027_v42, %v2711_v12  ;;  %s22012_s7 = smov 45  }
 0x1cb   : > { %v18005_v4 = vpop.permute.xlu1 %584  ;;  %7485 = vmatprep.subr.bf16.mxu0 %v2763_v7  ;;  %v583_v1 = vpop.permute.xlu0 %582 }
 0x1cc   : > { %v590_v37 = vsel %vm588_vm5, %v16991_v57, %v583_v1  ;;  %v591_v2 = vsel %vm588_vm5, %v583_v1, %v18005_v4  ;;  %7486 = vmatpush1.bf16.msra.mxu0 %v2762_v25  ;;  %v16033_v57 = vld [vmem:[%s21935_s1 + $0x3fc] ss:$24 sps:$4 sm:$0xff]   ;;  %v16034_v1 = vld [vmem:[%s21935_s1 + $0x38] ss:$24 sps:$4 sm:$0xff]  }
 0x1cd   : > { %1010 = vrot.lane.b32.xlu1 %v17748_v22, %s22012_s7  ;;  %v642_v50 = vmul.bf16 %v16028_v23, %v590_v37  ;;  %3982 = vrot.lane.b32.xlu0 %v17748_v22, %s22010_s5  ;;  %v643_v42 = vmul.bf16 %v16030_v38, %v591_v2  ;;  %s22013_s7 = smov 109  }
 0x1cf   : > { %v18021_v29 = vpop.permute.xlu1 %2598  ;;  %7450 = vmatprep.subr.bf16.mxu1 %v643_v42  ;;  %v2597_v12 = vpop.permute.xlu0 %2596 }
 0x1d0   : > { %v2604_v25 = vsel %vm2602_vm13, %v17204_v5, %v2597_v12  ;;  %v2605_v7 = vsel %vm2602_vm13, %v2597_v12, %v18021_v29  ;;  %7451 = vmatpush1.bf16.msra.mxu1 %v642_v50  ;;  %v16036_v5 = vld [vmem:[%s21935_s1 + $0x3c] ss:$24 sps:$4 sm:$0xff]   ;;  %v16037_v12 = vld [vmem:[%s21935_s1 + $0x3c8] ss:$24 sps:$4 sm:$0xff]  }
 0x1d1   : > { %3876 = vrot.lane.b32.xlu1 %v17748_v22, %s22013_s7  ;;  %v2656_v23 = vmul.bf16 %v16031_v8, %v2604_v25  ;;  %3874 = vrot.lane.b32.xlu0 %v17412_v0, %s22013_s7  ;;  %v2657_v38 = vmul.bf16 %v16033_v57, %v2605_v7 }
 0x1d3   : > { %v18037_v37 = vpop.permute.xlu1 %478  ;;  %7487 = vmatprep.subr.bf16.mxu0 %v2657_v38  ;;  %v477_v2 = vpop.permute.xlu0 %476 }
 0x1d4   : > { %v484_v50 = vsel %vm21811_vm6, %v17005_v63, %v477_v2  ;;  %v485_v42 = vsel %vm21811_vm6, %v477_v2, %v18037_v37  ;;  %7488 = vmatpush1.bf16.msra.mxu0 %v2656_v23  ;;  %v16039_v63 = vld [vmem:[%s21935_s1 + $0x3cc] ss:$24 sps:$4 sm:$0xff]   ;;  %v16040_v2 = vld [vmem:[%s21935_s1 + $0x8] ss:$24 sps:$4 sm:$0xff]  }
 0x1d5   : > { %3768 = vrot.lane.b32.xlu1 %v17412_v0, %s22014_s8  ;;  %v536_v8 = vmul.bf16 %v16034_v1, %v484_v50  ;;  %904 = vrot.lane.b32.xlu0 %v17748_v22, %s22015_s18  ;;  %v537_v57 = vmul.bf16 %v16036_v5, %v485_v42  ;;  %s22016_s18 = smov 47  }
 0x1d7   : > { %v18053_v25 = vpop.permute.xlu1 %2492  ;;  %7452 = vmatprep.subr.bf16.mxu1 %v537_v57  ;;  %v2491_v7 = vpop.permute.xlu0 %2490 }
 0x1d8   : > { %v2498_v23 = vsel %vm21793_vm11, %v17244_v44, %v2491_v7  ;;  %v2499_v38 = vsel %vm21793_vm11, %v2491_v7, %v18053_v25  ;;  %7453 = vmatpush1.bf16.msra.mxu1 %v536_v8  ;;  %v16042_v44 = vld [vmem:[%s21935_s1 + $0xc] ss:$24 sps:$4 sm:$0xff]   ;;  %v16043_v7 = vld [vmem:[%s21935_s1 + $0x398] ss:$24 sps:$4 sm:$0xff]  }
 0x1d9   : > { %798 = vrot.lane.b32.xlu1 %v17748_v22, %s22016_s18  ;;  %v2550_v1 = vmul.bf16 %v16037_v12, %v2498_v23  ;;  %3770 = vrot.lane.b32.xlu0 %v17748_v22, %s22014_s8  ;;  %v2551_v5 = vmul.bf16 %v16039_v63, %v2499_v38  ;;  %s22017_s18 = smov 111  }
 0x1db   : > { %v18069_v50 = vpop.permute.xlu1 %372  ;;  %7489 = vmatprep.subr.bf16.mxu0 %v2551_v5  ;;  %v371_v42 = vpop.permute.xlu0 %370 }
 0x1dc   : > { %v378_v8 = vsel %vm21810_vm7, %v17033_v15, %v371_v42  ;;  %v379_v57 = vsel %vm21810_vm7, %v371_v42, %v18069_v50  ;;  %7490 = vmatpush1.bf16.msra.mxu0 %v2550_v1  ;;  %v16045_v15 = vld [vmem:[%s21935_s1 + $0x39c] ss:$24 sps:$4 sm:$0xff]   ;;  %v16046_v42 = vld [vmem:[%s21935_s1 + $0x2d8] ss:$24 sps:$4 sm:$0xff]  }
 0x1dd   : > { %3664 = vrot.lane.b32.xlu1 %v17748_v22, %s22017_s18  ;;  %v430_v12 = vmul.bf16 %v16040_v2, %v378_v8  ;;  %3662 = vrot.lane.b32.xlu0 %v17412_v0, %s22017_s18  ;;  %v431_v63 = vmul.bf16 %v16042_v44, %v379_v57 }
 0x1df   : > { %v18085_v23 = vpop.permute.xlu1 %2386  ;;  %7454 = vmatprep.subr.bf16.mxu1 %v431_v63  ;;  %v2385_v38 = vpop.permute.xlu0 %2384 }
 0x1e0   : > { %v2392_v1 = vsel %vm21792_vm10, %v17284_v24, %v2385_v38  ;;  %v2393_v5 = vsel %vm21792_vm10, %v2385_v38, %v18085_v23  ;;  %7455 = vmatpush1.bf16.msra.mxu1 %v430_v12  ;;  %v16048_v24 = vld [vmem:[%s21935_s1 + $0x2dc] ss:$24 sps:$4 sm:$0xff]   ;;  %vm22020_vm10 = vcmask 146432  }
 0x1e1   : > { %5252 = vrot.lane.b32.xlu1 %v17412_v0, %s22018_s29  ;;  %v2444_v2 = vmul.bf16 %v16043_v7, %v2392_v1  ;;  %692 = vrot.lane.b32.xlu0 %v17748_v22, %s22019_s0  ;;  %v2445_v44 = vmul.bf16 %v16045_v15, %v2393_v5  ;;  %vm22021_vm11 = vmmov %vm22020_vm10  ;;  %s22022_s0 = smov 49   ;;  %v16049_v15 = vld [vmem:[%s21935_s1 + $0x368] ss:$24 sps:$4 sm:$0xff]  }
 0x1e3   : > { %v18101_v8 = vpop.permute.xlu1 %1962  ;;  %7491 = vmatprep.subr.bf16.mxu0 %v2445_v44  ;;  %v1961_v57 = vpop.permute.xlu0 %1960 }
 0x1e4   : > { %v1968_v0 = vsel %vm22020_vm10, %v17044_v21, %v1961_v57  ;;  %v1969_v12 = vsel %vm22021_vm11, %v1961_v57, %v18101_v8  ;;  %7492 = vmatpush1.bf16.msra.mxu0 %v2444_v2  ;;  %v16051_v21 = vld [vmem:[%s21935_s1 + $0x36c] ss:$24 sps:$4 sm:$0xff]   ;;  %vm22023_vm10 = vcmask 121856   ;;  %v16052_v57 = vld [vmem:[%s21935_s1 + $0x2a8] ss:$24 sps:$4 sm:$0xff]  }
 0x1e5   : > { %586 = vrot.lane.b32.xlu1 %v17748_v22, %s22022_s0  ;;  %v2020_v63 = vmul.bf16 %v16046_v42, %v1968_v0  ;;  %5254 = vrot.lane.b32.xlu0 %v17748_v22, %s22018_s29  ;;  %v2021_v7 = vmul.bf16 %v16048_v24, %v1969_v12  ;;  %vm22024_vm11 = vmmov %vm22023_vm10  ;;  %s22025_s0 = smov 79   ;;  %v18126_v42 = vld [vmem:[%s16743_s14 + $0xc] ss:$24 sps:$4 sm:$0xff]   ;;  %s22084_s29 = smov 79  }
 0x1e7   : > { %v18117_v38 = vpop.permute.xlu1 %2280  ;;  %7456 = vmatprep.subr.bf16.mxu1 %v2021_v7  ;;  %v2279_v1 = vpop.permute.xlu0 %2278 }
 0x1e8   : > { %v2286_v5 = vsel %vm22023_vm10, %v17309_v59, %v2279_v1  ;;  %v2287_v2 = vsel %vm22024_vm11, %v2279_v1, %v18117_v38  ;;  %7457 = vmatpush2.bf16.msra.mxu1 %v2020_v63  ;;  %v16054_v59 = vld [vmem:[%s21935_s1 + $0x2ac] ss:$24 sps:$4 sm:$0xff]   ;;  %vm22026_vm10 = vcmask 154624   ;;  %v16055_v1 = vld [vmem:[%s21935_s1 + $0x338] ss:$24 sps:$4 sm:$0xff]  }
 0x1e9   : > { %5148 = vrot.lane.b32.xlu1 %v17748_v22, %s22025_s0  ;;  %v2338_v44 = vmul.bf16 %v16049_v15, %v2286_v5  ;;  %5146 = vrot.lane.b32.xlu0 %v18126_v42, %s22025_s0  ;;  %v2339_v24 = vmul.bf16 %v16051_v21, %v2287_v2  ;;  %vm22027_vm11 = vmmov %vm22026_vm10  ;;  %s22028_s0 = smov 80  }
 0x1eb   : > { %v18136_v0 = vpop.permute.xlu1 %1856  ;;  %7493 = vmatprep.subr.bf16.mxu0 %v2339_v24  ;;  %v1855_v12 = vpop.permute.xlu0 %1854 }
 0x1ec   : > { %v1862_v63 = vsel %vm22026_vm10, %v17073_v39, %v1855_v12  ;;  %v1863_v7 = vsel %vm22027_vm11, %v1855_v12, %v18136_v0  ;;  %7494 = vmatpush1.bf16.msra.mxu0 %v2338_v44  ;;  %v16057_v39 = vld [vmem:[%s21935_s1 + $0x33c] ss:$24 sps:$4 sm:$0xff]   ;;  %v16058_v12 = vld [vmem:[%s21935_s1 + $0x278] ss:$24 sps:$4 sm:$0xff]   ;;  %vm22030_vm10 = vcmask 236544  }
 0x1ed   : > { %5040 = vrot.lane.b32.xlu1 %v18126_v42, %s22028_s0  ;;  %v1914_v15 = vmul.bf16 %v16052_v57, %v1862_v63  ;;  %480 = vrot.lane.b32.xlu0 %v17748_v22, %s22029_s17  ;;  %v1915_v21 = vmul.bf16 %v16054_v59, %v1863_v7  ;;  %vm22031_vm11 = vmmov %vm22030_vm10  ;;  %s22035_s17 = smov 82  }
 0x1ef   : > { %v18152_v5 = vpop.permute.xlu1 %2174  ;;  %7458 = vmatprep.subr.bf16.mxu1 %v1915_v21  ;;  %v2173_v2 = vpop.permute.xlu0 %2172 }
 0x1f0   : > { %v2180_v44 = vsel %vm2178_vm15, %v17355_v54, %v2173_v2  ;;  %v2181_v24 = vsel %vm2178_vm15, %v2173_v2, %v18152_v5  ;;  %7459 = vmatpush2.bf16.msra.mxu1 %v1914_v15  ;;  %v16060_v54 = vld [vmem:[%s21935_s1 + $0x27c] ss:$24 sps:$4 sm:$0xff]   ;;  %v16061_v2 = vld [vmem:[%s21935_s1 + $0x308] ss:$24 sps:$4 sm:$0xff]  }
 0x1f1   : > { %374 = vrot.lane.b32.xlu1 %v17748_v22, %s21969_s28  ;;  %v2232_v57 = vmul.bf16 %v16055_v1, %v2180_v44  ;;  %5042 = vrot.lane.b32.xlu0 %v17748_v22, %s22028_s0  ;;  %v2233_v59 = vmul.bf16 %v16057_v39, %v2181_v24  ;;  %s22032_s28 = smov 81  }
 0x1f3   : > { %v18168_v63 = vpop.permute.xlu1 %1750  ;;  %7495 = vmatprep.subr.bf16.mxu0 %v2233_v59  ;;  %v1749_v7 = vpop.permute.xlu0 %1748 }
 0x1f4   : > { %v1756_v15 = vsel %vm22030_vm10, %v17084_v45, %v1749_v7  ;;  %v1757_v21 = vsel %vm22031_vm11, %v1749_v7, %v18168_v63  ;;  %7496 = vmatpush1.bf16.msra.mxu0 %v2232_v57  ;;  %v16063_v45 = vld [vmem:[%s21935_s1 + $0x30c] ss:$24 sps:$4 sm:$0xff]   ;;  %vm22033_vm10 = vcmask 138240   ;;  %v16064_v7 = vld [vmem:[%s21935_s1 + $0x248] ss:$24 sps:$4 sm:$0xff]  }
 0x1f5   : > { %4936 = vrot.lane.b32.xlu1 %v17748_v22, %s22032_s28  ;;  %v1808_v1 = vmul.bf16 %v16058_v12, %v1756_v15  ;;  %4934 = vrot.lane.b32.xlu0 %v18126_v42, %s22032_s28  ;;  %v1809_v39 = vmul.bf16 %v16060_v54, %v1757_v21  ;;  %vm22034_vm11 = vmmov %vm22033_vm10 }
 0x1f7   : > { %v18184_v44 = vpop.permute.xlu1 %2068  ;;  %7460 = vmatprep.subr.bf16.mxu1 %v1809_v39  ;;  %v2067_v24 = vpop.permute.xlu0 %2066 }
 0x1f8   : > { %v2074_v57 = vsel %vm22033_vm10, %v17400_v32, %v2067_v24  ;;  %v2075_v59 = vsel %vm22034_vm11, %v2067_v24, %v18184_v44  ;;  %7461 = vmatpush2.bf16.msra.mxu1 %v1808_v1  ;;  %v16066_v32 = vld [vmem:[%s21935_s1 + $0x24c] ss:$24 sps:$4 sm:$0xff]   ;;  %vm22036_vm10 = vcmask 244736   ;;  %v16067_v24 = vld [vmem:[%s21935_s1 + $0x5d8] ss:$24 sps:$4 sm:$0xff]  }
 0x1f9   : > { %4828 = vrot.lane.b32.xlu1 %v18126_v42, %s22035_s17  ;;  %v2126_v12 = vmul.bf16 %v16061_v2, %v2074_v57  ;;  %1964 = vrot.lane.b32.xlu0 %v17748_v22, %s21971_s25  ;;  %v2127_v54 = vmul.bf16 %v16063_v45, %v2075_v59  ;;  %vm22037_vm11 = vmmov %vm22036_vm10  ;;  %s22043_s25 = smov 93  }
 0x1fb   : > { %v18200_v15 = vpop.permute.xlu1 %1644  ;;  %7497 = vmatprep.subr.bf16.mxu0 %v2127_v54  ;;  %v1643_v21 = vpop.permute.xlu0 %1642 }
 0x1fc   : > { %v1650_v1 = vsel %vm22036_vm10, %v17109_v62, %v1643_v21  ;;  %v1651_v39 = vsel %vm22037_vm11, %v1643_v21, %v18200_v15  ;;  %7498 = vmatpush1.bf16.msra.mxu0 %v2126_v12  ;;  %v16069_v62 = vld [vmem:[%s21935_s1 + $0x5dc] ss:$24 sps:$4 sm:$0xff]   ;;  %vm22038_vm10 = vcmask 916480   ;;  %v16070_v21 = vld [vmem:[%s21935_s1 + $0x218] ss:$24 sps:$4 sm:$0xff]  }
 0x1fd   : > { %1858 = vrot.lane.b32.xlu1 %v17748_v22, %s21974_s23  ;;  %v1702_v2 = vmul.bf16 %v16064_v7, %v1650_v1  ;;  %4830 = vrot.lane.b32.xlu0 %v17748_v22, %s22035_s17  ;;  %v1703_v45 = vmul.bf16 %v16066_v32, %v1651_v39  ;;  %vm22039_vm11 = vmmov %vm22038_vm10  ;;  %s22040_s23 = smov 83  }
 0x1ff   : > { %v18216_v57 = vpop.permute.xlu1 %3558  ;;  %7462 = vmatprep.subr.bf16.mxu1 %v1703_v45  ;;  %v3557_v59 = vpop.permute.xlu0 %3556 }
 0x200   : > { %v3565_v12 = vsel %vm22038_vm10, %v17443_v51, %v3557_v59  ;;  %v3566_v54 = vsel %vm22039_vm11, %v3557_v59, %v18216_v57  ;;  %7463 = vmatpush2.bf16.msra.mxu1 %v1702_v2  ;;  %v16072_v51 = vld [vmem:[%s21935_s1 + $0x21c] ss:$24 sps:$4 sm:$0xff]   ;;  %vm22041_vm10 = vcmask 252928   ;;  %v16073_v59 = vld [vmem:[%s21935_s1 + $0x5a8] ss:$24 sps:$4 sm:$0xff]  }
 0x201   : > { %4724 = vrot.lane.b32.xlu1 %v17748_v22, %s22040_s23  ;;  %v3616_v7 = vmul.bf16 %v16067_v24, %v3565_v12  ;;  %4722 = vrot.lane.b32.xlu0 %v18126_v42, %s22040_s23  ;;  %v3617_v32 = vmul.bf16 %v16069_v62, %v3566_v54  ;;  %vm22042_vm11 = vmmov %vm22041_vm10 }
 0x203   : > { %v18232_v1 = vpop.permute.xlu1 %1538  ;;  %7499 = vmatprep.subr.bf16.mxu0 %v3617_v32  ;;  %v1537_v39 = vpop.permute.xlu0 %1536 }
 0x204   : > { %v1544_v2 = vsel %vm22041_vm10, %v17146_v26, %v1537_v39  ;;  %v1545_v45 = vsel %vm22042_vm11, %v1537_v39, %v18232_v1  ;;  %7500 = vmatpush2.bf16.msra.mxu0 %v3616_v7  ;;  %v16075_v26 = vld [vmem:[%s21935_s1 + $0x5ac] ss:$24 sps:$4 sm:$0xff]   ;;  %vm22044_vm10 = vcmask 924672   ;;  %v16076_v39 = vld [vmem:[%s21935_s1 + $0x1e8] ss:$24 sps:$4 sm:$0xff]  }
 0x205   : > { %4616 = vrot.lane.b32.xlu1 %v18126_v42, %s22043_s25  ;;  %v1596_v24 = vmul.bf16 %v16070_v21, %v1544_v2  ;;  %1752 = vrot.lane.b32.xlu0 %v17748_v22, %s21978_s24  ;;  %v1597_v62 = vmul.bf16 %v16072_v51, %v1545_v45  ;;  %vm22045_vm11 = vmmov %vm22044_vm10 }
 0x207   : > { %v18248_v12 = vpop.permute.xlu1 %3452  ;;  %7464 = vmatprep.subr.bf16.mxu1 %v1597_v62  ;;  %v3451_v54 = vpop.permute.xlu0 %3450 }
 0x208   : > { %v3459_v7 = vsel %vm22044_vm10, %v17486_v58, %v3451_v54  ;;  %v3460_v32 = vsel %vm22045_vm11, %v3451_v54, %v18248_v12  ;;  %7465 = vmatpush2.bf16.msra.mxu1 %v1596_v24  ;;  %v16078_v58 = vld [vmem:[%s21935_s1 + $0x1ec] ss:$24 sps:$4 sm:$0xff]   ;;  %vm22046_vm10 = vcmask 261120   ;;  %v16079_v54 = vld [vmem:[%s21935_s1 + $0x578] ss:$24 sps:$4 sm:$0xff]  }
 0x209   : > { %1646 = vrot.lane.b32.xlu1 %v17748_v22, %s21983_s27  ;;  %v3510_v21 = vmul.bf16 %v16073_v59, %v3459_v7  ;;  %4618 = vrot.lane.b32.xlu0 %v17748_v22, %s22043_s25  ;;  %v3511_v51 = vmul.bf16 %v16075_v26, %v3460_v32  ;;  %vm22047_vm11 = vmmov %vm22046_vm10  ;;  %s22048_s27 = smov 94  }
 0x20b   : > { %v18264_v2 = vpop.permute.xlu1 %1432  ;;  %7501 = vmatprep.subr.bf16.mxu0 %v3511_v51  ;;  %v1431_v45 = vpop.permute.xlu0 %1430 }
 0x20c   : > { %v1438_v24 = vsel %vm22046_vm10, %v17186_v56, %v1431_v45  ;;  %v1439_v62 = vsel %vm22047_vm11, %v1431_v45, %v18264_v2  ;;  %7502 = vmatpush2.bf16.msra.mxu0 %v3510_v21  ;;  %v16081_v56 = vld [vmem:[%s21935_s1 + $0x57c] ss:$24 sps:$4 sm:$0xff]   ;;  %vm22049_vm10 = vcmask 932864   ;;  %v16082_v45 = vld [vmem:[%s21935_s1 + $0x1b8] ss:$24 sps:$4 sm:$0xff]  }
 0x20d   : > { %4512 = vrot.lane.b32.xlu1 %v17748_v22, %s22048_s27  ;;  %v1490_v59 = vmul.bf16 %v16076_v39, %v1438_v24  ;;  %4510 = vrot.lane.b32.xlu0 %v18126_v42, %s22048_s27  ;;  %v1491_v26 = vmul.bf16 %v16078_v58, %v1439_v62  ;;  %vm22050_vm11 = vmmov %vm22049_vm10 }
 0x20f   : > { %v18280_v7 = vpop.permute.xlu1 %3346  ;;  %7466 = vmatprep.subr.bf16.mxu1 %v1491_v26  ;;  %v3345_v32 = vpop.permute.xlu0 %3344 }
 0x210   : > { %v3353_v21 = vsel %vm22049_vm10, %v17529_v20, %v3345_v32  ;;  %v3354_v51 = vsel %vm22050_vm11, %v3345_v32, %v18280_v7  ;;  %7467 = vmatpush2.bf16.msra.mxu1 %v1490_v59  ;;  %v16084_v20 = vld [vmem:[%s21935_s1 + $0x1bc] ss:$24 sps:$4 sm:$0xff]   ;;  %vm22051_vm10 = vcmask 269312   ;;  %v16085_v32 = vld [vmem:[%s21935_s1 + $0x548] ss:$24 sps:$4 sm:$0xff]  }
 0x211   : > { %1434 = vrot.lane.b32.xlu1 %v17748_v22, %s21993_s19  ;;  %v3404_v39 = vmul.bf16 %v16079_v54, %v3353_v21  ;;  %1540 = vrot.lane.b32.xlu0 %v17748_v22, %s21988_s21  ;;  %v3405_v58 = vmul.bf16 %v16081_v56, %v3354_v51  ;;  %vm22052_vm11 = vmmov %vm22051_vm10  ;;  %s22053_s19 = smov 77   ;;  %s22056_s21 = smov 1  }
 0x213   : > { %v18296_v24 = vpop.permute.xlu1 %1326  ;;  %7503 = vmatprep.subr.bf16.mxu0 %v3405_v58  ;;  %v1325_v62 = vpop.permute.xlu0 %1324 }
 0x214   : > { %v1332_v59 = vsel %vm22051_vm10, %v17226_v28, %v1325_v62  ;;  %v1333_v26 = vsel %vm22052_vm11, %v1325_v62, %v18296_v24  ;;  %7504 = vmatpush2.bf16.msra.mxu0 %v3404_v39  ;;  %v16087_v28 = vld [vmem:[%s21935_s1 + $0x54c] ss:$24 sps:$4 sm:$0xff]   ;;  %vm22054_vm10 = vcmask 941056   ;;  %v16088_v62 = vld [vmem:[%s21935_s1 + $0x188] ss:$24 sps:$4 sm:$0xff]  }
 0x215   : > { %5360 = vrot.lane.b32.xlu1 %v17748_v22, %s22053_s19  ;;  %v1384_v54 = vmul.bf16 %v16082_v45, %v1332_v59  ;;  %5358 = vrot.lane.b32.xlu0 %v18126_v42, %s22053_s19  ;;  %v1385_v56 = vmul.bf16 %v16084_v20, %v1333_v26  ;;  %vm22055_vm11 = vmmov %vm22054_vm10 }
 0x217   : > { %v18312_v21 = vpop.permute.xlu1 %3240  ;;  %7468 = vmatprep.subr.bf16.mxu1 %v1385_v56  ;;  %v3239_v51 = vpop.permute.xlu0 %3238 }
 0x218   : > { %v3247_v39 = vsel %vm22054_vm10, %v17569_v52, %v3239_v51  ;;  %v3248_v58 = vsel %vm22055_vm11, %v3239_v51, %v18312_v21  ;;  %7469 = vmatpush2.bf16.msra.mxu1 %v1384_v54  ;;  %v16090_v52 = vld [vmem:[%s21935_s1 + $0x18c] ss:$24 sps:$4 sm:$0xff]   ;;  %vm22057_vm10 = vcmask 277504   ;;  %v16091_v51 = vld [vmem:[%s21935_s1 + $0x518] ss:$24 sps:$4 sm:$0xff]  }
 0x219   : > { %2812 = vrot.lane.b32.xlu1 %v17748_v22, %s22056_s21  ;;  %v3298_v45 = vmul.bf16 %v16085_v32, %v3247_v39  ;;  %1328 = vrot.lane.b32.xlu0 %v17748_v22, %s21996_s22  ;;  %v3299_v20 = vmul.bf16 %v16087_v28, %v3248_v58  ;;  %vm22058_vm11 = vmmov %vm22057_vm10  ;;  %s22059_s21 = smov 2  }
 0x21b   : > { %v18328_v59 = vpop.permute.xlu1 %1220  ;;  %7505 = vmatprep.subr.bf16.mxu0 %v3299_v20  ;;  %v1219_v26 = vpop.permute.xlu0 %1218 }
 0x21c   : > { %v1226_v54 = vsel %vm22057_vm10, %v17266_v9, %v1219_v26  ;;  %v1227_v56 = vsel %vm22058_vm11, %v1219_v26, %v18328_v59  ;;  %7506 = vmatpush2.bf16.msra.mxu0 %v3298_v45  ;;  %v16093_v9 = vld [vmem:[%s21935_s1 + $0x51c] ss:$24 sps:$4 sm:$0xff]   ;;  %vm22060_vm10 = vcmask 1022976  }
 0x21d   : > { %2706 = vrot.lane.b32.xlu1 %v17748_v22, %s22059_s21  ;;  %v1278_v32 = vmul.bf16 %v16088_v62, %v1226_v54  ;;  %1222 = vrot.lane.b32.xlu0 %v17748_v22, %s21999_s30  ;;  %v1279_v28 = vmul.bf16 %v16090_v52, %v1227_v56  ;;  %vm22061_vm11 = vmmov %vm22060_vm10  ;;  %s22062_s21 = smov 3   ;;  %v18353_v52 = vld [vmem:[%s16743_s14 + $0x14] ss:$24 sps:$4 sm:$0xff]   ;;  %v16094_v54 = vld [vmem:[%s21935_s1 + $0x758] ss:$24 sps:$4 sm:$0xff]   ;;  %s22067_s30 = smov 14  }
 0x21f   : > { %v18344_v39 = vpop.permute.xlu1 %3134  ;;  %7470 = vmatprep.subr.bf16.mxu1 %v1279_v28  ;;  %v3133_v58 = vpop.permute.xlu0 %3132  ;;  %v18368_v28 = vld [vmem:[%s21936_s2] ss:$28 sps:$4 sm:$0xff]  }
 0x220   : > { %v3141_v45 = vsel %vm22060_vm10, %v17609_v48, %v3133_v58  ;;  %v3142_v20 = vsel %vm22061_vm11, %v3133_v58, %v18344_v39  ;;  %7471 = vmatpush2.bf16.msra.mxu1 %v1278_v32  ;;  %v16096_v48 = vld [vmem:[%s21935_s1 + $0x75c] ss:$24 sps:$4 sm:$0xff]   ;;  %vm22063_vm10 = vcmask 777216  }
 0x221   : > { %2600 = vrot.lane.b32.xlu1 %v17748_v22, %s22062_s21  ;;  %v3192_v62 = vmul.bf16 %v16091_v51, %v3141_v45  ;;  %4408 = vrot.lane.b32.xlu0 %v18353_v52, %s22003_s20  ;;  %v3193_v26 = vmul.bf16 %v16093_v9, %v3142_v20  ;;  %vm22064_vm11 = vmmov %vm22063_vm10  ;;  %v16097_v20 = vld [vmem:[%s21935_s1 + $0x4e8] ss:$24 sps:$4 sm:$0xff]   ;;  %s22083_s21 = smov 115  }
 0x223   : > { %v18363_v56 = vpop.permute.xlu1 %4406  ;;  %7507 = vmatprep.subr.bf16.mxu0 %v3193_v26  ;;  %v4405_v32 = vpop.permute.xlu0 %4404  ;;  %7473 = vmatmul.mubr.bf16.vlgmr.msra.gmra.mxu1 %v18368_v28 }
 0x224   : > { %v4413_v51 = vsel %vm22063_vm10, %v17327_v16, %v4405_v32  ;;  %v4414_v9 = vsel %vm22064_vm11, %v4405_v32, %v18363_v56  ;;  %7508 = vmatpush2.bf16.msra.mxu0 %v3192_v62  ;;  %v16099_v16 = vld [vmem:[%s21935_s1 + $0x4ec] ss:$24 sps:$4 sm:$0xff]   ;;  %v18388_v62 = vld [vmem:[%s21936_s2 + $0x14] ss:$28 sps:$4 sm:$0xff]   ;;  %vm22065_vm10 = vcmask 1031168  }
 0x225   : > { %2494 = vrot.lane.b32.xlu1 %v17748_v22, %s21967_s13  ;;  %v4464_v58 = vmul.bf16 %v16094_v54, %v4413_v51  ;;  %4302 = vrot.lane.b32.xlu0 %v18353_v52, %s22006_s10  ;;  %v4465_v45 = vmul.bf16 %v16096_v48, %v4414_v9  ;;  %vm22066_vm11 = vmmov %vm22065_vm10 }
 0x226   : > { %7558 = vmatprep.mubr.bf16.mxu1 %v18388_v62 }
 0x227   : > { %v18391_v26 = vpop.permute.xlu1 %3028  ;;  %7526 = vmatprep.subr.bf16.mxu1 %v4465_v45  ;;  %v3027_v54 = vpop.permute.xlu0 %3026  ;;  %v16100_v45 = vld [vmem:[%s21935_s1 + $0x728] ss:$24 sps:$4 sm:$0xff]  }
 0x228   : > { %v3035_v48 = vsel %vm22065_vm10, %v17649_v13, %v3027_v54  ;;  %v3036_v32 = vsel %vm22066_vm11, %v3027_v54, %v18391_v26  ;;  %7527 = vmatpush1.bf16.msra.mxu1 %v4464_v58  ;;  %v16102_v13 = vld [vmem:[%s21935_s1 + $0x72c] ss:$24 sps:$4 sm:$0xff]   ;;  %vm22068_vm10 = vcmask 785408  }
 0x229   : > { %2388 = vrot.lane.b32.xlu1 %v17748_v22, %s22067_s30  ;;  %v3086_v51 = vmul.bf16 %v16097_v20, %v3035_v48  ;;  %4196 = vrot.lane.b32.xlu0 %v18353_v52, %s22008_s15  ;;  %v3087_v9 = vmul.bf16 %v16099_v16, %v3036_v32  ;;  %vm22069_vm11 = vmmov %vm22068_vm10  ;;  %v16103_v32 = vld [vmem:[%s21935_s1 + $0x4b8] ss:$24 sps:$4 sm:$0xff]  }
 0x22b   : > { %v18407_v53 = vpop.permute.xlu1 %4300  ;;  %7509 = vmatprep.subr.bf16.mxu0 %v3087_v9  ;;  %v4299_v58 = vpop.permute.xlu0 %4298 }
 0x22c   : > { %v4307_v54 = vsel %vm22068_vm10, %v17373_v27, %v4299_v58  ;;  %v4308_v20 = vsel %vm22069_vm11, %v4299_v58, %v18407_v53  ;;  %7510 = vmatpush2.bf16.msra.mxu0 %v3086_v51  ;;  %v16105_v27 = vld [vmem:[%s21935_s1 + $0x4bc] ss:$24 sps:$4 sm:$0xff]   ;;  %vm22071_vm10 = vcmask 1039360  }
 0x22d   : > { %2282 = vrot.lane.b32.xlu1 %v17748_v22, %s22070_s6  ;;  %v4358_v16 = vmul.bf16 %v16100_v45, %v4307_v54  ;;  %4090 = vrot.lane.b32.xlu0 %v18353_v52, %s22009_s3  ;;  %v4359_v48 = vmul.bf16 %v16102_v13, %v4308_v20  ;;  %vm22072_vm11 = vmmov %vm22071_vm10  ;;  %v16106_v20 = vld [vmem:[%s21935_s1 + $0x6f8] ss:$24 sps:$4 sm:$0xff]  }
 0x22f   : > { %v18423_v9 = vpop.permute.xlu1 %2922  ;;  %7528 = vmatprep.subr.bf16.mxu1 %v4359_v48  ;;  %v2921_v51 = vpop.permute.xlu0 %2920 }
 0x230   : > { %v2929_v58 = vsel %vm22071_vm10, %v17689_v18, %v2921_v51  ;;  %v2930_v45 = vsel %vm22072_vm11, %v2921_v51, %v18423_v9  ;;  %7529 = vmatpush1.bf16.msra.mxu1 %v4358_v16  ;;  %v16108_v18 = vld [vmem:[%s21935_s1 + $0x6fc] ss:$24 sps:$4 sm:$0xff]   ;;  %vm22073_vm10 = vcmask 793600  }
 0x231   : > { %2176 = vrot.lane.b32.xlu1 %v17748_v22, %s21975_s12  ;;  %v2980_v13 = vmul.bf16 %v16103_v32, %v2929_v58  ;;  %3984 = vrot.lane.b32.xlu0 %v18353_v52, %s22010_s5  ;;  %v2981_v54 = vmul.bf16 %v16105_v27, %v2930_v45  ;;  %vm22074_vm11 = vmmov %vm22073_vm10  ;;  %v16109_v45 = vld [vmem:[%s21935_s1 + $0x6c8] ss:$24 sps:$4 sm:$0xff]   ;;  %s22079_s12 = smov 114  }
 0x233   : > { %v18439_v48 = vpop.permute.xlu1 %4194  ;;  %7511 = vmatprep.subr.bf16.mxu0 %v2981_v54  ;;  %v4193_v16 = vpop.permute.xlu0 %4192 }
 0x234   : > { %v4201_v51 = vsel %vm22073_vm10, %v17421_v11, %v4193_v16  ;;  %v4202_v32 = vsel %vm22074_vm11, %v4193_v16, %v18439_v48  ;;  %7512 = vmatpush2.bf16.msra.mxu0 %v2980_v13  ;;  %v16113_v11 = vld [vmem:[%s21935_s1 + $0x6cc] ss:$24 sps:$4 sm:$0xff]   ;;  %vm22075_vm10 = vcmask 801792   ;;  %v16114_v16 = vld [vmem:[%s21935_s1 + $0x160] ss:$24 sps:$4 sm:$0xff]  }
 0x235   : > { %2070 = vrot.lane.b32.xlu1 %v17748_v22, %s21980_s16  ;;  %v4252_v27 = vmul.bf16 %v16106_v20, %v4201_v51  ;;  %3878 = vrot.lane.b32.xlu0 %v18353_v52, %s22013_s7  ;;  %v4253_v58 = vmul.bf16 %v16108_v18, %v4202_v32  ;;  %vm22076_vm11 = vmmov %vm22075_vm10  ;;  %v16614_v51 = vld [vmem:[%s16743_s14 + $0x8] ss:$24 sps:$4 sm:$0xff]   ;;  %s22080_s16 = smov 78  }
 0x236   : > { %7513 = vmatprep.subr.bf16.mxu0 %v18126_v42 }
 0x237   : > { %v18456_v13 = vpop.permute.xlu1 %4088  ;;  %7530 = vmatprep.subr.bf16.mxu1 %v4253_v58  ;;  %v4087_v22 = vpop.permute.xlu0 %4086 }
 0x238   : > { %v4095_v54 = vsel %vm22075_vm10, %v17461_v46, %v4087_v22  ;;  %v4096_v20 = vsel %vm22076_vm11, %v4087_v22, %v18456_v13  ;;  %7531 = vmatpush1.bf16.msra.mxu1 %v4252_v27  ;;  %7514 = vmatpush2.bf16.msra.mxu0 %v16614_v51  ;;  %v16118_v46 = vld [vmem:[%s21935_s1 + $0x164] ss:$24 sps:$4 sm:$0xff]   ;;  %v16120_v22 = vld [vmem:[%s21935_s1 + $0x134] ss:$24 sps:$4 sm:$0xff]   ;;  %vm22077_vm10 = vcmask 809984  }
 0x239   : > { %3560 = vrot.lane.b32.xlu1 %v18353_v52, %s21986_s26  ;;  %v4146_v18 = vmul.bf16 %v16109_v45, %v4095_v54  ;;  %3772 = vrot.lane.b32.xlu0 %v18353_v52, %s22014_s8  ;;  %v4147_v42 = vmul.bf16 %v16113_v11, %v4096_v20  ;;  %v16116_v11 = vld [vmem:[%s21935_s1 + $0x130] ss:$24 sps:$4 sm:$0xff]   ;;  %v16119_v20 = vld [vmem:[%s21935_s1 + $0x69c] ss:$24 sps:$4 sm:$0xff]   ;;  %vm22078_vm11 = vmmov %vm22077_vm10  ;;  %s22091_s26 = smov 127  }
 0x23b   : > { %v3981_v32 = vpop.permute.xlu1 %3980  ;;  %7532 = vmatprep.subr.bf16.mxu1 %v4147_v42  ;;  %v1117_v27 = vpop.permute.xlu0 %1116 }
 0x23c   : > { %v1122_v58 = vsel %vm1118_vm0, %v17833_v36, %v1117_v27  ;;  %v1123_v45 = vsel %vm1118_vm0, %v1117_v27, %v16870_v3  ;;  %7533 = vmatpush1.bf16.msra.mxu1 %v4146_v18  ;;  %v16615_v3 = vld [vmem:[%s21936_s2 + $0x8] ss:$28 sps:$4 sm:$0xff]   ;;  %v16111_v18 = vld [vmem:[%s21935_s1 + $0x698] ss:$24 sps:$4 sm:$0xff]  }
 0x23d   : > { %3454 = vrot.lane.b32.xlu1 %v18353_v52, %s21990_s11  ;;  %v1174_v54 = vmul.bf16 %v16114_v16, %v1122_v58  ;;  %3666 = vrot.lane.b32.xlu0 %v18353_v52, %s22017_s18  ;;  %v1175_v36 = vmul.bf16 %v16118_v46, %v1123_v45  ;;  %v3989_v16 = vsel %vm22077_vm10, %v17507_v19, %v3981_v32  ;;  %vm22081_vm10 = vcmask 891904   ;;  %s22088_s18 = smov 126   ;;  %s22229_s11 = smov 48  }
 0x23e   : > { %7516 = vmatmul.mubr.bf16.vlgmr.msra.gmra.mxu0 %v16615_v3 }
 0x23f   : > { %v1011_v42 = vpop.permute.xlu1 %1010  ;;  %7644 = vmatprep.mubr.bf16.mxu0 %v17828_v33  ;;  %7612 = vmatprep.subr.bf16.mxu0 %v1175_v36  ;;  %v18503_v27 = vpop.permute.xlu0 %3982 }
 0x240   : > { %v1016_v51 = vsel %vm1012_vm1, %v17865_v47, %v1011_v42  ;;  %v1017_v46 = vsel %vm1012_vm1, %v1011_v42, %v16898_v14  ;;  %v3990_v45 = vsel %vm22078_vm11, %v3981_v32, %v18503_v27  ;;  %7613 = vmatpush1.bf16.msra.mxu0 %v1174_v54  ;;  %v16121_v14 = vld [vmem:[%s21935_s1 + $0x668] ss:$24 sps:$4 sm:$0xff]   ;;  %v16125_v47 = vld [vmem:[%s21935_s1 + $0x66c] ss:$24 sps:$4 sm:$0xff]   ;;  %vm22082_vm11 = vmmov %vm22081_vm10 }
 0x241   : > { %v1068_v58 = vmul.bf16 %v16116_v11, %v1016_v51  ;;  %3348 = vrot.lane.b32.xlu1 %v18353_v52, %s22079_s12  ;;  %v1069_v33 = vmul.bf16 %v16120_v22, %v1017_v46  ;;  %5256 = vrot.lane.b32.xlu0 %v18353_v52, %s22080_s16  ;;  %v4041_v19 = vmul.bf16 %v16119_v20, %v3990_v45  ;;  %v16132_v45 = vld [vmem:[%s21935_s1 + $0xd4] ss:$24 sps:$4 sm:$0xff]   ;;  %s22095_s12 = sld [smem:[#allocation85_spill]]  ;;  %s22231_s16 = smov 50  }
 0x242   : > { %v4040_v11 = vmul.bf16 %v16111_v18, %v3989_v16  ;;  %v16126_v18 = vld [vmem:[%s21935_s1 + $0x100] ss:$24 sps:$4 sm:$0xff]  }
 0x243   : > { %v18517_v36 = vpop.permute.xlu1 %3876  ;;  %7614 = vmatprep.subr.bf16.mxu0 %v1069_v33  ;;  %7534 = vmatprep.subr.bf16.mxu1 %v4041_v19  ;;  %v3875_v32 = vpop.permute.xlu0 %3874  ;;  %v16123_v19 = vld [vmem:[%s21935_s1 + $0x638] ss:$24 sps:$4 sm:$0xff]  }
 0x244   : > { %v3883_v22 = vsel %vm22081_vm10, %v17547_v60, %v3875_v32  ;;  %v3884_v54 = vsel %vm22082_vm11, %v3875_v32, %v18517_v36  ;;  %7535 = vmatpush1.bf16.msra.mxu1 %v4040_v11  ;;  %7615 = vmatpush1.bf16.msra.mxu0 %v1068_v58  ;;  %v16130_v60 = vld [vmem:[%s21935_s1 + $0x104] ss:$24 sps:$4 sm:$0xff]   ;;  %v16128_v58 = vld [vmem:[%s21935_s1 + $0xd0] ss:$24 sps:$4 sm:$0xff]   ;;  %vm22086_vm10 = vcmask 900096  }
 0x245   : > { %v3934_v3 = vmul.bf16 %v16121_v14, %v3883_v22  ;;  %3242 = vrot.lane.b32.xlu1 %v18353_v52, %s22083_s21  ;;  %5150 = vrot.lane.b32.xlu0 %v18353_v52, %s22084_s29  ;;  %v3935_v20 = vmul.bf16 %v16125_v47, %v3884_v54  ;;  %vm22087_vm11 = vmmov %vm22086_vm10  ;;  %s22227_s21 = smov 46   ;;  %s22228_s29 = smov 47  }
 0x247   : > { %v3769_v42 = vpop.permute.xlu1 %3768  ;;  %7536 = vmatprep.subr.bf16.mxu1 %v3935_v20  ;;  %v905_v16 = vpop.permute.xlu0 %904 }
 0x248   : > { %v910_v51 = vsel %vm906_vm2, %v17905_v17, %v905_v16  ;;  %v911_v46 = vsel %vm906_vm2, %v905_v16, %v16930_v30  ;;  %7537 = vmatpush1.bf16.msra.mxu1 %v3934_v3  ;;  %v16131_v30 = vld [vmem:[%s21935_s1 + $0x63c] ss:$24 sps:$4 sm:$0xff]   ;;  %v3777_v47 = vsel %vm22086_vm10, %v17587_v61, %v3769_v42  ;;  %vm22089_vm10 = vcmask 908288  }
 0x249   : > { %v962_v33 = vmul.bf16 %v16126_v18, %v910_v51  ;;  %3136 = vrot.lane.b32.xlu1 %v18353_v52, %s22085_s9  ;;  %5044 = vrot.lane.b32.xlu0 %v18353_v52, %s22028_s0  ;;  %v963_v17 = vmul.bf16 %v16130_v60, %v911_v46  ;;  %v3828_v18 = vmul.bf16 %v16123_v19, %v3777_v47  ;;  %v16144_v47 = vld [vmem:[%s21935_s1 + $0x74] ss:$24 sps:$4 sm:$0xff]  }
 0x24b   : > { %v799_v14 = vpop.permute.xlu1 %798  ;;  %7616 = vmatprep.subr.bf16.mxu0 %v963_v17  ;;  %v18559_v22 = vpop.permute.xlu0 %3770 }
 0x24c   : > { %v804_v11 = vsel %vm800_vm3, %v17937_v34, %v799_v14  ;;  %v805_v32 = vsel %vm800_vm3, %v799_v14, %v16944_v35  ;;  %v3778_v3 = vsel %vm22087_vm11, %v3769_v42, %v18559_v22  ;;  %7617 = vmatpush1.bf16.msra.mxu0 %v962_v33  ;;  %v16133_v35 = vld [vmem:[%s21935_s1 + $0x608] ss:$24 sps:$4 sm:$0xff]   ;;  %v16137_v34 = vld [vmem:[%s21935_s1 + $0x60c] ss:$24 sps:$4 sm:$0xff]   ;;  %vm22090_vm11 = vmmov %vm22089_vm10 }
 0x24d   : > { %v856_v54 = vmul.bf16 %v16128_v58, %v804_v11  ;;  %v857_v20 = vmul.bf16 %v16132_v45, %v805_v32  ;;  %3030 = vrot.lane.b32.xlu1 %v18353_v52, %s22088_s18  ;;  %4938 = vrot.lane.b32.xlu0 %v18353_v52, %s22032_s28  ;;  %v3829_v61 = vmul.bf16 %v16131_v30, %v3778_v3  ;;  %v16138_v45 = vld [vmem:[%s21935_s1 + $0xa0] ss:$24 sps:$4 sm:$0xff]   ;;  %v16140_v14 = vld [vmem:[%s21935_s1 + $0x70] ss:$24 sps:$4 sm:$0xff]   ;;  %s22234_s18 = smov 19  }
 0x24e   : > { %v16135_v32 = vld [vmem:[%s21935_s1 + $0x8d8] ss:$24 sps:$4 sm:$0xff]  }
 0x24f   : > { %v18573_v60 = vpop.permute.xlu1 %3664  ;;  %7618 = vmatprep.subr.bf16.mxu0 %v857_v20  ;;  %7538 = vmatprep.subr.bf16.mxu1 %v3829_v61  ;;  %v3663_v42 = vpop.permute.xlu0 %3662  ;;  %v22093_v61 = vld [vmem:[#allocation5_spill] sm:$0xff] }
 0x250   : > { %v3671_v16 = vsel %vm22089_vm10, %v17627_v10, %v3663_v42  ;;  %v3672_v51 = vsel %vm22090_vm11, %v3663_v42, %v18573_v60  ;;  %7539 = vmatpush1.bf16.msra.mxu1 %v3828_v18  ;;  %7619 = vmatpush1.bf16.msra.mxu0 %v856_v54  ;;  %v16142_v10 = vld [vmem:[%s21935_s1 + $0xa4] ss:$24 sps:$4 sm:$0xff]   ;;  %vm22092_vm10 = vcmask 637952  }
 0x251   : > { %v3722_v46 = vmul.bf16 %v16133_v35, %v3671_v16  ;;  %2924 = vrot.lane.b32.xlu1 %v18353_v52, %s22091_s26  ;;  %4832 = vrot.lane.b32.xlu0 %v18353_v52, %s22035_s17  ;;  %v3723_v58 = vmul.bf16 %v16137_v34, %v3672_v51  ;;  %vm22094_vm11 = vmmov %vm22092_vm10  ;;  %v16149_v51 = vld [vmem:[%s21935_s1 + $0x8ac] ss:$24 sps:$4 sm:$0xff]   ;;  %s22235_s26 = smov 30  }
 0x253   : > { %v5253_v33 = vpop.permute.xlu1 %5252  ;;  %7540 = vmatprep.subr.bf16.mxu1 %v3723_v58  ;;  %v693_v17 = vpop.permute.xlu0 %692 }
 0x254   : > { %v698_v30 = vsel %vm694_vm4, %v17973_v43, %v693_v17  ;;  %v699_v19 = vsel %vm694_vm4, %v693_v17, %v16973_v49  ;;  %7541 = vmatpush1.bf16.msra.mxu1 %v3722_v46  ;;  %v16143_v49 = vld [vmem:[%s21935_s1 + $0x8dc] ss:$24 sps:$4 sm:$0xff]   ;;  %v5261_v3 = vsel %vm22092_vm10, %v17667_v40, %v5253_v33  ;;  %vm22097_vm10 = vcmask 646144  }
 0x255   : > { %v750_v11 = vmul.bf16 %v16138_v45, %v698_v30  ;;  %4620 = vrot.lane.b32.xlu1 %v18353_v52, %s22043_s25  ;;  %4726 = vrot.lane.b32.xlu0 %v18353_v52, %s22040_s23  ;;  %v751_v43 = vmul.bf16 %v16142_v10, %v699_v19  ;;  %v5312_v46 = vmul.bf16 %v16135_v32, %v5261_v3  ;;  %v7785_v45 = vld [vmem:[%s22095_s12 + $0x8] sm:$0xff] }
 0x257   : > { %v587_v54 = vpop.permute.xlu1 %586  ;;  %7620 = vmatprep.subr.bf16.mxu0 %v751_v43  ;;  %v18615_v34 = vpop.permute.xlu0 %5254 }
 0x258   : > { %v592_v20 = vsel %vm588_vm5, %v18005_v4, %v587_v54  ;;  %v593_v35 = vsel %vm588_vm5, %v587_v54, %v22093_v61  ;;  %v5262_v42 = vsel %vm22094_vm11, %v5253_v33, %v18615_v34  ;;  %7621 = vmatpush1.bf16.msra.mxu0 %v750_v11  ;;  %v16145_v4 = vld [vmem:[%s21935_s1 + $0x8a8] ss:$24 sps:$4 sm:$0xff]   ;;  %v22096_v33 = vld [vmem:[#allocation40_spill] sm:$0xff]  ;;  %vm22098_vm11 = vmmov %vm22097_vm10 }
 0x259   : > { %v644_v18 = vmul.bf16 %v16140_v14, %v592_v20  ;;  %v645_v16 = vmul.bf16 %v16144_v47, %v593_v35  ;;  %5362 = vrot.lane.b32.xlu1 %v18353_v52, %s22053_s19  ;;  %4514 = vrot.lane.b32.xlu0 %v18353_v52, %s22048_s27  ;;  %v5313_v40 = vmul.bf16 %v16143_v49, %v5262_v42  ;;  %v7784_v52 = vld [vmem:[%s22095_s12] sm:$0xff]  ;;  %v22099_v54 = vld [vmem:[#allocation6_spill] sm:$0xff]  ;;  %v16155_v42 = vld [vmem:[%s21935_s1 + $0x87c] ss:$24 sps:$4 sm:$0xff]   ;;  %s22226_s19 = smov 45   ;;  %s22232_s27 = smov 51  }
 0x25a   : > { %v16150_v47 = vld [vmem:[%s21935_s1 + $0x40] ss:$24 sps:$4 sm:$0xff]   ;;  %v16154_v11 = vld [vmem:[%s21935_s1 + $0x44] ss:$24 sps:$4 sm:$0xff]   ;;  %v16152_v20 = vld [vmem:[%s21935_s1 + $0x10] ss:$24 sps:$4 sm:$0xff]  }
 0x25b   : > { %v18629_v58 = vpop.permute.xlu1 %5148  ;;  %7622 = vmatprep.subr.bf16.mxu0 %v645_v16  ;;  %7542 = vmatprep.subr.bf16.mxu1 %v5313_v40  ;;  %v5147_v10 = vpop.permute.xlu0 %5146  ;;  %v16156_v61 = vld [vmem:[%s21935_s1 + $0x14] ss:$24 sps:$4 sm:$0xff]   ;;  %s22233_s12 = smov 18  }
 0x25c   : > { %v5155_v17 = vsel %vm22097_vm10, %v22096_v33, %v5147_v10  ;;  %v5156_v30 = vsel %vm22098_vm11, %v5147_v10, %v18629_v58  ;;  %7543 = vmatpush2.bf16.msra.mxu1 %v5312_v46  ;;  %7623 = vmatpush1.bf16.msra.mxu0 %v644_v18  ;;  %v22100_v40 = vld [vmem:[#allocation43_spill] sm:$0xff]  ;;  %vm22101_vm10 = vcmask 654336  }
 0x25d   : > { %v5206_v19 = vmul.bf16 %v16145_v4, %v5155_v17  ;;  %7793 = vperm.xlu1 %15843, %v7785_v45   ;;  %7788 = vperm.xlu0 %15842, %v7784_v52   ;;  %v5207_v14 = vmul.bf16 %v16149_v51, %v5156_v30  ;;  %v22102_v46 = vld [vmem:[#allocation7_spill] sm:$0xff]  ;;  %vm22103_vm11 = vmmov %vm22101_vm10 }
 0x25f   : > { %v5041_v43 = vpop.permute.xlu1 %5040  ;;  %7544 = vmatprep.subr.bf16.mxu1 %v5207_v14  ;;  %v481_v49 = vpop.permute.xlu0 %480 }
 0x260   : > { %v486_v32 = vsel %vm21811_vm6, %v18037_v37, %v481_v49  ;;  %v487_v3 = vsel %vm21811_vm6, %v481_v49, %v22099_v54  ;;  %7545 = vmatpush2.bf16.msra.mxu1 %v5206_v19  ;;  %v16147_v37 = vld [vmem:[%s21935_s1 + $0x878] ss:$24 sps:$4 sm:$0xff]   ;;  %v5049_v4 = vsel %vm22101_vm10, %v22100_v40, %v5041_v43  ;;  %v16157_v19 = vld [vmem:[%s21935_s1 + $0x848] ss:$24 sps:$4 sm:$0xff]   ;;  %vm22105_vm10 = vcmask 662528  }
 0x261   : > { %v538_v35 = vmul.bf16 %v16150_v47, %v486_v32  ;;  %v539_v18 = vmul.bf16 %v16154_v11, %v487_v3  ;;  %v5100_v14 = vmul.bf16 %v16147_v37, %v5049_v4  ;;  %v22104_v49 = vld [vmem:[#allocation44_spill] sm:$0xff]  ;;  %v16164_v40 = vld [vmem:[%s21935_s1 + $0x2b0] ss:$24 sps:$4 sm:$0xff]   ;;  %v16168_v4 = vld [vmem:[%s21935_s1 + $0x2b4] ss:$24 sps:$4 sm:$0xff]  }
 0x262   : > { %v22108_v37 = vld [vmem:[#allocation8_spill] sm:$0xff] }
 0x263   : > { %v375_v16 = vpop.permute.xlu1 %374  ;;  %7624 = vmatprep.subr.bf16.mxu0 %v539_v18  ;;  %v18669_v52 = vpop.permute.xlu0 %5042 }
 0x264   : > { %v380_v51 = vsel %vm21810_vm7, %v18069_v50, %v375_v16  ;;  %v381_v45 = vsel %vm21810_vm7, %v375_v16, %v22102_v46  ;;  %v5050_v33 = vsel %vm22103_vm11, %v5041_v43, %v18669_v52  ;;  %7625 = vmatpush1.bf16.msra.mxu0 %v538_v35  ;;  %v16161_v50 = vld [vmem:[%s21935_s1 + $0x84c] ss:$24 sps:$4 sm:$0xff]   ;;  %vm22106_vm11 = vmmov %vm22105_vm10 }
 0x265   : > { %v432_v10 = vmul.bf16 %v16152_v20, %v380_v51  ;;  %v433_v17 = vmul.bf16 %v16156_v61, %v381_v45  ;;  %v5101_v30 = vmul.bf16 %v16155_v42, %v5050_v33  ;;  %v16162_v20 = vld [vmem:[%s21935_s1 + $0x2e0] ss:$24 sps:$4 sm:$0xff]   ;;  %v16166_v61 = vld [vmem:[%s21935_s1 + $0x2e4] ss:$24 sps:$4 sm:$0xff]  }
 0x266   : > { %v16167_v45 = vld [vmem:[%s21935_s1 + $0x81c] ss:$24 sps:$4 sm:$0xff]  }
 0x267   : > { %v18679_v47 = vpop.permute.xlu1 %4936  ;;  %7626 = vmatprep.subr.bf16.mxu0 %v433_v17  ;;  %7546 = vmatprep.subr.bf16.mxu1 %v5101_v30  ;;  %v4935_v11 = vpop.permute.xlu0 %4934  ;;  %v22110_v33 = vld [vmem:[#allocation48_spill] sm:$0xff] }
 0x268   : > { %v4943_v43 = vsel %vm22105_vm10, %v22104_v49, %v4935_v11  ;;  %v4944_v32 = vsel %vm22106_vm11, %v4935_v11, %v18679_v47  ;;  %7547 = vmatpush2.bf16.msra.mxu1 %v5100_v14  ;;  %7627 = vmatpush1.bf16.msra.mxu0 %v432_v10  ;;  %vm22107_vm10 = vcmask 146432  }
 0x269   : > { %v4994_v54 = vmul.bf16 %v16157_v19, %v4943_v43  ;;  %v4995_v3 = vmul.bf16 %v16161_v50, %v4944_v32  ;;  %vm22109_vm11 = vmmov %vm22107_vm10  ;;  %v22112_v19 = vld [vmem:[#allocation9_spill] sm:$0xff] }
 0x26b   : > { %v4829_v35 = vpop.permute.xlu1 %4828  ;;  %7548 = vmatprep.subr.bf16.mxu1 %v4995_v3  ;;  %v1965_v18 = vpop.permute.xlu0 %1964 }
 0x26c   : > { %v1970_v42 = vsel %vm22107_vm10, %v18101_v8, %v1965_v18  ;;  %v1971_v16 = vsel %vm22109_vm11, %v1965_v18, %v22108_v37  ;;  %7549 = vmatpush2.bf16.msra.mxu1 %v4994_v54  ;;  %v16159_v8 = vld [vmem:[%s21935_s1 + $0x818] ss:$24 sps:$4 sm:$0xff]   ;;  %v4837_v17 = vsel %vm4834_vm9, %v22110_v33, %v4829_v35  ;;  %vm22111_vm10 = vcmask 154624   ;;  %v16169_v54 = vld [vmem:[%s21935_s1 + $0x7e8] ss:$24 sps:$4 sm:$0xff]  }
 0x26d   : > { %v2022_v51 = vmul.bf16 %v16162_v20, %v1970_v42  ;;  %v2023_v46 = vmul.bf16 %v16166_v61, %v1971_v16  ;;  %vm22113_vm11 = vmmov %vm22111_vm10  ;;  %v4888_v3 = vmul.bf16 %v16159_v8, %v4837_v17  ;;  %v16174_v16 = vld [vmem:[%s21935_s1 + $0x280] ss:$24 sps:$4 sm:$0xff]   ;;  %v16176_v8 = vld [vmem:[%s21935_s1 + $0x250] ss:$24 sps:$4 sm:$0xff]  }
 0x26f   : > { %v1859_v10 = vpop.permute.xlu1 %1858  ;;  %7628 = vmatprep.subr.bf16.mxu0 %v2023_v46  ;;  %v18713_v14 = vpop.permute.xlu0 %4830  ;;  %v22117_v46 = vld [vmem:[#allocation10_spill] sm:$0xff] }
 0x270   : > { %v1864_v30 = vsel %vm22111_vm10, %v18136_v0, %v1859_v10  ;;  %v1865_v50 = vsel %vm22113_vm11, %v1859_v10, %v22112_v19  ;;  %v4838_v49 = vsel %vm4834_vm9, %v4829_v35, %v18713_v14  ;;  %7629 = vmatpush2.bf16.msra.mxu0 %v2022_v51  ;;  %v16173_v0 = vld [vmem:[%s21935_s1 + $0x7ec] ss:$24 sps:$4 sm:$0xff]   ;;  %vm22114_vm10 = vcmask 678912  }
 0x271   : > { %v1916_v11 = vmul.bf16 %v16164_v40, %v1864_v30  ;;  %v1917_v43 = vmul.bf16 %v16168_v4, %v1865_v50  ;;  %v4889_v32 = vmul.bf16 %v16167_v45, %v4838_v49  ;;  %vm22115_vm11 = vmmov %vm22114_vm10  ;;  %v16178_v40 = vld [vmem:[%s21935_s1 + $0x284] ss:$24 sps:$4 sm:$0xff]   ;;  %v16180_v10 = vld [vmem:[%s21935_s1 + $0x254] ss:$24 sps:$4 sm:$0xff]  }
 0x272   : > { %v16179_v30 = vld [vmem:[%s21935_s1 + $0x7bc] ss:$24 sps:$4 sm:$0xff]  }
 0x273   : > { %v18723_v20 = vpop.permute.xlu1 %4724  ;;  %7630 = vmatprep.subr.bf16.mxu0 %v1917_v43  ;;  %7550 = vmatprep.subr.bf16.mxu1 %v4889_v32  ;;  %v4723_v61 = vpop.permute.xlu0 %4722  ;;  %v22119_v50 = vld [vmem:[#allocation51_spill] sm:$0xff] }
 0x274   : > { %v4731_v35 = vsel %vm22114_vm10, %v17851_v6, %v4723_v61  ;;  %v4732_v18 = vsel %vm22115_vm11, %v4723_v61, %v18723_v20  ;;  %7551 = vmatpush2.bf16.msra.mxu1 %v4888_v3  ;;  %7631 = vmatpush2.bf16.msra.mxu0 %v1916_v11  ;;  %vm22116_vm10 = vcmask 236544   ;;  %v22122_v43 = vld [vmem:[#allocation11_spill] sm:$0xff] }
 0x275   : > { %v4782_v42 = vmul.bf16 %v16169_v54, %v4731_v35  ;;  %v4783_v37 = vmul.bf16 %v16173_v0, %v4732_v18  ;;  %vm22118_vm11 = vmmov %vm22116_vm10  ;;  %v16181_v18 = vld [vmem:[%s21935_s1 + $0x788] ss:$24 sps:$4 sm:$0xff]  }
 0x277   : > { %v4617_v4 = vpop.permute.xlu1 %4616  ;;  %7552 = vmatprep.subr.bf16.mxu1 %v4783_v37  ;;  %v1753_v51 = vpop.permute.xlu0 %1752 }
 0x278   : > { %v1758_v6 = vsel %vm22116_vm10, %v18168_v63, %v1753_v51  ;;  %v1759_v45 = vsel %vm22118_vm11, %v1753_v51, %v22117_v46  ;;  %7553 = vmatpush2.bf16.msra.mxu1 %v4782_v42  ;;  %v16171_v63 = vld [vmem:[%s21935_s1 + $0x7b8] ss:$24 sps:$4 sm:$0xff]   ;;  %vm22120_vm10 = vcmask 760832   ;;  %vm22121_vm11 = vcmask 244736  }
 0x279   : > { %v1810_v33 = vmul.bf16 %v16174_v16, %v1758_v6  ;;  %v1811_v17 = vmul.bf16 %v16178_v40, %v1759_v45  ;;  %v4625_v11 = vsel %vm22120_vm10, %v22119_v50, %v4617_v4  ;;  %vm22123_vm7 = vmmov %vm22121_vm11  ;;  %v16186_v46 = vld [vmem:[%s21935_s1 + $0x220] ss:$24 sps:$4 sm:$0xff]   ;;  %v16188_v45 = vld [vmem:[%s21935_s1 + $0x224] ss:$24 sps:$4 sm:$0xff]  }
 0x27a   : > { %vm22124_vm6 = vmmov %vm22120_vm10  ;;  %v4676_v42 = vmul.bf16 %v16171_v63, %v4625_v11  ;;  %v22128_v63 = vld [vmem:[#allocation13_spill] sm:$0xff] }
 0x27b   : > { %v1647_v19 = vpop.permute.xlu1 %1646  ;;  %7632 = vmatprep.subr.bf16.mxu0 %v1811_v17  ;;  %v18757_v54 = vpop.permute.xlu0 %4618 }
 0x27c   : > { %v1652_v49 = vsel %vm22121_vm11, %v18200_v15, %v1647_v19  ;;  %v1653_v32 = vsel %vm22123_vm7, %v1647_v19, %v22122_v43  ;;  %v4626_v3 = vsel %vm22124_vm6, %v4617_v4, %v18757_v54  ;;  %7633 = vmatpush2.bf16.msra.mxu0 %v1810_v33  ;;  %v16185_v15 = vld [vmem:[%s21935_s1 + $0x78c] ss:$24 sps:$4 sm:$0xff]   ;;  %v22125_v33 = vld [vmem:[#allocation15_spill] sm:$0xff]  ;;  %vm22126_vm6 = vcmask 261120  }
 0x27d   : > { %v1704_v0 = vmul.bf16 %v16176_v8, %v1652_v49  ;;  %v1705_v61 = vmul.bf16 %v16180_v10, %v1653_v32  ;;  %v4677_v35 = vmul.bf16 %v16179_v30, %v4626_v3  ;;  %vm22127_vm7 = vcmask 252928   ;;  %v16189_v49 = vld [vmem:[%s21935_s1 + $0x908] ss:$24 sps:$4 sm:$0xff]   ;;  %v16194_v43 = vld [vmem:[%s21935_s1 + $0x90c] ss:$24 sps:$4 sm:$0xff]   ;;  %vm22130_vm11 = vmmov %vm22126_vm6 }
 0x27e   : > { %vm22129_vm10 = vmmov %vm22127_vm7  ;;  %v16183_v32 = vld [vmem:[%s21935_s1 + $0x1f0] ss:$24 sps:$4 sm:$0xff]  }
 0x27f   : > { %v18767_v37 = vpop.permute.xlu1 %4512  ;;  %7634 = vmatprep.subr.bf16.mxu0 %v1705_v61  ;;  %7554 = vmatprep.subr.bf16.mxu1 %v4677_v35  ;;  %v4511_v16 = vpop.permute.xlu0 %4510  ;;  %v18804_v3 = vld [vmem:[%s21936_s2 + $0x10] ss:$28 sps:$4 sm:$0xff]  }
 0x280   : > { %v4519_v40 = vsel %vm4516_vm8, %v17923_v31, %v4511_v16  ;;  %v4520_v4 = vsel %vm4516_vm8, %v4511_v16, %v18767_v37  ;;  %7555 = vmatpush2.bf16.msra.mxu1 %v4676_v42  ;;  %7635 = vmatpush2.bf16.msra.mxu0 %v1704_v0  ;;  %v16191_v31 = vld [vmem:[%s21935_s1 + $0x1f4] ss:$24 sps:$4 sm:$0xff]   ;;  %v22134_v16 = vmov 0  }
 0x281   : > { %v4570_v51 = vmul.bf16 %v16181_v18, %v4519_v40  ;;  %v4571_v6 = vmul.bf16 %v16185_v15, %v4520_v4  ;;  %v22131_v18 = vld [vmem:[#allocation46_spill] sm:$0xff] }
 0x283   : > { %v1435_v8 = vpop.permute.xlu1 %1434  ;;  %7556 = vmatprep.subr.bf16.mxu1 %v4571_v6  ;;  %v1541_v10 = vpop.permute.xlu0 %1540  ;;  %v16199_v6 = vld [vmem:[%s21935_s1 + $0x1c4] ss:$24 sps:$4 sm:$0xff]  }
 0x284   : > { %v1441_v17 = vsel %vm22126_vm6, %v1435_v8, %v22125_v33  ;;  %v1546_v30 = vsel %vm22127_vm7, %v18232_v1, %v1541_v10  ;;  %v1547_v19 = vsel %vm22129_vm10, %v1541_v10, %v22128_v63  ;;  %7557 = vmatpush2.bf16.msra.mxu1 %v4570_v51  ;;  %v1440_v1 = vsel %vm22130_vm11, %v18264_v2, %v1435_v8  ;;  %v16192_v2 = vld [vmem:[%s21935_s1 + $0x460] ss:$24 sps:$4 sm:$0xff]  }
 0x285   : > { %v1598_v50 = vmul.bf16 %v16186_v46, %v1546_v30  ;;  %v1599_v11 = vmul.bf16 %v16188_v45, %v1547_v19  ;;  %v1493_v35 = vmul.bf16 %v16191_v31, %v1441_v17  ;;  %vm22132_vm6 = vcmask 629760   ;;  %v16195_v51 = vld [vmem:[%s21935_s1 + $0x1c0] ss:$24 sps:$4 sm:$0xff]   ;;  %v16200_v46 = vld [vmem:[%s21935_s1 + $0x464] ss:$24 sps:$4 sm:$0xff]  }
 0x286   : > { %vm22133_vm7 = vmmov %vm22132_vm6  ;;  %v1492_v45 = vmul.bf16 %v16183_v32, %v1440_v1  ;;  %v22135_v31 = vld [vmem:[#allocation12_spill] sm:$0xff]  ;;  %vm22136_vm10 = vcmask 269312   ;;  %v22137_v63 = vld [vmem:[#allocation17_spill] sm:$0xff] }
 0x287   : > { %v18797_v0 = vpop.permute.xlu1 %5360  ;;  %7559 = vmatmul.mubr.bf16.vlgmr.msra.gmra.mxu1 %v18804_v3  ;;  %7636 = vmatprep.subr.bf16.mxu0 %v1599_v11  ;;  %v5359_v61 = vpop.permute.xlu0 %5358  ;;  %vm22138_vm11 = vmmov %vm22136_vm10  ;;  %v16201_v32 = vld [vmem:[%s21935_s1 + $0x190] ss:$24 sps:$4 sm:$0xff]   ;;  %v16206_v1 = vld [vmem:[%s21935_s1 + $0x434] ss:$24 sps:$4 sm:$0xff]  }
 0x288   : > { %v5367_v15 = vsel %vm22132_vm6, %v22131_v18, %v5359_v61  ;;  %v5368_v42 = vsel %vm22133_vm7, %v5359_v61, %v18797_v0  ;;  %7637 = vmatpush2.bf16.msra.mxu0 %v1598_v50  ;;  %7601 = vmatprep.mubr.bf16.mxu1 %v22134_v16  ;;  %v16197_v50 = vld [vmem:[%s21935_s1 + $0x430] ss:$24 sps:$4 sm:$0xff]   ;;  %vm22140_vm6 = vcmask 277504  }
 0x289   : > { %v5418_v40 = vmul.bf16 %v16189_v49, %v5367_v15  ;;  %7638 = vmatprep.subr.bf16.mxu0 %v1493_v35  ;;  %v5419_v4 = vmul.bf16 %v16194_v43, %v5368_v42  ;;  %v22139_v18 = vld [vmem:[#allocation14_spill] sm:$0xff]  ;;  %v18851_v42 = vld [vmem:[%s21936_s2 + $0x18] ss:$28 sps:$4 sm:$0xff]   ;;  %vm22142_vm7 = vmmov %vm22140_vm6 }
 0x28b   : > { %v2813_v8 = vpop.permute.xlu1 %2812  ;;  %7583 = vmatprep.subr.bf16.mxu1 %v5419_v4  ;;  %v1329_v17 = vpop.permute.xlu0 %1328 }
 0x28c   : > { %v2818_v10 = vsel %vm2814_vm12, %v17956_v41, %v2813_v8  ;;  %v2819_v33 = vsel %vm2814_vm12, %v2813_v8, %v22135_v31  ;;  %v1334_v30 = vsel %vm22136_vm10, %v18296_v24, %v1329_v17  ;;  %v1335_v19 = vsel %vm22138_vm11, %v1329_v17, %v22137_v63  ;;  %7584 = vmatpush1.bf16.msra.mxu1 %v5418_v40  ;;  %v16205_v24 = vld [vmem:[%s21935_s1 + $0x194] ss:$24 sps:$4 sm:$0xff]   ;;  %v16212_v31 = vld [vmem:[%s21935_s1 + $0x764] ss:$24 sps:$4 sm:$0xff]  }
 0x28d   : > { %7639 = vmatpush2.bf16.msra.mxu0 %v1492_v45  ;;  %v2870_v11 = vmul.bf16 %v16192_v2, %v2818_v10  ;;  %v1386_v49 = vmul.bf16 %v16195_v51, %v1334_v30  ;;  %v1387_v41 = vmul.bf16 %v16199_v6, %v1335_v19  ;;  %v2871_v43 = vmul.bf16 %v16200_v46, %v2819_v33  ;;  %v22141_v51 = vld [vmem:[#allocation19_spill] sm:$0xff]  ;;  %v16211_v6 = vld [vmem:[%s21935_s1 + $0x404] ss:$24 sps:$4 sm:$0xff]   ;;  %v16203_v45 = vld [vmem:[%s21935_s1 + $0x400] ss:$24 sps:$4 sm:$0xff]  }
 0x28e   : > { %v16618_v33 = vld [vmem:[%s21936_s2 + $0xc] ss:$28 sps:$4 sm:$0xff]   ;;  %v22143_v63 = vld [vmem:[#allocation16_spill] sm:$0xff]  ;;  %vm22144_vm10 = vcmask 777216  }
 0x28f   : > { %v2707_v61 = vpop.permute.xlu1 %2706  ;;  %15043 = vmatmul.mubr.msk.bf16.vlgmr.msra.gmra.mxu1 %vm2178_vm15, %v18851_v42  ;;  %7640 = vmatprep.subr.bf16.mxu0 %v1387_v41  ;;  %v1223_v2 = vpop.permute.xlu0 %1222  ;;  %vm22146_vm11 = vmmov %vm22144_vm10 }
 0x290   : > { %v2712_v35 = vsel %vm2708_vm14, %v17989_v55, %v2707_v61  ;;  %v2713_v15 = vsel %vm2708_vm14, %v2707_v61, %v22139_v18  ;;  %7655 = vmatprep.subr.bf16.mxu1 %v2871_v43  ;;  %v1228_v4 = vsel %vm22140_vm6, %v18328_v59, %v1223_v2  ;;  %v1229_v55 = vsel %vm22142_vm7, %v1223_v2, %v22141_v51  ;;  %v16207_v59 = vld [vmem:[%s21935_s1 + $0x760] ss:$24 sps:$4 sm:$0xff]   ;;  %v22148_v2 = vld [vmem:[#allocation18_spill] sm:$0xff] }
 0x291   : > { %v2764_v40 = vmul.bf16 %v16197_v50, %v2712_v35  ;;  %7641 = vmatpush2.bf16.msra.mxu0 %v1386_v49  ;;  %v1280_v46 = vmul.bf16 %v16201_v32, %v1228_v4  ;;  %7656 = vmatpush1.bf16.msra.mxu1 %v2870_v11  ;;  %v1281_v8 = vmul.bf16 %v16205_v24, %v1229_v55  ;;  %v22145_v49 = vld [vmem:[#allocation22_spill] sm:$0xff]  ;;  %vm22147_vm6 = vcmask 105472   ;;  %v22151_v55 = vld [vmem:[#allocation24_spill] sm:$0xff] }
 0x292   : > { %v2765_v10 = vmul.bf16 %v16206_v1, %v2713_v15  ;;  %7687 = vmatprep.mubr.bf16.mxu1 %v16618_v33  ;;  %v16217_v32 = vld [vmem:[%s21935_s1 + $0x3d4] ss:$24 sps:$4 sm:$0xff]   ;;  %v16209_v1 = vld [vmem:[%s21935_s1 + $0x3d0] ss:$24 sps:$4 sm:$0xff]   ;;  %vm22149_vm7 = vmmov %vm22147_vm6 }
 0x293   : > { %v2601_v17 = vpop.permute.xlu1 %2600  ;;  %7642 = vmatprep.subr.bf16.mxu0 %v1281_v8  ;;  %v4409_v50 = vpop.permute.xlu0 %4408  ;;  %v16218_v35 = vld [vmem:[%s21935_s1 + $0x734] ss:$24 sps:$4 sm:$0xff]  }
 0x294   : > { %v2606_v30 = vsel %vm2602_vm13, %v18021_v29, %v2601_v17  ;;  %v2607_v19 = vsel %vm2602_vm13, %v2601_v17, %v22143_v63  ;;  %7657 = vmatprep.subr.bf16.mxu1 %v2765_v10  ;;  %v4415_v11 = vsel %vm22144_vm10, %v18363_v56, %v4409_v50  ;;  %v4424_v41 = vsel %vm22146_vm11, %v4409_v50, %v22145_v49  ;;  %v16213_v56 = vld [vmem:[%s21935_s1 + $0x730] ss:$24 sps:$4 sm:$0xff]   ;;  %v22154_v17 = vld [vmem:[#allocation20_spill] sm:$0xff] }
 0x295   : > { %7643 = vmatpush2.bf16.msra.mxu0 %v1280_v46  ;;  %v2659_v43 = vmul.bf16 %v16211_v6, %v2607_v19  ;;  %v2658_v24 = vmul.bf16 %v16203_v45, %v2606_v30  ;;  %v4466_v29 = vmul.bf16 %v16207_v59, %v4415_v11  ;;  %7658 = vmatpush1.bf16.msra.mxu1 %v2764_v40  ;;  %vm22150_vm10 = vcmask 785408   ;;  %v16223_v45 = vld [vmem:[%s21935_s1 + $0x3a4] ss:$24 sps:$4 sm:$0xff]   ;;  %v22157_v50 = vld [vmem:[#allocation26_spill] sm:$0xff] }
 0x296   : > { %v4467_v61 = vmul.bf16 %v16212_v31, %v4424_v41  ;;  %vm22152_vm11 = vmmov %vm22150_vm10  ;;  %v16224_v59 = vld [vmem:[%s21935_s1 + $0x704] ss:$24 sps:$4 sm:$0xff]  }
 0x297   : > { %v2495_v18 = vpop.permute.xlu1 %2494  ;;  %7659 = vmatprep.subr.bf16.mxu1 %v2659_v43  ;;  %v4303_v4 = vpop.permute.xlu0 %4302 }
 0x298   : > { %v2500_v15 = vsel %vm22147_vm6, %v18053_v25, %v2495_v18  ;;  %v2501_v40 = vsel %vm22149_vm7, %v2495_v18, %v22148_v2  ;;  %7645 = vmatmul.mubr.bf16.vlgmr.msra.gmra.mxu0 %v18368_v28  ;;  %7698 = vmatprep.subr.bf16.mxu0 %v4467_v61  ;;  %v4309_v51 = vsel %vm22150_vm10, %v18407_v53, %v4303_v4  ;;  %v16215_v28 = vld [vmem:[%s21935_s1 + $0x3a0] ss:$24 sps:$4 sm:$0xff]   ;;  %vm22153_vm6 = vcmask 113664  }
 0x299   : > { %v4318_v6 = vsel %vm22152_vm11, %v4303_v4, %v22151_v55  ;;  %7699 = vmatpush1.bf16.msra.mxu0 %v4466_v29  ;;  %v2553_v46 = vmul.bf16 %v16217_v32, %v2501_v40  ;;  %v2552_v25 = vmul.bf16 %v16209_v1, %v2500_v15  ;;  %v4360_v8 = vmul.bf16 %v16213_v56, %v4309_v51  ;;  %v16219_v53 = vld [vmem:[%s21935_s1 + $0x700] ss:$24 sps:$4 sm:$0xff]   ;;  %vm22155_vm7 = vmmov %vm22153_vm6  ;;  %v16235_v4 = vld [vmem:[%s21935_s1 + $0x344] ss:$24 sps:$4 sm:$0xff]  }
 0x29a   : > { %7660 = vmatpush1.bf16.msra.mxu1 %v2658_v24  ;;  %v4361_v10 = vmul.bf16 %v16218_v35, %v4318_v6  ;;  %7730 = vmatprep.mubr.bf16.mxu0 %v18388_v62  ;;  %vm22156_vm10 = vcmask 793600   ;;  %v16229_v62 = vld [vmem:[%s21935_s1 + $0x374] ss:$24 sps:$4 sm:$0xff]   ;;  %v22160_v61 = vld [vmem:[#allocation21_spill] sm:$0xff]  ;;  %v22163_v15 = vld [vmem:[#allocation28_spill] sm:$0xff] }
 0x29b   : > { %v2389_v31 = vpop.permute.xlu1 %2388  ;;  %7661 = vmatprep.subr.bf16.mxu1 %v2553_v46  ;;  %v4197_v63 = vpop.permute.xlu0 %4196  ;;  %vm22158_vm11 = vmmov %vm22156_vm10  ;;  %v16230_v24 = vld [vmem:[%s21935_s1 + $0x6d4] ss:$24 sps:$4 sm:$0xff]   ;;  %v16236_v46 = vld [vmem:[%s21935_s1 + $0x6a4] ss:$24 sps:$4 sm:$0xff]  }
 0x29c   : > { %v2394_v33 = vsel %vm22153_vm6, %v18085_v23, %v2389_v31  ;;  %v2395_v30 = vsel %vm22155_vm7, %v2389_v31, %v22154_v17  ;;  %7700 = vmatprep.subr.bf16.mxu0 %v4361_v10  ;;  %v4203_v19 = vsel %vm22156_vm10, %v18439_v48, %v4197_v63  ;;  %v4212_v11 = vsel %vm22158_vm11, %v4197_v63, %v22157_v50  ;;  %v16221_v23 = vld [vmem:[%s21935_s1 + $0x370] ss:$24 sps:$4 sm:$0xff]   ;;  %v16241_v17 = vld [vmem:[%s21935_s1 + $0x314] ss:$24 sps:$4 sm:$0xff]  }
 0x29d   : > { %7701 = vmatpush1.bf16.msra.mxu0 %v4360_v8  ;;  %v2447_v49 = vmul.bf16 %v16223_v45, %v2395_v30  ;;  %v2446_v41 = vmul.bf16 %v16215_v28, %v2394_v33  ;;  %v4254_v43 = vmul.bf16 %v16219_v53, %v4203_v19  ;;  %v4255_v32 = vmul.bf16 %v16224_v59, %v4212_v11  ;;  %v16225_v48 = vld [vmem:[%s21935_s1 + $0x6d0] ss:$24 sps:$4 sm:$0xff]   ;;  %v16242_v50 = vld [vmem:[%s21935_s1 + $0x674] ss:$24 sps:$4 sm:$0xff]  }
 0x29e   : > { %7662 = vmatpush1.bf16.msra.mxu1 %v2552_v25  ;;  %vm22159_vm6 = vcmask 121856   ;;  %vm22162_vm10 = vcmask 801792   ;;  %v22165_v8 = vld [vmem:[#allocation23_spill] sm:$0xff]  ;;  %v22167_v59 = vld [vmem:[#allocation30_spill] sm:$0xff] }
 0x29f   : > { %v2283_v29 = vpop.permute.xlu1 %2282  ;;  %7663 = vmatprep.subr.bf16.mxu1 %v2447_v49  ;;  %vm22161_vm7 = vmmov %vm22159_vm6  ;;  %7702 = vmatprep.subr.bf16.mxu0 %v4255_v32  ;;  %v4091_v35 = vpop.permute.xlu0 %4090  ;;  %v22173_v32 = vld [vmem:[#allocation32_spill] sm:$0xff] }
 0x2a0   : > { %v2288_v1 = vsel %vm22159_vm6, %v18117_v38, %v2283_v29  ;;  %v2289_v56 = vsel %vm22161_vm7, %v2283_v29, %v22160_v61  ;;  %v4097_v18 = vsel %vm22162_vm10, %v18456_v13, %v4091_v35  ;;  %vm22164_vm11 = vmmov %vm22162_vm10  ;;  %v16227_v38 = vld [vmem:[%s21935_s1 + $0x340] ss:$24 sps:$4 sm:$0xff]   ;;  %vm22166_vm6 = vcmask 809984   ;;  %v16247_v29 = vld [vmem:[%s21935_s1 + $0x5e4] ss:$24 sps:$4 sm:$0xff]  }
 0x2a1   : > { %v4106_v2 = vsel %vm22164_vm11, %v4091_v35, %v22163_v15  ;;  %7703 = vmatpush1.bf16.msra.mxu0 %v4254_v43  ;;  %v2341_v40 = vmul.bf16 %v16229_v62, %v2289_v56  ;;  %v2340_v51 = vmul.bf16 %v16221_v23, %v2288_v1  ;;  %v4148_v55 = vmul.bf16 %v16225_v48, %v4097_v18  ;;  %v16231_v13 = vld [vmem:[%s21935_s1 + $0x6a0] ss:$24 sps:$4 sm:$0xff]   ;;  %vm22168_vm7 = vmmov %vm22166_vm6  ;;  %v16248_v35 = vld [vmem:[%s21935_s1 + $0x644] ss:$24 sps:$4 sm:$0xff]  }
 0x2a2   : > { %7664 = vmatpush1.bf16.msra.mxu1 %v2446_v41  ;;  %v4149_v6 = vmul.bf16 %v16230_v24, %v4106_v2  ;;  %vm22169_vm10 = vcmask 138240   ;;  %v22170_v62 = vld [vmem:[#allocation25_spill] sm:$0xff]  ;;  %v22176_v2 = vld [vmem:[#allocation27_spill] sm:$0xff] }
 0x2a3   : > { %v2177_v45 = vpop.permute.xlu1 %2176  ;;  %7665 = vmatprep.subr.bf16.mxu1 %v2341_v40  ;;  %v3985_v10 = vpop.permute.xlu0 %3984  ;;  %vm22171_vm11 = vmmov %vm22169_vm10 }
 0x2a4   : > { %v2182_v25 = vsel %vm2178_vm15, %v18152_v5, %v2177_v45  ;;  %v2183_v28 = vsel %vm2178_vm15, %v2177_v45, %v22165_v8  ;;  %7704 = vmatprep.subr.bf16.mxu0 %v4149_v6  ;;  %v3991_v53 = vsel %vm22166_vm6, %v18503_v27, %v3985_v10  ;;  %v4000_v31 = vsel %vm22168_vm7, %v3985_v10, %v22167_v59  ;;  %v16233_v5 = vld [vmem:[%s21935_s1 + $0x310] ss:$24 sps:$4 sm:$0xff]   ;;  %v16254_v8 = vld [vmem:[%s21935_s1 + $0x614] ss:$24 sps:$4 sm:$0xff]  }
 0x2a5   : > { %7705 = vmatpush1.bf16.msra.mxu0 %v4148_v55  ;;  %v2235_v33 = vmul.bf16 %v16235_v4, %v2183_v28  ;;  %v2234_v30 = vmul.bf16 %v16227_v38, %v2182_v25  ;;  %v4042_v63 = vmul.bf16 %v16231_v13, %v3991_v53  ;;  %v4043_v19 = vmul.bf16 %v16236_v46, %v4000_v31  ;;  %v16237_v27 = vld [vmem:[%s21935_s1 + $0x670] ss:$24 sps:$4 sm:$0xff]   ;;  %v16253_v13 = vld [vmem:[%s21935_s1 + $0x5b4] ss:$24 sps:$4 sm:$0xff]   ;;  %v22182_v53 = vld [vmem:[#allocation29_spill] sm:$0xff] }
 0x2a6   : > { %7666 = vmatpush1.bf16.msra.mxu1 %v2340_v51  ;;  %vm22172_vm6 = vcmask 891904   ;;  %v22179_v55 = vld [vmem:[#allocation34_spill] sm:$0xff] }
 0x2a7   : > { %v2071_v11 = vpop.permute.xlu1 %2070  ;;  %7667 = vmatprep.subr.bf16.mxu1 %v2235_v33  ;;  %7706 = vmatprep.subr.bf16.mxu0 %v4043_v19  ;;  %v3879_v43 = vpop.permute.xlu0 %3878  ;;  %vm22174_vm7 = vmmov %vm22172_vm6 }
 0x2a8   : > { %v2076_v49 = vsel %vm22169_vm10, %v18184_v44, %v2071_v11  ;;  %v2077_v41 = vsel %vm22171_vm11, %v2071_v11, %v22170_v62  ;;  %v3885_v23 = vsel %vm22172_vm6, %v18517_v36, %v3879_v43  ;;  %v3894_v48 = vsel %vm22174_vm7, %v3879_v43, %v22173_v32  ;;  %v16239_v44 = vld [vmem:[%s21935_s1 + $0x5e0] ss:$24 sps:$4 sm:$0xff]   ;;  %v16260_v11 = vld [vmem:[%s21935_s1 + $0x8e4] ss:$24 sps:$4 sm:$0xff]  }
 0x2a9   : > { %7707 = vmatpush1.bf16.msra.mxu0 %v4042_v63  ;;  %v2129_v24 = vmul.bf16 %v16241_v17, %v2077_v41  ;;  %v2128_v1 = vmul.bf16 %v16233_v5, %v2076_v49  ;;  %v3936_v61 = vmul.bf16 %v16237_v27, %v3885_v23  ;;  %v3937_v56 = vmul.bf16 %v16242_v50, %v3894_v48  ;;  %v16243_v36 = vld [vmem:[%s21935_s1 + $0x640] ss:$24 sps:$4 sm:$0xff]   ;;  %v16259_v5 = vld [vmem:[%s21935_s1 + $0x584] ss:$24 sps:$4 sm:$0xff]   ;;  %v22188_v41 = vld [vmem:[#allocation31_spill] sm:$0xff] }
 0x2aa   : > { %7668 = vmatpush1.bf16.msra.mxu1 %v2234_v30  ;;  %vm22175_vm10 = vcmask 916480   ;;  %vm22178_vm6 = vcmask 900096   ;;  %v22185_v17 = vld [vmem:[#allocation36_spill] sm:$0xff]  ;;  %v22191_v48 = vld [vmem:[#allocation38_spill] sm:$0xff] }
 0x2ab   : > { %v3561_v18 = vpop.permute.xlu1 %3560  ;;  %7669 = vmatprep.subr.bf16.mxu1 %v2129_v24  ;;  %vm22177_vm11 = vmmov %vm22175_vm10  ;;  %7708 = vmatprep.subr.bf16.mxu0 %v3937_v56  ;;  %v3773_v4 = vpop.permute.xlu0 %3772  ;;  %v16261_v56 = vld [vmem:[%s21935_s1 + $0x8b0] ss:$24 sps:$4 sm:$0xff]  }
 0x2ac   : > { %v3567_v15 = vsel %vm22175_vm10, %v18216_v57, %v3561_v18  ;;  %v3576_v40 = vsel %vm22177_vm11, %v3561_v18, %v22176_v2  ;;  %v3779_v51 = vsel %vm22178_vm6, %v18559_v22, %v3773_v4  ;;  %vm22180_vm7 = vmmov %vm22178_vm6  ;;  %v16245_v57 = vld [vmem:[%s21935_s1 + $0x5b0] ss:$24 sps:$4 sm:$0xff]   ;;  %vm22181_vm10 = vcmask 924672   ;;  %v22194_v2 = vld [vmem:[#allocation33_spill] sm:$0xff] }
 0x2ad   : > { %v3788_v38 = vsel %vm22180_vm7, %v3773_v4, %v22179_v55  ;;  %7709 = vmatpush1.bf16.msra.mxu0 %v3936_v61  ;;  %v3619_v6 = vmul.bf16 %v16247_v29, %v3576_v40  ;;  %v3618_v46 = vmul.bf16 %v16239_v44, %v3567_v15  ;;  %v3830_v45 = vmul.bf16 %v16243_v36, %v3779_v51  ;;  %v16249_v22 = vld [vmem:[%s21935_s1 + $0x610] ss:$24 sps:$4 sm:$0xff]   ;;  %vm22183_vm11 = vmmov %vm22181_vm10  ;;  %v16266_v36 = vld [vmem:[%s21935_s1 + $0x8b4] ss:$24 sps:$4 sm:$0xff]  }
 0x2ae   : > { %7670 = vmatpush1.bf16.msra.mxu1 %v2128_v1  ;;  %v3831_v25 = vmul.bf16 %v16248_v35, %v3788_v38  ;;  %vm22184_vm6 = vcmask 908288   ;;  %v16257_v29 = vld [vmem:[%s21935_s1 + $0x550] ss:$24 sps:$4 sm:$0xff]   ;;  %v22197_v51 = vld [vmem:[#allocation41_spill] sm:$0xff] }
 0x2af   : > { %v3455_v28 = vpop.permute.xlu1 %3454  ;;  %7671 = vmatprep.subr.bf16.mxu1 %v3619_v6  ;;  %v3667_v31 = vpop.permute.xlu0 %3666  ;;  %vm22186_vm7 = vmmov %vm22184_vm6  ;;  %v16263_v38 = vld [vmem:[%s21935_s1 + $0x520] ss:$24 sps:$4 sm:$0xff]  }
 0x2b0   : > { %v3461_v10 = vsel %vm22181_vm10, %v18248_v12, %v3455_v28  ;;  %v3470_v59 = vsel %vm22183_vm11, %v3455_v28, %v22182_v53  ;;  %7710 = vmatprep.subr.bf16.mxu0 %v3831_v25  ;;  %v3673_v33 = vsel %vm22184_vm6, %v18573_v60, %v3667_v31  ;;  %v3682_v30 = vsel %vm22186_vm7, %v3667_v31, %v22185_v17  ;;  %v16251_v12 = vld [vmem:[%s21935_s1 + $0x580] ss:$24 sps:$4 sm:$0xff]   ;;  %v22200_v28 = vld [vmem:[#allocation35_spill] sm:$0xff] }
 0x2b1   : > { %7711 = vmatpush1.bf16.msra.mxu0 %v3830_v45  ;;  %v3513_v63 = vmul.bf16 %v16253_v13, %v3470_v59  ;;  %v3512_v19 = vmul.bf16 %v16245_v57, %v3461_v10  ;;  %v3724_v27 = vmul.bf16 %v16249_v22, %v3673_v33  ;;  %v3725_v50 = vmul.bf16 %v16254_v8, %v3682_v30  ;;  %v16255_v60 = vld [vmem:[%s21935_s1 + $0x8e0] ss:$24 sps:$4 sm:$0xff]   ;;  %v16272_v57 = vld [vmem:[%s21935_s1 + $0x884] ss:$24 sps:$4 sm:$0xff]   ;;  %v22203_v59 = vld [vmem:[#allocation42_spill] sm:$0xff] }
 0x2b2   : > { %7672 = vmatpush2.bf16.msra.mxu1 %v3618_v46  ;;  %vm22187_vm10 = vcmask 932864   ;;  %vm22190_vm6 = vcmask 637952   ;;  %v16269_v33 = vld [vmem:[%s21935_s1 + $0x4f0] ss:$24 sps:$4 sm:$0xff]  }
 0x2b3   : > { %v3349_v49 = vpop.permute.xlu1 %3348  ;;  %7673 = vmatprep.subr.bf16.mxu1 %v3513_v63  ;;  %vm22189_vm11 = vmmov %vm22187_vm10  ;;  %7712 = vmatprep.subr.bf16.mxu0 %v3725_v50  ;;  %v5257_v23 = vpop.permute.xlu0 %5256 }
 0x2b4   : > { %v3355_v62 = vsel %vm22187_vm10, %v18280_v7, %v3349_v49  ;;  %v3364_v43 = vsel %vm22189_vm11, %v3349_v49, %v22188_v41  ;;  %v5263_v32 = vsel %vm22190_vm6, %v18615_v34, %v5257_v23  ;;  %vm22192_vm7 = vmmov %vm22190_vm6  ;;  %v16265_v34 = vld [vmem:[%s21935_s1 + $0x554] ss:$24 sps:$4 sm:$0xff]   ;;  %vm22193_vm10 = vcmask 941056  }
 0x2b5   : > { %v5272_v24 = vsel %vm22192_vm7, %v5257_v23, %v22191_v48  ;;  %7713 = vmatpush1.bf16.msra.mxu0 %v3724_v27  ;;  %v3407_v1 = vmul.bf16 %v16259_v5, %v3364_v43  ;;  %v3406_v61 = vmul.bf16 %v16251_v12, %v3355_v62  ;;  %v5314_v44 = vmul.bf16 %v16255_v60, %v5263_v32  ;;  %vm22195_vm11 = vmmov %vm22193_vm10  ;;  %v22206_v60 = vld [vmem:[#allocation37_spill] sm:$0xff] }
 0x2b6   : > { %7674 = vmatpush2.bf16.msra.mxu1 %v3512_v19  ;;  %v5315_v7 = vmul.bf16 %v16260_v11, %v5272_v24  ;;  %vm22196_vm6 = vcmask 646144   ;;  %v16278_v19 = vld [vmem:[%s21935_s1 + $0x854] ss:$24 sps:$4 sm:$0xff]   ;;  %v22209_v62 = vld [vmem:[#allocation45_spill] sm:$0xff] }
 0x2b7   : > { %7675 = vmatprep.subr.bf16.mxu1 %v3407_v1  ;;  %v3243_v35 = vpop.permute.xlu1 %3242  ;;  %v5151_v18 = vpop.permute.xlu0 %5150  ;;  %vm22198_vm7 = vmmov %vm22196_vm6  ;;  %v16275_v43 = vld [vmem:[%s21935_s1 + $0x4c0] ss:$24 sps:$4 sm:$0xff]  }
 0x2b8   : > { %7714 = vmatprep.subr.bf16.mxu0 %v5315_v7  ;;  %v3249_v15 = vsel %vm22193_vm10, %v18312_v21, %v3243_v35  ;;  %v3258_v40 = vsel %vm22195_vm11, %v3243_v35, %v22194_v2  ;;  %v5157_v4 = vsel %vm22196_vm6, %v18629_v58, %v5151_v18  ;;  %v5166_v55 = vsel %vm22198_vm7, %v5151_v18, %v22197_v51  ;;  %v16267_v21 = vld [vmem:[%s21935_s1 + $0x880] ss:$24 sps:$4 sm:$0xff]   ;;  %v16271_v58 = vld [vmem:[%s21935_s1 + $0x524] ss:$24 sps:$4 sm:$0xff]   ;;  %v22212_v7 = vld [vmem:[#allocation39_spill] sm:$0xff] }
 0x2b9   : > { %7715 = vmatpush2.bf16.msra.mxu0 %v5314_v44  ;;  %v3300_v6 = vmul.bf16 %v16257_v29, %v3249_v15  ;;  %v5208_v13 = vmul.bf16 %v16261_v56, %v5157_v4  ;;  %v3301_v46 = vmul.bf16 %v16265_v34, %v3258_v40  ;;  %v5209_v45 = vmul.bf16 %v16266_v36, %v5166_v55  ;;  %v16284_v29 = vld [vmem:[%s21935_s1 + $0x824] ss:$24 sps:$4 sm:$0xff]   ;;  %v16285_v4 = vld [vmem:[%s21935_s1 + $0x7f0] ss:$24 sps:$4 sm:$0xff]  }
 0x2ba   : > { %7676 = vmatpush2.bf16.msra.mxu1 %v3406_v61  ;;  %vm22199_vm10 = vcmask 1022976   ;;  %vm22202_vm6 = vcmask 654336   ;;  %v22214_v36 = vld [vmem:[#allocation49_spill] sm:$0xff] }
 0x2bb   : > { %v3137_v25 = vpop.permute.xlu1 %3136  ;;  %7677 = vmatprep.subr.bf16.mxu1 %v3301_v46  ;;  %7716 = vmatprep.subr.bf16.mxu0 %v5209_v45  ;;  %v5045_v22 = vpop.permute.xlu0 %5044  ;;  %vm22201_vm11 = vmmov %vm22199_vm10  ;;  %v16292_v55 = vld [vmem:[%s21935_s1 + $0x7c4] ss:$24 sps:$4 sm:$0xff]   ;;  %v22218_v46 = vld [vmem:[#allocation50_spill] sm:$0xff] }
 0x2bc   : > { %v3143_v8 = vsel %vm22199_vm10, %v18344_v39, %v3137_v25  ;;  %v3152_v10 = vsel %vm22201_vm11, %v3137_v25, %v22200_v28  ;;  %v5051_v53 = vsel %vm22202_vm6, %v18669_v52, %v5045_v22  ;;  %vm22204_vm7 = vmmov %vm22202_vm6  ;;  %v16273_v39 = vld [vmem:[%s21935_s1 + $0x850] ss:$24 sps:$4 sm:$0xff]   ;;  %v16277_v52 = vld [vmem:[%s21935_s1 + $0x4f4] ss:$24 sps:$4 sm:$0xff]   ;;  %vm22205_vm10 = vcmask 1031168  }
 0x2bd   : > { %v5060_v31 = vsel %vm22204_vm7, %v5045_v22, %v22203_v59  ;;  %7717 = vmatpush2.bf16.msra.mxu0 %v5208_v13  ;;  %v3194_v17 = vmul.bf16 %v16263_v38, %v3143_v8  ;;  %v5102_v30 = vmul.bf16 %v16267_v21, %v5051_v53  ;;  %v3195_v63 = vmul.bf16 %v16271_v58, %v3152_v10  ;;  %vm22207_vm11 = vmmov %vm22205_vm10  ;;  %v22215_v38 = vld [vmem:[#allocation52_spill] sm:$0xff]  ;;  %v16287_v58 = vld [vmem:[%s21935_s1 + $0x910] ss:$24 sps:$4 sm:$0xff]  }
 0x2be   : > { %7678 = vmatpush2.bf16.msra.mxu1 %v3300_v6  ;;  %v5103_v5 = vmul.bf16 %v16272_v57, %v5060_v31  ;;  %vm22208_vm6 = vcmask 662528   ;;  %v16293_v25 = vld [vmem:[%s21935_s1 + $0x914] ss:$24 sps:$4 sm:$0xff]  }
 0x2bf   : > { %v3031_v27 = vpop.permute.xlu1 %3030  ;;  %7679 = vmatprep.subr.bf16.mxu1 %v3195_v63  ;;  %v4939_v12 = vpop.permute.xlu0 %4938  ;;  %vm22210_vm7 = vmmov %vm22208_vm6  ;;  %v16619_v22 = vld [vmem:[%s16743_s14 + $0x14] ss:$24 sps:$4 sm:$0xff]  }
 0x2c0   : > { %7718 = vmatprep.subr.bf16.mxu0 %v5103_v5  ;;  %v3037_v50 = vsel %vm22205_vm10, %v18391_v26, %v3031_v27  ;;  %v3046_v11 = vsel %vm22207_vm11, %v3031_v27, %v22206_v60  ;;  %v4945_v49 = vsel %vm22208_vm6, %v18679_v47, %v4939_v12  ;;  %v4954_v41 = vsel %vm22210_vm7, %v4939_v12, %v22209_v62  ;;  %v16279_v26 = vld [vmem:[%s21935_s1 + $0x820] ss:$24 sps:$4 sm:$0xff]   ;;  %v16283_v47 = vld [vmem:[%s21935_s1 + $0x4c4] ss:$24 sps:$4 sm:$0xff]   ;;  %v16294_v59 = vld [vmem:[%s21935_s1 + $0x794] ss:$24 sps:$4 sm:$0xff]  }
 0x2c1   : > { %7719 = vmatpush2.bf16.msra.mxu0 %v5102_v30  ;;  %v3088_v23 = vmul.bf16 %v16269_v33, %v3037_v50  ;;  %v4996_v32 = vmul.bf16 %v16273_v39, %v4945_v49  ;;  %v3089_v48 = vmul.bf16 %v16277_v52, %v3046_v11  ;;  %v4997_v24 = vmul.bf16 %v16278_v19, %v4954_v41  ;;  %v22222_v33 = vld [vmem:[#allocation47_spill] sm:$0xff]  ;;  %v22224_v30 = vld [vmem:[#allocation53_spill] sm:$0xff] }
 0x2c2   : > { %7680 = vmatpush2.bf16.msra.mxu1 %v3194_v17  ;;  %vm22211_vm10 = vcmask 1039360   ;;  %vm22216_vm6 = vcmask 760832   ;;  %vm22217_vm7 = vcmask 678912   ;;  %v16290_v19 = vld [vmem:[%s21935_s1 + $0x790] ss:$24 sps:$4 sm:$0xff]  }
 0x2c3   : > { %v2925_v1 = vpop.permute.xlu1 %2924  ;;  %7681 = vmatprep.subr.bf16.mxu1 %v3089_v48  ;;  %7720 = vmatprep.subr.bf16.mxu0 %v4997_v24  ;;  %v4833_v61 = vpop.permute.xlu0 %4832  ;;  %vm22213_vm11 = vmmov %vm22211_vm10  ;;  %v16621_v12 = vld [vmem:[%s21936_s2 + $0x8] ss:$28 sps:$4 sm:$0xff]   ;;  %s22236_s2 = smov 31  }
 0x2c4   : > { %v2931_v44 = vsel %vm22211_vm10, %v18423_v9, %v2925_v1  ;;  %v2940_v56 = vsel %vm22213_vm11, %v2925_v1, %v22212_v7  ;;  %v4839_v34 = vsel %vm4834_vm9, %v18713_v14, %v4833_v61  ;;  %v4848_v35 = vsel %vm4834_vm9, %v4833_v61, %v22214_v36  ;;  %v16289_v9 = vld [vmem:[%s21935_s1 + $0x7f4] ss:$24 sps:$4 sm:$0xff]   ;;  %vm22219_vm10 = vmmov %vm22217_vm7 }
 0x2c5   : > { %7721 = vmatpush2.bf16.msra.mxu0 %v4996_v32  ;;  %v2982_v18 = vmul.bf16 %v16275_v43, %v2931_v44  ;;  %v4890_v15 = vmul.bf16 %v16279_v26, %v4839_v34  ;;  %v2983_v2 = vmul.bf16 %v16283_v47, %v2940_v56  ;;  %v4891_v40 = vmul.bf16 %v16284_v29, %v4848_v35  ;;  %vm22220_vm11 = vmmov %vm22216_vm6  ;;  %v7302_v43 = vpop.f32.mrf.mxu0 }
 0x2c6   : > { %7682 = vmatpush2.bf16.msra.mxu1 %v3088_v23 }
 0x2c7   : > { %v4621_v51 = vpop.permute.xlu1 %4620  ;;  %7683 = vmatprep.subr.bf16.mxu1 %v2983_v2  ;;  %7722 = vmatprep.subr.bf16.mxu0 %v4891_v40  ;;  %v4727_v14 = vpop.permute.xlu0 %4726 }
 0x2c8   : > { %v4636_v6 = vsel %vm22216_vm6, %v4621_v51, %v22215_v38  ;;  %v4733_v13 = vsel %vm22217_vm7, %v18723_v20, %v4727_v14  ;;  %v4742_v45 = vsel %vm22219_vm10, %v4727_v14, %v22218_v46  ;;  %v16281_v20 = vld [vmem:[%s21935_s1 + $0x7c0] ss:$24 sps:$4 sm:$0xff]   ;;  %v4627_v8 = vsel %vm22220_vm11, %v18757_v54, %v4621_v51  ;;  %v16620_v54 = vld [vmem:[%s16743_s14 + $0x10] ss:$24 sps:$4 sm:$0xff]   ;;  %v7304_v32 = vpop.f32.mrf.mxu0  ;;  %s22225_s14 = smov 35  }
 0x2c9   : > { %7723 = vmatpush2.bf16.msra.mxu0 %v4890_v15  ;;  %v4784_v21 = vmul.bf16 %v16285_v4, %v4733_v13  ;;  %v4785_v57 = vmul.bf16 %v16289_v9, %v4742_v45  ;;  %v4679_v53 = vmul.bf16 %v16292_v55, %v4636_v6  ;;  %vm22221_vm6 = vcmask 629760  }
 0x2ca   : > { %7684 = vmatpush2.bf16.msra.mxu1 %v2982_v18  ;;  %vm22223_vm7 = vmmov %vm22221_vm6  ;;  %v4678_v52 = vmul.bf16 %v16281_v20, %v4627_v8  ;;  %v7306_v26 = vpop.f32.mrf.mxu0  ;;  %vm22250_vm10 = vcmask 408576  }
 0x2cb   : > { %7685 = vmatprep.subr.bf16.mxu1 %v16619_v22  ;;  %v5363_v28 = vpop.permute.xlu1 %5362  ;;  %7724 = vmatprep.subr.bf16.mxu0 %v4785_v57  ;;  %v4515_v10 = vpop.permute.xlu0 %4514  ;;  %vm22251_vm11 = vmmov %vm22250_vm10 }
 0x2cc   : > { %v5369_v31 = vsel %vm22221_vm6, %v18797_v0, %v5363_v28  ;;  %v5378_v17 = vsel %vm22223_vm7, %v5363_v28, %v22222_v33  ;;  %v4530_v63 = vsel %vm4516_vm8, %v4515_v10, %v22224_v30  ;;  %v4521_v0 = vsel %vm4516_vm8, %v18767_v37, %v4515_v10  ;;  %v7345_v37 = vpop.f32.mrf.mxu1  ;;  %v7308_v29 = vpop.f32.mrf.mxu0 }
 0x2cd   : > { %7725 = vmatpush2.bf16.msra.mxu0 %v4784_v21  ;;  %v5420_v5 = vmul.bf16 %v16287_v58, %v5369_v31  ;;  %v5421_v39 = vmul.bf16 %v16293_v25, %v5378_v17  ;;  %v4573_v27 = vmul.bf16 %v16294_v59, %v4530_v63  ;;  %v4572_v50 = vmul.bf16 %v16290_v19, %v4521_v0 }
 0x2ce   : > { %7686 = vmatpush2.bf16.msra.mxu1 %v16620_v54  ;;  %7726 = vmatprep.subr.bf16.mxu0 %v4679_v53  ;;  %v7347_v60 = vpop.f32.mrf.mxu1  ;;  %v7388_v1 = vpop.f32.mrf.mxu0  ;;  %v7346_v6 = vadd.f32 %v7345_v37, %v7302_v43  ;;  %vm22253_vm6 = vcmask 416768  }
 0x2cf   : > { %7755 = vmatprep.subr.bf16.mxu1 %v5421_v39  ;;  %vm22254_vm7 = vmmov %vm22253_vm6 }
 0x2d0   : > { %v7349_v11 = vpop.f32.mrf.mxu1  ;;  %v7389_v25 = vadd.f32 %v7388_v1, %v7346_v6 }
 0x2d1   : > { %7688 = vmatmul.mubr.bf16.vlgmr.msra.gmra.mxu1 %v16621_v12  ;;  %7727 = vmatpush2.bf16.msra.mxu0 %v4678_v52  ;;  %v7350_v46 = vadd.f32 %v7349_v11, %v7306_v26 }
 0x2d2   : > { %7756 = vmatpush1.bf16.msra.mxu1 %v5420_v5  ;;  %7728 = vmatprep.subr.bf16.mxu0 %v4573_v27  ;;  %v7351_v49 = vpop.f32.mrf.mxu1  ;;  %v7348_v5 = vadd.f32 %v7347_v60, %v7304_v32 }
 0x2d3   : > { %7773 = vmatprep.mubr.bf16.mxu1 %v22134_v16  ;;  %v7352_v8 = vadd.f32 %v7351_v49, %v7308_v29 }
 0x2d4   : > { %v7431_v62 = vpop.f32.mrf.mxu1 }
 0x2d5   : > { %7729 = vmatpush2.bf16.msra.mxu0 %v4572_v50  ;;  %v7432_v54 = vadd.f32 %v7431_v62, %v7389_v25 }
 0x2d6   : > { %v19173_v41 = vpop.f32.mrf.mxu1 }
 0x2d8   : > { %7731 = vmatmul.mubr.bf16.vlgmr.msra.gmra.mxu0 %v18804_v3  ;;  %v7435_v23 = vpop.f32.mrf.mxu1  ;;  %v7789_v39 = vpop.permute.xlu0 %7788 }
 0x2d9   : > { %15044 = vmatmul.mubr.msk.bf16.vlgmr.msra.gmra.mxu1 %vm2178_vm15, %v18851_v42  ;;  %v19177_v42 = vpop.f32.mrf.mxu0  ;;  %v7794_v11 = vpop.permute.xlu1 %7793  ;;  %v19181_v1 = vadd.f32 %v7789_v39, %v7432_v54  ;;  %v16299_v54 = vld [vmem:[%s21935_s1 + $0x154] ss:$24 sps:$4 sm:$0xff]  }
 0x2da   : > { %v19175_v48 = vpop.f32.mrf.mxu1 }
 0x2db   : > { %v7392_v7 = vpop.f32.mrf.mxu0 }
 0x2dc   : > { %v7393_v28 = vadd.f32 %v7392_v7, %v7350_v46 }
 0x2dd   : > { %v7394_v34 = vpop.f32.mrf.mxu0 }
 0x2de   : > { %v7395_v0 = vadd.f32 %v7394_v34, %v7352_v8  ;;  %v7436_v27 = vadd.f32 %v7435_v23, %v7393_v28  ;;  %v7391_v34 = vadd.f32 %v19177_v42, %v7348_v5  ;;  %v16295_v5 = vld [vmem:[%s21935_s1 + $0x150] ss:$24 sps:$4 sm:$0xff]  }
 0x2e3   : > { %v7474_v24 = vpop.f32.mrf.mxu1 }
 0x2e5   : > { %v7476_v47 = vpop.f32.mrf.mxu1 }
 0x2e7   : > { %v7478_v3 = vpop.f32.mrf.mxu1 }
 0x2e9   : > { %v7480_v61 = vpop.f32.mrf.mxu1 }
 0x2fe   : > { %v7517_v35 = vpop.f32.mrf.mxu0 }
 0x2ff   : > { %v7518_v21 = vadd.f32 %v7517_v35, %v7474_v24 }
 0x300   : > { %v7519_v15 = vpop.f32.mrf.mxu0 }
 0x301   : > { %v7520_v12 = vadd.f32 %v7519_v15, %v7476_v47 }
 0x302   : > { %v7521_v40 = vpop.f32.mrf.mxu0 }
 0x303   : > { %v7522_v57 = vadd.f32 %v7521_v40, %v7478_v3  ;;  %v7438_v40 = vadd.f32 %v19175_v48, %v7395_v0 }
 0x304   : > { %v7523_v9 = vpop.f32.mrf.mxu0 }
 0x305   : > { %v7524_v17 = vadd.f32 %v7523_v9, %v7480_v61 }
 0x347   : > { %v7560_v44 = vpop.f32.mrf.mxu1 }
 0x348   : > { %v7561_v20 = vadd.f32 %v7560_v44, %v7518_v21 }
 0x349   : > { %v7562_v56 = vpop.f32.mrf.mxu1 }
 0x34a   : > { %v7563_v3 = vadd.f32 %v7562_v56, %v7520_v12  ;;  %v16297_v12 = vld [vmem:[%s21935_s1 + $0x120] ss:$24 sps:$4 sm:$0xff]  }
 0x34b   : > { %v7564_v36 = vpop.f32.mrf.mxu1 }
 0x34c   : > { %v7565_v10 = vadd.f32 %v7564_v36, %v7522_v57  ;;  %v19186_v36 = vadd.f32 %v7794_v11, %v7436_v27 }
 0x34d   : > { %v7566_v18 = vpop.f32.mrf.mxu1 }
 0x34e   : > { %v7567_v50 = vadd.f32 %v7566_v18, %v7524_v17 }
 0x34f   : > { %v7603_v2 = vpop.f32.mrf.mxu1 }
 0x350   : > { %v7604_v59 = vadd.f32 %v7603_v2, %v7561_v20 }
 0x351   : > { %v7605_v4 = vpop.f32.mrf.mxu1 }
 0x352   : > { %v19179_v49 = vadd.f32 %v7789_v39, %v7604_v59  ;;  %v7606_v56 = vadd.f32 %v7605_v4, %v7563_v3  ;;  %v16300_v3 = vld [vmem:[%s21935_s1 + $0xf0] ss:$24 sps:$4 sm:$0xff]  }
 0x353   : > { %v7607_v14 = vpop.f32.mrf.mxu1 }
 0x354   : > { %v7608_v30 = vadd.f32 %v7607_v14, %v7565_v10  ;;  %v7808_v18 = vadd.f32 %v19179_v49, %v19181_v1  ;;  %v19196_v46 = vadd.f32 %v7789_v39, %v7606_v56 }
 0x355   : > { %v7609_v38 = vpop.f32.mrf.mxu1 }
 0x356   : > { %v19183_v60 = vadd.f32 %v7794_v11, %v7608_v30  ;;  %v7610_v62 = vadd.f32 %v7609_v38, %v7567_v50 }
 0x358   : > { %v7646_v51 = vpop.f32.mrf.mxu0  ;;  %v7810_v9 = vadd.f32 %v19183_v60, %v19186_v36 }
 0x35a   : > { %v7648_v55 = vpop.f32.mrf.mxu0 }
 0x35c   : > { %v7650_v45 = vpop.f32.mrf.mxu0 }
 0x35e   : > { %v7652_v53 = vpop.f32.mrf.mxu0 }
 0x391   : > { %v7689_v13 = vpop.f32.mrf.mxu1 }
 0x392   : > { %v7690_v31 = vadd.f32 %v7689_v13, %v7646_v51  ;;  %v19193_v51 = vadd.f32 %v7794_v11, %v7610_v62  ;;  %v7434_v13 = vadd.f32 %v19173_v41, %v7391_v34  ;;  %v16303_v34 = vld [vmem:[%s21935_s1 + $0xc0] ss:$24 sps:$4 sm:$0xff]  }
 0x393   : > { %v7691_v58 = vpop.f32.mrf.mxu1 }
 0x394   : > { %v7692_v43 = vadd.f32 %v7691_v58, %v7648_v55  ;;  %v19200_v58 = vadd.f32 %v7789_v39, %v7434_v13 }
 0x395   : > { %v7693_v22 = vpop.f32.mrf.mxu1 }
 0x396   : > { %v7694_v24 = vadd.f32 %v7693_v22, %v7650_v45  ;;  %v19198_v45 = vadd.f32 %v7794_v11, %v7438_v40  ;;  %v7809_v22 = vadd.f32 %v19196_v46, %v19200_v58 }
 0x397   : > { %v7695_v33 = vpop.f32.mrf.mxu1 }
 0x398   : > { %v7732_v63 = vpop.f32.mrf.mxu0  ;;  %v7696_v61 = vadd.f32 %v7695_v33, %v7652_v53  ;;  %v7811_v48 = vadd.f32 %v19193_v51, %v19198_v45 }
 0x399   : > { %v7733_v52 = vadd.f32 %v7732_v63, %v7690_v31  ;;  %v7775_v19 = vpop.f32.mrf.mxu1 }
 0x39a   : > { %v7734_v37 = vpop.f32.mrf.mxu0 }
 0x39b   : > { %v7776_v26 = vadd.f32 %v7775_v19, %v7733_v52  ;;  %v7777_v29 = vpop.f32.mrf.mxu1  ;;  %v7735_v23 = vadd.f32 %v7734_v37, %v7692_v43  ;;  %v16302_v37 = vld [vmem:[%s21935_s1 + $0x124] ss:$24 sps:$4 sm:$0xff]  }
 0x39c   : > { %v7736_v32 = vpop.f32.mrf.mxu0 }
 0x39d   : > { %v7804_v44 = vadd.f32 %v7789_v39, %v7776_v26  ;;  %v7737_v47 = vadd.f32 %v7736_v32, %v7694_v24  ;;  %v7779_v7 = vpop.f32.mrf.mxu1  ;;  %v7778_v38 = vadd.f32 %v7777_v29, %v7735_v23  ;;  %v16305_v32 = vld [vmem:[%s21935_s1 + $0xf4] ss:$24 sps:$4 sm:$0xff]  }
 0x39e   : > { %v7738_v35 = vpop.f32.mrf.mxu0 }
 0x39f   : > { %v7780_v15 = vadd.f32 %v7779_v7, %v7737_v47  ;;  %v7739_v2 = vadd.f32 %v7738_v35, %v7696_v61  ;;  %v7781_v14 = vpop.f32.mrf.mxu1  ;;  %v7812_v55 = vadd.f32 %v7808_v18, %v7804_v44  ;;  %v7805_v25 = vadd.f32 %v7789_v39, %v7778_v38  ;;  %v16308_v18 = vld [vmem:[%s21935_s1 + $0xc4] ss:$24 sps:$4 sm:$0xff]   ;;  %v16311_v38 = vld [vmem:[%s21935_s1 + $0x94] ss:$24 sps:$4 sm:$0xff]  }
 0x3a1   : > { %v7806_v42 = vadd.f32 %v7794_v11, %v7780_v15  ;;  %v7782_v6 = vadd.f32 %v7781_v14, %v7739_v2  ;;  %v7816_v57 = vmax.f32 %v7812_v55, 0.0  ;;  %v7813_v28 = vadd.f32 %v7809_v22, %v7805_v25  ;;  %v16306_v14 = vld [vmem:[%s21935_s1 + $0x90] ss:$24 sps:$4 sm:$0xff]   ;;  %v16314_v25 = vld [vmem:[%s21935_s1 + $0x64] ss:$24 sps:$4 sm:$0xff]  }
 0x3a3   : > { %v7814_v4 = vadd.f32 %v7810_v9, %v7806_v42  ;;  %v7807_v21 = vadd.f32 %v7794_v11, %v7782_v6  ;;  %v7817_v53 = vmax.f32 %v7813_v28, 0.0 }
 0x3a5   : > { %v7818_v20 = vmax.f32 %v7814_v4, 0.0  ;;  %v7815_v41 = vadd.f32 %v7811_v48, %v7807_v21  ;;  %v16309_v48 = vld [vmem:[%s21935_s1 + $0x60] ss:$24 sps:$4 sm:$0xff]  }
 0x3a7   : > { %v19206_v8 = vpack.c.bf16 %v7818_v20, %v7816_v57  ;;  %v7819_v10 = vmax.f32 %v7815_v41, 0.0 }
 0x3a9   : > { %9202 = vrot.lane.b32.xlu1 %v19206_v8, %s22003_s20  ;;  %8078 = vrot.lane.b32.xlu0 %v19206_v8, %s22225_s14  ;;  %v19216_v59 = vpack.c.bf16 %v7819_v10, %v7817_v53  ;;  %v16312_v53 = vld [vmem:[%s21935_s1 + $0x30] ss:$24 sps:$4 sm:$0xff]  }
 0x3ad   : > { %9166 = vrot.lane.b32.xlu1 %v19206_v8, %s22006_s10  ;;  %8042 = vrot.lane.b32.xlu0 %v19206_v8, %s22226_s19 }
 0x3b1   : > { %8076 = vrot.lane.b32.xlu1 %v19216_v59, %s22225_s14  ;;  %8006 = vrot.lane.b32.xlu0 %v19206_v8, %s22227_s21 }
 0x3b5   : > { %8040 = vrot.lane.b32.xlu1 %v19216_v59, %s22226_s19  ;;  %7970 = vrot.lane.b32.xlu0 %v19206_v8, %s22228_s29 }
 0x3b9   : > { %8004 = vrot.lane.b32.xlu1 %v19216_v59, %s22227_s21  ;;  %7934 = vrot.lane.b32.xlu0 %v19206_v8, %s22229_s11 }
 0x3bd   : > { %7968 = vrot.lane.b32.xlu1 %v19216_v59, %s22228_s29  ;;  %7898 = vrot.lane.b32.xlu0 %v19206_v8, %s22230_s4 }
 0x3c1   : > { %7932 = vrot.lane.b32.xlu1 %v19216_v59, %s22229_s11  ;;  %7862 = vrot.lane.b32.xlu0 %v19206_v8, %s22231_s16 }
 0x3c5   : > { %7896 = vrot.lane.b32.xlu1 %v19216_v59, %s22230_s4  ;;  %7826 = vrot.lane.b32.xlu0 %v19206_v8, %s22232_s27 }
 0x3c9   : > { %7860 = vrot.lane.b32.xlu1 %v19216_v59, %s22231_s16  ;;  %8366 = vrot.lane.b32.xlu0 %v19206_v8, %s22233_s12  ;;  %s22239_s16 = sld [smem:[#allocation83_spill]] }
 0x3cd   : > { %7823 = vrot.lane.b32.xlu1 %v19216_v59, %s22232_s27  ;;  %8330 = vrot.lane.b32.xlu0 %v19206_v8, %s22234_s18  ;;  %s22237_s27 = smov 32  }
 0x3cf   : > { %v16352_v31 = vld [vmem:[%s22239_s16 + $0x4] ss:$28 sps:$4 sm:$0xff]  }
 0x3d0   : > { %10240 = vmatprep.mubr.bf16.mxu1 %v16352_v31 }
 0x3d1   : > { %8364 = vrot.lane.b32.xlu1 %v19216_v59, %s22233_s12  ;;  %8294 = vrot.lane.b32.xlu0 %v19206_v8, %s21978_s24  ;;  %s22242_s12 = smov 3  }
 0x3d5   : > { %8328 = vrot.lane.b32.xlu1 %v19216_v59, %s22234_s18  ;;  %8258 = vrot.lane.b32.xlu0 %v19206_v8, %s22235_s26  ;;  %s22238_s18 = smov 34  }
 0x3d9   : > { %8292 = vrot.lane.b32.xlu1 %v19216_v59, %s21978_s24  ;;  %8222 = vrot.lane.b32.xlu0 %v19206_v8, %s22236_s2  ;;  %s22241_s24 = smov 2  }
 0x3dd   : > { %8256 = vrot.lane.b32.xlu1 %v19216_v59, %s22235_s26  ;;  %8186 = vrot.lane.b32.xlu0 %v19206_v8, %s22237_s27  ;;  %s22240_s26 = smov 1  }
 0x3e1   : > { %8220 = vrot.lane.b32.xlu1 %v19216_v59, %s22236_s2  ;;  %8150 = vrot.lane.b32.xlu0 %v19206_v8, %s21996_s22  ;;  %s22252_s2 = smov 114  }
 0x3e5   : > { %8184 = vrot.lane.b32.xlu1 %v19216_v59, %s22237_s27  ;;  %8114 = vrot.lane.b32.xlu0 %v19206_v8, %s22238_s18  ;;  %s22249_s27 = smov 113  }
 0x3e9   : > { %8148 = vrot.lane.b32.xlu1 %v19216_v59, %s21996_s22  ;;  %8654 = vrot.lane.b32.xlu0 %v19206_v8, %s22240_s26  ;;  %s22248_s22 = smov 79  }
 0x3ed   : > { %8112 = vrot.lane.b32.xlu1 %v19216_v59, %s22238_s18  ;;  %9204 = vrot.lane.b32.xlu0 %v19216_v59, %s22003_s20  ;;  %s22279_s18 = sld [smem:[#allocation86_spill]] }
 0x3f1   : > { %8652 = vrot.lane.b32.xlu1 %v19216_v59, %s22240_s26  ;;  %9168 = vrot.lane.b32.xlu0 %v19216_v59, %s22006_s10  ;;  %s22329_s26 = smov 50  }
 0x3f5   : > { %8616 = vrot.lane.b32.xlu1 %v19216_v59, %s22241_s24  ;;  %8618 = vrot.lane.b32.xlu0 %v19206_v8, %s22241_s24  ;;  %s22337_s24 = smov 115  }
 0x3f9   : > { %9130 = vrot.lane.b32.xlu1 %v19206_v8, %s22008_s15  ;;  %9132 = vrot.lane.b32.xlu0 %v19216_v59, %s22008_s15 }
 0x3fd   : > { %8580 = vrot.lane.b32.xlu1 %v19216_v59, %s22242_s12  ;;  %8582 = vrot.lane.b32.xlu0 %v19206_v8, %s22242_s12  ;;  %s22246_s12 = smov 78  }
 0x401   : > { %9094 = vrot.lane.b32.xlu1 %v19206_v8, %s22009_s3  ;;  %9096 = vrot.lane.b32.xlu0 %v19216_v59, %s22009_s3 }
 0x405   : > { %8544 = vrot.lane.b32.xlu1 %v19216_v59, %s21967_s13  ;;  %8546 = vrot.lane.b32.xlu0 %v19206_v8, %s21967_s13  ;;  %s22244_s13 = smov 111  }
 0x409   : > { %9058 = vrot.lane.b32.xlu1 %v19206_v8, %s22010_s5  ;;  %9060 = vrot.lane.b32.xlu0 %v19216_v59, %s22010_s5 }
 0x40d   : > { %8508 = vrot.lane.b32.xlu1 %v19216_v59, %s22067_s30  ;;  %8510 = vrot.lane.b32.xlu0 %v19206_v8, %s22067_s30  ;;  %s22243_s30 = smov 16  }
 0x411   : > { %9022 = vrot.lane.b32.xlu1 %v19206_v8, %s22013_s7  ;;  %9024 = vrot.lane.b32.xlu0 %v19216_v59, %s22013_s7 }
 0x415   : > { %8472 = vrot.lane.b32.xlu1 %v19216_v59, %s22070_s6  ;;  %8474 = vrot.lane.b32.xlu0 %v19206_v8, %s22070_s6  ;;  %s22330_s6 = smov 51  }
 0x419   : > { %8986 = vrot.lane.b32.xlu1 %v19206_v8, %s22014_s8  ;;  %8988 = vrot.lane.b32.xlu0 %v19216_v59, %s22014_s8 }
 0x41b   : > { %v19329_v33 = vpop.permute.xlu1 %9202  ;;  %v8079_v17 = vpop.permute.xlu0 %8078 }
 0x41d   : > { %8436 = vrot.lane.b32.xlu1 %v19216_v59, %s22243_s30  ;;  %8438 = vrot.lane.b32.xlu0 %v19206_v8, %s22243_s30  ;;  %s22245_s30 = smov 17  }
 0x41f   : > { %v19335_v30 = vpop.permute.xlu1 %9166  ;;  %v8043_v63 = vpop.permute.xlu0 %8042 }
 0x421   : > { %8950 = vrot.lane.b32.xlu1 %v19206_v8, %s22244_s13  ;;  %8952 = vrot.lane.b32.xlu0 %v19216_v59, %s22244_s13 }
 0x423   : > { %v8077_v39 = vpop.permute.xlu1 %8076  ;;  %v8007_v52 = vpop.permute.xlu0 %8006 }
 0x424   : > { %v8080_v19 = vsel %vm1118_vm0, %v8079_v17, %v8077_v39  ;;  %v8084_v0 = vsel %vm1118_vm0, %v8077_v39, %v8079_v17  ;;  %v16317_v17 = vld [vmem:[%s21935_s1 + $0x34] ss:$24 sps:$4 sm:$0xff]  }
 0x425   : > { %v8098_v27 = vmul.bf16 %v16295_v5, %v8084_v0  ;;  %8400 = vrot.lane.b32.xlu1 %v19216_v59, %s22245_s30  ;;  %8402 = vrot.lane.b32.xlu0 %v19206_v8, %s22245_s30  ;;  %v8099_v50 = vmul.bf16 %v16299_v54, %v8080_v19  ;;  %s22247_s30 = smov 112   ;;  %v16315_v19 = vld [vmem:[%s21935_s1] ss:$24 sps:$4 sm:$0xff]  }
 0x427   : > { %v8041_v11 = vpop.permute.xlu1 %8040  ;;  %10208 = vmatprep.subr.bf16.mxu1 %v8099_v50  ;;  %v7971_v43 = vpop.permute.xlu0 %7970 }
 0x428   : > { %v8044_v24 = vsel %vm1012_vm1, %v8043_v63, %v8041_v11  ;;  %v8048_v26 = vsel %vm1012_vm1, %v8041_v11, %v8043_v63  ;;  %10209 = vmatpush1.bf16.msra.mxu1 %v8098_v27  ;;  %v16320_v27 = vld [vmem:[%s21935_s1 + $0x4] ss:$24 sps:$4 sm:$0xff]  }
 0x429   : > { %v8062_v29 = vmul.bf16 %v16297_v12, %v8048_v26  ;;  %9490 = vrot.lane.b32.xlu1 %v19206_v8, %s22246_s12  ;;  %9492 = vrot.lane.b32.xlu0 %v19216_v59, %s22246_s12  ;;  %v8063_v62 = vmul.bf16 %v16302_v37, %v8044_v24  ;;  %v16318_v24 = vld [vmem:[%s21935_s1 + $0x2d0] ss:$24 sps:$4 sm:$0xff]  }
 0x42b   : > { %v8005_v61 = vpop.permute.xlu1 %8004  ;;  %10210 = vmatprep.subr.bf16.mxu1 %v8063_v62  ;;  %v7935_v44 = vpop.permute.xlu0 %7934 }
 0x42c   : > { %v8008_v23 = vsel %vm906_vm2, %v8007_v52, %v8005_v61  ;;  %v8012_v47 = vsel %vm906_vm2, %v8005_v61, %v8007_v52  ;;  %10211 = vmatpush1.bf16.msra.mxu1 %v8062_v29  ;;  %v16323_v29 = vld [vmem:[%s21935_s1 + $0x2d4] ss:$24 sps:$4 sm:$0xff]  }
 0x42d   : > { %v8026_v7 = vmul.bf16 %v16300_v3, %v8012_v47  ;;  %8914 = vrot.lane.b32.xlu1 %v19206_v8, %s22247_s30  ;;  %8916 = vrot.lane.b32.xlu0 %v19216_v59, %s22247_s30  ;;  %v8027_v35 = vmul.bf16 %v16305_v32, %v8008_v23  ;;  %v16321_v23 = vld [vmem:[%s21935_s1 + $0x2a0] ss:$24 sps:$4 sm:$0xff]  }
 0x42f   : > { %v7969_v56 = vpop.permute.xlu1 %7968  ;;  %10212 = vmatprep.subr.bf16.mxu1 %v8027_v35  ;;  %v7899_v15 = vpop.permute.xlu0 %7898 }
 0x430   : > { %v7972_v2 = vsel %vm800_vm3, %v7971_v43, %v7969_v56  ;;  %v7976_v40 = vsel %vm800_vm3, %v7969_v56, %v7971_v43  ;;  %10213 = vmatpush1.bf16.msra.mxu1 %v8026_v7  ;;  %v16326_v7 = vld [vmem:[%s21935_s1 + $0x2a4] ss:$24 sps:$4 sm:$0xff]  }
 0x431   : > { %v7990_v9 = vmul.bf16 %v16303_v34, %v7976_v40  ;;  %9454 = vrot.lane.b32.xlu1 %v19206_v8, %s22248_s22  ;;  %9456 = vrot.lane.b32.xlu0 %v19216_v59, %s22248_s22  ;;  %v7991_v55 = vmul.bf16 %v16308_v18, %v7972_v2  ;;  %v16324_v2 = vld [vmem:[%s21935_s1 + $0x270] ss:$24 sps:$4 sm:$0xff]   ;;  %s22331_s22 = smov 18  }
 0x433   : > { %v7933_v42 = vpop.permute.xlu1 %7932  ;;  %10214 = vmatprep.subr.bf16.mxu1 %v7991_v55  ;;  %v7863_v6 = vpop.permute.xlu0 %7862 }
 0x434   : > { %v7936_v13 = vsel %vm694_vm4, %v7935_v44, %v7933_v42  ;;  %v7940_v4 = vsel %vm694_vm4, %v7933_v42, %v7935_v44  ;;  %10215 = vmatpush1.bf16.msra.mxu1 %v7990_v9  ;;  %v16329_v9 = vld [vmem:[%s21935_s1 + $0x274] ss:$24 sps:$4 sm:$0xff]  }
 0x435   : > { %v7954_v21 = vmul.bf16 %v16306_v14, %v7940_v4  ;;  %8878 = vrot.lane.b32.xlu1 %v19206_v8, %s22249_s27  ;;  %8880 = vrot.lane.b32.xlu0 %v19216_v59, %s22249_s27  ;;  %v7955_v57 = vmul.bf16 %v16311_v38, %v7936_v13  ;;  %v16327_v13 = vld [vmem:[%s21935_s1 + $0x240] ss:$24 sps:$4 sm:$0xff]  }
 0x437   : > { %v7897_v20 = vpop.permute.xlu1 %7896  ;;  %10216 = vmatprep.subr.bf16.mxu1 %v7955_v57  ;;  %v7827_v22 = vpop.permute.xlu0 %7826 }
 0x438   : > { %v7900_v41 = vsel %vm588_vm5, %v7899_v15, %v7897_v20  ;;  %v7904_v28 = vsel %vm588_vm5, %v7897_v20, %v7899_v15  ;;  %10217 = vmatpush1.bf16.msra.mxu1 %v7954_v21  ;;  %v16332_v21 = vld [vmem:[%s21935_s1 + $0x244] ss:$24 sps:$4 sm:$0xff]  }
 0x439   : > { %v7918_v10 = vmul.bf16 %v16309_v48, %v7904_v28  ;;  %9418 = vrot.lane.b32.xlu1 %v19206_v8, %s22028_s0  ;;  %9420 = vrot.lane.b32.xlu0 %v19216_v59, %s22028_s0  ;;  %v7919_v31 = vmul.bf16 %v16314_v25, %v7900_v41  ;;  %s22257_s0 = smov 115   ;;  %v16330_v41 = vld [vmem:[%s21935_s1 + $0x210] ss:$24 sps:$4 sm:$0xff]  }
 0x43b   : > { %v7861_v63 = vpop.permute.xlu1 %7860  ;;  %10218 = vmatprep.subr.bf16.mxu1 %v7919_v31  ;;  %v8367_v5 = vpop.permute.xlu0 %8366 }
 0x43c   : > { %v7864_v54 = vsel %vm22250_vm10, %v7863_v6, %v7861_v63  ;;  %v7868_v39 = vsel %vm22251_vm11, %v7861_v63, %v7863_v6  ;;  %10219 = vmatpush1.bf16.msra.mxu1 %v7918_v10  ;;  %vm22255_vm10 = vcmask 146432   ;;  %v16335_v10 = vld [vmem:[%s21935_s1 + $0x214] ss:$24 sps:$4 sm:$0xff]  }
 0x43d   : > { %v7882_v52 = vmul.bf16 %v16312_v53, %v7868_v39  ;;  %8842 = vrot.lane.b32.xlu1 %v19206_v8, %s22252_s2  ;;  %8844 = vrot.lane.b32.xlu0 %v19216_v59, %s22252_s2  ;;  %v7883_v0 = vmul.bf16 %v16317_v17, %v7864_v54  ;;  %vm22256_vm11 = vmmov %vm22255_vm10  ;;  %v16333_v54 = vld [vmem:[%s21935_s1 + $0x1e0] ss:$24 sps:$4 sm:$0xff]  }
 0x43f   : > { %v7824_v12 = vpop.permute.xlu1 %7823  ;;  %10220 = vmatprep.subr.bf16.mxu1 %v7883_v0  ;;  %v8331_v50 = vpop.permute.xlu0 %8330 }
 0x440   : > { %v7828_v37 = vsel %vm22253_vm6, %v7827_v22, %v7824_v12  ;;  %v7832_v11 = vsel %vm22254_vm7, %v7824_v12, %v7827_v22  ;;  %10221 = vmatpush1.bf16.msra.mxu1 %v7882_v52  ;;  %vm22258_vm6 = vcmask 154624   ;;  %v16338_v52 = vld [vmem:[%s21935_s1 + $0x1e4] ss:$24 sps:$4 sm:$0xff]  }
 0x441   : > { %v7846_v43 = vmul.bf16 %v16315_v19, %v7832_v11  ;;  %9382 = vrot.lane.b32.xlu1 %v19206_v8, %s22032_s28  ;;  %9384 = vrot.lane.b32.xlu0 %v19216_v59, %s22032_s28  ;;  %v7847_v26 = vmul.bf16 %v16320_v27, %v7828_v37  ;;  %vm22259_vm7 = vmmov %vm22258_vm6  ;;  %s22271_s28 = smov 127  }
 0x443   : > { %v8365_v3 = vpop.permute.xlu1 %8364  ;;  %10222 = vmatprep.subr.bf16.mxu1 %v7847_v26  ;;  %v8295_v62 = vpop.permute.xlu0 %8294 }
 0x444   : > { %v8368_v32 = vsel %vm22255_vm10, %v8367_v5, %v8365_v3  ;;  %v8372_v61 = vsel %vm22256_vm11, %v8365_v3, %v8367_v5  ;;  %10223 = vmatpush1.bf16.msra.mxu1 %v7846_v43  ;;  %vm22260_vm10 = vcmask 236544   ;;  %v16341_v43 = vld [vmem:[%s21935_s1 + $0x1b4] ss:$24 sps:$4 sm:$0xff]  }
 0x445   : > { %v8386_v44 = vmul.bf16 %v16318_v24, %v8372_v61  ;;  %8806 = vrot.lane.b32.xlu1 %v19206_v8, %s22257_s0  ;;  %8808 = vrot.lane.b32.xlu0 %v19216_v59, %s22257_s0  ;;  %v8387_v47 = vmul.bf16 %v16323_v29, %v8368_v32  ;;  %vm22261_vm11 = vmmov %vm22260_vm10  ;;  %v16443_v24 = vld [vmem:[%s22239_s16 + $0xc] ss:$28 sps:$4 sm:$0xff]   ;;  %v16339_v61 = vld [vmem:[%s21935_s1 + $0x180] ss:$24 sps:$4 sm:$0xff]   ;;  %s22332_s0 = smov 19  }
 0x446   : > { %10283 = vmatprep.mubr.bf16.mxu0 %v16443_v24 }
 0x447   : > { %v8329_v34 = vpop.permute.xlu1 %8328  ;;  %10224 = vmatprep.subr.bf16.mxu1 %v8387_v47  ;;  %v8259_v35 = vpop.permute.xlu0 %8258 }
 0x448   : > { %v8332_v18 = vsel %vm22258_vm6, %v8331_v50, %v8329_v34  ;;  %v8336_v56 = vsel %vm22259_vm7, %v8329_v34, %v8331_v50  ;;  %10225 = vmatpush2.bf16.msra.mxu1 %v8386_v44  ;;  %vm22262_vm6 = vcmask 244736   ;;  %v16336_v50 = vld [vmem:[%s21935_s1 + $0x1b0] ss:$24 sps:$4 sm:$0xff]  }
 0x449   : > { %v8350_v15 = vmul.bf16 %v16321_v23, %v8336_v56  ;;  %9346 = vrot.lane.b32.xlu1 %v19206_v8, %s22035_s17  ;;  %9348 = vrot.lane.b32.xlu0 %v19216_v59, %s22035_s17  ;;  %v8351_v40 = vmul.bf16 %v16326_v7, %v8332_v18  ;;  %vm22263_vm7 = vmmov %vm22262_vm6  ;;  %s22266_s17 = smov 126   ;;  %v16346_v23 = vld [vmem:[%s21935_s1 + $0x184] ss:$24 sps:$4 sm:$0xff]   ;;  %v16349_v18 = vld [vmem:[%s21935_s1 + $0x754] ss:$24 sps:$4 sm:$0xff]  }
 0x44b   : > { %v8293_v14 = vpop.permute.xlu1 %8292  ;;  %10226 = vmatprep.subr.bf16.mxu1 %v8351_v40  ;;  %v8223_v55 = vpop.permute.xlu0 %8222 }
 0x44c   : > { %v8296_v38 = vsel %vm22260_vm10, %v8295_v62, %v8293_v14  ;;  %v8300_v42 = vsel %vm22261_vm11, %v8293_v14, %v8295_v62  ;;  %10227 = vmatpush2.bf16.msra.mxu1 %v8350_v15  ;;  %vm22264_vm10 = vcmask 252928   ;;  %v16342_v14 = vld [vmem:[%s21935_s1 + $0x750] ss:$24 sps:$4 sm:$0xff]  }
 0x44d   : > { %v8314_v6 = vmul.bf16 %v16324_v2, %v8300_v42  ;;  %8770 = vrot.lane.b32.xlu1 %v19206_v8, %s22085_s9  ;;  %8772 = vrot.lane.b32.xlu0 %v19216_v59, %s22085_s9  ;;  %v8315_v4 = vmul.bf16 %v16329_v9, %v8296_v38  ;;  %vm22265_vm11 = vmmov %vm22264_vm10  ;;  %v16344_v2 = vld [vmem:[%s21935_s1 + $0x450] ss:$24 sps:$4 sm:$0xff]   ;;  %v16353_v9 = vld [vmem:[%s21935_s1 + $0x454] ss:$24 sps:$4 sm:$0xff]   ;;  %s22333_s9 = smov 29  }
 0x44f   : > { %v8257_v48 = vpop.permute.xlu1 %8256  ;;  %10228 = vmatprep.subr.bf16.mxu1 %v8315_v4  ;;  %v8187_v57 = vpop.permute.xlu0 %8186 }
 0x450   : > { %v8260_v25 = vsel %vm22262_vm6, %v8259_v35, %v8257_v48  ;;  %v8264_v20 = vsel %vm22263_vm7, %v8257_v48, %v8259_v35  ;;  %10229 = vmatpush2.bf16.msra.mxu1 %v8314_v6  ;;  %vm22267_vm6 = vcmask 261120   ;;  %v16350_v6 = vld [vmem:[%s22239_s16] ss:$28 sps:$4 sm:$0xff]  }
 0x451   : > { %v8278_v22 = vmul.bf16 %v16327_v13, %v8264_v20  ;;  %9310 = vrot.lane.b32.xlu1 %v19206_v8, %s22040_s23  ;;  %9312 = vrot.lane.b32.xlu0 %v19216_v59, %s22040_s23  ;;  %v8279_v28 = vmul.bf16 %v16332_v21, %v8260_v25  ;;  %vm22268_vm7 = vmmov %vm22267_vm6  ;;  %s22275_s23 = smov 94   ;;  %v16347_v21 = vld [vmem:[%s21935_s1 + $0x720] ss:$24 sps:$4 sm:$0xff]  }
 0x453   : > { %v8221_v53 = vpop.permute.xlu1 %8220  ;;  %10230 = vmatprep.subr.bf16.mxu1 %v8279_v28  ;;  %v8151_v31 = vpop.permute.xlu0 %8150 }
 0x454   : > { %v8224_v17 = vsel %vm22264_vm10, %v8223_v55, %v8221_v53  ;;  %v8228_v63 = vsel %vm22265_vm11, %v8221_v53, %v8223_v55  ;;  %10231 = vmatpush2.bf16.msra.mxu1 %v8278_v22  ;;  %vm22269_vm10 = vcmask 269312   ;;  %v16354_v22 = vld [vmem:[%s21935_s1 + $0x420] ss:$24 sps:$4 sm:$0xff]   ;;  %v9669_v53 = vld [vmem:[%s22279_s18 + $0x8] sm:$0xff] }
 0x455   : > { %v8242_v5 = vmul.bf16 %v16330_v41, %v8228_v63  ;;  %8734 = vrot.lane.b32.xlu1 %v19206_v8, %s22266_s17  ;;  %8736 = vrot.lane.b32.xlu0 %v19216_v59, %s22266_s17  ;;  %v8243_v39 = vmul.bf16 %v16335_v10, %v8224_v17  ;;  %vm22270_vm11 = vmmov %vm22269_vm10  ;;  %s22278_s17 = smov 77   ;;  %v16357_v41 = vld [vmem:[%s21935_s1 + $0x424] ss:$24 sps:$4 sm:$0xff]  }
 0x456   : > { %v9668_v10 = vld [vmem:[%s22279_s18] sm:$0xff]  ;;  %s22340_s18 = smov 1  }
 0x457   : > { %v8185_v19 = vpop.permute.xlu1 %8184  ;;  %10232 = vmatprep.subr.bf16.mxu1 %v8243_v39  ;;  %v8115_v0 = vpop.permute.xlu0 %8114 }
 0x458   : > { %v8188_v27 = vsel %vm22267_vm6, %v8187_v57, %v8185_v19  ;;  %v8192_v12 = vsel %vm22268_vm7, %v8185_v19, %v8187_v57  ;;  %10233 = vmatpush2.bf16.msra.mxu1 %v8242_v5  ;;  %vm22272_vm6 = vcmask 277504  }
 0x459   : > { %v8206_v37 = vmul.bf16 %v16333_v54, %v8192_v12  ;;  %9274 = vrot.lane.b32.xlu1 %v19206_v8, %s22043_s25  ;;  %9276 = vrot.lane.b32.xlu0 %v19216_v59, %s22043_s25  ;;  %v8207_v11 = vmul.bf16 %v16338_v52, %v8188_v27  ;;  %vm22273_vm7 = vmmov %vm22272_vm6  ;;  %v16358_v27 = vld [vmem:[%s21935_s1 + $0x6f0] ss:$24 sps:$4 sm:$0xff]   ;;  %s22336_s25 = smov 31  }
 0x45b   : > { %v8149_v26 = vpop.permute.xlu1 %8148  ;;  %10234 = vmatprep.subr.bf16.mxu1 %v8207_v11  ;;  %v8655_v29 = vpop.permute.xlu0 %8654 }
 0x45c   : > { %v8152_v3 = vsel %vm22269_vm10, %v8151_v31, %v8149_v26  ;;  %v8156_v62 = vsel %vm22270_vm11, %v8149_v26, %v8151_v31  ;;  %10235 = vmatpush2.bf16.msra.mxu1 %v8206_v37  ;;  %vm22274_vm10 = vcmask 777216   ;;  %v16446_v31 = vld [vmem:[%s22239_s16 + $0x14] ss:$28 sps:$4 sm:$0xff]  }
 0x45d   : > { %v8170_v32 = vmul.bf16 %v16336_v50, %v8156_v62  ;;  %8698 = vrot.lane.b32.xlu1 %v19206_v8, %s22271_s28  ;;  %8700 = vrot.lane.b32.xlu0 %v19216_v59, %s22271_s28  ;;  %v8171_v44 = vmul.bf16 %v16341_v43, %v8152_v3  ;;  %vm22276_vm11 = vmmov %vm22274_vm10  ;;  %v16363_v3 = vld [vmem:[%s21935_s1 + $0x3f4] ss:$24 sps:$4 sm:$0xff]   ;;  %s22338_s28 = smov 32  }
 0x45f   : > { %v8113_v47 = vpop.permute.xlu1 %8112  ;;  %10236 = vmatprep.subr.bf16.mxu1 %v8171_v44  ;;  %v9205_v7 = vpop.permute.xlu0 %9204 }
 0x460   : > { %v8116_v34 = vsel %vm22272_vm6, %v8115_v0, %v8113_v47  ;;  %v8120_v35 = vsel %vm22273_vm7, %v8113_v47, %v8115_v0  ;;  %10237 = vmatpush2.bf16.msra.mxu1 %v8170_v32  ;;  %v9210_v15 = vsel %vm22274_vm10, %v9205_v7, %v19329_v33  ;;  %v9206_v55 = vsel %vm22276_vm11, %v19329_v33, %v9205_v7  ;;  %v16356_v33 = vld [vmem:[%s21935_s1 + $0x724] ss:$24 sps:$4 sm:$0xff]   ;;  %v16364_v7 = vld [vmem:[%s21935_s1 + $0x6c0] ss:$24 sps:$4 sm:$0xff]  }
 0x461   : > { %v8134_v56 = vmul.bf16 %v16339_v61, %v8120_v35  ;;  %9238 = vrot.lane.b32.xlu1 %v19206_v8, %s22275_s23  ;;  %9240 = vrot.lane.b32.xlu0 %v19216_v59, %s22275_s23  ;;  %v8135_v40 = vmul.bf16 %v16346_v23, %v8116_v34  ;;  %v9225_v48 = vmul.bf16 %v16349_v18, %v9210_v15  ;;  %vm22277_vm6 = vcmask 785408   ;;  %v16366_v34 = vld [vmem:[%s21935_s1 + $0x6c4] ss:$24 sps:$4 sm:$0xff]   ;;  %s22335_s23 = smov 79  }
 0x462   : > { %v9224_v28 = vmul.bf16 %v16342_v14, %v9206_v55  ;;  %vm22280_vm7 = vmmov %vm22277_vm6  ;;  %vm22281_vm10 = vcmask 793600   ;;  %v16369_v14 = vld [vmem:[%s21935_s1 + $0x3c4] ss:$24 sps:$4 sm:$0xff]  }
 0x463   : > { %v8653_v38 = vpop.permute.xlu1 %8652  ;;  %10238 = vmatprep.subr.bf16.mxu1 %v8135_v40  ;;  %v9169_v42 = vpop.permute.xlu0 %9168  ;;  %vm22282_vm11 = vmmov %vm22281_vm10 }
 0x464   : > { %v8656_v13 = vsel %vm2814_vm12, %v8655_v29, %v8653_v38  ;;  %v8660_v4 = vsel %vm2814_vm12, %v8653_v38, %v8655_v29  ;;  %10239 = vmatpush2.bf16.msra.mxu1 %v8134_v56  ;;  %v9174_v25 = vsel %vm22277_vm6, %v9169_v42, %v19335_v30  ;;  %v9170_v17 = vsel %vm22280_vm7, %v19335_v30, %v9169_v42  ;;  %v16360_v30 = vld [vmem:[%s21935_s1 + $0x6f4] ss:$24 sps:$4 sm:$0xff]   ;;  %v16361_v29 = vld [vmem:[%s21935_s1 + $0x3f0] ss:$24 sps:$4 sm:$0xff]  }
 0x465   : > { %v8674_v57 = vmul.bf16 %v16344_v2, %v8660_v4  ;;  %9526 = vrot.lane.b32.xlu1 %v19206_v8, %s22278_s17  ;;  %9528 = vrot.lane.b32.xlu0 %v19216_v59, %s22278_s17  ;;  %v8675_v20 = vmul.bf16 %v16353_v9, %v8656_v13  ;;  %v9189_v52 = vmul.bf16 %v16356_v33, %v9174_v25  ;;  %vm22283_vm6 = vcmask 801792   ;;  %v16367_v9 = vld [vmem:[%s21935_s1 + $0x3c0] ss:$24 sps:$4 sm:$0xff]   ;;  %s22334_s17 = smov 30  }
 0x466   : > { %10294 = vmatprep.subr.bf16.mxu1 %v9225_v48  ;;  %v9188_v12 = vmul.bf16 %v16347_v21, %v9170_v17  ;;  %vm22284_vm7 = vmmov %vm22283_vm6  ;;  %v16370_v21 = vld [vmem:[%s21935_s1 + $0x690] ss:$24 sps:$4 sm:$0xff]   ;;  %v16372_v48 = vld [vmem:[%s21935_s1 + $0x694] ss:$24 sps:$4 sm:$0xff]  }
 0x467   : > { %v8617_v63 = vpop.permute.xlu1 %8616  ;;  %10241 = vmatmul.mubr.bf16.vlgmr.msra.gmra.mxu1 %v16350_v6  ;;  %10251 = vmatprep.subr.bf16.mxu0 %v8675_v20  ;;  %v8619_v5 = vpop.permute.xlu0 %8618 }
 0x468   : > { %v8620_v54 = vsel %vm2708_vm14, %v8619_v5, %v8617_v63  ;;  %v8624_v39 = vsel %vm2708_vm14, %v8617_v63, %v8619_v5  ;;  %10252 = vmatpush1.bf16.msra.mxu0 %v8674_v57  ;;  %10295 = vmatpush1.bf16.msra.mxu1 %v9224_v28  ;;  %v16373_v28 = vld [vmem:[%s21935_s1 + $0x390] ss:$24 sps:$4 sm:$0xff]  }
 0x469   : > { %v8638_v19 = vmul.bf16 %v16354_v22, %v8624_v39  ;;  %9672 = vperm.xlu1 %15843, %v9668_v10   ;;  %9677 = vperm.xlu0 %15842, %v9669_v53   ;;  %v8639_v0 = vmul.bf16 %v16357_v41, %v8620_v54  ;;  %v16375_v10 = vld [vmem:[%s21935_s1 + $0x394] ss:$24 sps:$4 sm:$0xff]   ;;  %v16376_v39 = vld [vmem:[%s21935_s1 + $0x660] ss:$24 sps:$4 sm:$0xff]  }
 0x46a   : > { %10296 = vmatprep.subr.bf16.mxu1 %v9189_v52  ;;  %10326 = vmatprep.mubr.bf16.mxu1 %v16446_v31  ;;  %v16378_v52 = vld [vmem:[%s21935_s1 + $0x664] ss:$24 sps:$4 sm:$0xff]  }
 0x46b   : > { %v9131_v50 = vpop.permute.xlu1 %9130  ;;  %10253 = vmatprep.subr.bf16.mxu0 %v8639_v0  ;;  %v9133_v37 = vpop.permute.xlu0 %9132 }
 0x46c   : > { %v9134_v11 = vsel %vm22281_vm10, %v9131_v50, %v9133_v37  ;;  %v9138_v43 = vsel %vm22282_vm11, %v9133_v37, %v9131_v50  ;;  %10254 = vmatpush1.bf16.msra.mxu0 %v8638_v19  ;;  %10297 = vmatpush1.bf16.msra.mxu1 %v9188_v12  ;;  %vm22285_vm10 = vcmask 105472   ;;  %v16379_v37 = vld [vmem:[%s21935_s1 + $0x360] ss:$24 sps:$4 sm:$0xff]  }
 0x46d   : > { %v9152_v24 = vmul.bf16 %v16358_v27, %v9134_v11  ;;  %v9153_v26 = vmul.bf16 %v16360_v30, %v9138_v43  ;;  %vm22286_vm11 = vmmov %vm22285_vm10  ;;  %v16381_v11 = vld [vmem:[%s21935_s1 + $0x364] ss:$24 sps:$4 sm:$0xff]  }
 0x46f   : > { %v8581_v62 = vpop.permute.xlu1 %8580  ;;  %10298 = vmatprep.subr.bf16.mxu1 %v9153_v26  ;;  %v8583_v32 = vpop.permute.xlu0 %8582 }
 0x470   : > { %v8584_v61 = vsel %vm2602_vm13, %v8583_v32, %v8581_v62  ;;  %v8588_v44 = vsel %vm2602_vm13, %v8581_v62, %v8583_v32  ;;  %10299 = vmatpush1.bf16.msra.mxu1 %v9152_v24  ;;  %v16382_v32 = vld [vmem:[%s21935_s1 + $0x630] ss:$24 sps:$4 sm:$0xff]  }
 0x471   : > { %v8602_v23 = vmul.bf16 %v16361_v29, %v8588_v44  ;;  %v8603_v47 = vmul.bf16 %v16363_v3, %v8584_v61  ;;  %v16384_v61 = vld [vmem:[%s21935_s1 + $0x634] ss:$24 sps:$4 sm:$0xff]  }
 0x473   : > { %v9095_v35 = vpop.permute.xlu1 %9094  ;;  %10255 = vmatprep.subr.bf16.mxu0 %v8603_v47  ;;  %v9097_v18 = vpop.permute.xlu0 %9096 }
 0x474   : > { %v9098_v56 = vsel %vm22283_vm6, %v9095_v35, %v9097_v18  ;;  %v9102_v15 = vsel %vm22284_vm7, %v9097_v18, %v9095_v35  ;;  %10256 = vmatpush1.bf16.msra.mxu0 %v8602_v23  ;;  %vm22287_vm6 = vcmask 809984   ;;  %v16385_v18 = vld [vmem:[%s21935_s1 + $0x330] ss:$24 sps:$4 sm:$0xff]  }
 0x475   : > { %v9116_v2 = vmul.bf16 %v16364_v7, %v9098_v56  ;;  %v9117_v40 = vmul.bf16 %v16366_v34, %v9102_v15  ;;  %vm22288_vm7 = vmmov %vm22287_vm6  ;;  %v16387_v56 = vld [vmem:[%s21935_s1 + $0x334] ss:$24 sps:$4 sm:$0xff]  }
 0x477   : > { %v8545_v55 = vpop.permute.xlu1 %8544  ;;  %10300 = vmatprep.subr.bf16.mxu1 %v9117_v40  ;;  %v8547_v38 = vpop.permute.xlu0 %8546 }
 0x478   : > { %v8548_v42 = vsel %vm22285_vm10, %v8547_v38, %v8545_v55  ;;  %v8552_v6 = vsel %vm22286_vm11, %v8545_v55, %v8547_v38  ;;  %10301 = vmatpush1.bf16.msra.mxu1 %v9116_v2  ;;  %vm22289_vm10 = vcmask 113664   ;;  %v16388_v38 = vld [vmem:[%s21935_s1 + $0x600] ss:$24 sps:$4 sm:$0xff]  }
 0x479   : > { %v8566_v13 = vmul.bf16 %v16367_v9, %v8552_v6  ;;  %v8567_v4 = vmul.bf16 %v16369_v14, %v8548_v42  ;;  %vm22290_vm11 = vmmov %vm22289_vm10  ;;  %v16390_v42 = vld [vmem:[%s21935_s1 + $0x604] ss:$24 sps:$4 sm:$0xff]  }
 0x47b   : > { %v9059_v33 = vpop.permute.xlu1 %9058  ;;  %10257 = vmatprep.subr.bf16.mxu0 %v8567_v4  ;;  %v9061_v57 = vpop.permute.xlu0 %9060 }
 0x47c   : > { %v9062_v25 = vsel %vm22287_vm6, %v9059_v33, %v9061_v57  ;;  %v9066_v20 = vsel %vm22288_vm7, %v9061_v57, %v9059_v33  ;;  %10258 = vmatpush1.bf16.msra.mxu0 %v8566_v13  ;;  %vm22291_vm6 = vcmask 891904   ;;  %v16391_v57 = vld [vmem:[%s21935_s1 + $0x300] ss:$24 sps:$4 sm:$0xff]  }
 0x47d   : > { %v9080_v22 = vmul.bf16 %v16370_v21, %v9062_v25  ;;  %v9081_v41 = vmul.bf16 %v16372_v48, %v9066_v20  ;;  %vm22292_vm7 = vmmov %vm22291_vm6  ;;  %v16393_v25 = vld [vmem:[%s21935_s1 + $0x304] ss:$24 sps:$4 sm:$0xff]  }
 0x47f   : > { %v8509_v53 = vpop.permute.xlu1 %8508  ;;  %10302 = vmatprep.subr.bf16.mxu1 %v9081_v41  ;;  %v8511_v31 = vpop.permute.xlu0 %8510 }
 0x480   : > { %v8512_v17 = vsel %vm22289_vm10, %v8511_v31, %v8509_v53  ;;  %v8516_v63 = vsel %vm22290_vm11, %v8509_v53, %v8511_v31  ;;  %10303 = vmatpush1.bf16.msra.mxu1 %v9080_v22  ;;  %vm22293_vm10 = vcmask 121856   ;;  %v16394_v31 = vld [vmem:[%s21935_s1 + $0x8d0] ss:$24 sps:$4 sm:$0xff]  }
 0x481   : > { %v8530_v5 = vmul.bf16 %v16373_v28, %v8516_v63  ;;  %v8531_v54 = vmul.bf16 %v16375_v10, %v8512_v17  ;;  %vm22294_vm11 = vmmov %vm22293_vm10  ;;  %v16396_v17 = vld [vmem:[%s21935_s1 + $0x8d4] ss:$24 sps:$4 sm:$0xff]  }
 0x483   : > { %v9023_v19 = vpop.permute.xlu1 %9022  ;;  %10259 = vmatprep.subr.bf16.mxu0 %v8531_v54  ;;  %v9025_v0 = vpop.permute.xlu0 %9024 }
 0x484   : > { %v9026_v27 = vsel %vm22291_vm6, %v9023_v19, %v9025_v0  ;;  %v9030_v30 = vsel %vm22292_vm7, %v9025_v0, %v9023_v19  ;;  %10260 = vmatpush1.bf16.msra.mxu0 %v8530_v5  ;;  %vm22295_vm6 = vcmask 900096   ;;  %v16397_v0 = vld [vmem:[%s21935_s1 + $0x5d0] ss:$24 sps:$4 sm:$0xff]  }
 0x485   : > { %v9044_v12 = vmul.bf16 %v16376_v39, %v9026_v27  ;;  %v9045_v50 = vmul.bf16 %v16378_v52, %v9030_v30  ;;  %vm22296_vm7 = vmmov %vm22295_vm6  ;;  %v16399_v27 = vld [vmem:[%s21935_s1 + $0x5d4] ss:$24 sps:$4 sm:$0xff]  }
 0x487   : > { %v8473_v43 = vpop.permute.xlu1 %8472  ;;  %10304 = vmatprep.subr.bf16.mxu1 %v9045_v50  ;;  %v8475_v24 = vpop.permute.xlu0 %8474 }
 0x488   : > { %v8476_v26 = vsel %vm22293_vm10, %v8475_v24, %v8473_v43  ;;  %v8480_v29 = vsel %vm22294_vm11, %v8473_v43, %v8475_v24  ;;  %10305 = vmatpush1.bf16.msra.mxu1 %v9044_v12  ;;  %vm22297_vm10 = vcmask 908288   ;;  %v16400_v24 = vld [vmem:[%s21935_s1 + $0x8a0] ss:$24 sps:$4 sm:$0xff]  }
 0x489   : > { %v8494_v3 = vmul.bf16 %v16379_v37, %v8480_v29  ;;  %v8495_v62 = vmul.bf16 %v16381_v11, %v8476_v26  ;;  %vm22298_vm11 = vmmov %vm22297_vm10  ;;  %v16402_v26 = vld [vmem:[%s21935_s1 + $0x8a4] ss:$24 sps:$4 sm:$0xff]  }
 0x48b   : > { %v8987_v44 = vpop.permute.xlu1 %8986  ;;  %10261 = vmatprep.subr.bf16.mxu0 %v8495_v62  ;;  %v8989_v23 = vpop.permute.xlu0 %8988 }
 0x48c   : > { %v8990_v47 = vsel %vm22295_vm6, %v8987_v44, %v8989_v23  ;;  %v8994_v7 = vsel %vm22296_vm7, %v8989_v23, %v8987_v44  ;;  %10262 = vmatpush1.bf16.msra.mxu0 %v8494_v3  ;;  %vm22299_vm6 = vcmask 138240   ;;  %v16403_v23 = vld [vmem:[%s21935_s1 + $0x5a0] ss:$24 sps:$4 sm:$0xff]  }
 0x48d   : > { %v9008_v34 = vmul.bf16 %v16382_v32, %v8990_v47  ;;  %v9009_v35 = vmul.bf16 %v16384_v61, %v8994_v7  ;;  %vm22300_vm7 = vmmov %vm22299_vm6  ;;  %v16405_v47 = vld [vmem:[%s21935_s1 + $0x5a4] ss:$24 sps:$4 sm:$0xff]  }
 0x48f   : > { %v8437_v15 = vpop.permute.xlu1 %8436  ;;  %10306 = vmatprep.subr.bf16.mxu1 %v9009_v35  ;;  %v8439_v2 = vpop.permute.xlu0 %8438 }
 0x490   : > { %v8440_v40 = vsel %vm2178_vm15, %v8439_v2, %v8437_v15  ;;  %v8444_v9 = vsel %vm2178_vm15, %v8437_v15, %v8439_v2  ;;  %10307 = vmatpush1.bf16.msra.mxu1 %v9008_v34  ;;  %v16406_v2 = vld [vmem:[%s21935_s1 + $0x870] ss:$24 sps:$4 sm:$0xff]  }
 0x491   : > { %v8458_v14 = vmul.bf16 %v16385_v18, %v8444_v9  ;;  %v8459_v55 = vmul.bf16 %v16387_v56, %v8440_v40  ;;  %v16408_v40 = vld [vmem:[%s21935_s1 + $0x874] ss:$24 sps:$4 sm:$0xff]  }
 0x493   : > { %v8951_v6 = vpop.permute.xlu1 %8950  ;;  %10263 = vmatprep.subr.bf16.mxu0 %v8459_v55  ;;  %v8953_v13 = vpop.permute.xlu0 %8952 }
 0x494   : > { %v8954_v4 = vsel %vm22297_vm10, %v8951_v6, %v8953_v13  ;;  %v8958_v21 = vsel %vm22298_vm11, %v8953_v13, %v8951_v6  ;;  %10264 = vmatpush1.bf16.msra.mxu0 %v8458_v14  ;;  %vm22301_vm10 = vcmask 637952   ;;  %v16409_v13 = vld [vmem:[%s21935_s1 + $0x570] ss:$24 sps:$4 sm:$0xff]  }
 0x495   : > { %v8972_v48 = vmul.bf16 %v16388_v38, %v8954_v4  ;;  %v8973_v33 = vmul.bf16 %v16390_v42, %v8958_v21  ;;  %vm22302_vm11 = vmmov %vm22301_vm10  ;;  %v16411_v4 = vld [vmem:[%s21935_s1 + $0x574] ss:$24 sps:$4 sm:$0xff]  }
 0x497   : > { %v8401_v20 = vpop.permute.xlu1 %8400  ;;  %10308 = vmatprep.subr.bf16.mxu1 %v8973_v33  ;;  %v8403_v22 = vpop.permute.xlu0 %8402 }
 0x498   : > { %v8404_v41 = vsel %vm22299_vm6, %v8403_v22, %v8401_v20  ;;  %v8408_v28 = vsel %vm22300_vm7, %v8401_v20, %v8403_v22  ;;  %10309 = vmatpush1.bf16.msra.mxu1 %v8972_v48  ;;  %vm22303_vm6 = vcmask 916480   ;;  %v16412_v22 = vld [vmem:[%s21935_s1 + $0x840] ss:$24 sps:$4 sm:$0xff]  }
 0x499   : > { %v8422_v10 = vmul.bf16 %v16391_v57, %v8408_v28  ;;  %v8423_v53 = vmul.bf16 %v16393_v25, %v8404_v41  ;;  %vm22304_vm7 = vmmov %vm22303_vm6  ;;  %v16414_v41 = vld [vmem:[%s21935_s1 + $0x844] ss:$24 sps:$4 sm:$0xff]  }
 0x49b   : > { %v9491_v63 = vpop.permute.xlu1 %9490  ;;  %10265 = vmatprep.subr.bf16.mxu0 %v8423_v53  ;;  %v9493_v5 = vpop.permute.xlu0 %9492 }
 0x49c   : > { %v9494_v54 = vsel %vm22301_vm10, %v9491_v63, %v9493_v5  ;;  %v9498_v39 = vsel %vm22302_vm11, %v9493_v5, %v9491_v63  ;;  %10266 = vmatpush1.bf16.msra.mxu0 %v8422_v10  ;;  %vm22305_vm10 = vcmask 646144   ;;  %v16415_v5 = vld [vmem:[%s21935_s1 + $0x540] ss:$24 sps:$4 sm:$0xff]  }
 0x49d   : > { %v9512_v52 = vmul.bf16 %v16394_v31, %v9494_v54  ;;  %v9513_v19 = vmul.bf16 %v16396_v17, %v9498_v39  ;;  %vm22306_vm11 = vmmov %vm22305_vm10  ;;  %v16417_v54 = vld [vmem:[%s21935_s1 + $0x544] ss:$24 sps:$4 sm:$0xff]  }
 0x49f   : > { %v8915_v30 = vpop.permute.xlu1 %8914  ;;  %10310 = vmatprep.subr.bf16.mxu1 %v9513_v19  ;;  %v8917_v12 = vpop.permute.xlu0 %8916 }
 0x4a0   : > { %v8918_v50 = vsel %vm22303_vm6, %v8915_v30, %v8917_v12  ;;  %v8922_v37 = vsel %vm22304_vm7, %v8917_v12, %v8915_v30  ;;  %10311 = vmatpush2.bf16.msra.mxu1 %v9512_v52  ;;  %vm22307_vm6 = vcmask 924672   ;;  %v16418_v12 = vld [vmem:[%s21935_s1 + $0x810] ss:$24 sps:$4 sm:$0xff]  }
 0x4a1   : > { %v8936_v11 = vmul.bf16 %v16397_v0, %v8918_v50  ;;  %v8937_v43 = vmul.bf16 %v16399_v27, %v8922_v37  ;;  %vm22308_vm7 = vmmov %vm22307_vm6  ;;  %v16420_v50 = vld [vmem:[%s21935_s1 + $0x814] ss:$24 sps:$4 sm:$0xff]  }
 0x4a3   : > { %v9455_v29 = vpop.permute.xlu1 %9454  ;;  %10267 = vmatprep.subr.bf16.mxu0 %v8937_v43  ;;  %v9457_v3 = vpop.permute.xlu0 %9456 }
 0x4a4   : > { %v9458_v62 = vsel %vm22305_vm10, %v9455_v29, %v9457_v3  ;;  %v9462_v32 = vsel %vm22306_vm11, %v9457_v3, %v9455_v29  ;;  %10268 = vmatpush2.bf16.msra.mxu0 %v8936_v11  ;;  %vm22309_vm10 = vcmask 654336   ;;  %v16421_v3 = vld [vmem:[%s21935_s1 + $0x510] ss:$24 sps:$4 sm:$0xff]  }
 0x4a5   : > { %v9476_v61 = vmul.bf16 %v16400_v24, %v9458_v62  ;;  %v9477_v44 = vmul.bf16 %v16402_v26, %v9462_v32  ;;  %vm22310_vm11 = vmmov %vm22309_vm10  ;;  %v16423_v62 = vld [vmem:[%s21935_s1 + $0x514] ss:$24 sps:$4 sm:$0xff]  }
 0x4a7   : > { %v8879_v7 = vpop.permute.xlu1 %8878  ;;  %10312 = vmatprep.subr.bf16.mxu1 %v9477_v44  ;;  %v8881_v34 = vpop.permute.xlu0 %8880 }
 0x4a8   : > { %v8882_v35 = vsel %vm22307_vm6, %v8879_v7, %v8881_v34  ;;  %v8886_v18 = vsel %vm22308_vm7, %v8881_v34, %v8879_v7  ;;  %10313 = vmatpush2.bf16.msra.mxu1 %v9476_v61  ;;  %vm22311_vm6 = vcmask 932864   ;;  %v16424_v34 = vld [vmem:[%s21935_s1 + $0x7e0] ss:$24 sps:$4 sm:$0xff]  }
 0x4a9   : > { %v8900_v56 = vmul.bf16 %v16403_v23, %v8882_v35  ;;  %v8901_v15 = vmul.bf16 %v16405_v47, %v8886_v18  ;;  %vm22312_vm7 = vmmov %vm22311_vm6  ;;  %v16426_v35 = vld [vmem:[%s21935_s1 + $0x7e4] ss:$24 sps:$4 sm:$0xff]  }
 0x4ab   : > { %v9419_v9 = vpop.permute.xlu1 %9418  ;;  %10269 = vmatprep.subr.bf16.mxu0 %v8901_v15  ;;  %v9421_v14 = vpop.permute.xlu0 %9420 }
 0x4ac   : > { %v9422_v55 = vsel %vm22309_vm10, %v9419_v9, %v9421_v14  ;;  %v9426_v38 = vsel %vm22310_vm11, %v9421_v14, %v9419_v9  ;;  %10270 = vmatpush2.bf16.msra.mxu0 %v8900_v56  ;;  %vm22313_vm10 = vcmask 662528   ;;  %v16427_v14 = vld [vmem:[%s21935_s1 + $0x4e0] ss:$24 sps:$4 sm:$0xff]  }
 0x4ad   : > { %v9440_v42 = vmul.bf16 %v16406_v2, %v9422_v55  ;;  %v9441_v6 = vmul.bf16 %v16408_v40, %v9426_v38  ;;  %vm22314_vm11 = vmmov %vm22313_vm10  ;;  %v16429_v55 = vld [vmem:[%s21935_s1 + $0x4e4] ss:$24 sps:$4 sm:$0xff]  }
 0x4af   : > { %v8843_v21 = vpop.permute.xlu1 %8842  ;;  %10314 = vmatprep.subr.bf16.mxu1 %v9441_v6  ;;  %v8845_v48 = vpop.permute.xlu0 %8844 }
 0x4b0   : > { %v8846_v33 = vsel %vm22311_vm6, %v8843_v21, %v8845_v48  ;;  %v8850_v57 = vsel %vm22312_vm7, %v8845_v48, %v8843_v21  ;;  %10315 = vmatpush2.bf16.msra.mxu1 %v9440_v42  ;;  %vm22315_vm6 = vcmask 941056   ;;  %v16430_v48 = vld [vmem:[%s21935_s1 + $0x7b0] ss:$24 sps:$4 sm:$0xff]  }
 0x4b1   : > { %v8864_v25 = vmul.bf16 %v16409_v13, %v8846_v33  ;;  %v8865_v20 = vmul.bf16 %v16411_v4, %v8850_v57  ;;  %vm22316_vm7 = vmmov %vm22315_vm6  ;;  %v16432_v33 = vld [vmem:[%s21935_s1 + $0x7b4] ss:$24 sps:$4 sm:$0xff]  }
 0x4b3   : > { %v9383_v28 = vpop.permute.xlu1 %9382  ;;  %10271 = vmatprep.subr.bf16.mxu0 %v8865_v20  ;;  %v9385_v10 = vpop.permute.xlu0 %9384 }
 0x4b4   : > { %v9386_v53 = vsel %vm22313_vm10, %v9383_v28, %v9385_v10  ;;  %v9390_v31 = vsel %vm22314_vm11, %v9385_v10, %v9383_v28  ;;  %10272 = vmatpush2.bf16.msra.mxu0 %v8864_v25  ;;  %vm22317_vm10 = vcmask 1022976   ;;  %v16433_v10 = vld [vmem:[%s21935_s1 + $0x4b0] ss:$24 sps:$4 sm:$0xff]  }
 0x4b5   : > { %v9404_v17 = vmul.bf16 %v16412_v22, %v9386_v53  ;;  %v9405_v63 = vmul.bf16 %v16414_v41, %v9390_v31  ;;  %vm22318_vm11 = vmmov %vm22317_vm10  ;;  %v16435_v53 = vld [vmem:[%s21935_s1 + $0x4b4] ss:$24 sps:$4 sm:$0xff]  }
 0x4b7   : > { %v8807_v39 = vpop.permute.xlu1 %8806  ;;  %10316 = vmatprep.subr.bf16.mxu1 %v9405_v63  ;;  %v8809_v52 = vpop.permute.xlu0 %8808 }
 0x4b8   : > { %v8810_v19 = vsel %vm22315_vm6, %v8807_v39, %v8809_v52  ;;  %v8814_v0 = vsel %vm22316_vm7, %v8809_v52, %v8807_v39  ;;  %10317 = vmatpush2.bf16.msra.mxu1 %v9404_v17  ;;  %vm22319_vm6 = vcmask 678912   ;;  %v16436_v52 = vld [vmem:[%s21935_s1 + $0x780] ss:$24 sps:$4 sm:$0xff]  }
 0x4b9   : > { %v8828_v27 = vmul.bf16 %v16415_v5, %v8810_v19  ;;  %v8829_v30 = vmul.bf16 %v16417_v54, %v8814_v0  ;;  %vm22320_vm7 = vmmov %vm22319_vm6  ;;  %v16438_v19 = vld [vmem:[%s21935_s1 + $0x784] ss:$24 sps:$4 sm:$0xff]  }
 0x4bb   : > { %v9347_v37 = vpop.permute.xlu1 %9346  ;;  %10273 = vmatprep.subr.bf16.mxu0 %v8829_v30  ;;  %v9349_v11 = vpop.permute.xlu0 %9348 }
 0x4bc   : > { %v9350_v43 = vsel %vm4834_vm9, %v9347_v37, %v9349_v11  ;;  %v9354_v24 = vsel %vm4834_vm9, %v9349_v11, %v9347_v37  ;;  %10274 = vmatpush2.bf16.msra.mxu0 %v8828_v27  ;;  %v16439_v11 = vld [vmem:[%s21935_s1 + $0x900] ss:$24 sps:$4 sm:$0xff]  }
 0x4bd   : > { %v9368_v26 = vmul.bf16 %v16418_v12, %v9350_v43  ;;  %v9369_v29 = vmul.bf16 %v16420_v50, %v9354_v24  ;;  %v16447_v43 = vld [vmem:[%s21935_s1 + $0x904] ss:$24 sps:$4 sm:$0xff]   ;;  %s22341_s1 = smov 34  }
 0x4bf   : > { %v8771_v32 = vpop.permute.xlu1 %8770  ;;  %10318 = vmatprep.subr.bf16.mxu1 %v9369_v29  ;;  %v8773_v61 = vpop.permute.xlu0 %8772  ;;  %v16441_v29 = vld [vmem:[%s22239_s16 + $0x8] ss:$28 sps:$4 sm:$0xff]  }
 0x4c0   : > { %v8774_v44 = vsel %vm22317_vm10, %v8771_v32, %v8773_v61  ;;  %v8778_v23 = vsel %vm22318_vm11, %v8773_v61, %v8771_v32  ;;  %10319 = vmatpush2.bf16.msra.mxu1 %v9368_v26  ;;  %vm22321_vm10 = vcmask 1031168  }
 0x4c1   : > { %v8792_v47 = vmul.bf16 %v16421_v3, %v8774_v44  ;;  %v8793_v7 = vmul.bf16 %v16423_v62, %v8778_v23  ;;  %vm22322_vm11 = vmmov %vm22321_vm10  ;;  %v16448_v44 = vld [vmem:[%s22239_s16 + $0x18] ss:$28 sps:$4 sm:$0xff]  }
 0x4c3   : > { %v9311_v18 = vpop.permute.xlu1 %9310  ;;  %10275 = vmatprep.subr.bf16.mxu0 %v8793_v7  ;;  %v9313_v56 = vpop.permute.xlu0 %9312 }
 0x4c4   : > { %v9314_v15 = vsel %vm22319_vm6, %v9311_v18, %v9313_v56  ;;  %v9318_v2 = vsel %vm22320_vm7, %v9313_v56, %v9311_v18  ;;  %10276 = vmatpush2.bf16.msra.mxu0 %v8792_v47  ;;  %vm22323_vm6 = vcmask 760832  }
 0x4c5   : > { %v9332_v40 = vmul.bf16 %v16424_v34, %v9314_v15  ;;  %v9333_v9 = vmul.bf16 %v16426_v35, %v9318_v2  ;;  %vm22324_vm7 = vmmov %vm22323_vm6 }
 0x4c7   : > { %v8735_v38 = vpop.permute.xlu1 %8734  ;;  %10320 = vmatprep.subr.bf16.mxu1 %v9333_v9  ;;  %v8737_v42 = vpop.permute.xlu0 %8736 }
 0x4c8   : > { %v8738_v6 = vsel %vm22321_vm10, %v8735_v38, %v8737_v42  ;;  %v8742_v13 = vsel %vm22322_vm11, %v8737_v42, %v8735_v38  ;;  %10321 = vmatpush2.bf16.msra.mxu1 %v9332_v40  ;;  %vm22325_vm10 = vcmask 1039360  }
 0x4c9   : > { %v8756_v4 = vmul.bf16 %v16427_v14, %v8738_v6  ;;  %v8757_v21 = vmul.bf16 %v16429_v55, %v8742_v13  ;;  %vm22326_vm11 = vmmov %vm22325_vm10 }
 0x4cb   : > { %v9275_v57 = vpop.permute.xlu1 %9274  ;;  %10277 = vmatprep.subr.bf16.mxu0 %v8757_v21  ;;  %v9277_v25 = vpop.permute.xlu0 %9276 }
 0x4cc   : > { %v9278_v20 = vsel %vm22323_vm6, %v9275_v57, %v9277_v25  ;;  %v9282_v22 = vsel %vm22324_vm7, %v9277_v25, %v9275_v57  ;;  %10278 = vmatpush2.bf16.msra.mxu0 %v8756_v4  ;;  %vm22327_vm6 = vcmask 629760  }
 0x4cd   : > { %v9296_v41 = vmul.bf16 %v16430_v48, %v9278_v20  ;;  %v9297_v28 = vmul.bf16 %v16432_v33, %v9282_v22  ;;  %vm22328_vm7 = vmmov %vm22327_vm6 }
 0x4cf   : > { %v8699_v31 = vpop.permute.xlu1 %8698  ;;  %10322 = vmatprep.subr.bf16.mxu1 %v9297_v28  ;;  %v8701_v17 = vpop.permute.xlu0 %8700 }
 0x4d0   : > { %v8702_v63 = vsel %vm22325_vm10, %v8699_v31, %v8701_v17  ;;  %v8706_v5 = vsel %vm22326_vm11, %v8701_v17, %v8699_v31  ;;  %10323 = vmatpush2.bf16.msra.mxu1 %v9296_v41  ;;  %vm22369_vm10 = vcmask 154624  }
 0x4d1   : > { %v8720_v54 = vmul.bf16 %v16433_v10, %v8702_v63  ;;  %v8721_v39 = vmul.bf16 %v16435_v53, %v8706_v5  ;;  %vm22370_vm11 = vmmov %vm22369_vm10 }
 0x4d3   : > { %v9239_v0 = vpop.permute.xlu1 %9238  ;;  %10279 = vmatprep.subr.bf16.mxu0 %v8721_v39  ;;  %v9241_v27 = vpop.permute.xlu0 %9240 }
 0x4d4   : > { %v9242_v30 = vsel %vm4516_vm8, %v9239_v0, %v9241_v27  ;;  %v9246_v12 = vsel %vm4516_vm8, %v9241_v27, %v9239_v0  ;;  %10280 = vmatpush2.bf16.msra.mxu0 %v8720_v54 }
 0x4d5   : > { %v9260_v50 = vmul.bf16 %v16436_v52, %v9242_v30  ;;  %10281 = vmatprep.subr.bf16.mxu0 %v19216_v59  ;;  %v9261_v37 = vmul.bf16 %v16438_v19, %v9246_v12  ;;  %v16444_v59 = vld [vmem:[%s22239_s16 + $0x10] ss:$28 sps:$4 sm:$0xff]   ;;  %s22339_s16 = smov 33  }
 0x4d7   : > { %v9527_v24 = vpop.permute.xlu1 %9526  ;;  %10324 = vmatprep.subr.bf16.mxu1 %v9261_v37  ;;  %v9529_v26 = vpop.permute.xlu0 %9528 }
 0x4d8   : > { %v9530_v3 = vsel %vm22327_vm6, %v9527_v24, %v9529_v26  ;;  %v9534_v62 = vsel %vm22328_vm7, %v9529_v26, %v9527_v24  ;;  %10282 = vmatpush2.bf16.msra.mxu0 %v19206_v8  ;;  %10325 = vmatpush2.bf16.msra.mxu1 %v9260_v50  ;;  %vm22371_vm6 = vcmask 236544  }
 0x4d9   : > { %v9548_v32 = vmul.bf16 %v16439_v11, %v9530_v3  ;;  %v9549_v61 = vmul.bf16 %v16447_v43, %v9534_v62  ;;  %vm22372_vm7 = vmmov %vm22371_vm6 }
 0x4db   : > { %10284 = vmatmul.mubr.bf16.vlgmr.msra.gmra.mxu0 %v16441_v29  ;;  %10327 = vmatmul.mubr.bf16.vlgmr.msra.gmra.mxu1 %v16444_v59 }
 0x4dc   : > { %10351 = vmatprep.subr.bf16.mxu1 %v9549_v61  ;;  %10369 = vmatprep.mubr.bf16.mxu1 %v22134_v16 }
 0x4dd   : > { %10352 = vmatpush1.bf16.msra.mxu1 %v9548_v32 }
 0x4e3   : > { %15344 = vmatmul.mubr.msk.bf16.vlgmr.msra.gmra.mxu1 %vm2178_vm15, %v16448_v44 }
 0x4e4   : > { %v9673_v8 = vpop.permute.xlu1 %9672  ;;  %v9678_v9 = vpop.permute.xlu0 %9677 }
 0x527   : > { %v10242_v23 = vpop.f32.mrf.mxu1 }
 0x528   : > { %v10243_v56 = vadd.f32 %v10242_v23, %v9673_v8 }
 0x529   : > { %v10244_v47 = vpop.f32.mrf.mxu1 }
 0x52a   : > { %v10245_v15 = vadd.f32 %v10244_v47, %v9673_v8 }
 0x52b   : > { %v10246_v7 = vpop.f32.mrf.mxu1 }
 0x52c   : > { %v10247_v6 = vadd.f32 %v10246_v7, %v9678_v9 }
 0x52d   : > { %v10248_v34 = vpop.f32.mrf.mxu1 }
 0x52e   : > { %v10249_v48 = vadd.f32 %v10248_v34, %v9678_v9 }
 0x59b   : > { %v10285_v35 = vpop.f32.mrf.mxu0  ;;  %v10328_v18 = vpop.f32.mrf.mxu1 }
 0x59c   : > { %v10286_v14 = vadd.f32 %v10285_v35, %v10243_v56 }
 0x59d   : > { %v10287_v2 = vpop.f32.mrf.mxu0  ;;  %v10330_v40 = vpop.f32.mrf.mxu1 }
 0x59e   : > { %v10288_v55 = vadd.f32 %v10287_v2, %v10245_v15  ;;  %v10329_v33 = vadd.f32 %v10328_v18, %v10286_v14 }
 0x59f   : > { %v10289_v38 = vpop.f32.mrf.mxu0  ;;  %v10332_v42 = vpop.f32.mrf.mxu1 }
 0x5a0   : > { %v10331_v13 = vadd.f32 %v10330_v40, %v10288_v55  ;;  %v10290_v57 = vadd.f32 %v10289_v38, %v10247_v6 }
 0x5a1   : > { %v10291_v4 = vpop.f32.mrf.mxu0  ;;  %v10334_v21 = vpop.f32.mrf.mxu1 }
 0x5a2   : > { %v10292_v20 = vadd.f32 %v10291_v4, %v10249_v48  ;;  %v10333_v28 = vadd.f32 %v10332_v42, %v10290_v57 }
 0x5a3   : > { %v10371_v25 = vpop.f32.mrf.mxu1 }
 0x5a4   : > { %v10372_v22 = vadd.f32 %v10371_v25, %v10329_v33  ;;  %v10335_v31 = vadd.f32 %v10334_v21, %v10292_v20 }
 0x5a5   : > { %v10373_v41 = vpop.f32.mrf.mxu1 }
 0x5a6   : > { %v10374_v10 = vadd.f32 %v10373_v41, %v10331_v13  ;;  %v10380_v17 = vadd.f32 %v10372_v22, %v19181_v1 }
 0x5a7   : > { %v10375_v53 = vpop.f32.mrf.mxu1 }
 0x5a8   : > { %v10376_v63 = vadd.f32 %v10375_v53, %v10333_v28  ;;  %v10381_v54 = vadd.f32 %v10374_v10, %v19200_v58  ;;  %v10384_v19 = vmax.f32 %v10380_v17, 0.0 }
 0x5a9   : > { %v10377_v5 = vpop.f32.mrf.mxu1 }
 0x5aa   : > { %v10382_v39 = vadd.f32 %v10376_v63, %v19186_v36  ;;  %v10378_v52 = vadd.f32 %v10377_v5, %v10335_v31  ;;  %v10385_v30 = vmax.f32 %v10381_v54, 0.0 }
 0x5ac   : > { %v10386_v0 = vmax.f32 %v10382_v39, 0.0  ;;  %v10383_v27 = vadd.f32 %v10378_v52, %v19198_v45 }
 0x5ae   : > { %v19829_v12 = vpack.c.bf16 %v10386_v0, %v10384_v19  ;;  %v10387_v50 = vmax.f32 %v10383_v27, 0.0 }
 0x5b0   : > { %v19831_v37 = vpack.c.bf16 %v10387_v50, %v10385_v30  ;;  %11770 = vrot.lane.b32.xlu1 %v19829_v12, %s22003_s20  ;;  %10646 = vrot.lane.b32.xlu0 %v19829_v12, %s22225_s14 }
 0x5b4   : > { %11734 = vrot.lane.b32.xlu1 %v19829_v12, %s22006_s10  ;;  %10610 = vrot.lane.b32.xlu0 %v19829_v12, %s22226_s19 }
 0x5b8   : > { %11698 = vrot.lane.b32.xlu1 %v19829_v12, %s22008_s15  ;;  %10574 = vrot.lane.b32.xlu0 %v19829_v12, %s22227_s21 }
 0x5bc   : > { %11662 = vrot.lane.b32.xlu1 %v19829_v12, %s22009_s3  ;;  %10538 = vrot.lane.b32.xlu0 %v19829_v12, %s22228_s29 }
 0x5c0   : > { %11626 = vrot.lane.b32.xlu1 %v19829_v12, %s22010_s5  ;;  %10502 = vrot.lane.b32.xlu0 %v19829_v12, %s22229_s11 }
 0x5c4   : > { %11590 = vrot.lane.b32.xlu1 %v19829_v12, %s22013_s7  ;;  %10466 = vrot.lane.b32.xlu0 %v19829_v12, %s22230_s4 }
 0x5c8   : > { %11554 = vrot.lane.b32.xlu1 %v19829_v12, %s22014_s8  ;;  %10430 = vrot.lane.b32.xlu0 %v19829_v12, %s22329_s26 }
 0x5cc   : > { %11482 = vrot.lane.b32.xlu1 %v19829_v12, %s22247_s30  ;;  %10394 = vrot.lane.b32.xlu0 %v19829_v12, %s22330_s6 }
 0x5d0   : > { %11518 = vrot.lane.b32.xlu1 %v19829_v12, %s22244_s13  ;;  %10934 = vrot.lane.b32.xlu0 %v19829_v12, %s22331_s22 }
 0x5d4   : > { %11446 = vrot.lane.b32.xlu1 %v19829_v12, %s22249_s27  ;;  %10898 = vrot.lane.b32.xlu0 %v19829_v12, %s22332_s0 }
 0x5d8   : > { %12058 = vrot.lane.b32.xlu1 %v19829_v12, %s22246_s12  ;;  %10862 = vrot.lane.b32.xlu0 %v19829_v12, %s22333_s9 }
 0x5dc   : > { %11410 = vrot.lane.b32.xlu1 %v19829_v12, %s22252_s2  ;;  %10826 = vrot.lane.b32.xlu0 %v19829_v12, %s22334_s17 }
 0x5e0   : > { %12022 = vrot.lane.b32.xlu1 %v19829_v12, %s22335_s23  ;;  %10790 = vrot.lane.b32.xlu0 %v19829_v12, %s22336_s25 }
 0x5e4   : > { %11374 = vrot.lane.b32.xlu1 %v19829_v12, %s22337_s24  ;;  %10754 = vrot.lane.b32.xlu0 %v19829_v12, %s22338_s28  ;;  %s22342_s24 = smov 2  }
 0x5e8   : > { %10644 = vrot.lane.b32.xlu1 %v19831_v37, %s22225_s14  ;;  %10718 = vrot.lane.b32.xlu0 %v19829_v12, %s22339_s16  ;;  %s22343_s14 = smov 3  }
 0x5ec   : > { %10608 = vrot.lane.b32.xlu1 %v19831_v37, %s22226_s19  ;;  %11222 = vrot.lane.b32.xlu0 %v19829_v12, %s22340_s18  ;;  %s22344_s19 = smov 13  }
 0x5f0   : > { %10572 = vrot.lane.b32.xlu1 %v19831_v37, %s22227_s21  ;;  %10682 = vrot.lane.b32.xlu0 %v19829_v12, %s22341_s1  ;;  %s22345_s21 = smov 14  }
 0x5f4   : > { %10536 = vrot.lane.b32.xlu1 %v19831_v37, %s22228_s29  ;;  %11186 = vrot.lane.b32.xlu0 %v19829_v12, %s22342_s24  ;;  %s22346_s29 = smov 15  }
 0x5f8   : > { %10500 = vrot.lane.b32.xlu1 %v19831_v37, %s22229_s11  ;;  %11150 = vrot.lane.b32.xlu0 %v19829_v12, %s22343_s14  ;;  %s22347_s11 = smov 16  }
 0x5fc   : > { %10464 = vrot.lane.b32.xlu1 %v19831_v37, %s22230_s4  ;;  %11114 = vrot.lane.b32.xlu0 %v19829_v12, %s22344_s19  ;;  %s22348_s4 = smov 17  }
 0x600   : > { %10428 = vrot.lane.b32.xlu1 %v19831_v37, %s22329_s26  ;;  %11078 = vrot.lane.b32.xlu0 %v19829_v12, %s22345_s21  ;;  %s22349_s26 = sld [smem:[#allocation84_spill]] }
 0x604   : > { %10391 = vrot.lane.b32.xlu1 %v19831_v37, %s22330_s6  ;;  %11042 = vrot.lane.b32.xlu0 %v19829_v12, %s22346_s29  ;;  %s22357_s6 = smov 127  }
 0x606   : > { %v16529_v1 = vld [vmem:[%s22349_s26 + $0x4] ss:$28 sps:$4 sm:$0xff]   ;;  %v16595_v20 = vld [vmem:[%s22349_s26 + $0xc] ss:$28 sps:$4 sm:$0xff]  }
 0x607   : > { %12808 = vmatprep.mubr.bf16.mxu0 %v16529_v1  ;;  %12851 = vmatprep.mubr.bf16.mxu1 %v16595_v20 }
 0x608   : > { %10932 = vrot.lane.b32.xlu1 %v19831_v37, %s22331_s22  ;;  %11006 = vrot.lane.b32.xlu0 %v19829_v12, %s22347_s11 }
 0x60c   : > { %10896 = vrot.lane.b32.xlu1 %v19831_v37, %s22332_s0  ;;  %10970 = vrot.lane.b32.xlu0 %v19829_v12, %s22348_s4 }
 0x610   : > { %10860 = vrot.lane.b32.xlu1 %v19831_v37, %s22333_s9  ;;  %11772 = vrot.lane.b32.xlu0 %v19831_v37, %s22003_s20  ;;  %s22360_s20 = smov 94  }
 0x614   : > { %10824 = vrot.lane.b32.xlu1 %v19831_v37, %s22334_s17  ;;  %11736 = vrot.lane.b32.xlu0 %v19831_v37, %s22006_s10 }
 0x618   : > { %10788 = vrot.lane.b32.xlu1 %v19831_v37, %s22336_s25  ;;  %11700 = vrot.lane.b32.xlu0 %v19831_v37, %s22008_s15 }
 0x61c   : > { %10752 = vrot.lane.b32.xlu1 %v19831_v37, %s22338_s28  ;;  %11664 = vrot.lane.b32.xlu0 %v19831_v37, %s22009_s3  ;;  %s22352_s3 = smov 125  }
 0x620   : > { %10716 = vrot.lane.b32.xlu1 %v19831_v37, %s22339_s16  ;;  %11628 = vrot.lane.b32.xlu0 %v19831_v37, %s22010_s5  ;;  %s22353_s5 = smov 81  }
 0x622   : > { %v19952_v36 = vpop.permute.xlu1 %11770  ;;  %v10647_v45 = vpop.permute.xlu0 %10646 }
 0x624   : > { %11220 = vrot.lane.b32.xlu1 %v19831_v37, %s22340_s18  ;;  %11592 = vrot.lane.b32.xlu0 %v19831_v37, %s22013_s7 }
 0x626   : > { %v19958_v58 = vpop.permute.xlu1 %11734  ;;  %v19960_v11 = vpop.permute.xlu0 %10610 }
 0x628   : > { %10680 = vrot.lane.b32.xlu1 %v19831_v37, %s22341_s1  ;;  %11556 = vrot.lane.b32.xlu0 %v19831_v37, %s22014_s8  ;;  %s22350_s1 = smov 115   ;;  %s22354_s8 = smov 126  }
 0x62a   : > { %v19966_v43 = vpop.permute.xlu1 %11698  ;;  %v19968_v24 = vpop.permute.xlu0 %10574 }
 0x62c   : > { %11184 = vrot.lane.b32.xlu1 %v19831_v37, %s22342_s24  ;;  %11484 = vrot.lane.b32.xlu0 %v19831_v37, %s22247_s30  ;;  %s22356_s30 = sld [smem:[#allocation81_spill]] }
 0x62e   : > { %v19974_v26 = vpop.permute.xlu1 %11662  ;;  %v19976_v29 = vpop.permute.xlu0 %10538 }
 0x630   : > { %11148 = vrot.lane.b32.xlu1 %v19831_v37, %s22343_s14  ;;  %11520 = vrot.lane.b32.xlu0 %v19831_v37, %s22244_s13  ;;  %s22355_s13 = smov 82  }
 0x632   : > { %v19982_v59 = vpop.permute.xlu1 %11626  ;;  %v19984_v3 = vpop.permute.xlu0 %10502  ;;  %v16449_v38 = vld [vmem:[%s22356_s30 + $0x150] ss:$24 sps:$4 sm:$0xff]   ;;  %v16451_v42 = vld [vmem:[%s22356_s30 + $0x154] ss:$24 sps:$4 sm:$0xff]   ;;  %v16452_v48 = vld [vmem:[%s22356_s30 + $0x120] ss:$24 sps:$4 sm:$0xff]  }
 0x633   : > { %v16454_v25 = vld [vmem:[%s22356_s30 + $0x124] ss:$24 sps:$4 sm:$0xff]   ;;  %v16455_v17 = vld [vmem:[%s22356_s30 + $0xf0] ss:$24 sps:$4 sm:$0xff]   ;;  %v16457_v63 = vld [vmem:[%s22356_s30 + $0xf4] ss:$24 sps:$4 sm:$0xff]  }
 0x634   : > { %11112 = vrot.lane.b32.xlu1 %v19831_v37, %s22344_s19  ;;  %11448 = vrot.lane.b32.xlu0 %v19831_v37, %s22249_s27  ;;  %s22359_s19 = smov 93   ;;  %v16458_v27 = vld [vmem:[%s22356_s30 + $0xc0] ss:$24 sps:$4 sm:$0xff]   ;;  %v16460_v30 = vld [vmem:[%s22356_s30 + $0xc4] ss:$24 sps:$4 sm:$0xff]  }
 0x635   : > { %v16466_v20 = vld [vmem:[%s22356_s30 + $0x64] ss:$24 sps:$4 sm:$0xff]  }
 0x636   : > { %v19990_v62 = vpop.permute.xlu1 %11590  ;;  %v19992_v32 = vpop.permute.xlu0 %10466 }
 0x638   : > { %11076 = vrot.lane.b32.xlu1 %v19831_v37, %s22345_s21  ;;  %12060 = vrot.lane.b32.xlu0 %v19831_v37, %s22246_s12  ;;  %s22362_s12 = sld [smem:[#allocation87_spill]] }
 0x63a   : > { %v19998_v61 = vpop.permute.xlu1 %11554  ;;  %v20000_v44 = vpop.permute.xlu0 %10430 }
 0x63c   : > { %11040 = vrot.lane.b32.xlu1 %v19831_v37, %s22346_s29  ;;  %11412 = vrot.lane.b32.xlu0 %v19831_v37, %s22252_s2  ;;  %s22351_s2 = smov 80   ;;  %s22435_s29 = sld [smem:[#allocation88_spill]] }
 0x63e   : > { %v20006_v23 = vpop.permute.xlu1 %11482  ;;  %v20008_v47 = vpop.permute.xlu0 %10394 }
 0x640   : > { %11004 = vrot.lane.b32.xlu1 %v19831_v37, %s22347_s11  ;;  %12024 = vrot.lane.b32.xlu0 %v19831_v37, %s22335_s23  ;;  %s22358_s23 = smov 83  }
 0x642   : > { %v20014_v7 = vpop.permute.xlu1 %11518  ;;  %v20016_v34 = vpop.permute.xlu0 %10934 }
 0x644   : > { %10968 = vrot.lane.b32.xlu1 %v19831_v37, %s22348_s4  ;;  %11376 = vrot.lane.b32.xlu0 %v19831_v37, %s22350_s1 }
 0x646   : > { %v20022_v8 = vpop.permute.xlu1 %11446  ;;  %v20024_v35 = vpop.permute.xlu0 %10898 }
 0x648   : > { %11986 = vrot.lane.b32.xlu1 %v19829_v12, %s22351_s2  ;;  %11988 = vrot.lane.b32.xlu0 %v19831_v37, %s22351_s2 }
 0x64a   : > { %v20030_v18 = vpop.permute.xlu1 %12058  ;;  %v20032_v56 = vpop.permute.xlu0 %10862 }
 0x64c   : > { %11338 = vrot.lane.b32.xlu1 %v19829_v12, %s22352_s3  ;;  %11340 = vrot.lane.b32.xlu0 %v19831_v37, %s22352_s3  ;;  %s22587_s3 = sld [smem:[#allocation89_spill]] }
 0x64e   : > { %v20038_v15 = vpop.permute.xlu1 %11410  ;;  %v20040_v2 = vpop.permute.xlu0 %10826 }
 0x650   : > { %11950 = vrot.lane.b32.xlu1 %v19829_v12, %s22353_s5  ;;  %11952 = vrot.lane.b32.xlu0 %v19831_v37, %s22353_s5  ;;  %s22361_s5 = smov 77  }
 0x652   : > { %v20046_v40 = vpop.permute.xlu1 %12022  ;;  %v20048_v9 = vpop.permute.xlu0 %10790 }
 0x654   : > { %11302 = vrot.lane.b32.xlu1 %v19829_v12, %s22354_s8  ;;  %11304 = vrot.lane.b32.xlu0 %v19831_v37, %s22354_s8 }
 0x656   : > { %v20054_v14 = vpop.permute.xlu1 %11374  ;;  %v20056_v55 = vpop.permute.xlu0 %10754 }
 0x658   : > { %11914 = vrot.lane.b32.xlu1 %v19829_v12, %s22355_s13  ;;  %11916 = vrot.lane.b32.xlu0 %v19831_v37, %s22355_s13 }
 0x65a   : > { %v10645_v6 = vpop.permute.xlu1 %10644  ;;  %v20068_v13 = vpop.permute.xlu0 %10718 }
 0x65b   : > { %v10648_v4 = vsel %vm1118_vm0, %v10647_v45, %v10645_v6  ;;  %v10652_v21 = vsel %vm1118_vm0, %v10645_v6, %v10647_v45  ;;  %v16463_v6 = vld [vmem:[%s22356_s30 + $0x94] ss:$24 sps:$4 sm:$0xff]   ;;  %vm22363_vm0 = vcmask 408576  }
 0x65c   : > { %v10666_v33 = vmul.bf16 %v16449_v38, %v10652_v21  ;;  %v10667_v57 = vmul.bf16 %v16451_v42, %v10648_v4  ;;  %11266 = vrot.lane.b32.xlu1 %v19829_v12, %s22357_s6  ;;  %11268 = vrot.lane.b32.xlu0 %v19831_v37, %s22357_s6  ;;  %v16461_v42 = vld [vmem:[%s22356_s30 + $0x90] ss:$24 sps:$4 sm:$0xff]  }
 0x65e   : > { %v10609_v22 = vpop.permute.xlu1 %10608  ;;  %12776 = vmatprep.subr.bf16.mxu0 %v10667_v57  ;;  %v20085_v41 = vpop.permute.xlu0 %11222 }
 0x65f   : > { %v10612_v28 = vsel %vm1012_vm1, %v19960_v11, %v10609_v22  ;;  %v10616_v10 = vsel %vm1012_vm1, %v10609_v22, %v19960_v11  ;;  %12777 = vmatpush1.bf16.msra.mxu0 %v10666_v33  ;;  %v12237_v22 = vld [vmem:[%s22362_s12 + $0x8] sm:$0xff]  ;;  %vm22364_vm1 = vmmov %vm22363_vm0 }
 0x660   : > { %v10630_v53 = vmul.bf16 %v16452_v48, %v10616_v10  ;;  %v10631_v31 = vmul.bf16 %v16454_v25, %v10612_v28  ;;  %11878 = vrot.lane.b32.xlu1 %v19829_v12, %s22358_s23  ;;  %11880 = vrot.lane.b32.xlu0 %v19831_v37, %s22358_s23  ;;  %v16464_v25 = vld [vmem:[%s22356_s30 + $0x60] ss:$24 sps:$4 sm:$0xff]  }
 0x662   : > { %v10573_v5 = vpop.permute.xlu1 %10572  ;;  %12778 = vmatprep.subr.bf16.mxu0 %v10631_v31  ;;  %v20101_v54 = vpop.permute.xlu0 %10682 }
 0x663   : > { %v10576_v39 = vsel %vm906_vm2, %v19968_v24, %v10573_v5  ;;  %v10580_v52 = vsel %vm906_vm2, %v10573_v5, %v19968_v24  ;;  %12779 = vmatpush1.bf16.msra.mxu0 %v10630_v53  ;;  %v16467_v5 = vld [vmem:[%s22356_s30 + $0x30] ss:$24 sps:$4 sm:$0xff]   ;;  %vm22365_vm2 = vcmask 416768  }
 0x664   : > { %v10594_v19 = vmul.bf16 %v16455_v17, %v10580_v52  ;;  %v10595_v0 = vmul.bf16 %v16457_v63, %v10576_v39  ;;  %11842 = vrot.lane.b32.xlu1 %v19829_v12, %s22359_s19  ;;  %11844 = vrot.lane.b32.xlu0 %v19831_v37, %s22359_s19  ;;  %v16469_v39 = vld [vmem:[%s22356_s30 + $0x34] ss:$24 sps:$4 sm:$0xff]  }
 0x666   : > { %v10537_v50 = vpop.permute.xlu1 %10536  ;;  %12780 = vmatprep.subr.bf16.mxu0 %v10595_v0  ;;  %v20117_v1 = vpop.permute.xlu0 %11186 }
 0x667   : > { %v10540_v45 = vsel %vm800_vm3, %v19976_v29, %v10537_v50  ;;  %v10544_v11 = vsel %vm800_vm3, %v10537_v50, %v19976_v29  ;;  %12781 = vmatpush1.bf16.msra.mxu0 %v10594_v19  ;;  %v16470_v50 = vld [vmem:[%s22356_s30] ss:$24 sps:$4 sm:$0xff]   ;;  %vm22366_vm3 = vmmov %vm22365_vm2 }
 0x668   : > { %v10558_v24 = vmul.bf16 %v16458_v27, %v10544_v11  ;;  %v10559_v38 = vmul.bf16 %v16460_v30, %v10540_v45  ;;  %11806 = vrot.lane.b32.xlu1 %v19829_v12, %s22360_s20  ;;  %11808 = vrot.lane.b32.xlu0 %v19831_v37, %s22360_s20  ;;  %v16472_v45 = vld [vmem:[%s22356_s30 + $0x4] ss:$24 sps:$4 sm:$0xff]   ;;  %s22586_s20 = sld [smem:[#allocation4_spill]] }
 0x66a   : > { %v10501_v4 = vpop.permute.xlu1 %10500  ;;  %12782 = vmatprep.subr.bf16.mxu0 %v10559_v38  ;;  %v20133_v29 = vpop.permute.xlu0 %11150 }
 0x66b   : > { %v10504_v21 = vsel %vm694_vm4, %v19984_v3, %v10501_v4  ;;  %v10508_v48 = vsel %vm694_vm4, %v10501_v4, %v19984_v3  ;;  %12783 = vmatpush1.bf16.msra.mxu0 %v10558_v24  ;;  %v12236_v3 = vld [vmem:[%s22362_s12] sm:$0xff]  ;;  %v16473_v4 = vld [vmem:[%s22356_s30 + $0x2d0] ss:$24 sps:$4 sm:$0xff]   ;;  %vm22367_vm4 = vcmask 146432  }
 0x66c   : > { %v10522_v33 = vmul.bf16 %v16461_v42, %v10508_v48  ;;  %v10523_v57 = vmul.bf16 %v16463_v6, %v10504_v21  ;;  %12094 = vrot.lane.b32.xlu1 %v19829_v12, %s22361_s5  ;;  %12096 = vrot.lane.b32.xlu0 %v19831_v37, %s22361_s5  ;;  %v16475_v21 = vld [vmem:[%s22356_s30 + $0x2d4] ss:$24 sps:$4 sm:$0xff]  }
 0x66e   : > { %v10465_v28 = vpop.permute.xlu1 %10464  ;;  %12784 = vmatprep.subr.bf16.mxu0 %v10523_v57  ;;  %v20155_v10 = vpop.permute.xlu0 %11114  ;;  %s15775_s10 = sshll.u32 %s22586_s20, 7 }
 0x66f   : > { %v10468_v53 = vsel %vm588_vm5, %v19992_v32, %v10465_v28  ;;  %v10472_v31 = vsel %vm588_vm5, %v10465_v28, %v19992_v32  ;;  %12785 = vmatpush1.bf16.msra.mxu0 %v10522_v33  ;;  %vm22368_vm5 = vmmov %vm22367_vm4  ;;  %s21570_s5 = scalar_lea.vmem %s22587_s3, %s15775_s10 }
 0x670   : > { %v10486_v17 = vmul.bf16 %v16464_v25, %v10472_v31  ;;  %v10487_v63 = vmul.bf16 %v16466_v20, %v10468_v53  ;;  %12240 = vperm.xlu1 %15843, %v12236_v3   ;;  %12245 = vperm.xlu0 %15842, %v12237_v22   ;;  %v16476_v3 = vld [vmem:[%s22356_s30 + $0x2a0] ss:$24 sps:$4 sm:$0xff]   ;;  %v16478_v22 = vld [vmem:[%s22356_s30 + $0x2a4] ss:$24 sps:$4 sm:$0xff]  }
 0x672   : > { %v10429_v52 = vpop.permute.xlu1 %10428  ;;  %12786 = vmatprep.subr.bf16.mxu0 %v10487_v63  ;;  %v20167_v19 = vpop.permute.xlu0 %11078 }
 0x673   : > { %v10432_v32 = vsel %vm22363_vm0, %v20000_v44, %v10429_v52  ;;  %v10436_v0 = vsel %vm22364_vm1, %v10429_v52, %v20000_v44  ;;  %12787 = vmatpush1.bf16.msra.mxu0 %v10486_v17  ;;  %vm22373_vm0 = vcmask 244736  }
 0x674   : > { %v10450_v27 = vmul.bf16 %v16467_v5, %v10436_v0  ;;  %v10451_v30 = vmul.bf16 %v16469_v39, %v10432_v32  ;;  %v16479_v5 = vld [vmem:[%s22356_s30 + $0x270] ss:$24 sps:$4 sm:$0xff]   ;;  %v16481_v39 = vld [vmem:[%s22356_s30 + $0x274] ss:$24 sps:$4 sm:$0xff]   ;;  %vm22374_vm1 = vmmov %vm22373_vm0 }
 0x676   : > { %v10392_v11 = vpop.permute.xlu1 %10391  ;;  %12788 = vmatprep.subr.bf16.mxu0 %v10451_v30  ;;  %v20179_v24 = vpop.permute.xlu0 %11042 }
 0x677   : > { %v10396_v38 = vsel %vm22365_vm2, %v20008_v47, %v10392_v11  ;;  %v10400_v44 = vsel %vm22366_vm3, %v10392_v11, %v20008_v47  ;;  %12789 = vmatpush1.bf16.msra.mxu0 %v10450_v27  ;;  %vm22375_vm2 = vcmask 252928  }
 0x678   : > { %v10414_v42 = vmul.bf16 %v16470_v50, %v10400_v44  ;;  %v10415_v6 = vmul.bf16 %v16472_v45, %v10396_v38  ;;  %v16485_v50 = vld [vmem:[%s22356_s30 + $0x240] ss:$24 sps:$4 sm:$0xff]   ;;  %v16487_v45 = vld [vmem:[%s22356_s30 + $0x244] ss:$24 sps:$4 sm:$0xff]   ;;  %vm22376_vm3 = vmmov %vm22375_vm2 }
 0x67a   : > { %v10933_v48 = vpop.permute.xlu1 %10932  ;;  %12790 = vmatprep.subr.bf16.mxu0 %v10415_v6  ;;  %v20191_v33 = vpop.permute.xlu0 %11006 }
 0x67b   : > { %v10936_v57 = vsel %vm22367_vm4, %v20016_v34, %v10933_v48  ;;  %v10940_v47 = vsel %vm22368_vm5, %v10933_v48, %v20016_v34  ;;  %12791 = vmatpush1.bf16.msra.mxu0 %v10414_v42  ;;  %vm22377_vm4 = vcmask 261120  }
 0x67c   : > { %v10954_v25 = vmul.bf16 %v16473_v4, %v10940_v47  ;;  %v10955_v20 = vmul.bf16 %v16475_v21, %v10936_v57  ;;  %v16491_v4 = vld [vmem:[%s22356_s30 + $0x210] ss:$24 sps:$4 sm:$0xff]   ;;  %v16493_v21 = vld [vmem:[%s22356_s30 + $0x214] ss:$24 sps:$4 sm:$0xff]   ;;  %vm22378_vm5 = vmmov %vm22377_vm4 }
 0x67e   : > { %v10897_v28 = vpop.permute.xlu1 %10896  ;;  %12792 = vmatprep.subr.bf16.mxu0 %v10955_v20  ;;  %v20203_v53 = vpop.permute.xlu0 %10970 }
 0x67f   : > { %v10900_v31 = vsel %vm22369_vm10, %v20024_v35, %v10897_v28  ;;  %v10904_v34 = vsel %vm22370_vm11, %v10897_v28, %v20024_v35  ;;  %12793 = vmatpush2.bf16.msra.mxu0 %v10954_v25  ;;  %vm22379_vm10 = vcmask 269312  }
 0x680   : > { %v10918_v17 = vmul.bf16 %v16476_v3, %v10904_v34  ;;  %v10919_v63 = vmul.bf16 %v16478_v22, %v10900_v31  ;;  %v16497_v3 = vld [vmem:[%s22356_s30 + $0x1e0] ss:$24 sps:$4 sm:$0xff]   ;;  %v16499_v22 = vld [vmem:[%s22356_s30 + $0x1e4] ss:$24 sps:$4 sm:$0xff]   ;;  %vm22380_vm11 = vmmov %vm22379_vm10 }
 0x682   : > { %v10861_v52 = vpop.permute.xlu1 %10860  ;;  %12794 = vmatprep.subr.bf16.mxu0 %v10919_v63  ;;  %v20215_v32 = vpop.permute.xlu0 %11772 }
 0x683   : > { %v10864_v0 = vsel %vm22371_vm6, %v20032_v56, %v10861_v52  ;;  %v10868_v35 = vsel %vm22372_vm7, %v10861_v52, %v20032_v56  ;;  %12795 = vmatpush2.bf16.msra.mxu0 %v10918_v17  ;;  %vm22382_vm6 = vcmask 277504  }
 0x684   : > { %v10882_v27 = vmul.bf16 %v16479_v5, %v10868_v35  ;;  %v10883_v30 = vmul.bf16 %v16481_v39, %v10864_v0  ;;  %v16503_v5 = vld [vmem:[%s22356_s30 + $0x1b0] ss:$24 sps:$4 sm:$0xff]   ;;  %v16505_v39 = vld [vmem:[%s22356_s30 + $0x1b4] ss:$24 sps:$4 sm:$0xff]   ;;  %vm22383_vm7 = vmmov %vm22382_vm6 }
 0x686   : > { %v10825_v11 = vpop.permute.xlu1 %10824  ;;  %12796 = vmatprep.subr.bf16.mxu0 %v10883_v30  ;;  %v20227_v38 = vpop.permute.xlu0 %11736 }
 0x687   : > { %v10828_v44 = vsel %vm22373_vm0, %v20040_v2, %v10825_v11  ;;  %v10832_v56 = vsel %vm22374_vm1, %v10825_v11, %v20040_v2  ;;  %12797 = vmatpush2.bf16.msra.mxu0 %v10882_v27  ;;  %vm22385_vm1 = vcmask 785408  }
 0x688   : > { %v10846_v42 = vmul.bf16 %v16485_v50, %v10832_v56  ;;  %v10847_v6 = vmul.bf16 %v16487_v45, %v10828_v44  ;;  %v16509_v50 = vld [vmem:[%s22356_s30 + $0x450] ss:$24 sps:$4 sm:$0xff]   ;;  %v16511_v45 = vld [vmem:[%s22356_s30 + $0x454] ss:$24 sps:$4 sm:$0xff]  }
 0x68a   : > { %v10789_v48 = vpop.permute.xlu1 %10788  ;;  %12798 = vmatprep.subr.bf16.mxu0 %v10847_v6  ;;  %v20239_v57 = vpop.permute.xlu0 %11700 }
 0x68b   : > { %v10792_v47 = vsel %vm22375_vm2, %v20048_v9, %v10789_v48  ;;  %v10796_v2 = vsel %vm22376_vm3, %v10789_v48, %v20048_v9  ;;  %12799 = vmatpush2.bf16.msra.mxu0 %v10846_v42  ;;  %v16484_v48 = vld [vmem:[%s22356_s30 + $0x754] ss:$24 sps:$4 sm:$0xff]   ;;  %vm22387_vm2 = vcmask 793600   ;;  %vm22389_vm3 = vcmask 105472  }
 0x68c   : > { %v10810_v25 = vmul.bf16 %v16491_v4, %v10796_v2  ;;  %v10811_v20 = vmul.bf16 %v16493_v21, %v10792_v47  ;;  %v16515_v4 = vld [vmem:[%s22356_s30 + $0x180] ss:$24 sps:$4 sm:$0xff]   ;;  %v16517_v21 = vld [vmem:[%s22356_s30 + $0x184] ss:$24 sps:$4 sm:$0xff]  }
 0x68e   : > { %v10753_v28 = vpop.permute.xlu1 %10752  ;;  %12800 = vmatprep.subr.bf16.mxu0 %v10811_v20  ;;  %v20251_v31 = vpop.permute.xlu0 %11664 }
 0x68f   : > { %v10756_v34 = vsel %vm22377_vm4, %v20056_v55, %v10753_v28  ;;  %v10760_v9 = vsel %vm22378_vm5, %v10753_v28, %v20056_v55  ;;  %12801 = vmatpush2.bf16.msra.mxu0 %v10810_v25  ;;  %v16521_v28 = vld [vmem:[%s22356_s30 + $0x420] ss:$24 sps:$4 sm:$0xff]   ;;  %vm22390_vm4 = vmmov %vm22389_vm3  ;;  %vm22391_vm5 = vcmask 801792  }
 0x690   : > { %v10774_v17 = vmul.bf16 %v16497_v3, %v10760_v9  ;;  %v10775_v63 = vmul.bf16 %v16499_v22, %v10756_v34  ;;  %v16523_v34 = vld [vmem:[%s22356_s30 + $0x424] ss:$24 sps:$4 sm:$0xff]   ;;  %v16482_v9 = vld [vmem:[%s22356_s30 + $0x750] ss:$24 sps:$4 sm:$0xff]  }
 0x692   : > { %v10717_v52 = vpop.permute.xlu1 %10716  ;;  %12802 = vmatprep.subr.bf16.mxu0 %v10775_v63  ;;  %v20263_v0 = vpop.permute.xlu0 %11628 }
 0x693   : > { %v10720_v35 = vsel %vm22379_vm10, %v20068_v13, %v10717_v52  ;;  %v10724_v55 = vsel %vm22380_vm11, %v10717_v52, %v20068_v13  ;;  %12803 = vmatpush2.bf16.msra.mxu0 %v10774_v17  ;;  %v16490_v52 = vld [vmem:[%s22356_s30 + $0x724] ss:$24 sps:$4 sm:$0xff]   ;;  %vm22392_vm10 = vmmov %vm22391_vm5  ;;  %vm22393_vm11 = vcmask 113664  }
 0x694   : > { %v10738_v27 = vmul.bf16 %v16503_v5, %v10724_v55  ;;  %v10739_v30 = vmul.bf16 %v16505_v39, %v10720_v35 }
 0x696   : > { %v11221_v11 = vpop.permute.xlu1 %11220  ;;  %12804 = vmatprep.subr.bf16.mxu0 %v10739_v30  ;;  %v20275_v44 = vpop.permute.xlu0 %11592 }
 0x697   : > { %v11224_v56 = vsel %vm2814_vm12, %v20085_v41, %v11221_v11  ;;  %v11228_v13 = vsel %vm2814_vm12, %v11221_v11, %v20085_v41  ;;  %12805 = vmatpush2.bf16.msra.mxu0 %v10738_v27  ;;  %vm22381_vm12 = vcmask 777216   ;;  %v11742_v27 = vsel %vm22385_vm1, %v20227_v38, %v19958_v58  ;;  %v16488_v11 = vld [vmem:[%s22356_s30 + $0x720] ss:$24 sps:$4 sm:$0xff]  }
 0x698   : > { %v11242_v42 = vmul.bf16 %v16509_v50, %v11228_v13  ;;  %v11243_v6 = vmul.bf16 %v16511_v45, %v11224_v56  ;;  %v11778_v41 = vsel %vm22381_vm12, %v20215_v32, %v19952_v36  ;;  %vm22384_vm0 = vmmov %vm22381_vm12 }
 0x699   : > { %v11793_v17 = vmul.bf16 %v16484_v48, %v11778_v41  ;;  %v11774_v39 = vsel %vm22384_vm0, %v19952_v36, %v20215_v32  ;;  %v16530_v36 = vld [vmem:[%s22356_s30 + $0x3f0] ss:$24 sps:$4 sm:$0xff]   ;;  %v16532_v32 = vld [vmem:[%s22356_s30 + $0x3f4] ss:$24 sps:$4 sm:$0xff]   ;;  %vm22394_vm12 = vmmov %vm22393_vm11  ;;  %vm22397_vm0 = vcmask 121856  }
 0x69a   : > { %v10681_v47 = vpop.permute.xlu1 %10680  ;;  %12819 = vmatprep.subr.bf16.mxu1 %v11243_v6  ;;  %v20290_v2 = vpop.permute.xlu0 %11556  ;;  %v11792_v45 = vmul.bf16 %v16482_v9, %v11774_v39  ;;  %v11757_v6 = vmul.bf16 %v16490_v52, %v11742_v27  ;;  %v16502_v9 = vld [vmem:[%s22356_s30 + $0x6c4] ss:$24 sps:$4 sm:$0xff]  }
 0x69b   : > { %v10684_v25 = vsel %vm22382_vm6, %v20101_v54, %v10681_v47  ;;  %v10688_v20 = vsel %vm22383_vm7, %v10681_v47, %v20101_v54  ;;  %12820 = vmatpush1.bf16.msra.mxu1 %v11242_v42  ;;  %v16527_v54 = vld [vmem:[%s22349_s26] ss:$28 sps:$4 sm:$0xff]   ;;  %v11706_v47 = vsel %vm22387_vm2, %v20239_v57, %v19966_v43  ;;  %vm22395_vm6 = vcmask 809984  }
 0x69c   : > { %v10702_v3 = vmul.bf16 %v16515_v4, %v10688_v20  ;;  %v10703_v22 = vmul.bf16 %v16517_v21, %v10684_v25  ;;  %v16496_v4 = vld [vmem:[%s22356_s30 + $0x6f4] ss:$24 sps:$4 sm:$0xff]   ;;  %vm22396_vm7 = vmmov %vm22395_vm6 }
 0x69e   : > { %v11185_v63 = vpop.permute.xlu1 %11184  ;;  %12806 = vmatprep.subr.bf16.mxu0 %v10703_v22  ;;  %v20308_v5 = vpop.permute.xlu0 %11484 }
 0x69f   : > { %v11188_v35 = vsel %vm2708_vm14, %v20117_v1, %v11185_v63  ;;  %v11192_v55 = vsel %vm2708_vm14, %v11185_v63, %v20117_v1  ;;  %12807 = vmatpush2.bf16.msra.mxu0 %v10702_v3  ;;  %v16601_v1 = vld [vmem:[%s22349_s26 + $0x14] ss:$28 sps:$4 sm:$0xff]   ;;  %vm22386_vm14 = vmmov %vm22385_vm1 }
 0x6a0   : > { %v11206_v30 = vmul.bf16 %v16521_v28, %v11192_v55  ;;  %v11207_v50 = vmul.bf16 %v16523_v34, %v11188_v35  ;;  %12862 = vmatprep.subr.bf16.mxu0 %v11793_v17  ;;  %v11738_v42 = vsel %vm22386_vm14, %v19958_v58, %v20227_v38  ;;  %v16536_v58 = vld [vmem:[%s22356_s30 + $0x3c0] ss:$24 sps:$4 sm:$0xff]   ;;  %v16538_v38 = vld [vmem:[%s22356_s30 + $0x3c4] ss:$24 sps:$4 sm:$0xff]   ;;  %v11721_v34 = vmul.bf16 %v16496_v4, %v11706_v47  ;;  %vm22398_vm1 = vmmov %vm22397_vm0 }
 0x6a1   : > { %v11756_v20 = vmul.bf16 %v16488_v11, %v11738_v42  ;;  %v16514_v47 = vld [vmem:[%s22356_s30 + $0x664] ss:$24 sps:$4 sm:$0xff]   ;;  %vm22399_vm14 = vcmask 891904  }
 0x6a2   : > { %v11149_v56 = vpop.permute.xlu1 %11148  ;;  %12809 = vmatmul.mubr.bf16.vlgmr.msra.gmra.mxu0 %v16527_v54  ;;  %12821 = vmatprep.subr.bf16.mxu1 %v11207_v50  ;;  %v20338_v13 = vpop.permute.xlu0 %11520  ;;  %v11670_v54 = vsel %vm22391_vm5, %v20251_v31, %v19974_v26  ;;  %vm22404_vm5 = vcmask 138240  }
 0x6a3   : > { %v11152_v21 = vsel %vm2602_vm13, %v20133_v29, %v11149_v56  ;;  %v11156_v48 = vsel %vm2602_vm13, %v11149_v56, %v20133_v29  ;;  %12822 = vmatpush1.bf16.msra.mxu1 %v11206_v30  ;;  %12863 = vmatpush1.bf16.msra.mxu0 %v11792_v45  ;;  %v16494_v29 = vld [vmem:[%s22356_s30 + $0x6f0] ss:$24 sps:$4 sm:$0xff]   ;;  %vm22388_vm13 = vmmov %vm22387_vm2  ;;  %v11666_v30 = vsel %vm22392_vm10, %v19974_v26, %v20251_v31  ;;  %v16548_v26 = vld [vmem:[%s22356_s30 + $0x360] ss:$24 sps:$4 sm:$0xff]  }
 0x6a4   : > { %v11170_v41 = vmul.bf16 %v16530_v36, %v11156_v48  ;;  %v11171_v25 = vmul.bf16 %v16532_v32, %v11152_v21  ;;  %12864 = vmatprep.subr.bf16.mxu0 %v11757_v6  ;;  %12894 = vmatprep.mubr.bf16.mxu0 %v16601_v1  ;;  %v11702_v28 = vsel %vm22388_vm13, %v19966_v43, %v20239_v57  ;;  %v16542_v43 = vld [vmem:[%s22356_s30 + $0x390] ss:$24 sps:$4 sm:$0xff]   ;;  %v16544_v57 = vld [vmem:[%s22356_s30 + $0x394] ss:$24 sps:$4 sm:$0xff]   ;;  %v16550_v31 = vld [vmem:[%s22356_s30 + $0x364] ss:$24 sps:$4 sm:$0xff]  }
 0x6a5   : > { %v11720_v35 = vmul.bf16 %v16494_v29, %v11702_v28  ;;  %v11685_v50 = vmul.bf16 %v16502_v9, %v11670_v54  ;;  %v16508_v36 = vld [vmem:[%s22356_s30 + $0x694] ss:$24 sps:$4 sm:$0xff]   ;;  %v11634_v45 = vsel %vm22395_vm6, %v20263_v0, %v19982_v59  ;;  %v11630_v21 = vsel %vm22396_vm7, %v19982_v59, %v20263_v0  ;;  %v16554_v59 = vld [vmem:[%s22356_s30 + $0x330] ss:$24 sps:$4 sm:$0xff]   ;;  %vm22400_vm2 = vmmov %vm22399_vm14 }
 0x6a6   : > { %v11113_v3 = vpop.permute.xlu1 %11112  ;;  %12823 = vmatprep.subr.bf16.mxu1 %v11171_v25  ;;  %v20362_v22 = vpop.permute.xlu0 %11448  ;;  %v11649_v48 = vmul.bf16 %v16508_v36, %v11634_v45  ;;  %v16556_v0 = vld [vmem:[%s22356_s30 + $0x334] ss:$24 sps:$4 sm:$0xff]   ;;  %vm22401_vm13 = vcmask 900096   ;;  %vm22405_vm10 = vmmov %vm22404_vm5  ;;  %vm22409_vm7 = vcmask 924672  }
 0x6a7   : > { %v11116_v17 = vsel %vm22389_vm3, %v20155_v10, %v11113_v3  ;;  %v11120_v63 = vsel %vm22390_vm4, %v11113_v3, %v20155_v10  ;;  %12824 = vmatpush1.bf16.msra.mxu1 %v11170_v41  ;;  %12865 = vmatpush1.bf16.msra.mxu0 %v11756_v20  ;;  %v16500_v10 = vld [vmem:[%s22356_s30 + $0x6c0] ss:$24 sps:$4 sm:$0xff]   ;;  %vm22402_vm3 = vmmov %vm22401_vm13  ;;  %vm22403_vm4 = vcmask 916480  }
 0x6a8   : > { %v11134_v39 = vmul.bf16 %v16536_v58, %v11120_v63  ;;  %v11135_v52 = vmul.bf16 %v16538_v38, %v11116_v17  ;;  %12866 = vmatprep.subr.bf16.mxu0 %v11721_v34  ;;  %v11684_v42 = vmul.bf16 %v16500_v10, %v11666_v30  ;;  %v11598_v58 = vsel %vm22399_vm14, %v20275_v44, %v19990_v62  ;;  %v16520_v17 = vld [vmem:[%s22356_s30 + $0x634] ss:$24 sps:$4 sm:$0xff]  }
 0x6a9   : > { %v11594_v34 = vsel %vm22400_vm2, %v19990_v62, %v20275_v44  ;;  %v11613_v9 = vmul.bf16 %v16514_v47, %v11598_v58  ;;  %v16560_v62 = vld [vmem:[%s22356_s30 + $0x300] ss:$24 sps:$4 sm:$0xff]   ;;  %v16562_v44 = vld [vmem:[%s22356_s30 + $0x304] ss:$24 sps:$4 sm:$0xff]   ;;  %v16526_v10 = vld [vmem:[%s22356_s30 + $0x5d4] ss:$24 sps:$4 sm:$0xff]   ;;  %v11490_v36 = vsel %vm22403_vm4, %v20308_v5, %v20006_v23 }
 0x6aa   : > { %v11077_v55 = vpop.permute.xlu1 %11076  ;;  %12825 = vmatprep.subr.bf16.mxu1 %v11135_v52  ;;  %v20386_v27 = vpop.permute.xlu0 %12060  ;;  %vm22413_vm2 = vcmask 932864  }
 0x6ab   : > { %v11080_v32 = vsel %vm22393_vm11, %v20167_v19, %v11077_v55  ;;  %v11084_v1 = vsel %vm22394_vm12, %v11077_v55, %v20167_v19  ;;  %12826 = vmatpush1.bf16.msra.mxu1 %v11134_v39  ;;  %12867 = vmatpush1.bf16.msra.mxu0 %v11720_v35  ;;  %v16506_v19 = vld [vmem:[%s22356_s30 + $0x690] ss:$24 sps:$4 sm:$0xff]   ;;  %v11562_v39 = vsel %vm22401_vm13, %v20290_v2, %v19998_v61  ;;  %vm22406_vm11 = vcmask 908288   ;;  %vm22407_vm12 = vmmov %vm22403_vm4 }
 0x6ac   : > { %v11098_v11 = vmul.bf16 %v16542_v43, %v11084_v1  ;;  %v11099_v56 = vmul.bf16 %v16544_v57, %v11080_v32  ;;  %12868 = vmatprep.subr.bf16.mxu0 %v11685_v50  ;;  %v11648_v29 = vmul.bf16 %v16506_v19, %v11630_v21  ;;  %v11558_v35 = vsel %vm22402_vm3, %v19998_v61, %v20290_v2  ;;  %v16535_v32 = vld [vmem:[%s22356_s30 + $0x604] ss:$24 sps:$4 sm:$0xff]   ;;  %vm22408_vm6 = vmmov %vm22406_vm11 }
 0x6ad   : > { %v11577_v50 = vmul.bf16 %v16520_v17, %v11562_v39  ;;  %v11526_v1 = vsel %vm22406_vm11, %v20338_v13, %v20014_v7  ;;  %v16541_v19 = vld [vmem:[%s22356_s30 + $0x5a4] ss:$24 sps:$4 sm:$0xff]   ;;  %vm22414_vm13 = vcmask 646144   ;;  %vm22415_vm3 = vmmov %vm22413_vm2 }
 0x6ae   : > { %v11041_v6 = vpop.permute.xlu1 %11040  ;;  %12827 = vmatprep.subr.bf16.mxu1 %v11099_v56  ;;  %v20410_v4 = vpop.permute.xlu0 %11412  ;;  %v16524_v56 = vld [vmem:[%s22356_s30 + $0x5d0] ss:$24 sps:$4 sm:$0xff]   ;;  %v11541_v47 = vmul.bf16 %v16535_v32, %v11526_v1  ;;  %v16565_v39 = vld [vmem:[%s22356_s30 + $0x544] ss:$24 sps:$4 sm:$0xff]   ;;  %vm22416_vm4 = vmmov %vm22414_vm13 }
 0x6af   : > { %v11044_v41 = vsel %vm22397_vm0, %v20179_v24, %v11041_v6  ;;  %v11048_v25 = vsel %vm22398_vm1, %v11041_v6, %v20179_v24  ;;  %12828 = vmatpush1.bf16.msra.mxu1 %v11098_v11  ;;  %12869 = vmatpush1.bf16.msra.mxu0 %v11684_v42  ;;  %v16512_v24 = vld [vmem:[%s22356_s30 + $0x660] ss:$24 sps:$4 sm:$0xff]   ;;  %v11505_v42 = vmul.bf16 %v16526_v10, %v11490_v36  ;;  %vm22410_vm0 = vcmask 637952   ;;  %vm22411_vm1 = vmmov %vm22409_vm7 }
 0x6b0   : > { %v11062_v38 = vmul.bf16 %v16548_v26, %v11048_v25  ;;  %v11063_v20 = vmul.bf16 %v16550_v31, %v11044_v41  ;;  %12870 = vmatprep.subr.bf16.mxu0 %v11649_v48  ;;  %v11612_v57 = vmul.bf16 %v16512_v24, %v11594_v34  ;;  %v11486_v31 = vsel %vm22407_vm12, %v20006_v23, %v20308_v5  ;;  %v16547_v5 = vld [vmem:[%s22356_s30 + $0x8d4] ss:$24 sps:$4 sm:$0xff]   ;;  %vm22412_vm14 = vmmov %vm22410_vm0 }
 0x6b1   : > { %v11522_v48 = vsel %vm22408_vm6, %v20014_v7, %v20338_v13  ;;  %v11454_v23 = vsel %vm22409_vm7, %v20362_v22, %v20022_v8  ;;  %v12066_v41 = vsel %vm22410_vm0, %v20386_v27, %v20030_v18  ;;  %v11504_v25 = vmul.bf16 %v16524_v56, %v11486_v31  ;;  %v16539_v7 = vld [vmem:[%s22356_s30 + $0x5a0] ss:$24 sps:$4 sm:$0xff]  }
 0x6b2   : > { %v11005_v3 = vpop.permute.xlu1 %11004  ;;  %12829 = vmatprep.subr.bf16.mxu1 %v11063_v20  ;;  %v20434_v28 = vpop.permute.xlu0 %12024  ;;  %v11450_v58 = vsel %vm22411_vm1, %v20022_v8, %v20362_v22  ;;  %v16545_v20 = vld [vmem:[%s22356_s30 + $0x8d0] ss:$24 sps:$4 sm:$0xff]   ;;  %v12062_v24 = vsel %vm22412_vm14, %v20030_v18, %v20386_v27  ;;  %v11418_v8 = vsel %vm22413_vm2, %v20410_v4, %v20038_v15  ;;  %v16559_v22 = vld [vmem:[%s22356_s30 + $0x8a4] ss:$24 sps:$4 sm:$0xff]   ;;  %v11414_v17 = vsel %vm22415_vm3, %v20038_v15, %v20410_v4  ;;  %v16568_v4 = vld [vmem:[%s22356_s30 + $0x874] ss:$24 sps:$4 sm:$0xff]  }
 0x6b3   : > { %v11008_v63 = vsel %vm2178_vm15, %v20191_v33, %v11005_v3  ;;  %v11012_v54 = vsel %vm2178_vm15, %v11005_v3, %v20191_v33  ;;  %12830 = vmatpush1.bf16.msra.mxu1 %v11062_v38  ;;  %12871 = vmatpush1.bf16.msra.mxu0 %v11648_v29  ;;  %v16518_v33 = vld [vmem:[%s22356_s30 + $0x630] ss:$24 sps:$4 sm:$0xff]   ;;  %v11469_v38 = vmul.bf16 %v16541_v19, %v11454_v23  ;;  %vm22421_vm6 = vcmask 1022976   ;;  %v16580_v23 = vld [vmem:[%s22356_s30 + $0x814] ss:$24 sps:$4 sm:$0xff]  }
 0x6b4   : > { %v11026_v52 = vmul.bf16 %v16554_v59, %v11012_v54  ;;  %v11027_v43 = vmul.bf16 %v16556_v0, %v11008_v63  ;;  %12872 = vmatprep.subr.bf16.mxu0 %v11613_v9  ;;  %v11576_v26 = vmul.bf16 %v16518_v33, %v11558_v35  ;;  %v16553_v59 = vld [vmem:[%s22356_s30 + $0x574] ss:$24 sps:$4 sm:$0xff]   ;;  %v12081_v3 = vmul.bf16 %v16547_v5, %v12066_v41  ;;  %v16551_v18 = vld [vmem:[%s22356_s30 + $0x570] ss:$24 sps:$4 sm:$0xff]   ;;  %v16557_v54 = vld [vmem:[%s22356_s30 + $0x8a0] ss:$24 sps:$4 sm:$0xff]  }
 0x6b5   : > { %v12030_v34 = vsel %vm22414_vm13, %v20434_v28, %v20046_v40  ;;  %v11468_v9 = vmul.bf16 %v16539_v7, %v11450_v58  ;;  %v12080_v27 = vmul.bf16 %v16545_v20, %v12062_v24  ;;  %v11433_v63 = vmul.bf16 %v16553_v59, %v11418_v8  ;;  %v16563_v35 = vld [vmem:[%s22356_s30 + $0x540] ss:$24 sps:$4 sm:$0xff]   ;;  %vm22423_vm0 = vmmov %vm22421_vm6  ;;  %v16583_v59 = vld [vmem:[%s22356_s30 + $0x4b4] ss:$24 sps:$4 sm:$0xff]  }
 0x6b6   : > { %v10969_v55 = vpop.permute.xlu1 %10968  ;;  %12831 = vmatprep.subr.bf16.mxu1 %v11027_v43  ;;  %v20464_v30 = vpop.permute.xlu0 %11376  ;;  %v11432_v33 = vmul.bf16 %v16551_v18, %v11414_v17  ;;  %vm22422_vm7 = vcmask 662528   ;;  %vm22425_vm14 = vcmask 1031168   ;;  %vm22427_vm13 = vcmask 1039360   ;;  %v16584_v8 = vld [vmem:[%s22356_s30 + $0x7e0] ss:$24 sps:$4 sm:$0xff]  }
 0x6b7   : > { %v10972_v61 = vsel %vm22404_vm5, %v20203_v53, %v10969_v55  ;;  %v10976_v2 = vsel %vm22405_vm10, %v10969_v55, %v20203_v53  ;;  %12832 = vmatpush1.bf16.msra.mxu1 %v11026_v52  ;;  %12873 = vmatpush1.bf16.msra.mxu0 %v11612_v57  ;;  %v16533_v53 = vld [vmem:[%s22356_s30 + $0x600] ss:$24 sps:$4 sm:$0xff]   ;;  %vm22417_vm5 = vcmask 941056   ;;  %vm22418_vm10 = vcmask 654336   ;;  %v16566_v55 = vld [vmem:[%s22356_s30 + $0x870] ss:$24 sps:$4 sm:$0xff]   ;;  %vm22424_vm1 = vmmov %vm22422_vm7 }
 0x6b8   : > { %v10990_v45 = vmul.bf16 %v16560_v62, %v10976_v2  ;;  %v10991_v11 = vmul.bf16 %v16562_v44, %v10972_v61  ;;  %12874 = vmatprep.subr.bf16.mxu0 %v11577_v50  ;;  %v11540_v13 = vmul.bf16 %v16533_v53, %v11522_v48  ;;  %v12026_v62 = vsel %vm22416_vm4, %v20046_v40, %v20434_v28  ;;  %vm22419_vm11 = vmmov %vm22417_vm5  ;;  %v16571_v50 = vld [vmem:[%s22356_s30 + $0x514] ss:$24 sps:$4 sm:$0xff]   ;;  %v16577_v53 = vld [vmem:[%s22356_s30 + $0x4e4] ss:$24 sps:$4 sm:$0xff]  }
 0x6b9   : > { %v12045_v44 = vmul.bf16 %v16559_v22, %v12030_v34  ;;  %v11382_v15 = vsel %vm22417_vm5, %v20464_v30, %v20054_v14  ;;  %v12044_v40 = vmul.bf16 %v16557_v54, %v12026_v62  ;;  %v11378_v28 = vsel %vm22419_vm11, %v20054_v14, %v20464_v30  ;;  %vm22420_vm12 = vmmov %vm22418_vm10  ;;  %v16574_v14 = vld [vmem:[%s22356_s30 + $0x844] ss:$24 sps:$4 sm:$0xff]  }
 0x6ba   : > { %v11987_v6 = vpop.permute.xlu1 %11986  ;;  %12833 = vmatprep.subr.bf16.mxu1 %v10991_v11  ;;  %v11989_v21 = vpop.permute.xlu0 %11988  ;;  %v11397_v10 = vmul.bf16 %v16565_v39, %v11382_v15  ;;  %v16569_v11 = vld [vmem:[%s22356_s30 + $0x510] ss:$24 sps:$4 sm:$0xff]   ;;  %vm22426_vm2 = vmmov %vm22425_vm14  ;;  %v16586_v22 = vld [vmem:[%s22356_s30 + $0x7e4] ss:$24 sps:$4 sm:$0xff]   ;;  %vm22429_vm3 = vcmask 678912   ;;  %vm22431_vm5 = vcmask 760832  }
 0x6bb   : > { %12834 = vmatpush1.bf16.msra.mxu1 %v10990_v45  ;;  %12875 = vmatpush1.bf16.msra.mxu0 %v11576_v26  ;;  %v11994_v57 = vsel %vm22418_vm10, %v11989_v21, %v11987_v6  ;;  %v11990_v61 = vsel %vm22420_vm12, %v11987_v6, %v11989_v21  ;;  %v11396_v45 = vmul.bf16 %v16563_v35, %v11378_v28  ;;  %vm22430_vm4 = vmmov %vm22429_vm3  ;;  %v16589_v15 = vld [vmem:[%s22356_s30 + $0x7b4] ss:$24 sps:$4 sm:$0xff]   ;;  %vm22433_vm11 = vcmask 629760  }
 0x6bc   : > { %12835 = vmatprep.subr.bf16.mxu1 %v11505_v42  ;;  %12876 = vmatprep.subr.bf16.mxu0 %v11541_v47  ;;  %v12009_v2 = vmul.bf16 %v16568_v4, %v11994_v57  ;;  %v12008_v56 = vmul.bf16 %v16566_v55, %v11990_v61  ;;  %v16572_v42 = vld [vmem:[%s22356_s30 + $0x840] ss:$24 sps:$4 sm:$0xff]   ;;  %vm22432_vm10 = vmmov %vm22431_vm5  ;;  %v16593_v61 = vld [vmem:[%s22349_s26 + $0x8] ss:$28 sps:$4 sm:$0xff]  }
 0x6bd   : > { %v16590_v55 = vld [vmem:[%s22356_s30 + $0x780] ss:$24 sps:$4 sm:$0xff]  }
 0x6be   : > { %v11339_v0 = vpop.permute.xlu1 %11338  ;;  %v11341_v29 = vpop.permute.xlu0 %11340 }
 0x6bf   : > { %12836 = vmatpush2.bf16.msra.mxu1 %v11504_v25  ;;  %12877 = vmatpush1.bf16.msra.mxu0 %v11540_v13  ;;  %v11346_v1 = vsel %vm22421_vm6, %v11341_v29, %v11339_v0  ;;  %v11342_v26 = vsel %vm22423_vm0, %v11339_v0, %v11341_v29  ;;  %v16575_v25 = vld [vmem:[%s22356_s30 + $0x4e0] ss:$24 sps:$4 sm:$0xff]  }
 0x6c0   : > { %12837 = vmatprep.subr.bf16.mxu1 %v11469_v38  ;;  %12878 = vmatprep.subr.bf16.mxu0 %v12081_v3  ;;  %v11361_v31 = vmul.bf16 %v16571_v50, %v11346_v1  ;;  %v11360_v41 = vmul.bf16 %v16569_v11, %v11342_v26  ;;  %v16578_v38 = vld [vmem:[%s22356_s30 + $0x810] ss:$24 sps:$4 sm:$0xff]   ;;  %v16592_v50 = vld [vmem:[%s22356_s30 + $0x784] ss:$24 sps:$4 sm:$0xff]  }
 0x6c2   : > { %v11951_v52 = vpop.permute.xlu1 %11950  ;;  %v11953_v43 = vpop.permute.xlu0 %11952 }
 0x6c3   : > { %12838 = vmatpush2.bf16.msra.mxu1 %v11468_v9  ;;  %12879 = vmatpush2.bf16.msra.mxu0 %v12080_v27  ;;  %v11958_v30 = vsel %vm22422_vm7, %v11953_v43, %v11951_v52  ;;  %v11954_v21 = vsel %vm22424_vm1, %v11951_v52, %v11953_v43  ;;  %v16581_v9 = vld [vmem:[%s22356_s30 + $0x4b0] ss:$24 sps:$4 sm:$0xff]  }
 0x6c4   : > { %12839 = vmatprep.subr.bf16.mxu1 %v11433_v63  ;;  %12880 = vmatprep.subr.bf16.mxu0 %v12045_v44  ;;  %v11973_v48 = vmul.bf16 %v16574_v14, %v11958_v30  ;;  %v11972_v7 = vmul.bf16 %v16572_v42, %v11954_v21  ;;  %v16587_v44 = vld [vmem:[%s22356_s30 + $0x7b0] ss:$24 sps:$4 sm:$0xff]   ;;  %v16596_v30 = vld [vmem:[%s22356_s30 + $0x900] ss:$24 sps:$4 sm:$0xff]  }
 0x6c5   : > { %v13025_v21 = vld [vmem:[%s22435_s29 + $0x1c8] sm:$0xff] }
 0x6c6   : > { %v11303_v36 = vpop.permute.xlu1 %11302  ;;  %v11305_v32 = vpop.permute.xlu0 %11304 }
 0x6c7   : > { %12840 = vmatpush2.bf16.msra.mxu1 %v11432_v33  ;;  %12881 = vmatpush2.bf16.msra.mxu0 %v12044_v40  ;;  %v11310_v47 = vsel %vm22425_vm14, %v11305_v32, %v11303_v36  ;;  %v11306_v13 = vsel %vm22426_vm2, %v11303_v36, %v11305_v32 }
 0x6c8   : > { %12841 = vmatprep.subr.bf16.mxu1 %v11397_v10  ;;  %12882 = vmatprep.subr.bf16.mxu0 %v12009_v2  ;;  %v11325_v58 = vmul.bf16 %v16577_v53, %v11310_v47  ;;  %v11324_v34 = vmul.bf16 %v16575_v25, %v11306_v13 }
 0x6ca   : > { %v11915_v19 = vpop.permute.xlu1 %11914  ;;  %v11917_v6 = vpop.permute.xlu0 %11916 }
 0x6cb   : > { %12842 = vmatpush2.bf16.msra.mxu1 %v11396_v45  ;;  %v11922_v5 = vsel %vm4834_vm9, %v11917_v6, %v11915_v19  ;;  %12883 = vmatpush2.bf16.msra.mxu0 %v12008_v56  ;;  %v11918_v29 = vsel %vm4834_vm9, %v11915_v19, %v11917_v6  ;;  %vm22428_vm9 = vmmov %vm22427_vm13  ;;  %v16598_v45 = vld [vmem:[%s22356_s30 + $0x904] ss:$24 sps:$4 sm:$0xff]   ;;  %v16602_v19 = vld [vmem:[%s22349_s26 + $0x18] ss:$28 sps:$4 sm:$0xff]  }
 0x6cc   : > { %12843 = vmatprep.subr.bf16.mxu1 %v11361_v31  ;;  %12884 = vmatprep.subr.bf16.mxu0 %v11973_v48  ;;  %v11937_v24 = vmul.bf16 %v16580_v23, %v11922_v5  ;;  %v11936_v18 = vmul.bf16 %v16578_v38, %v11918_v29  ;;  %v13024_v6 = vld [vmem:[%s22435_s29 + $0x1c0] sm:$0xff]  ;;  %v13029_v23 = vld [vmem:[%s22435_s29 + $0x1e8] sm:$0xff] }
 0x6cd   : > { %v13016_v5 = vld [vmem:[%s22435_s29 + $0x180] sm:$0xff]  ;;  %v20666_v25 = vcombine.low %v13025_v21, %v13029_v23  ;;  %v13021_v38 = vld [vmem:[%s22435_s29 + $0x1a8] sm:$0xff] }
 0x6ce   : > { %v11267_v20 = vpop.permute.xlu1 %11266  ;;  %v11269_v0 = vpop.permute.xlu0 %11268  ;;  %v13009_v29 = vld [vmem:[%s22435_s29 + $0x148] sm:$0xff] }
 0x6cf   : > { %v11274_v3 = vsel %vm22427_vm13, %v11269_v0, %v11267_v20  ;;  %12844 = vmatpush2.bf16.msra.mxu1 %v11360_v41  ;;  %12885 = vmatpush2.bf16.msra.mxu0 %v11972_v7  ;;  %v11270_v27 = vsel %vm22428_vm9, %v11267_v20, %v11269_v0  ;;  %v13020_v41 = vld [vmem:[%s22435_s29 + $0x1a0] sm:$0xff]  ;;  %v20668_v7 = vcombine.high %v13025_v21, %v13029_v23 }
 0x6d0   : > { %12845 = vmatprep.subr.bf16.mxu1 %v11325_v58  ;;  %12886 = vmatprep.subr.bf16.mxu0 %v11937_v24  ;;  %v11289_v17 = vmul.bf16 %v16583_v59, %v11274_v3  ;;  %v11288_v4 = vmul.bf16 %v16581_v9, %v11270_v27  ;;  %v20670_v13 = vcombine.high %v13016_v5, %v13020_v41  ;;  %v13017_v58 = vld [vmem:[%s22435_s29 + $0x188] sm:$0xff]  ;;  %v13008_v20 = vld [vmem:[%s22435_s29 + $0x140] sm:$0xff] }
 0x6d1   : > { %v20682_v59 = vcombine.high %v13017_v58, %v13021_v38  ;;  %v13012_v0 = vld [vmem:[%s22435_s29 + $0x160] sm:$0xff]  ;;  %v13013_v24 = vld [vmem:[%s22435_s29 + $0x168] sm:$0xff]  ;;  %v20695_v3 = vcombine.low %v13016_v5, %v13020_v41 }
 0x6d2   : > { %v11879_v63 = vpop.permute.xlu1 %11878  ;;  %v11881_v54 = vpop.permute.xlu0 %11880  ;;  %v13000_v9 = vld [vmem:[%s22435_s29 + $0x100] sm:$0xff]  ;;  %v13001_v27 = vld [vmem:[%s22435_s29 + $0x108] sm:$0xff] }
 0x6d3   : > { %v11882_v39 = vsel %vm22429_vm3, %v11879_v63, %v11881_v54  ;;  %v11886_v52 = vsel %vm22430_vm4, %v11881_v54, %v11879_v63  ;;  %12846 = vmatpush2.bf16.msra.mxu1 %v11324_v34  ;;  %12887 = vmatpush2.bf16.msra.mxu0 %v11936_v18  ;;  %v20704_v34 = vcombine.high %v13009_v29, %v13013_v24  ;;  %v13004_v18 = vld [vmem:[%s22435_s29 + $0x120] sm:$0xff]  ;;  %v13089_v5 = vld [vmem:[%s22435_s29 + $0x3c8] sm:$0xff] }
 0x6d4   : > { %v11900_v43 = vmul.bf16 %v16584_v8, %v11882_v39  ;;  %v11901_v62 = vmul.bf16 %v16586_v22, %v11886_v52  ;;  %12847 = vmatprep.subr.bf16.mxu1 %v11289_v17  ;;  %v20699_v8 = vcombine.low %v13017_v58, %v13021_v38  ;;  %v20701_v22 = vcombine.high %v13008_v20, %v13012_v0  ;;  %v13005_v17 = vld [vmem:[%s22435_s29 + $0x128] sm:$0xff]  ;;  %v13088_v21 = vld [vmem:[%s22435_s29 + $0x3c0] sm:$0xff] }
 0x6d5   : > { %v20719_v63 = vcombine.low %v13008_v20, %v13012_v0  ;;  %v20723_v54 = vcombine.low %v13009_v29, %v13013_v24  ;;  %v20725_v39 = vcombine.high %v13000_v9, %v13004_v18  ;;  %v20728_v52 = vcombine.high %v13001_v27, %v13005_v17  ;;  %v13092_v23 = vld [vmem:[%s22435_s29 + $0x3e0] sm:$0xff]  ;;  %v13093_v41 = vld [vmem:[%s22435_s29 + $0x3e8] sm:$0xff] }
 0x6d6   : > { %v11843_v57 = vpop.permute.xlu1 %11842  ;;  %12888 = vmatprep.subr.bf16.mxu0 %v11901_v62  ;;  %v11845_v33 = vpop.permute.xlu0 %11844  ;;  %v12996_v62 = vld [vmem:[%s22435_s29 + $0xe0] sm:$0xff]  ;;  %v20845_v20 = vcombine.high %v13088_v21, %v13092_v23  ;;  %v20848_v0 = vcombine.high %v13089_v5, %v13093_v41  ;;  %v20851_v29 = vcombine.low %v13088_v21, %v13092_v23  ;;  %v20855_v24 = vcombine.low %v13089_v5, %v13093_v41  ;;  %v13069_v21 = vld [vmem:[%s22435_s29 + $0x328] sm:$0xff] }
 0x6d7   : > { %v11846_v35 = vsel %vm22431_vm5, %v11843_v57, %v11845_v33  ;;  %v11850_v40 = vsel %vm22432_vm10, %v11845_v33, %v11843_v57  ;;  %12848 = vmatpush2.bf16.msra.mxu1 %v11288_v4  ;;  %12889 = vmatpush2.bf16.msra.mxu0 %v11900_v43  ;;  %v12992_v43 = vld [vmem:[%s22435_s29 + $0xc0] sm:$0xff]  ;;  %v20743_v4 = vcombine.low %v13000_v9, %v13004_v18 }
 0x6d8   : > { %v11864_v28 = vmul.bf16 %v16587_v44, %v11846_v35  ;;  %v11865_v10 = vmul.bf16 %v16589_v15, %v11850_v40  ;;  %12849 = vmatprep.subr.bf16.mxu1 %v19831_v37  ;;  %v12993_v44 = vld [vmem:[%s22435_s29 + $0xc8] sm:$0xff]  ;;  %v20747_v57 = vcombine.low %v13001_v27, %v13005_v17  ;;  %v20749_v33 = vcombine.high %v12992_v43, %v12996_v62  ;;  %v12984_v40 = vld [vmem:[%s22435_s29 + $0x80] sm:$0xff] }
 0x6d9   : > { %v12997_v15 = vld [vmem:[%s22435_s29 + $0xe8] sm:$0xff]  ;;  %22438 = vst [vmem:[#allocation6_spill] sm:$0xff] %v20845_v20  ;;  %22439 = vst [vmem:[#allocation43_spill] sm:$0xff] %v20848_v0  ;;  %v13080_v9 = vld [vmem:[%s22435_s29 + $0x380] sm:$0xff] }
 0x6da   : > { %v11807_v36 = vpop.permute.xlu1 %11806  ;;  %12890 = vmatprep.subr.bf16.mxu0 %v11865_v10  ;;  %v11809_v32 = vpop.permute.xlu0 %11808  ;;  %v20752_v35 = vcombine.high %v12993_v44, %v12997_v15  ;;  %v12985_v10 = vld [vmem:[%s22435_s29 + $0x88] sm:$0xff]  ;;  %22440 = vst [vmem:[#allocation7_spill] sm:$0xff] %v20851_v29  ;;  %22441 = vst [vmem:[#allocation44_spill] sm:$0xff] %v20855_v24  ;;  %v13084_v18 = vld [vmem:[%s22435_s29 + $0x3a0] sm:$0xff] }
 0x6db   : > { %v11810_v2 = vsel %vm4516_vm8, %v11807_v36, %v11809_v32  ;;  %v11814_v1 = vsel %vm4516_vm8, %v11809_v32, %v11807_v36  ;;  %12850 = vmatpush2.bf16.msra.mxu1 %v19829_v12  ;;  %12891 = vmatpush2.bf16.msra.mxu0 %v11864_v28  ;;  %vm22434_vm8 = vmmov %vm22433_vm11  ;;  %v16599_v12 = vld [vmem:[%s22349_s26 + $0x10] ss:$28 sps:$4 sm:$0xff]   ;;  %v12988_v28 = vld [vmem:[%s22435_s29 + $0xa0] sm:$0xff]  ;;  %v20771_v36 = vcombine.low %v12993_v44, %v12997_v15 }
 0x6dc   : > { %v11828_v37 = vmul.bf16 %v16590_v55, %v11810_v2  ;;  %v11829_v14 = vmul.bf16 %v16592_v50, %v11814_v1  ;;  %v12989_v55 = vld [vmem:[%s22435_s29 + $0xa8] sm:$0xff]  ;;  %v20767_v50 = vcombine.low %v12992_v43, %v12996_v62  ;;  %v20773_v32 = vcombine.high %v12984_v40, %v12988_v28  ;;  %v12976_v2 = vld [vmem:[%s22435_s29 + $0x40] sm:$0xff] }
 0x6dd   : > { %v12980_v1 = vld [vmem:[%s22435_s29 + $0x60] sm:$0xff]  ;;  %v13081_v27 = vld [vmem:[%s22435_s29 + $0x388] sm:$0xff]  ;;  %v20869_v17 = vcombine.high %v13080_v9, %v13084_v18  ;;  %v20874_v62 = vcombine.low %v13080_v9, %v13084_v18 }
 0x6de   : > { %v12095_v11 = vpop.permute.xlu1 %12094  ;;  %12852 = vmatmul.mubr.bf16.vlgmr.msra.gmra.mxu1 %v16593_v61  ;;  %12892 = vmatprep.subr.bf16.mxu0 %v11829_v14  ;;  %v12097_v56 = vpop.permute.xlu0 %12096  ;;  %v20776_v61 = vcombine.high %v12985_v10, %v12989_v55  ;;  %v12981_v14 = vld [vmem:[%s22435_s29 + $0x68] sm:$0xff]  ;;  %v13056_v9 = vld [vmem:[%s22435_s29 + $0x2c0] sm:$0xff] }
 0x6df   : > { %v12098_v26 = vsel %vm22433_vm11, %v12095_v11, %v12097_v56  ;;  %v12102_v31 = vsel %vm22434_vm8, %v12097_v56, %v12095_v11  ;;  %12937 = vmatprep.mubr.bf16.mxu1 %v22134_v16  ;;  %12893 = vmatpush2.bf16.msra.mxu0 %v11828_v37  ;;  %v13028_v16 = vld [vmem:[%s22435_s29 + $0x1e0] sm:$0xff]  ;;  %v12977_v37 = vld [vmem:[%s22435_s29 + $0x48] sm:$0xff]  ;;  %v20797_v11 = vcombine.high %v12976_v2, %v12980_v1 }
 0x6e0   : > { %v12116_v42 = vmul.bf16 %v16596_v30, %v12098_v26  ;;  %v12117_v53 = vmul.bf16 %v16598_v45, %v12102_v31  ;;  %v20653_v48 = vcombine.low %v13024_v6, %v13028_v16  ;;  %v20655_v47 = vcombine.high %v13024_v6, %v13028_v16  ;;  %13779 = vmatprep.subr.bf16.mxu0 %v20668_v7  ;;  %v12968_v26 = vld [vmem:[%s22435_s29] sm:$0xff]  ;;  %v13085_v43 = vld [vmem:[%s22435_s29 + $0x3a8] sm:$0xff] }
 0x6e1   : > { %v20791_v30 = vcombine.low %v12984_v40, %v12988_v28  ;;  %v20795_v45 = vcombine.low %v12985_v10, %v12989_v55  ;;  %v20800_v56 = vcombine.high %v12977_v37, %v12981_v14  ;;  %v12972_v31 = vld [vmem:[%s22435_s29 + $0x20] sm:$0xff]  ;;  %22442 = vst [vmem:[#allocation8_spill] sm:$0xff] %v20869_v17  ;;  %22443 = vst [vmem:[#allocation48_spill] sm:$0xff] %v20874_v62  ;;  %v13073_v10 = vld [vmem:[%s22435_s29 + $0x348] sm:$0xff] }
 0x6e2   : > { %12919 = vmatprep.subr.bf16.mxu1 %v12117_v53  ;;  %12895 = vmatmul.mubr.bf16.vlgmr.msra.gmra.mxu0 %v16599_v12  ;;  %v12969_v12 = vld [vmem:[%s22435_s29 + $0x8] sm:$0xff]  ;;  %v20815_v53 = vcombine.low %v12976_v2, %v12980_v1  ;;  %v20821_v6 = vcombine.high %v12968_v26, %v12972_v31  ;;  %v20839_v58 = vcombine.low %v12968_v26, %v12972_v31  ;;  %v13072_v40 = vld [vmem:[%s22435_s29 + $0x340] sm:$0xff] }
 0x6e3   : > { %12920 = vmatpush1.bf16.msra.mxu1 %v12116_v42  ;;  %13780 = vmatpush1.bf16.msra.mxu0 %v20666_v25  ;;  %v12973_v42 = vld [vmem:[%s22435_s29 + $0x28] sm:$0xff]  ;;  %v20876_v44 = vcombine.low %v13081_v27, %v13085_v43  ;;  %v20878_v15 = vcombine.high %v13081_v27, %v13085_v43  ;;  %v13076_v28 = vld [vmem:[%s22435_s29 + $0x360] sm:$0xff] }
 0x6e4   : > { %13736 = vmatprep.subr.bf16.mxu1 %v20655_v47  ;;  %13781 = vmatprep.subr.bf16.mxu0 %v20682_v59  ;;  %v20824_v16 = vcombine.high %v12969_v12, %v12973_v42  ;;  %22436 = vst [vmem:[#allocation5_spill] sm:$0xff] %v20839_v58  ;;  %v20843_v38 = vcombine.low %v12969_v12, %v12973_v42  ;;  %v13077_v2 = vld [vmem:[%s22435_s29 + $0x368] sm:$0xff]  ;;  %v13064_v26 = vld [vmem:[%s22435_s29 + $0x300] sm:$0xff] }
 0x6e5   : > { %22444 = vst [vmem:[#allocation9_spill] sm:$0xff] %v20876_v44  ;;  %22445 = vst [vmem:[#allocation10_spill] sm:$0xff] %v20878_v15  ;;  %v20893_v55 = vcombine.high %v13072_v40, %v13076_v28  ;;  %v20898_v1 = vcombine.low %v13072_v40, %v13076_v28  ;;  %v13068_v31 = vld [vmem:[%s22435_s29 + $0x320] sm:$0xff]  ;;  %v13065_v12 = vld [vmem:[%s22435_s29 + $0x308] sm:$0xff] }
 0x6e6   : > { %15644 = vmatmul.mubr.msk.bf16.vlgmr.msra.gmra.mxu1 %vm2178_vm15, %v16602_v19  ;;  %v20819_v19 = vcombine.low %v12977_v37, %v12981_v14  ;;  %22437 = vst [vmem:[#allocation40_spill] sm:$0xff] %v20843_v38  ;;  %v20900_v37 = vcombine.low %v13073_v10, %v13077_v2  ;;  %v20902_v14 = vcombine.high %v13073_v10, %v13077_v2  ;;  %v13060_v18 = vld [vmem:[%s22435_s29 + $0x2e0] sm:$0xff]  ;;  %v13057_v27 = vld [vmem:[%s22435_s29 + $0x2c8] sm:$0xff] }
 0x6e7   : > { %13737 = vmatpush1.bf16.msra.mxu1 %v20653_v48  ;;  %13782 = vmatpush1.bf16.msra.mxu0 %v20699_v8  ;;  %22446 = vst [vmem:[#allocation51_spill] sm:$0xff] %v20893_v55  ;;  %22447 = vst [vmem:[#allocation11_spill] sm:$0xff] %v20898_v1  ;;  %v20917_v42 = vcombine.high %v13064_v26, %v13068_v31  ;;  %v20922_v23 = vcombine.low %v13064_v26, %v13068_v31  ;;  %v13061_v40 = vld [vmem:[%s22435_s29 + $0x2e8] sm:$0xff]  ;;  %v13048_v26 = vld [vmem:[%s22435_s29 + $0x280] sm:$0xff] }
 0x6e8   : > { %13738 = vmatprep.subr.bf16.mxu1 %v20670_v13  ;;  %13783 = vmatprep.subr.bf16.mxu0 %v20704_v34  ;;  %22448 = vst [vmem:[#allocation15_spill] sm:$0xff] %v20900_v37  ;;  %22449 = vst [vmem:[#allocation13_spill] sm:$0xff] %v20902_v14  ;;  %v20924_v5 = vcombine.low %v13065_v12, %v13069_v21  ;;  %v20926_v41 = vcombine.high %v13065_v12, %v13069_v21  ;;  %v13052_v31 = vld [vmem:[%s22435_s29 + $0x2a0] sm:$0xff]  ;;  %v13049_v12 = vld [vmem:[%s22435_s29 + $0x288] sm:$0xff] }
 0x6e9   : > { %22450 = vst [vmem:[#allocation46_spill] sm:$0xff] %v20917_v42  ;;  %22451 = vst [vmem:[#allocation12_spill] sm:$0xff] %v20922_v23  ;;  %v20941_v43 = vcombine.high %v13056_v9, %v13060_v18  ;;  %v20946_v28 = vcombine.low %v13056_v9, %v13060_v18  ;;  %v20948_v10 = vcombine.low %v13057_v27, %v13061_v40  ;;  %v13053_v9 = vld [vmem:[%s22435_s29 + $0x2a8] sm:$0xff] }
 0x6ea   : > { %22452 = vst [vmem:[#allocation17_spill] sm:$0xff] %v20924_v5  ;;  %22453 = vst [vmem:[#allocation14_spill] sm:$0xff] %v20926_v41  ;;  %v20950_v2 = vcombine.high %v13057_v27, %v13061_v40  ;;  %v20965_v21 = vcombine.high %v13048_v26, %v13052_v31  ;;  %v20970_v18 = vcombine.low %v13048_v26, %v13052_v31  ;;  %v13041_v26 = vld [vmem:[%s22435_s29 + $0x248] sm:$0xff] }
 0x6eb   : > { %13739 = vmatpush1.bf16.msra.mxu1 %v20695_v3  ;;  %13784 = vmatpush1.bf16.msra.mxu0 %v20723_v54  ;;  %22454 = vst [vmem:[#allocation19_spill] sm:$0xff] %v20941_v43  ;;  %22455 = vst [vmem:[#allocation16_spill] sm:$0xff] %v20946_v28  ;;  %v20972_v27 = vcombine.low %v13049_v12, %v13053_v9  ;;  %v20974_v40 = vcombine.high %v13049_v12, %v13053_v9  ;;  %v13045_v12 = vld [vmem:[%s22435_s29 + $0x268] sm:$0xff] }
 0x6ec   : > { %13740 = vmatprep.subr.bf16.mxu1 %v20701_v22  ;;  %13785 = vmatprep.subr.bf16.mxu0 %v20728_v52  ;;  %22456 = vst [vmem:[#allocation22_spill] sm:$0xff] %v20948_v10  ;;  %22457 = vst [vmem:[#allocation18_spill] sm:$0xff] %v20950_v2 }
 0x6ed   : > { %22458 = vst [vmem:[#allocation24_spill] sm:$0xff] %v20965_v21  ;;  %22459 = vst [vmem:[#allocation20_spill] sm:$0xff] %v20970_v18 }
 0x6ee   : > { %22460 = vst [vmem:[#allocation26_spill] sm:$0xff] %v20972_v27  ;;  %22461 = vst [vmem:[#allocation21_spill] sm:$0xff] %v20974_v40 }
 0x6ef   : > { %13741 = vmatpush1.bf16.msra.mxu1 %v20719_v63  ;;  %13786 = vmatpush1.bf16.msra.mxu0 %v20747_v57 }
 0x6f0   : > { %13742 = vmatprep.subr.bf16.mxu1 %v20725_v39  ;;  %13787 = vmatprep.subr.bf16.mxu0 %v20752_v35 }
 0x6f3   : > { %13743 = vmatpush1.bf16.msra.mxu1 %v20743_v4  ;;  %13788 = vmatpush1.bf16.msra.mxu0 %v20771_v36 }
 0x6f4   : > { %13744 = vmatprep.subr.bf16.mxu1 %v20749_v33  ;;  %13789 = vmatprep.subr.bf16.mxu0 %v20776_v61 }
 0x6f7   : > { %13745 = vmatpush1.bf16.msra.mxu1 %v20767_v50  ;;  %13790 = vmatpush1.bf16.msra.mxu0 %v20795_v45 }
 0x6f8   : > { %13746 = vmatprep.subr.bf16.mxu1 %v20773_v32  ;;  %13791 = vmatprep.subr.bf16.mxu0 %v20800_v56 }
 0x6fb   : > { %13747 = vmatpush1.bf16.msra.mxu1 %v20791_v30  ;;  %13792 = vmatpush1.bf16.msra.mxu0 %v20819_v19 }
 0x6fc   : > { %13748 = vmatprep.subr.bf16.mxu1 %v20797_v11  ;;  %13793 = vmatprep.subr.bf16.mxu0 %v20824_v16 }
 0x6ff   : > { %13749 = vmatpush1.bf16.msra.mxu1 %v20815_v53  ;;  %13794 = vmatpush1.bf16.msra.mxu0 %v20843_v38 }
 0x700   : > { %13750 = vmatprep.subr.bf16.mxu1 %v20821_v6  ;;  %13795 = vmatprep.subr.bf16.mxu0 %v20848_v0 }
 0x703   : > { %13751 = vmatpush1.bf16.msra.mxu1 %v20839_v58  ;;  %13796 = vmatpush2.bf16.msra.mxu0 %v20855_v24 }
 0x704   : > { %13752 = vmatprep.subr.bf16.mxu1 %v20845_v20  ;;  %13797 = vmatprep.subr.bf16.mxu0 %v20878_v15 }
 0x707   : > { %13753 = vmatpush2.bf16.msra.mxu1 %v20851_v29  ;;  %13798 = vmatpush2.bf16.msra.mxu0 %v20876_v44 }
 0x708   : > { %13754 = vmatprep.subr.bf16.mxu1 %v20869_v17  ;;  %13799 = vmatprep.subr.bf16.mxu0 %v20902_v14  ;;  %v12246_v14 = vpop.permute.xlu0 %12245 }
 0x70b   : > { %13755 = vmatpush2.bf16.msra.mxu1 %v20874_v62  ;;  %13800 = vmatpush2.bf16.msra.mxu0 %v20900_v37 }
 0x70c   : > { %13756 = vmatprep.subr.bf16.mxu1 %v20893_v55  ;;  %13801 = vmatprep.subr.bf16.mxu0 %v20926_v41 }
 0x70f   : > { %13757 = vmatpush2.bf16.msra.mxu1 %v20898_v1  ;;  %13802 = vmatpush2.bf16.msra.mxu0 %v20924_v5  ;;  %v12241_v5 = vpop.permute.xlu1 %12240 }
 0x710   : > { %13758 = vmatprep.subr.bf16.mxu1 %v20917_v42  ;;  %13803 = vmatprep.subr.bf16.mxu0 %v20950_v2 }
 0x713   : > { %13759 = vmatpush2.bf16.msra.mxu1 %v20922_v23  ;;  %13804 = vmatpush2.bf16.msra.mxu0 %v20948_v10  ;;  %v13040_v10 = vld [vmem:[%s22435_s29 + $0x240] sm:$0xff] }
 0x714   : > { %13760 = vmatprep.subr.bf16.mxu1 %v20941_v43  ;;  %13805 = vmatprep.subr.bf16.mxu0 %v20974_v40  ;;  %v20998_v40 = vcombine.high %v13041_v26, %v13045_v12 }
 0x716   : > { %22465 = vst [vmem:[#allocation25_spill] sm:$0xff] %v20998_v40 }
 0x717   : > { %13761 = vmatpush2.bf16.msra.mxu1 %v20946_v28  ;;  %v13044_v28 = vld [vmem:[%s22435_s29 + $0x260] sm:$0xff]  ;;  %13806 = vmatpush2.bf16.msra.mxu0 %v20972_v27 }
 0x718   : > { %13762 = vmatprep.subr.bf16.mxu1 %v20965_v21  ;;  %v20989_v31 = vcombine.high %v13040_v10, %v13044_v28  ;;  %v20994_v9 = vcombine.low %v13040_v10, %v13044_v28  ;;  %13807 = vmatprep.subr.bf16.mxu0 %v20998_v40  ;;  %v13032_v27 = vld [vmem:[%s22435_s29 + $0x200] sm:$0xff]  ;;  %v13033_v28 = vld [vmem:[%s22435_s29 + $0x208] sm:$0xff] }
 0x719   : > { %v13036_v21 = vld [vmem:[%s22435_s29 + $0x220] sm:$0xff] }
 0x71a   : > { %22462 = vst [vmem:[#allocation28_spill] sm:$0xff] %v20989_v31  ;;  %22463 = vst [vmem:[#allocation23_spill] sm:$0xff] %v20994_v9  ;;  %v21013_v10 = vcombine.high %v13032_v27, %v13036_v21 }
 0x71b   : > { %13763 = vmatpush2.bf16.msra.mxu1 %v20970_v18  ;;  %v20996_v18 = vcombine.low %v13041_v26, %v13045_v12  ;;  %v13037_v26 = vld [vmem:[%s22435_s29 + $0x228] sm:$0xff]  ;;  %v21018_v12 = vcombine.low %v13032_v27, %v13036_v21  ;;  %v13027_v21 = vld [vmem:[%s22435_s29 + $0x1d8] sm:$0xff] }
 0x71c   : > { %13764 = vmatprep.subr.bf16.mxu1 %v20989_v31  ;;  %22466 = vst [vmem:[#allocation32_spill] sm:$0xff] %v21013_v10  ;;  %v21022_v40 = vcombine.high %v13033_v28, %v13037_v26  ;;  %v13030_v31 = vld [vmem:[%s22435_s29 + $0x1f0] sm:$0xff] }
 0x71d   : > { %22464 = vst [vmem:[#allocation30_spill] sm:$0xff] %v20996_v18  ;;  %13808 = vmatpush2.bf16.msra.mxu0 %v20996_v18  ;;  %22467 = vst [vmem:[#allocation27_spill] sm:$0xff] %v21018_v12  ;;  %v13026_v18 = vld [vmem:[%s22435_s29 + $0x1d0] sm:$0xff] }
 0x71e   : > { %22469 = vst [vmem:[#allocation29_spill] sm:$0xff] %v21022_v40  ;;  %13809 = vmatprep.subr.bf16.mxu0 %v21022_v40  ;;  %v21037_v27 = vcombine.high %v13026_v18, %v13030_v31 }
 0x71f   : > { %13765 = vmatpush2.bf16.msra.mxu1 %v20994_v9  ;;  %v21020_v9 = vcombine.low %v13033_v28, %v13037_v26  ;;  %v13031_v28 = vld [vmem:[%s22435_s29 + $0x1f8] sm:$0xff]  ;;  %v21042_v26 = vcombine.low %v13026_v18, %v13030_v31 }
 0x720   : > { %13766 = vmatprep.subr.bf16.mxu1 %v21013_v10  ;;  %22470 = vst [vmem:[#allocation36_spill] sm:$0xff] %v21037_v27  ;;  %v21046_v40 = vcombine.high %v13027_v21, %v13031_v28 }
 0x721   : > { %22468 = vst [vmem:[#allocation34_spill] sm:$0xff] %v21020_v9  ;;  %13810 = vmatpush2.bf16.msra.mxu0 %v21020_v9 }
 0x722   : > { %22471 = vst [vmem:[#allocation31_spill] sm:$0xff] %v21046_v40  ;;  %13865 = vmatprep.subr.bf16.mxu0 %v21046_v40 }
 0x723   : > { %13767 = vmatpush2.bf16.msra.mxu1 %v21018_v12  ;;  %v21044_v12 = vcombine.low %v13027_v21, %v13031_v28 }
 0x724   : > { %13822 = vmatprep.subr.bf16.mxu1 %v21037_v27 }
 0x762   : > { %v12810_v10 = vpop.f32.mrf.mxu0 }
 0x763   : > { %v12811_v41 = vadd.f32 %v12810_v10, %v12241_v5 }
 0x764   : > { %v12812_v2 = vpop.f32.mrf.mxu0 }
 0x765   : > { %v12813_v1 = vadd.f32 %v12812_v2, %v12241_v5 }
 0x766   : > { %v12814_v43 = vpop.f32.mrf.mxu0 }
 0x767   : > { %v12815_v21 = vadd.f32 %v12814_v43, %v12246_v14 }
 0x768   : > { %v12816_v42 = vpop.f32.mrf.mxu0 }
 0x769   : > { %v12817_v40 = vadd.f32 %v12816_v42, %v12246_v14 }
 0x79e   : > { %v12853_v9 = vpop.f32.mrf.mxu1 }
 0x79f   : > { %v12854_v18 = vadd.f32 %v12853_v9, %v12811_v41 }
 0x7a0   : > { %v12855_v23 = vpop.f32.mrf.mxu1 }
 0x7a1   : > { %v12856_v28 = vadd.f32 %v12855_v23, %v12813_v1 }
 0x7a2   : > { %v12857_v37 = vpop.f32.mrf.mxu1  ;;  %v12896_v31 = vpop.f32.mrf.mxu0 }
 0x7a3   : > { %v12897_v44 = vadd.f32 %v12896_v31, %v12854_v18  ;;  %v12858_v15 = vadd.f32 %v12857_v37, %v12815_v21  ;;  %v13010_v21 = vld [vmem:[%s22435_s29 + $0x150] sm:$0xff] }
 0x7a4   : > { %v12859_v55 = vpop.f32.mrf.mxu1  ;;  %v12898_v27 = vpop.f32.mrf.mxu0 }
 0x7a5   : > { %v12899_v17 = vadd.f32 %v12898_v27, %v12856_v28  ;;  %v12860_v20 = vadd.f32 %v12859_v55, %v12817_v40  ;;  %v13019_v40 = vld [vmem:[%s22435_s29 + $0x198] sm:$0xff] }
 0x7a6   : > { %v12939_v62 = vpop.f32.mrf.mxu1  ;;  %v12900_v24 = vpop.f32.mrf.mxu0  ;;  %v13023_v27 = vld [vmem:[%s22435_s29 + $0x1b8] sm:$0xff] }
 0x7a7   : > { %v12940_v29 = vadd.f32 %v12939_v62, %v12897_v44  ;;  %v12901_v10 = vadd.f32 %v12900_v24, %v12858_v15  ;;  %v13022_v15 = vld [vmem:[%s22435_s29 + $0x1b0] sm:$0xff] }
 0x7a8   : > { %v12941_v0 = vpop.f32.mrf.mxu1  ;;  %v12902_v38 = vpop.f32.mrf.mxu0 }
 0x7a9   : > { %v12942_v58 = vadd.f32 %v12941_v0, %v12899_v17  ;;  %v12948_v41 = vadd.f32 %v12940_v29, %v19179_v49  ;;  %v12903_v2 = vadd.f32 %v12902_v38, %v12860_v20 }
 0x7aa   : > { %v12943_v5 = vpop.f32.mrf.mxu1 }
 0x7ab   : > { %v12944_v9 = vadd.f32 %v12943_v5, %v12901_v10  ;;  %v12949_v1 = vadd.f32 %v12942_v58, %v19196_v46  ;;  %v12952_v37 = vmax.f32 %v12948_v41, 0.0  ;;  %v21081_v10 = vcombine.high %v13019_v40, %v13023_v27  ;;  %v13014_v5 = vld [vmem:[%s22435_s29 + $0x170] sm:$0xff]  ;;  %v13011_v41 = vld [vmem:[%s22435_s29 + $0x158] sm:$0xff] }
 0x7ac   : > { %v12945_v43 = vpop.f32.mrf.mxu1 }
 0x7ad   : > { %v12950_v23 = vadd.f32 %v12944_v9, %v19183_v60  ;;  %v12946_v14 = vadd.f32 %v12945_v43, %v12903_v2  ;;  %v12953_v44 = vmax.f32 %v12949_v1, 0.0  ;;  %v13015_v2 = vld [vmem:[%s22435_s29 + $0x178] sm:$0xff]  ;;  %v21098_v43 = vcombine.low %v13019_v40, %v13023_v27  ;;  %v12986_v40 = vld [vmem:[%s22435_s29 + $0x90] sm:$0xff] }
 0x7ae   : > { %v21100_v1 = vcombine.high %v13010_v21, %v13014_v5  ;;  %v12990_v27 = vld [vmem:[%s22435_s29 + $0xb0] sm:$0xff] }
 0x7af   : > { %v12954_v42 = vmax.f32 %v12950_v23, 0.0  ;;  %v12951_v62 = vadd.f32 %v12946_v14, %v19193_v51  ;;  %v13018_v51 = vld [vmem:[%s22435_s29 + $0x190] sm:$0xff]  ;;  %v21102_v23 = vcombine.high %v13011_v41, %v13015_v2 }
 0x7b0   : > { %v21079_v28 = vcombine.high %v13018_v51, %v13022_v15  ;;  %v21096_v9 = vcombine.low %v13018_v51, %v13022_v15  ;;  %v13002_v14 = vld [vmem:[%s22435_s29 + $0x110] sm:$0xff] }
 0x7b1   : > { %v21054_v55 = vpack.c.bf16 %v12954_v42, %v12952_v37  ;;  %v12955_v24 = vmax.f32 %v12951_v62, 0.0  ;;  %v13007_v62 = vld [vmem:[%s22435_s29 + $0x138] sm:$0xff] }
 0x7b3   : > { %v12958_v0 = vunpack.c.l.bf16 %v21054_v55  ;;  %v12960_v49 = vunpack.c.h.bf16 %v21054_v55  ;;  %v21058_v38 = vpack.c.bf16 %v12955_v24, %v12953_v44 }
 0x7b5   : > { %v12959_v20 = vunpack.c.l.bf16 %v21058_v38  ;;  %v12961_v46 = vunpack.c.h.bf16 %v21058_v38  ;;  %v12962_v60 = vsub.f32 %v12952_v37, %v12958_v0  ;;  %v12964_v58 = vsub.f32 %v12954_v42, %v12960_v49  ;;  %v13006_v37 = vld [vmem:[%s22435_s29 + $0x130] sm:$0xff]  ;;  %v13003_v42 = vld [vmem:[%s22435_s29 + $0x118] sm:$0xff] }
 0x7b6   : > { %v21126_v0 = vcombine.high %v13002_v14, %v13006_v37  ;;  %v21128_v49 = vcombine.high %v13003_v42, %v13007_v62 }
 0x7b7   : > { %v12963_v29 = vsub.f32 %v12953_v44, %v12959_v20  ;;  %v12965_v17 = vsub.f32 %v12955_v24, %v12961_v46  ;;  %v21074_v31 = vpack.c.bf16 %v12964_v58, %v12962_v60  ;;  %v21120_v44 = vcombine.low %v13010_v21, %v13014_v5  ;;  %v12994_v20 = vld [vmem:[%s22435_s29 + $0xd0] sm:$0xff]  ;;  %v12995_v60 = vld [vmem:[%s22435_s29 + $0xd8] sm:$0xff] }
 0x7b8   : > { %v21122_v24 = vcombine.low %v13011_v41, %v13015_v2  ;;  %v12998_v46 = vld [vmem:[%s22435_s29 + $0xf0] sm:$0xff]  ;;  %v12999_v58 = vld [vmem:[%s22435_s29 + $0xf8] sm:$0xff]  ;;  %v21174_v2 = vcombine.high %v12986_v40, %v12990_v27 }
 0x7b9   : > { %v12967_v18 = vpack.c.bf16 %v12965_v17, %v12963_v29  ;;  %v21144_v29 = vcombine.low %v13002_v14, %v13006_v37  ;;  %v21146_v17 = vcombine.low %v13003_v42, %v13007_v62  ;;  %v21150_v51 = vcombine.high %v12994_v20, %v12998_v46  ;;  %v12991_v21 = vld [vmem:[%s22435_s29 + $0xb8] sm:$0xff]  ;;  %v12978_v37 = vld [vmem:[%s22435_s29 + $0x50] sm:$0xff] }
 0x7ba   : > { %v21152_v15 = vcombine.high %v12995_v60, %v12999_v58  ;;  %v21168_v5 = vcombine.low %v12994_v20, %v12998_v46  ;;  %v21170_v41 = vcombine.low %v12995_v60, %v12999_v58  ;;  %22476 = vst [vmem:[#allocation42_spill] sm:$0xff] %v21174_v2  ;;  %v12982_v42 = vld [vmem:[%s22435_s29 + $0x70] sm:$0xff]  ;;  %v12979_v62 = vld [vmem:[%s22435_s29 + $0x58] sm:$0xff]  ;;  %v21192_v46 = vcombine.low %v12986_v40, %v12990_v27 }
 0x7bb   : > { %13768 = vmatprep.mubr.bf16.mxu1 %v12967_v18  ;;  %13811 = vmatprep.mubr.bf16.mxu0 %v12967_v18  ;;  %22472 = vst [vmem:[#allocation38_spill] sm:$0xff] %v21150_v51  ;;  %v12983_v20 = vld [vmem:[%s22435_s29 + $0x78] sm:$0xff]  ;;  %v21198_v58 = vcombine.high %v12978_v37, %v12982_v42 }
 0x7bc   : > { %13769 = vmatmul.mubr.bf16.vlgmr.msra.gmra.mxu1 %v21074_v31  ;;  %13812 = vmatmul.mubr.bf16.vlgmr.msra.gmra.mxu0 %v21074_v31  ;;  %22473 = vst [vmem:[#allocation33_spill] sm:$0xff] %v21152_v15  ;;  %22474 = vst [vmem:[#allocation41_spill] sm:$0xff] %v21168_v5  ;;  %v12971_v40 = vld [vmem:[%s22435_s29 + $0x18] sm:$0xff] }
 0x7bd   : > { %13823 = vmatpush1.bf16.msra.mxu1 %v21042_v26  ;;  %13866 = vmatpush1.bf16.msra.mxu0 %v21044_v12  ;;  %22475 = vst [vmem:[#allocation35_spill] sm:$0xff] %v21170_v41  ;;  %22478 = vst [vmem:[#allocation45_spill] sm:$0xff] %v21192_v46  ;;  %v12975_v27 = vld [vmem:[%s22435_s29 + $0x38] sm:$0xff] }
 0x7be   : > { %13854 = vmatprep.mubr.bf16.mxu1 %v12967_v18  ;;  %13897 = vmatprep.mubr.bf16.mxu0 %v12967_v18  ;;  %v12987_v18 = vld [vmem:[%s22435_s29 + $0x98] sm:$0xff]  ;;  %22480 = vst [vmem:[#allocation49_spill] sm:$0xff] %v21198_v58 }
 0x7bf   : > { %13824 = vmatprep.subr.bf16.mxu1 %v21079_v28  ;;  %13867 = vmatprep.subr.bf16.mxu0 %v21081_v10  ;;  %v21176_v14 = vcombine.high %v12987_v18, %v12991_v21  ;;  %v21194_v60 = vcombine.low %v12987_v18, %v12991_v21  ;;  %v21216_v18 = vcombine.low %v12978_v37, %v12982_v42  ;;  %v13091_v37 = vld [vmem:[%s22435_s29 + $0x3d8] sm:$0xff] }
 0x7c0   : > { %v21218_v21 = vcombine.low %v12979_v62, %v12983_v20  ;;  %v13095_v42 = vld [vmem:[%s22435_s29 + $0x3f8] sm:$0xff] }
 0x7c1   : > { %13825 = vmatpush1.bf16.msra.mxu1 %v21096_v9  ;;  %13868 = vmatpush1.bf16.msra.mxu0 %v21098_v43  ;;  %22477 = vst [vmem:[#allocation37_spill] sm:$0xff] %v21176_v14  ;;  %22479 = vst [vmem:[#allocation39_spill] sm:$0xff] %v21194_v60 }
 0x7c2   : > { %13826 = vmatprep.subr.bf16.mxu1 %v21100_v1  ;;  %13869 = vmatprep.subr.bf16.mxu0 %v21102_v23  ;;  %22482 = vst [vmem:[#allocation50_spill] sm:$0xff] %v21216_v18  ;;  %22483 = vst [vmem:[#allocation47_spill] sm:$0xff] %v21218_v21 }
 0x7c5   : > { %13827 = vmatpush1.bf16.msra.mxu1 %v21120_v44  ;;  %13870 = vmatpush1.bf16.msra.mxu0 %v21122_v24 }
 0x7c6   : > { %13828 = vmatprep.subr.bf16.mxu1 %v21126_v0  ;;  %13871 = vmatprep.subr.bf16.mxu0 %v21128_v49 }
 0x7c9   : > { %13829 = vmatpush1.bf16.msra.mxu1 %v21144_v29  ;;  %13872 = vmatpush1.bf16.msra.mxu0 %v21146_v17 }
 0x7ca   : > { %13830 = vmatprep.subr.bf16.mxu1 %v21150_v51  ;;  %13873 = vmatprep.subr.bf16.mxu0 %v21152_v15  ;;  %v21200_v15 = vcombine.high %v12979_v62, %v12983_v20  ;;  %v12970_v51 = vld [vmem:[%s22435_s29 + $0x10] sm:$0xff]  ;;  %v21242_v20 = vcombine.low %v12971_v40, %v12975_v27 }
 0x7cc   : > { %22481 = vst [vmem:[#allocation52_spill] sm:$0xff] %v21200_v15  ;;  %22487 = vst [vmem:[#allocation56_spill] sm:$0xff] %v21242_v20 }
 0x7cd   : > { %13831 = vmatpush1.bf16.msra.mxu1 %v21168_v5  ;;  %13874 = vmatpush1.bf16.msra.mxu0 %v21170_v41  ;;  %v12974_v41 = vld [vmem:[%s22435_s29 + $0x30] sm:$0xff] }
 0x7ce   : > { %13832 = vmatprep.subr.bf16.mxu1 %v21174_v2  ;;  %13875 = vmatprep.subr.bf16.mxu0 %v21176_v14  ;;  %v21222_v14 = vcombine.high %v12970_v51, %v12974_v41  ;;  %v21224_v2 = vcombine.high %v12971_v40, %v12975_v27  ;;  %v13090_v5 = vld [vmem:[%s22435_s29 + $0x3d0] sm:$0xff]  ;;  %v21240_v62 = vcombine.low %v12970_v51, %v12974_v41  ;;  %v13083_v51 = vld [vmem:[%s22435_s29 + $0x398] sm:$0xff] }
 0x7cf   : > { %v13087_v41 = vld [vmem:[%s22435_s29 + $0x3b8] sm:$0xff]  ;;  %v21266_v27 = vcombine.low %v13091_v37, %v13095_v42 }
 0x7d0   : > { %22484 = vst [vmem:[#allocation53_spill] sm:$0xff] %v21222_v14  ;;  %22485 = vst [vmem:[#allocation54_spill] sm:$0xff] %v21224_v2 }
 0x7d1   : > { %13833 = vmatpush1.bf16.msra.mxu1 %v21192_v46  ;;  %13876 = vmatpush1.bf16.msra.mxu0 %v21194_v60  ;;  %v13094_v60 = vld [vmem:[%s22435_s29 + $0x3f0] sm:$0xff]  ;;  %22486 = vst [vmem:[#allocation55_spill] sm:$0xff] %v21240_v62  ;;  %22491 = vst [vmem:[#allocation60_spill] sm:$0xff] %v21266_v27 }
 0x7d2   : > { %13834 = vmatprep.subr.bf16.mxu1 %v21198_v58  ;;  %13877 = vmatprep.subr.bf16.mxu0 %v21200_v15  ;;  %v21246_v15 = vcombine.high %v13090_v5, %v13094_v60  ;;  %v21248_v58 = vcombine.high %v13091_v37, %v13095_v42  ;;  %v13082_v46 = vld [vmem:[%s22435_s29 + $0x390] sm:$0xff]  ;;  %v21264_v40 = vcombine.low %v13090_v5, %v13094_v60  ;;  %v13075_v5 = vld [vmem:[%s22435_s29 + $0x358] sm:$0xff] }
 0x7d3   : > { %v13079_v60 = vld [vmem:[%s22435_s29 + $0x378] sm:$0xff]  ;;  %v21290_v42 = vcombine.low %v13083_v51, %v13087_v41 }
 0x7d4   : > { %22488 = vst [vmem:[#allocation57_spill] sm:$0xff] %v21246_v15  ;;  %22489 = vst [vmem:[#allocation58_spill] sm:$0xff] %v21248_v58 }
 0x7d5   : > { %13835 = vmatpush1.bf16.msra.mxu1 %v21216_v18  ;;  %13878 = vmatpush1.bf16.msra.mxu0 %v21218_v21  ;;  %v13086_v21 = vld [vmem:[%s22435_s29 + $0x3b0] sm:$0xff]  ;;  %22490 = vst [vmem:[#allocation59_spill] sm:$0xff] %v21264_v40  ;;  %22495 = vst [vmem:[#allocation64_spill] sm:$0xff] %v21290_v42 }
 0x7d6   : > { %13836 = vmatprep.subr.bf16.mxu1 %v21222_v14  ;;  %13879 = vmatprep.subr.bf16.mxu0 %v21224_v2  ;;  %v21270_v2 = vcombine.high %v13082_v46, %v13086_v21  ;;  %v21272_v14 = vcombine.high %v13083_v51, %v13087_v41  ;;  %v13074_v18 = vld [vmem:[%s22435_s29 + $0x350] sm:$0xff]  ;;  %v21288_v37 = vcombine.low %v13082_v46, %v13086_v21  ;;  %v13067_v46 = vld [vmem:[%s22435_s29 + $0x318] sm:$0xff] }
 0x7d7   : > { %v13071_v21 = vld [vmem:[%s22435_s29 + $0x338] sm:$0xff]  ;;  %v21314_v41 = vcombine.low %v13075_v5, %v13079_v60 }
 0x7d8   : > { %22492 = vst [vmem:[#allocation61_spill] sm:$0xff] %v21270_v2  ;;  %22493 = vst [vmem:[#allocation62_spill] sm:$0xff] %v21272_v14 }
 0x7d9   : > { %13837 = vmatpush1.bf16.msra.mxu1 %v21240_v62  ;;  %13880 = vmatpush1.bf16.msra.mxu0 %v21242_v20  ;;  %v13078_v20 = vld [vmem:[%s22435_s29 + $0x370] sm:$0xff]  ;;  %22494 = vst [vmem:[#allocation63_spill] sm:$0xff] %v21288_v37  ;;  %22499 = vst [vmem:[#allocation68_spill] sm:$0xff] %v21314_v41 }
 0x7da   : > { %13838 = vmatprep.subr.bf16.mxu1 %v21246_v15  ;;  %13881 = vmatprep.subr.bf16.mxu0 %v21248_v58  ;;  %v21294_v58 = vcombine.high %v13074_v18, %v13078_v20  ;;  %v21296_v15 = vcombine.high %v13075_v5, %v13079_v60  ;;  %v13066_v62 = vld [vmem:[%s22435_s29 + $0x310] sm:$0xff]  ;;  %v21312_v51 = vcombine.low %v13074_v18, %v13078_v20  ;;  %v13059_v18 = vld [vmem:[%s22435_s29 + $0x2d8] sm:$0xff] }
 0x7db   : > { %v13063_v20 = vld [vmem:[%s22435_s29 + $0x2f8] sm:$0xff]  ;;  %v21338_v60 = vcombine.low %v13067_v46, %v13071_v21 }
 0x7dc   : > { %22496 = vst [vmem:[#allocation65_spill] sm:$0xff] %v21294_v58  ;;  %22497 = vst [vmem:[#allocation66_spill] sm:$0xff] %v21296_v15 }
 0x7dd   : > { %13839 = vmatpush2.bf16.msra.mxu1 %v21264_v40  ;;  %13882 = vmatpush2.bf16.msra.mxu0 %v21266_v27  ;;  %v13070_v27 = vld [vmem:[%s22435_s29 + $0x330] sm:$0xff]  ;;  %22498 = vst [vmem:[#allocation67_spill] sm:$0xff] %v21312_v51  ;;  %22503 = vst [vmem:[#allocation72_spill] sm:$0xff] %v21338_v60 }
 0x7de   : > { %13840 = vmatprep.subr.bf16.mxu1 %v21270_v2  ;;  %13883 = vmatprep.subr.bf16.mxu0 %v21272_v14  ;;  %v21318_v14 = vcombine.high %v13066_v62, %v13070_v27  ;;  %v21320_v2 = vcombine.high %v13067_v46, %v13071_v21  ;;  %v13058_v40 = vld [vmem:[%s22435_s29 + $0x2d0] sm:$0xff]  ;;  %v21336_v5 = vcombine.low %v13066_v62, %v13070_v27  ;;  %v13051_v62 = vld [vmem:[%s22435_s29 + $0x298] sm:$0xff] }
 0x7df   : > { %v13055_v27 = vld [vmem:[%s22435_s29 + $0x2b8] sm:$0xff]  ;;  %v21362_v21 = vcombine.low %v13059_v18, %v13063_v20 }
 0x7e0   : > { %22500 = vst [vmem:[#allocation69_spill] sm:$0xff] %v21318_v14  ;;  %22501 = vst [vmem:[#allocation70_spill] sm:$0xff] %v21320_v2 }
 0x7e1   : > { %13841 = vmatpush2.bf16.msra.mxu1 %v21288_v37  ;;  %13884 = vmatpush2.bf16.msra.mxu0 %v21290_v42  ;;  %v13062_v42 = vld [vmem:[%s22435_s29 + $0x2f0] sm:$0xff]  ;;  %22502 = vst [vmem:[#allocation71_spill] sm:$0xff] %v21336_v5  ;;  %22507 = vst [vmem:[#allocation76_spill] sm:$0xff] %v21362_v21 }
 0x7e2   : > { %13842 = vmatprep.subr.bf16.mxu1 %v21294_v58  ;;  %13885 = vmatprep.subr.bf16.mxu0 %v21296_v15  ;;  %v21342_v15 = vcombine.high %v13058_v40, %v13062_v42  ;;  %v21344_v58 = vcombine.high %v13059_v18, %v13063_v20  ;;  %v13050_v37 = vld [vmem:[%s22435_s29 + $0x290] sm:$0xff]  ;;  %v21360_v46 = vcombine.low %v13058_v40, %v13062_v42  ;;  %v13043_v40 = vld [vmem:[%s22435_s29 + $0x258] sm:$0xff] }
 0x7e3   : > { %v13047_v42 = vld [vmem:[%s22435_s29 + $0x278] sm:$0xff]  ;;  %v21386_v20 = vcombine.low %v13051_v62, %v13055_v27 }
 0x7e4   : > { %22504 = vst [vmem:[#allocation73_spill] sm:$0xff] %v21342_v15  ;;  %22505 = vst [vmem:[#allocation74_spill] sm:$0xff] %v21344_v58 }
 0x7e5   : > { %13843 = vmatpush2.bf16.msra.mxu1 %v21312_v51  ;;  %13886 = vmatpush2.bf16.msra.mxu0 %v21314_v41  ;;  %v13054_v41 = vld [vmem:[%s22435_s29 + $0x2b0] sm:$0xff]  ;;  %22506 = vst [vmem:[#allocation75_spill] sm:$0xff] %v21360_v46 }
 0x7e6   : > { %13844 = vmatprep.subr.bf16.mxu1 %v21318_v14  ;;  %13887 = vmatprep.subr.bf16.mxu0 %v21320_v2  ;;  %v21366_v2 = vcombine.high %v13050_v37, %v13054_v41  ;;  %v21368_v14 = vcombine.high %v13051_v62, %v13055_v27  ;;  %v13042_v51 = vld [vmem:[%s22435_s29 + $0x250] sm:$0xff]  ;;  %v21384_v18 = vcombine.low %v13050_v37, %v13054_v41  ;;  %v13035_v37 = vld [vmem:[%s22435_s29 + $0x218] sm:$0xff] }
 0x7e7   : > { %v13039_v41 = vld [vmem:[%s22435_s29 + $0x238] sm:$0xff]  ;;  %v21410_v27 = vcombine.low %v13043_v40, %v13047_v42 }
 0x7e8   : > { %22508 = vst [vmem:[#allocation77_spill] sm:$0xff] %v21366_v2  ;;  %22509 = vst [vmem:[#allocation78_spill] sm:$0xff] %v21368_v14 }
 0x7e9   : > { %13845 = vmatpush2.bf16.msra.mxu1 %v21336_v5  ;;  %13888 = vmatpush2.bf16.msra.mxu0 %v21338_v60  ;;  %v13046_v60 = vld [vmem:[%s22435_s29 + $0x270] sm:$0xff]  ;;  %22510 = vst [vmem:[#allocation79_spill] sm:$0xff] %v21384_v18 }
 0x7ea   : > { %13846 = vmatprep.subr.bf16.mxu1 %v21342_v15  ;;  %13889 = vmatprep.subr.bf16.mxu0 %v21344_v58  ;;  %v21390_v58 = vcombine.high %v13042_v51, %v13046_v60  ;;  %v21392_v15 = vcombine.high %v13043_v40, %v13047_v42  ;;  %v13034_v5 = vld [vmem:[%s22435_s29 + $0x210] sm:$0xff]  ;;  %v21408_v62 = vcombine.low %v13042_v51, %v13046_v60  ;;  %v22542_v51 = vld [vmem:[#allocation29_spill] sm:$0xff]  ;;  %v22544_v60 = vld [vmem:[#allocation34_spill] sm:$0xff] }
 0x7eb   : > { %v22546_v40 = vld [vmem:[#allocation31_spill] sm:$0xff]  ;;  %v22562_v42 = vld [vmem:[#allocation56_spill] sm:$0xff] }
 0x7ed   : > { %13847 = vmatpush2.bf16.msra.mxu1 %v21360_v46  ;;  %13890 = vmatpush2.bf16.msra.mxu0 %v21362_v21  ;;  %v13038_v21 = vld [vmem:[%s22435_s29 + $0x230] sm:$0xff] }
 0x7ee   : > { %13848 = vmatprep.subr.bf16.mxu1 %v21366_v2  ;;  %13891 = vmatprep.subr.bf16.mxu0 %v21368_v14  ;;  %v21414_v14 = vcombine.high %v13034_v5, %v13038_v21  ;;  %v21416_v2 = vcombine.high %v13035_v37, %v13039_v41  ;;  %v21420_v46 = vcombine.low %v13034_v5, %v13038_v21  ;;  %v22543_v5 = vld [vmem:[#allocation27_spill] sm:$0xff]  ;;  %v22545_v21 = vld [vmem:[#allocation36_spill] sm:$0xff] }
 0x7f1   : > { %13849 = vmatpush2.bf16.msra.mxu1 %v21384_v18  ;;  %13892 = vmatpush2.bf16.msra.mxu0 %v21386_v20  ;;  %v21422_v18 = vcombine.low %v13035_v37, %v13039_v41  ;;  %v22563_v37 = vld [vmem:[#allocation57_spill] sm:$0xff]  ;;  %v22564_v41 = vld [vmem:[#allocation58_spill] sm:$0xff] }
 0x7f2   : > { %13850 = vmatprep.subr.bf16.mxu1 %v21390_v58  ;;  %13893 = vmatprep.subr.bf16.mxu0 %v21392_v15 }
 0x7f5   : > { %13851 = vmatpush2.bf16.msra.mxu1 %v21408_v62  ;;  %13894 = vmatpush2.bf16.msra.mxu0 %v21410_v27 }
 0x7f6   : > { %13852 = vmatprep.subr.bf16.mxu1 %v21414_v14  ;;  %13895 = vmatprep.subr.bf16.mxu0 %v21416_v2 }
 0x7f9   : > { %13853 = vmatpush2.bf16.msra.mxu1 %v21420_v46  ;;  %13896 = vmatpush2.bf16.msra.mxu0 %v21422_v18 }
 0x7fa   : > { %13908 = vmatprep.subr.bf16.mxu1 %v20655_v47  ;;  %13951 = vmatprep.subr.bf16.mxu0 %v20668_v7  ;;  %v22512_v47 = vld [vmem:[#allocation40_spill] sm:$0xff]  ;;  %v22514_v7 = vld [vmem:[#allocation43_spill] sm:$0xff] }
 0x7fc   : > { %13855 = vmatmul.mubr.bf16.vlgmr.msra.gmra.mxu1 %v21074_v31  ;;  %13898 = vmatmul.mubr.bf16.vlgmr.msra.gmra.mxu0 %v21074_v31  ;;  %v22541_v31 = vld [vmem:[#allocation32_spill] sm:$0xff] }
 0x7fd   : > { %13909 = vmatpush1.bf16.msra.mxu1 %v20653_v48  ;;  %13940 = vmatprep.mubr.bf16.mxu1 %v21058_v38  ;;  %v22511_v48 = vld [vmem:[#allocation5_spill] sm:$0xff] }
 0x7fe   : > { %13952 = vmatpush1.bf16.msra.mxu0 %v20666_v25  ;;  %13983 = vmatprep.mubr.bf16.mxu0 %v21058_v38  ;;  %v22513_v25 = vld [vmem:[#allocation6_spill] sm:$0xff] }
 0x7ff   : > { %13910 = vmatprep.subr.bf16.mxu1 %v20670_v13  ;;  %13953 = vmatprep.subr.bf16.mxu0 %v20682_v59  ;;  %v22515_v13 = vld [vmem:[#allocation7_spill] sm:$0xff]  ;;  %v22516_v59 = vld [vmem:[#allocation44_spill] sm:$0xff] }
 0x801   : > { %13911 = vmatpush1.bf16.msra.mxu1 %v20695_v3  ;;  %v22517_v3 = vld [vmem:[#allocation8_spill] sm:$0xff] }
 0x802   : > { %13954 = vmatpush1.bf16.msra.mxu0 %v20699_v8  ;;  %13912 = vmatprep.subr.bf16.mxu1 %v20701_v22  ;;  %v22518_v8 = vld [vmem:[#allocation10_spill] sm:$0xff]  ;;  %v22519_v22 = vld [vmem:[#allocation48_spill] sm:$0xff] }
 0x803   : > { %13955 = vmatprep.subr.bf16.mxu0 %v20704_v34  ;;  %v22520_v34 = vld [vmem:[#allocation9_spill] sm:$0xff] }
 0x805   : > { %13913 = vmatpush1.bf16.msra.mxu1 %v20719_v63  ;;  %v22521_v63 = vld [vmem:[#allocation51_spill] sm:$0xff] }
 0x806   : > { %13956 = vmatpush1.bf16.msra.mxu0 %v20723_v54  ;;  %13914 = vmatprep.subr.bf16.mxu1 %v20725_v39  ;;  %v22522_v54 = vld [vmem:[#allocation13_spill] sm:$0xff]  ;;  %v22523_v39 = vld [vmem:[#allocation11_spill] sm:$0xff] }
 0x807   : > { %13957 = vmatprep.subr.bf16.mxu0 %v20728_v52  ;;  %v22524_v52 = vld [vmem:[#allocation15_spill] sm:$0xff] }
 0x809   : > { %13915 = vmatpush1.bf16.msra.mxu1 %v20743_v4  ;;  %v22525_v4 = vld [vmem:[#allocation46_spill] sm:$0xff] }
 0x80a   : > { %13958 = vmatpush1.bf16.msra.mxu0 %v20747_v57  ;;  %13916 = vmatprep.subr.bf16.mxu1 %v20749_v33  ;;  %v22526_v57 = vld [vmem:[#allocation14_spill] sm:$0xff]  ;;  %v22527_v33 = vld [vmem:[#allocation12_spill] sm:$0xff] }
 0x80b   : > { %13959 = vmatprep.subr.bf16.mxu0 %v20752_v35  ;;  %v22528_v35 = vld [vmem:[#allocation17_spill] sm:$0xff] }
 0x80d   : > { %13917 = vmatpush1.bf16.msra.mxu1 %v20767_v50  ;;  %v22529_v50 = vld [vmem:[#allocation19_spill] sm:$0xff] }
 0x80e   : > { %13960 = vmatpush1.bf16.msra.mxu0 %v20771_v36  ;;  %13918 = vmatprep.subr.bf16.mxu1 %v20773_v32  ;;  %v22530_v36 = vld [vmem:[#allocation18_spill] sm:$0xff]  ;;  %v22531_v32 = vld [vmem:[#allocation16_spill] sm:$0xff] }
 0x80f   : > { %13961 = vmatprep.subr.bf16.mxu0 %v20776_v61  ;;  %v22532_v61 = vld [vmem:[#allocation22_spill] sm:$0xff] }
 0x811   : > { %13919 = vmatpush1.bf16.msra.mxu1 %v20791_v30  ;;  %v22533_v30 = vld [vmem:[#allocation24_spill] sm:$0xff] }
 0x812   : > { %13962 = vmatpush1.bf16.msra.mxu0 %v20795_v45  ;;  %13920 = vmatprep.subr.bf16.mxu1 %v20797_v11  ;;  %v22534_v45 = vld [vmem:[#allocation21_spill] sm:$0xff]  ;;  %v22535_v11 = vld [vmem:[#allocation20_spill] sm:$0xff] }
 0x813   : > { %13963 = vmatprep.subr.bf16.mxu0 %v20800_v56  ;;  %v22536_v56 = vld [vmem:[#allocation26_spill] sm:$0xff] }
 0x815   : > { %13921 = vmatpush1.bf16.msra.mxu1 %v20815_v53  ;;  %v22537_v53 = vld [vmem:[#allocation28_spill] sm:$0xff] }
 0x816   : > { %13964 = vmatpush1.bf16.msra.mxu0 %v20819_v19  ;;  %13922 = vmatprep.subr.bf16.mxu1 %v20821_v6  ;;  %v22538_v19 = vld [vmem:[#allocation25_spill] sm:$0xff]  ;;  %v22539_v6 = vld [vmem:[#allocation23_spill] sm:$0xff] }
 0x817   : > { %13965 = vmatprep.subr.bf16.mxu0 %v20824_v16  ;;  %v22540_v16 = vld [vmem:[#allocation30_spill] sm:$0xff] }
 0x819   : > { %13923 = vmatpush1.bf16.msra.mxu1 %v22511_v48  ;;  %v22565_v48 = vld [vmem:[#allocation59_spill] sm:$0xff] }
 0x81a   : > { %13966 = vmatpush1.bf16.msra.mxu0 %v22512_v47  ;;  %13924 = vmatprep.subr.bf16.mxu1 %v22513_v25  ;;  %v22566_v47 = vld [vmem:[#allocation60_spill] sm:$0xff]  ;;  %v22567_v25 = vld [vmem:[#allocation61_spill] sm:$0xff] }
 0x81b   : > { %13967 = vmatprep.subr.bf16.mxu0 %v22514_v7  ;;  %v22568_v7 = vld [vmem:[#allocation62_spill] sm:$0xff] }
 0x81d   : > { %13925 = vmatpush2.bf16.msra.mxu1 %v22515_v13  ;;  %v22569_v13 = vld [vmem:[#allocation63_spill] sm:$0xff] }
 0x81e   : > { %13968 = vmatpush2.bf16.msra.mxu0 %v22516_v59  ;;  %13926 = vmatprep.subr.bf16.mxu1 %v22517_v3  ;;  %v22570_v59 = vld [vmem:[#allocation64_spill] sm:$0xff]  ;;  %v22571_v3 = vld [vmem:[#allocation65_spill] sm:$0xff] }
 0x81f   : > { %13969 = vmatprep.subr.bf16.mxu0 %v22518_v8  ;;  %v22572_v8 = vld [vmem:[#allocation66_spill] sm:$0xff] }
 0x821   : > { %13927 = vmatpush2.bf16.msra.mxu1 %v22519_v22  ;;  %v22573_v22 = vld [vmem:[#allocation67_spill] sm:$0xff] }
 0x822   : > { %13970 = vmatpush2.bf16.msra.mxu0 %v22520_v34  ;;  %13928 = vmatprep.subr.bf16.mxu1 %v22521_v63  ;;  %v22574_v34 = vld [vmem:[#allocation68_spill] sm:$0xff]  ;;  %v22575_v63 = vld [vmem:[#allocation69_spill] sm:$0xff] }
 0x823   : > { %13971 = vmatprep.subr.bf16.mxu0 %v22522_v54  ;;  %v22576_v54 = vld [vmem:[#allocation70_spill] sm:$0xff] }
 0x825   : > { %13929 = vmatpush2.bf16.msra.mxu1 %v22523_v39  ;;  %v22577_v39 = vld [vmem:[#allocation71_spill] sm:$0xff] }
 0x826   : > { %13972 = vmatpush2.bf16.msra.mxu0 %v22524_v52  ;;  %13930 = vmatprep.subr.bf16.mxu1 %v22525_v4  ;;  %v22578_v52 = vld [vmem:[#allocation72_spill] sm:$0xff]  ;;  %v22579_v4 = vld [vmem:[#allocation73_spill] sm:$0xff] }
 0x827   : > { %13973 = vmatprep.subr.bf16.mxu0 %v22526_v57  ;;  %v22580_v57 = vld [vmem:[#allocation74_spill] sm:$0xff] }
 0x829   : > { %13931 = vmatpush2.bf16.msra.mxu1 %v22527_v33  ;;  %v22581_v33 = vld [vmem:[#allocation75_spill] sm:$0xff] }
 0x82a   : > { %13974 = vmatpush2.bf16.msra.mxu0 %v22528_v35  ;;  %13932 = vmatprep.subr.bf16.mxu1 %v22529_v50  ;;  %v22582_v35 = vld [vmem:[#allocation76_spill] sm:$0xff]  ;;  %v22583_v50 = vld [vmem:[#allocation77_spill] sm:$0xff] }
 0x82b   : > { %13975 = vmatprep.subr.bf16.mxu0 %v22530_v36  ;;  %v22584_v36 = vld [vmem:[#allocation78_spill] sm:$0xff] }
 0x82d   : > { %13933 = vmatpush2.bf16.msra.mxu1 %v22531_v32  ;;  %v22585_v32 = vld [vmem:[#allocation79_spill] sm:$0xff] }
 0x82e   : > { %13976 = vmatpush2.bf16.msra.mxu0 %v22532_v61  ;;  %13934 = vmatprep.subr.bf16.mxu1 %v22533_v30 }
 0x82f   : > { %13977 = vmatprep.subr.bf16.mxu0 %v22534_v45 }
 0x831   : > { %13935 = vmatpush2.bf16.msra.mxu1 %v22535_v11 }
 0x832   : > { %13978 = vmatpush2.bf16.msra.mxu0 %v22536_v56  ;;  %13936 = vmatprep.subr.bf16.mxu1 %v22537_v53 }
 0x833   : > { %13979 = vmatprep.subr.bf16.mxu0 %v22538_v19 }
 0x835   : > { %13937 = vmatpush2.bf16.msra.mxu1 %v22539_v6 }
 0x836   : > { %13980 = vmatpush2.bf16.msra.mxu0 %v22540_v16  ;;  %13938 = vmatprep.subr.bf16.mxu1 %v22541_v31 }
 0x837   : > { %13981 = vmatprep.subr.bf16.mxu0 %v22542_v51 }
 0x839   : > { %13939 = vmatpush2.bf16.msra.mxu1 %v22543_v5 }
 0x83a   : > { %13982 = vmatpush2.bf16.msra.mxu0 %v22544_v60  ;;  %13994 = vmatprep.subr.bf16.mxu1 %v22545_v21 }
 0x83b   : > { %14037 = vmatprep.subr.bf16.mxu0 %v22546_v40 }
 0x83c   : > { %13941 = vmatmul.mubr.bf16.vlgmr.msra.gmra.mxu1 %v21054_v55 }
 0x83d   : > { %13984 = vmatmul.mubr.bf16.vlgmr.msra.gmra.mxu0 %v21054_v55  ;;  %13995 = vmatpush1.bf16.msra.mxu1 %v21042_v26  ;;  %v22548_v26 = vld [vmem:[#allocation33_spill] sm:$0xff] }
 0x83e   : > { %14026 = vmatprep.mubr.bf16.mxu1 %v21058_v38  ;;  %14038 = vmatpush1.bf16.msra.mxu0 %v21044_v12  ;;  %v22547_v12 = vld [vmem:[#allocation38_spill] sm:$0xff] }
 0x83f   : > { %14069 = vmatprep.mubr.bf16.mxu0 %v21058_v38  ;;  %13996 = vmatprep.subr.bf16.mxu1 %v21079_v28  ;;  %v22549_v38 = vld [vmem:[#allocation41_spill] sm:$0xff]  ;;  %v22550_v28 = vld [vmem:[#allocation35_spill] sm:$0xff] }
 0x840   : > { %14039 = vmatprep.subr.bf16.mxu0 %v21081_v10  ;;  %v22551_v10 = vld [vmem:[#allocation42_spill] sm:$0xff] }
 0x841   : > { %13997 = vmatpush1.bf16.msra.mxu1 %v21096_v9  ;;  %v22552_v9 = vld [vmem:[#allocation37_spill] sm:$0xff] }
 0x842   : > { %14040 = vmatpush1.bf16.msra.mxu0 %v21098_v43  ;;  %13998 = vmatprep.subr.bf16.mxu1 %v21100_v1  ;;  %v22553_v43 = vld [vmem:[#allocation45_spill] sm:$0xff]  ;;  %v22554_v1 = vld [vmem:[#allocation39_spill] sm:$0xff] }
 0x843   : > { %14041 = vmatprep.subr.bf16.mxu0 %v21102_v23  ;;  %v22555_v23 = vld [vmem:[#allocation49_spill] sm:$0xff] }
 0x845   : > { %13999 = vmatpush1.bf16.msra.mxu1 %v21120_v44  ;;  %v22556_v44 = vld [vmem:[#allocation52_spill] sm:$0xff] }
 0x846   : > { %14042 = vmatpush1.bf16.msra.mxu0 %v21122_v24  ;;  %14000 = vmatprep.subr.bf16.mxu1 %v21126_v0  ;;  %v22557_v24 = vld [vmem:[#allocation50_spill] sm:$0xff]  ;;  %v22558_v0 = vld [vmem:[#allocation47_spill] sm:$0xff] }
 0x847   : > { %14043 = vmatprep.subr.bf16.mxu0 %v21128_v49  ;;  %v22559_v49 = vld [vmem:[#allocation53_spill] sm:$0xff] }
 0x849   : > { %14001 = vmatpush1.bf16.msra.mxu1 %v21144_v29  ;;  %v22560_v29 = vld [vmem:[#allocation54_spill] sm:$0xff] }
 0x84a   : > { %14044 = vmatpush1.bf16.msra.mxu0 %v21146_v17  ;;  %14002 = vmatprep.subr.bf16.mxu1 %v22547_v12  ;;  %v22561_v17 = vld [vmem:[#allocation55_spill] sm:$0xff] }
 0x84b   : > { %14045 = vmatprep.subr.bf16.mxu0 %v22548_v26 }
 0x84d   : > { %14003 = vmatpush1.bf16.msra.mxu1 %v22549_v38 }
 0x84e   : > { %14046 = vmatpush1.bf16.msra.mxu0 %v22550_v28  ;;  %14004 = vmatprep.subr.bf16.mxu1 %v22551_v10 }
 0x84f   : > { %14047 = vmatprep.subr.bf16.mxu0 %v22552_v9 }
 0x851   : > { %14005 = vmatpush1.bf16.msra.mxu1 %v22553_v43 }
 0x852   : > { %14048 = vmatpush1.bf16.msra.mxu0 %v22554_v1  ;;  %14006 = vmatprep.subr.bf16.mxu1 %v22555_v23 }
 0x853   : > { %14049 = vmatprep.subr.bf16.mxu0 %v22556_v44 }
 0x855   : > { %14007 = vmatpush1.bf16.msra.mxu1 %v22557_v24 }
 0x856   : > { %14050 = vmatpush1.bf16.msra.mxu0 %v22558_v0  ;;  %14008 = vmatprep.subr.bf16.mxu1 %v22559_v49 }
 0x857   : > { %14051 = vmatprep.subr.bf16.mxu0 %v22560_v29 }
 0x859   : > { %14009 = vmatpush1.bf16.msra.mxu1 %v22561_v17 }
 0x85a   : > { %14052 = vmatpush1.bf16.msra.mxu0 %v22562_v42  ;;  %14010 = vmatprep.subr.bf16.mxu1 %v22563_v37 }
 0x85b   : > { %14053 = vmatprep.subr.bf16.mxu0 %v22564_v41 }
 0x85d   : > { %14011 = vmatpush2.bf16.msra.mxu1 %v22565_v48 }
 0x85e   : > { %14054 = vmatpush2.bf16.msra.mxu0 %v22566_v47  ;;  %14012 = vmatprep.subr.bf16.mxu1 %v22567_v25 }
 0x85f   : > { %14055 = vmatprep.subr.bf16.mxu0 %v22568_v7 }
 0x861   : > { %14013 = vmatpush2.bf16.msra.mxu1 %v22569_v13 }
 0x862   : > { %14056 = vmatpush2.bf16.msra.mxu0 %v22570_v59  ;;  %14014 = vmatprep.subr.bf16.mxu1 %v22571_v3 }
 0x863   : > { %14057 = vmatprep.subr.bf16.mxu0 %v22572_v8 }
 0x865   : > { %14015 = vmatpush2.bf16.msra.mxu1 %v22573_v22 }
 0x866   : > { %14058 = vmatpush2.bf16.msra.mxu0 %v22574_v34  ;;  %14016 = vmatprep.subr.bf16.mxu1 %v22575_v63 }
 0x867   : > { %14059 = vmatprep.subr.bf16.mxu0 %v22576_v54 }
 0x869   : > { %14017 = vmatpush2.bf16.msra.mxu1 %v22577_v39 }
 0x86a   : > { %14060 = vmatpush2.bf16.msra.mxu0 %v22578_v52  ;;  %14018 = vmatprep.subr.bf16.mxu1 %v22579_v4 }
 0x86b   : > { %14061 = vmatprep.subr.bf16.mxu0 %v22580_v57 }
 0x86d   : > { %14019 = vmatpush2.bf16.msra.mxu1 %v22581_v33 }
 0x86e   : > { %14062 = vmatpush2.bf16.msra.mxu0 %v22582_v35  ;;  %14020 = vmatprep.subr.bf16.mxu1 %v22583_v50 }
 0x86f   : > { %14063 = vmatprep.subr.bf16.mxu0 %v22584_v36 }
 0x871   : > { %14021 = vmatpush2.bf16.msra.mxu1 %v22585_v32 }
 0x872   : > { %14064 = vmatpush2.bf16.msra.mxu0 %v21386_v20  ;;  %14022 = vmatprep.subr.bf16.mxu1 %v21390_v58 }
 0x873   : > { %14065 = vmatprep.subr.bf16.mxu0 %v21392_v15 }
 0x875   : > { %14023 = vmatpush2.bf16.msra.mxu1 %v21408_v62 }
 0x876   : > { %14066 = vmatpush2.bf16.msra.mxu0 %v21410_v27  ;;  %14024 = vmatprep.subr.bf16.mxu1 %v21414_v14 }
 0x877   : > { %14067 = vmatprep.subr.bf16.mxu0 %v21416_v2 }
 0x879   : > { %14025 = vmatpush2.bf16.msra.mxu1 %v21420_v46 }
 0x87a   : > { %14068 = vmatpush2.bf16.msra.mxu0 %v21422_v18 }
 0x87c   : > { %14027 = vmatmul.mubr.bf16.vlgmr.msra.gmra.mxu1 %v21054_v55  ;;  %v13770_v58 = vpop.f32.mrf.mxu1  ;;  %v13813_v20 = vpop.f32.mrf.mxu0 }
 0x87d   : > { %14070 = vmatmul.mubr.bf16.vlgmr.msra.gmra.mxu0 %v21054_v55 }
 0x87e   : > { %v13772_v15 = vpop.f32.mrf.mxu1  ;;  %v13815_v61 = vpop.f32.mrf.mxu0 }
 0x880   : > { %v13774_v62 = vpop.f32.mrf.mxu1  ;;  %v13817_v30 = vpop.f32.mrf.mxu0 }
 0x882   : > { %v13776_v27 = vpop.f32.mrf.mxu1  ;;  %v13819_v45 = vpop.f32.mrf.mxu0 }
 0x8bc   : > { %v13856_v14 = vpop.f32.mrf.mxu1  ;;  %v13899_v11 = vpop.f32.mrf.mxu0 }
 0x8be   : > { %v13858_v2 = vpop.f32.mrf.mxu1  ;;  %v13901_v56 = vpop.f32.mrf.mxu0 }
 0x8c0   : > { %v13860_v46 = vpop.f32.mrf.mxu1  ;;  %v13903_v53 = vpop.f32.mrf.mxu0 }
 0x8c2   : > { %v13862_v18 = vpop.f32.mrf.mxu1  ;;  %v13905_v19 = vpop.f32.mrf.mxu0 }
 0x8fc   : > { %v13942_v55 = vpop.f32.mrf.mxu1 }
 0x8fd   : > { %v13943_v6 = vadd.f32 %v13942_v55, %v13770_v58  ;;  %v13985_v16 = vpop.f32.mrf.mxu0 }
 0x8fe   : > { %v13986_v31 = vadd.f32 %v13985_v16, %v13813_v20  ;;  %v13944_v51 = vpop.f32.mrf.mxu1 }
 0x8ff   : > { %14080 = vst [vmem:[%s21570_s5] sm:$0xff] %v13943_v6  ;;  %v13945_v5 = vadd.f32 %v13944_v51, %v13772_v15  ;;  %v13987_v60 = vpop.f32.mrf.mxu0 }
 0x900   : > { %14082 = vst [vmem:[%s21570_s5 + $0x10] sm:$0xff] %v13986_v31  ;;  %v13988_v21 = vadd.f32 %v13987_v60, %v13815_v61  ;;  %v13946_v40 = vpop.f32.mrf.mxu1 }
 0x901   : > { %14081 = vst [vmem:[%s21570_s5 + $0x8] sm:$0xff] %v13945_v5  ;;  %v13947_v12 = vadd.f32 %v13946_v40, %v13774_v62  ;;  %v13989_v26 = vpop.f32.mrf.mxu0 }
 0x902   : > { %14083 = vst [vmem:[%s21570_s5 + $0x18] sm:$0xff] %v13988_v21  ;;  %v13990_v38 = vadd.f32 %v13989_v26, %v13817_v30  ;;  %v13948_v28 = vpop.f32.mrf.mxu1 }
 0x903   : > { %14088 = vst [vmem:[%s21570_s5 + $0x40] sm:$0xff] %v13947_v12  ;;  %v13949_v10 = vadd.f32 %v13948_v28, %v13776_v27  ;;  %v13991_v9 = vpop.f32.mrf.mxu0 }
 0x904   : > { %14090 = vst [vmem:[%s21570_s5 + $0x50] sm:$0xff] %v13990_v38  ;;  %v13992_v43 = vadd.f32 %v13991_v9, %v13819_v45 }
 0x905   : > { %14089 = vst [vmem:[%s21570_s5 + $0x48] sm:$0xff] %v13949_v10 }
 0x906   : > { %14091 = vst [vmem:[%s21570_s5 + $0x58] sm:$0xff] %v13992_v43 }
 0x93c   : > { %v14028_v1 = vpop.f32.mrf.mxu1 }
 0x93d   : > { %v14029_v23 = vadd.f32 %v14028_v1, %v13856_v14  ;;  %v14071_v44 = vpop.f32.mrf.mxu0 }
 0x93e   : > { %v14072_v24 = vadd.f32 %v14071_v44, %v13899_v11  ;;  %v14030_v0 = vpop.f32.mrf.mxu1 }
 0x93f   : > { %14084 = vst [vmem:[%s21570_s5 + $0x20] sm:$0xff] %v14029_v23  ;;  %v14031_v49 = vadd.f32 %v14030_v0, %v13858_v2  ;;  %v14073_v29 = vpop.f32.mrf.mxu0 }
 0x940   : > { %14086 = vst [vmem:[%s21570_s5 + $0x30] sm:$0xff] %v14072_v24  ;;  %v14074_v17 = vadd.f32 %v14073_v29, %v13901_v56  ;;  %v14032_v42 = vpop.f32.mrf.mxu1 }
 0x941   : > { %14085 = vst [vmem:[%s21570_s5 + $0x28] sm:$0xff] %v14031_v49  ;;  %v14033_v37 = vadd.f32 %v14032_v42, %v13860_v46  ;;  %v14075_v41 = vpop.f32.mrf.mxu0 }
 0x942   : > { %14087 = vst [vmem:[%s21570_s5 + $0x38] sm:$0xff] %v14074_v17  ;;  %v14076_v48 = vadd.f32 %v14075_v41, %v13903_v53  ;;  %v14034_v47 = vpop.f32.mrf.mxu1 }
 0x943   : > { %14092 = vst [vmem:[%s21570_s5 + $0x60] sm:$0xff] %v14033_v37  ;;  %v14035_v25 = vadd.f32 %v14034_v47, %v13862_v18  ;;  %v14077_v7 = vpop.f32.mrf.mxu0 }
 0x944   : > { %14094 = vst [vmem:[%s21570_s5 + $0x70] sm:$0xff] %v14076_v48  ;;  %v14078_v13 = vadd.f32 %v14077_v7, %v13905_v19 }
 0x945   : > { %14093 = vst [vmem:[%s21570_s5 + $0x68] sm:$0xff] %v14035_v25 }
 0x946   : > { %14095 = vst [vmem:[%s21570_s5 + $0x78] sm:$0xff] %v14078_v13 }
 0x947 PF: > { %s22588_s8 = sld [smem:[#allocation3_spill]] }
 0x94d   : > { %s19_s30 = sadd.s32 1, %s22588_s8  }
 0x94e   : > { %p16_p4 = scmp.ge.s32.totalorder %s19_s30, 4  }
 0x950   :  { %18 = sbr.rel (!%p16_p4) target bundleno = 11 (0xb), region = 86 }

</bundles_post_ra>
